<compile_context>
chip_gen: v7x
topology: tpu7x:2x2x1
jax: 0.10.0
libtpu: 0.0.40
codegen_flags: <defaults>
</compile_context>

<pallas_src>
import functools
import math

import jax
import jax.numpy as jnp
from jax.experimental import pallas as pl
from jax.experimental.pallas import tpu as pltpu


# ----------------------------------------------------------------------------
# Pallas kernels
# ----------------------------------------------------------------------------
def _conv_matmul_kernel(a_ref, b_ref, bias_ref, o_ref, acc_ref):
    """(M,K)@(K,N) + bias. A is the full resident patch tensor (G, M, tk)."""
    k = pl.program_id(1)

    @pl.when(k == 0)
    def _():
        acc_ref[...] = jnp.zeros_like(acc_ref)

    # a_ref stays resident in VMEM for the whole grid; pick this K-chunk.
    acc_ref[...] += jnp.dot(a_ref[k], b_ref[...],
                            preferred_element_type=jnp.float32)

    @pl.when(k == pl.num_programs(1) - 1)
    def _():
        o_ref[...] = (acc_ref[...] + bias_ref[...]).astype(o_ref.dtype)


def conv_matmul_bias(a_grouped, w, bias, *, tn=512, out_dtype=jnp.float32):
    """a_grouped: (G, M, tk) bf16, w: (G*tk, N) bf16, bias: (N,) f32 -> (M, N)."""
    G, M, tk = a_grouped.shape
    K, N = w.shape
    assert K == G * tk and N % tn == 0
    bias2d = bias.reshape(1, N).astype(jnp.float32)
    return pl.pallas_call(
        _conv_matmul_kernel,
        out_shape=jax.ShapeDtypeStruct((M, N), out_dtype),
        grid_spec=pltpu.PrefetchScalarGridSpec(
            num_scalar_prefetch=0,
            grid=(N // tn, G),                       # j (parallel), k (reduction)
            in_specs=[
                # Full patch tensor, constant index -> fetched once, stays resident.
                pl.BlockSpec((G, M, tk), lambda j, k: (0, 0, 0)),
                # Weight tiles streamed exactly once each.
                pl.BlockSpec((tk, tn), lambda j, k: (k, j)),
                pl.BlockSpec((1, tn), lambda j, k: (0, j)),
            ],
            out_specs=pl.BlockSpec((M, tn), lambda j, k: (0, j)),
            scratch_shapes=[pltpu.VMEM((M, tn), jnp.float32)],
        ),
        compiler_params=pltpu.CompilerParams(
            dimension_semantics=("parallel", "arbitrary"),
            vmem_limit_bytes=40 * 1024 * 1024),
    )(a_grouped, w, bias2d)


def _conv_matmul_maxpool_kernel(a_ref, b_ref, bias_ref, o_ref, acc_ref, *,
                                batch, spatial):
    """Same matmul, epilogue fuses MaxPool2d over each sample's spatial rows."""
    k = pl.program_id(1)

    @pl.when(k == 0)
    def _():
        acc_ref[...] = jnp.zeros_like(acc_ref)

    acc_ref[...] += jnp.dot(a_ref[k], b_ref[...],
                            preferred_element_type=jnp.float32)

    @pl.when(k == pl.num_programs(1) - 1)
    def _():
        acc = acc_ref[...]                                   # (batch*spatial, tn)
        rows = jax.lax.broadcasted_iota(jnp.int32, acc.shape, 0)
        neg = jnp.full_like(acc, -jnp.inf)
        # max over each sample's contiguous `spatial` rows (== MaxPool2d(6))
        pooled = jnp.concatenate(
            [jnp.max(
                jnp.where((rows >= b * spatial) & (rows < (b + 1) * spatial),
                          acc, neg),
                axis=0, keepdims=True)
             for b in range(batch)],
            axis=0)                                          # (batch, tn)
        # bias is per-channel, so adding it after the max is equivalent
        o_ref[...] = (pooled + bias_ref[...]).astype(o_ref.dtype)


def conv_matmul_bias_maxpool(a_grouped, w, bias, *, batch, spatial, tn=512):
    """Conv2 matmul with fused global max over spatial rows -> (batch, N) f32."""
    G, M, tk = a_grouped.shape
    K, N = w.shape
    assert K == G * tk and N % tn == 0 and M == batch * spatial
    bias2d = bias.reshape(1, N).astype(jnp.float32)
    kernel = functools.partial(_conv_matmul_maxpool_kernel,
                               batch=batch, spatial=spatial)
    return pl.pallas_call(
        kernel,
        out_shape=jax.ShapeDtypeStruct((batch, N), jnp.float32),
        grid_spec=pltpu.PrefetchScalarGridSpec(
            num_scalar_prefetch=0,
            grid=(N // tn, G),
            in_specs=[
                pl.BlockSpec((G, M, tk), lambda j, k: (0, 0, 0)),
                pl.BlockSpec((tk, tn), lambda j, k: (k, j)),
                pl.BlockSpec((1, tn), lambda j, k: (0, j)),
            ],
            out_specs=pl.BlockSpec((batch, tn), lambda j, k: (0, j)),
            scratch_shapes=[pltpu.VMEM((M, tn), jnp.float32)],
        ),
        compiler_params=pltpu.CompilerParams(
            dimension_semantics=("parallel", "arbitrary"),
            vmem_limit_bytes=40 * 1024 * 1024),
    )(a_grouped, w, bias2d)


def _fc_head_kernel(x_ref, w2_ref, b2_ref, w3_ref, b3_ref, o_ref):
    """Fused fc2 (1024->512) and fc3 (512->9), all resident in VMEM."""
    h = jnp.dot(x_ref[...], w2_ref[...],
                preferred_element_type=jnp.float32) + b2_ref[...]
    o_ref[...] = (jnp.dot(h, w3_ref[...],
                          preferred_element_type=jnp.float32)
                  + b3_ref[...]).astype(o_ref.dtype)


def fc_head(x, w2, b2, w3, b3):
    B = x.shape[0]
    return pl.pallas_call(
        _fc_head_kernel,
        out_shape=jax.ShapeDtypeStruct((B, 9), jnp.float32),
        in_specs=[pl.BlockSpec(memory_space=pltpu.MemorySpace.VMEM)] * 5,
        out_specs=pl.BlockSpec(memory_space=pltpu.MemorySpace.VMEM),
    )(x, w2, b2, w3, b3)


# ----------------------------------------------------------------------------
# Glue: im2col, parameter setup, full forward
# ----------------------------------------------------------------------------
def _im2col_taps(x_nhwc):
    B, H, W, C = x_nhwc.shape
    Ho, Wo = H - 2, W - 2
    taps = [x_nhwc[:, di:di + Ho, dj:dj + Wo, :].reshape(B * Ho * Wo, C)
            for di in range(3) for dj in range(3)]
    return taps, (B, Ho, Wo)


def im2col3x3_flat(x_nhwc):
    """(B,H,W,C) -> (B*Ho*Wo, 9*C) for a valid 3x3 / stride-1 conv (reference)."""
    taps, dims = _im2col_taps(x_nhwc)
    return jnp.concatenate(taps, axis=-1), dims


def im2col3x3_grouped(x_nhwc, groups=3):
    """(B,H,W,C) -> (groups, B*Ho*Wo, (9//groups)*C): K pre-split into chunks of
    3 conv taps so the kernel can index the resident patch tensor with a_ref[k]."""
    # TODO(synk): fold the 9 conv taps into the K grid axis directly from the
    # un-duplicated NHWC activation (shifted-window index_map) instead of
    # materializing the duplicated patch tensor in XLA.
    taps, dims = _im2col_taps(x_nhwc)
    per = len(taps) // groups
    chunks = [jnp.concatenate(taps[g * per:(g + 1) * per], axis=-1)
              for g in range(groups)]
    return jnp.stack(chunks, axis=0), dims


def init_params(key):
    """Deterministic synthetic init mirroring the module's parameter shapes."""
    ks = jax.random.split(key, 8)

    def u(k, shape, fan_in):
        bound = 1.0 / math.sqrt(fan_in)
        return jax.random.uniform(k, shape, jnp.float32, -bound, bound)

    # nn.Conv2d weights are (Cout, Cin, 3, 3); convert to im2col matmul layout
    # (3,3,Cin,Cout) -> (9*Cin, Cout), matching the tap-major patch order above.
    w1 = u(ks[0], (2048, 2048, 3, 3), 2048 * 9)
    b1 = u(ks[1], (2048,), 2048 * 9)
    w2 = u(ks[2], (1024, 2048, 3, 3), 2048 * 9)
    b2 = u(ks[3], (1024,), 2048 * 9)
    # nn.Linear weights are (out, in); transpose for x @ W.
    wfc2 = u(ks[4], (512, 1024), 1024)
    bfc2 = u(ks[5], (512,), 1024)
    wfc3 = u(ks[6], (9, 512), 512)
    bfc3 = u(ks[7], (9,), 512)

    return {
        # conv weights in bf16 (the dominant HBM stream); biases stay f32.
        "w1m": jnp.transpose(w1, (2, 3, 1, 0)).reshape(9 * 2048, 2048)
                  .astype(jnp.bfloat16),
        "b1": b1,
        "w2m": jnp.transpose(w2, (2, 3, 1, 0)).reshape(9 * 2048, 1024)
                  .astype(jnp.bfloat16),
        "b2": b2,
        "wfc2": jnp.transpose(wfc2),          # (1024, 512) f32
        "bfc2": bfc2.reshape(1, 512),
        "wfc3": jnp.transpose(wfc3),          # (512, 9) f32
        "bfc3": bfc3.reshape(1, 9),
    }


def calibration_global_forward(params, x_nchw):
    """x_nchw: (B, 2048, 10, 10) float32 -> (B, 9) float32."""
    B = x_nchw.shape[0]
    x = jnp.transpose(x_nchw, (0, 2, 3, 1)).astype(jnp.bfloat16)  # NCHW->NHWC bf16

    # conv1: 2048 -> 2048, 3x3 valid (im2col + tiled matmul, bf16 in / f32 acc)
    p, (_, Ho, Wo) = im2col3x3_grouped(x)
    y = conv_matmul_bias(p, params["w1m"], params["b1"], tn=512,
                         out_dtype=jnp.bfloat16)
    x = y.reshape(B, Ho, Wo, 2048)

    # conv2: 2048 -> 1024, 3x3 valid + fused MaxPool2d(6) epilogue -> (B, 1024)
    p, (_, Ho, Wo) = im2col3x3_grouped(x)
    assert Ho == 6 and Wo == 6, "spatial size must give a 6x6 map before MaxPool2d(6)"
    x = conv_matmul_bias_maxpool(p, params["w2m"], params["b2"],
                                 batch=B, spatial=Ho * Wo, tn=512)

    # fc2 + fc3 (fused, f32)
    return fc_head(x, params["wfc2"], params["bfc2"],
                   params["wfc3"], params["bfc3"])


def reference_forward(params, x_nchw):
    """Pure-JAX reference with matching precision (bf16 inputs, f32 accumulation)."""
    B = x_nchw.shape[0]
    x = jnp.transpose(x_nchw, (0, 2, 3, 1)).astype(jnp.bfloat16)
    p, (_, Ho, Wo) = im2col3x3_flat(x)
    y = jnp.dot(p, params["w1m"], preferred_element_type=jnp.float32) + params["b1"]
    x = y.astype(jnp.bfloat16).reshape(B, Ho, Wo, 2048)
    p, (_, Ho, Wo) = im2col3x3_flat(x)
    y = jnp.dot(p, params["w2m"], preferred_element_type=jnp.float32) + params["b2"]
    x = jnp.max(y.reshape(B, Ho * Wo, 1024), axis=1)
    h = x @ params["wfc2"] + params["bfc2"]
    return h @ params["wfc3"] + params["bfc3"]


if __name__ == "__main__":
    key = jax.random.PRNGKey(0)
    pkey, xkey = jax.random.split(key)

    params = init_params(pkey)
    # batch=2, channels=2048 (fixed by the module), spatial 10x10 (smallest
    # size consistent with the module's reshape to (B, 1024)).
    x = jax.random.normal(xkey, (2, 2048, 10, 10), dtype=jnp.float32)

    out = jax.block_until_ready(calibration_global_forward(params, x))
    assert out.shape == (2, 9) and out.dtype == jnp.float32

    ref = jax.block_until_ready(reference_forward(params, x))
    assert jnp.allclose(out, ref, rtol=3e-3, atol=3e-3), "mismatch vs reference"

    print("KERNEL_OK")
</pallas_src>

<mosaic_0001>
module attributes {stable_mosaic.version = 11 : i64} {
  func.func @_conv_matmul_kernel(%arg0: i32, %arg1: i32, %arg2: memref<3x128x6144xbf16, #tpu.memory_space<vmem>>, %arg3: memref<6144x512xbf16, #tpu.memory_space<vmem>>, %arg4: memref<1x512xf32, #tpu.memory_space<vmem>>, %arg5: memref<128x512xbf16, #tpu.memory_space<vmem>>, %arg6: memref<128x512xf32, #tpu.memory_space<vmem>>) attributes {dimension_semantics = [#tpu.dimension_semantics<parallel>, #tpu.dimension_semantics<arbitrary>], iteration_bounds = array<i64: 4, 3>, scalar_prefetch = 0 : i64, scratch_operands = 1 : i64, tpu.core_type = #tpu.core_type<tc>, window_params = [{pipeline_mode = #tpu.pipeline_mode<synchronous>, transform_indices = @transform_0, window_bounds = array<i64: 3, 128, 6144>}, {transform_indices = @transform_1, window_bounds = array<i64: 6144, 512>}, {transform_indices = @transform_2, window_bounds = array<i64: 1, 512>}, {transform_indices = @transform_3, window_bounds = array<i64: 128, 512>}]} {
    %c0_i32 = arith.constant 0 : i32
    %0 = arith.cmpi eq, %arg1, %c0_i32 : i32
    %1 = arith.extui %0 : i1 to i32
    %c0_i32_0 = arith.constant 0 : i32
    %2 = arith.cmpi ne, %1, %c0_i32_0 : i32
    scf.if %2 {
      %cst_9 = arith.constant 0.000000e+00 : f32
      %14 = vector.broadcast %cst_9 : f32 to vector<128x512xf32>
      %c0_10 = arith.constant 0 : index
      %c0_11 = arith.constant 0 : index
      %15 = vector.load %arg6[%c0_10, %c0_11] : memref<128x512xf32, #tpu.memory_space<vmem>>, vector<128x512xf32>
      tpu.vector_store %arg6[%c0_10, %c0_11], %14 {strides = array<i32>} : memref<128x512xf32, #tpu.memory_space<vmem>>, vector<128x512xf32>,
    } else {
    }
    %c0 = arith.constant 0 : index
    %c0_1 = arith.constant 0 : index
    %3 = vector.load %arg6[%c0, %c0_1] : memref<128x512xf32, #tpu.memory_space<vmem>>, vector<128x512xf32>
    %4 = arith.index_cast %arg1 : i32 to index
    %c0_2 = arith.constant 0 : index
    %c0_3 = arith.constant 0 : index
    %5 = vector.load %arg2[%4, %c0_2, %c0_3] : memref<3x128x6144xbf16, #tpu.memory_space<vmem>>, vector<1x128x6144xbf16>
    %6 = vector.shape_cast %5 : vector<1x128x6144xbf16> to vector<128x6144xbf16>
    %c0_4 = arith.constant 0 : index
    %c0_5 = arith.constant 0 : index
    %7 = vector.load %arg3[%c0_4, %c0_5] : memref<6144x512xbf16, #tpu.memory_space<vmem>>, vector<6144x512xbf16>
    %cst = arith.constant dense<0.000000e+00> : vector<128x512xf32>
    %8 = tpu.matmul %6, %7, %cst {dimension_numbers = #tpu.dot_dimension_numbers<[1], [0], [0], [1], [0, 0, 1, 1], [], []>} : vector<128x6144xbf16>, vector<6144x512xbf16>, vector<128x512xf32> -> vector<128x512xf32>
    %9 = arith.addf %3, %8 : vector<128x512xf32>
    %c0_6 = arith.constant 0 : index
    %c0_7 = arith.constant 0 : index
    %10 = vector.load %arg6[%c0_6, %c0_7] : memref<128x512xf32, #tpu.memory_space<vmem>>, vector<128x512xf32>
    tpu.vector_store %arg6[%c0_6, %c0_7], %9 {strides = array<i32>} : memref<128x512xf32, #tpu.memory_space<vmem>>, vector<128x512xf32>,
    %c2_i32 = arith.constant 2 : i32
    %11 = arith.cmpi eq, %arg1, %c2_i32 : i32
    %12 = arith.extui %11 : i1 to i32
    %c0_i32_8 = arith.constant 0 : i32
    %13 = arith.cmpi ne, %12, %c0_i32_8 : i32
    scf.if %13 {
      %c0_9 = arith.constant 0 : index
      %c0_10 = arith.constant 0 : index
      %14 = vector.load %arg6[%c0_9, %c0_10] : memref<128x512xf32, #tpu.memory_space<vmem>>, vector<128x512xf32>
      %c0_11 = arith.constant 0 : index
      %c0_12 = arith.constant 0 : index
      %15 = vector.load %arg4[%c0_11, %c0_12] : memref<1x512xf32, #tpu.memory_space<vmem>>, vector<1x512xf32>
      %16 = vector.broadcast %15 : vector<1x512xf32> to vector<128x512xf32>
      %17 = arith.addf %14, %16 : vector<128x512xf32>
      %18 = arith.truncf %17 : vector<128x512xf32> to vector<128x512xbf16>
      %c0_13 = arith.constant 0 : index
      %c0_14 = arith.constant 0 : index
      %19 = vector.load %arg5[%c0_13, %c0_14] : memref<128x512xbf16, #tpu.memory_space<vmem>>, vector<128x512xbf16>
      tpu.vector_store %arg5[%c0_13, %c0_14], %18 {strides = array<i32>} : memref<128x512xbf16, #tpu.memory_space<vmem>>, vector<128x512xbf16>,
    } else {
    }
    return
  }
  func.func @transform_0(%arg0: i32, %arg1: i32) -> (i32, i32, i32) {
    %c0_i32 = arith.constant 0 : i32
    %c0_i32_0 = arith.constant 0 : i32
    %c0_i32_1 = arith.constant 0 : i32
    %c0_i32_2 = arith.constant 0 : i32
    return %c0_i32, %c0_i32_0, %c0_i32_1 : i32, i32, i32
  }
  func.func @transform_1(%arg0: i32, %arg1: i32) -> (i32, i32) {
    %c0_i32 = arith.constant 0 : i32
    return %arg1, %arg0 : i32, i32
  }
  func.func @transform_2(%arg0: i32, %arg1: i32) -> (i32, i32) {
    %c0_i32 = arith.constant 0 : i32
    %c0_i32_0 = arith.constant 0 : i32
    return %c0_i32, %arg0 : i32, i32
  }
  func.func @transform_3(%arg0: i32, %arg1: i32) -> (i32, i32) {
    %c0_i32 = arith.constant 0 : i32
    %c0_i32_0 = arith.constant 0 : i32
    return %c0_i32, %arg0 : i32, i32
  }
}

</mosaic_0001>

<bundles_post_ra>
// kernel: tpu_custom_call.1
= control target key start
LH: loop header
LB: loop body
LE: loop exit
PB: predicated region body
PF: predicated region fallthrough
CT: control target
= control target key end

     0   :  { %s26588_s0 = inlined_call_operand.hbm [shape: bf16[3,128,6144], index: 0, kind: input, shape index: {}]   ;;  %s26589_s1 = inlined_call_operand.hbm [shape: bf16[18432,2048], index: 1, kind: input, shape index: {}]   ;;  %s26590_s2 = inlined_call_operand.hbm [shape: f32[1,2048], index: 2, kind: input, shape index: {}]   ;;  %s26591_s3 = inlined_call_operand.hbm [shape: bf16[128,2048], index: 3, kind: output, shape index: {}]  }
   0x1   :  { %26601 = sst [smem:[#allocation16_spill]] %s26588_s0 }
   0x2   :  { %26602 = sst [smem:[#allocation17_spill]] %s26591_s3 }
   0x3   :  { %8 = vsyncpa [#allocation4], 0 }
   0x4   :  { %9 = vsyncpa [#allocation7], 0 }
   0x5   :  { %11 = vsyncpa [#allocation7 + $0x1], 0 }
   0x6   :  { %12 = vsyncpa [#allocation5], 0 }
   0x7   :  { %14 = vsyncpa [#allocation5 + $0x1], 0  ;;  %s24149_s12 = smov 0   ;;  %s24151_s13 = smov 0  }
   0x8   :  { %s24153_s14 = smov 0   ;;  %s24155_s15 = smov 0  }
   0x9   :  { %s24157_s16 = smov 0   ;;  %s24159_s17 = smov 0  }
   0xa   :  { %s24161_s18 = smov 0   ;;  %s24163_s19 = smov 0  }
   0xb   :  { %s24165_s20 = smov 0   ;;  %s24167_s21 = smov 0  }
   0xc   :  { %s24169_s22 = smov 0  }
   0xd LB: > { %s29_s23 = sadd.s32 1, %s24106_s20  ;;  %s32_s24 = sadd.s32 1, %s24110_s21  ;;  %s24114_s22 = sphi %s24169_s22, %s20_s22   ;;  %s24110_s21 = sphi %s24167_s21, %s26638_s21   ;;  %s24106_s20 = sphi %s24165_s20, %s26637_s20   ;;  %s24102_s19 = sphi %s24163_s19, %s26636_s19   ;;  %s24098_s18 = sphi %s24161_s18, %s26635_s18   ;;  %s24094_s17 = sphi %s24159_s17, %s26634_s17   ;;  %s24090_s16 = sphi %s24157_s16, %s26633_s16   ;;  %s24086_s15 = sphi %s24155_s15, %s26632_s15   ;;  %s24082_s14 = sphi %s24153_s14, %s26631_s14   ;;  %s24078_s13 = sphi %s24151_s13, %s26630_s13   ;;  %s24074_s12 = sphi %s24149_s12, %s26629_s12  }
   0xe   : > { %p30_p0 = scmp.ge.s32.totalorder %s29_s23, 3  ;;  %s62_s25 = sadd.s32 1, %s24094_s17 }
   0xf   : > { %p69_p1 = scmp.ne.s32.totalorder %s24094_s17, %s24090_s16  ;;  %p26597_p2 = scmp.eq.s32.totalorder %s24114_s22, 0 }
  0x10   : > { %s26640_s23 = smov (%p30_p0, %s29_s23), 0  ;;  %s26642_s24 = smov (!%p30_p0, %s32_s24), %s24110_s21 }
  0x11   : > { %26603 = sst [smem:[#allocation14_spill]] %s26640_s23  ;;  %s57_s26 = ssub.s32 %s24106_s20, %s26640_s23 }
  0x12   : > { %p24217_p3 = por %p26597_p2, %p69_p1  ;;  %p34_p4 = scmp.ge.s32.totalorder %s26642_s24, 4 }
  0x13   : > { %p26595_p5 = scmp.lt.s32.totalorder %s24114_s22, 12  ;;  %s164_s28 = sand.u32 1, %s24114_s22  }
  0x14   : > { %s26644_s24 = smov (%p34_p4, %s26642_s24), 0  ;;  %s166_s29 = sand.u32 1, %s24094_s17  }
  0x15   : > { %26605 = sst [smem:[#allocation15_spill]] %s26644_s24  ;;  %s24228_s30 = ssub.s32 %s24110_s21, %s26644_s24 }
  0x16   : > { %s21463_s4 = smul.u32 12288, %s166_s29  ;;  %s59_s5 = sor.u32 %s24228_s30, %s57_s26 }
  0x17   : > { %s17985_s6 = sshll.u32 %s24110_s21, 2  ;;  %p60_p6 = scmp.eq.s32.totalorder %s59_s5, 0 }
  0x18   : > { %s19955_s7 = smul.u32 12288, %s24106_s20  ;;  %s168_s8 = scalar_lea.vmem [#allocation6], %s21463_s4 }
  0x19   : > { %s178_s9 = sshll.u32 %s168_s8, 4  ;;  %p24242_p7 = pnand %p26595_p5, %p24217_p3  ;;  %s24236_s9 = int_to_ptr.vmem [resolvable:$true] %s178_s9 }
  0x1a   : > { %s24234_s10 = scalar_select %p60_p6, %s24094_s17, %s62_s25  }
  0x1b   : > { %s175_s11 = sadd.s32 %s19955_s7, %s17985_s6  ;;  %s24251_s25 = scalar_lea.sflag [#allocation7], %s164_s28 }
  0x1c   : > { %s17987_s23 = sshll.u32 %s175_s11, 6  ;;  %p23898_p9 = pneg %p24242_p7 }
  0x1d   : > { %s24249_s26 = scalar_lea.hbm %s26589_s1, %s17987_s23  ;;  %s23901_s5 = scalar_lea.hbm %s26589_s1, 2359296 }
  0x1e   : > { %s23896_s4 = scalar_lea.hbm %s24249_s26, 196608  ;;  %p23902_p12 = scmp.lt.u32.totalorder %s24249_s26, %s26589_s1 }
  0x1f   : > { %p23897_p8 = scmp.ne.s32.totalorder %s24249_s26, %s23896_s4  ;;  %p23903_p13 = scmp.lt.u32.totalorder %s23901_s5, %s23896_s4 }
  0x20   : > { %p23905_p1 = scmp.lt.u32.totalorder %s23896_s4, %s24249_s26 }
  0x21   : > { %p23899_p10 = pnand %p23898_p9, %p23897_p8  ;;  %p23904_p0 = por %p23903_p13, %p23902_p12 }
  0x23   : > { %p23900_p11 = pneg %p23899_p10  ;;  %p23906_p3 = por %p23905_p1, %p23904_p0 }
  0x25   : > { %p23907_p4 = pnand %p23906_p3, %p23900_p11 }
  0x27   : > { %23910 = shalt.err (!%p23907_p4)
}
  0x28   : > { %s23911_s28 = scalar_lea.vmem %s24236_s9, 196608  ;;  %s24116_s7 = smov [#allocation6]  }
  0x29   : > { %p23912_p6 = scmp.ne.s32.totalorder %s24236_s9, %s23911_s28  ;;  %s23916_s8 = sshll.u32 %s24116_s7, 4  ;;  %s23917_s8 = int_to_ptr.vmem [resolvable:$false] %s23916_s8 }
  0x2a   : > { %s23918_s11 = scalar_lea.vmem %s23917_s8, 393216  ;;  %p23919_p5 = scmp.lt.s32.totalorder %s24236_s9, %s23917_s8 }
  0x2b   : > { %p23914_p8 = pnand %p23912_p6, %p23898_p9  ;;  %p23920_p12 = scmp.lt.s32.totalorder %s23918_s11, %s23911_s28 }
  0x2d   : > { %p23915_p10 = pneg %p23914_p8  ;;  %p23921_p13 = por %p23920_p12, %p23919_p5 }
  0x2f   : > { %p23922_p0 = pnand %p23921_p13, %p23915_p10 }
  0x31   : > { %23925 = shalt.err (!%p23922_p0)
}
  0x32   : > { %s24117_s29 = smov 1024   ;;  %s24118_s4 = smov 256  }
  0x33   : > { %s24119_s27 = smov 16   ;;  %s24280_s24 = sadd.s32 4294967295, %s24114_s22  }
  0x34   : > { %21482 = dma.hbm_to_vmem [thread:$0]  (!%p24242_p7), %s24249_s26, 196608, %s24236_s9, %s24251_s25, %s24117_s29, %s24118_s4, %s24119_s27  }
  0x35   : > { %p75_p5 = scmp.ne.s32.totalorder %s24090_s16, %s24086_s15  ;;  %p26596_p9 = scmp.eq.s32.totalorder %s24280_s24, 0 }
  0x36   : > { %p17982_p1 = scmp.ge.s32.totalorder %s24114_s22, 1  ;;  %p138_p4 = scmp.lt.s32.totalorder %s24114_s22, 13 }
  0x37   : > { %p24289_p3 = por %p26596_p9, %p75_p5  ;;  %s24120_s3 = smov [#allocation3]  }
  0x38   : > { %p24294_p6 = pnand %p17982_p1, %p138_p4  ;;  %s150_s9 = sshll.u32 %s24120_s3, 4  ;;  %s151_s9 = int_to_ptr.vmem [resolvable:$true] %s150_s9 }
  0x39   : > { %s26607_s5 = scalar_select %p24289_p3, 1, 0 }
  0x3a   : > { %s26608_s23 = scalar_select %p24294_p6, 1, 0 }
  0x3b   : > { %p21475_p7 = pneg %p24294_p6  ;;  %s26610_s0 = sld [smem:[#allocation16_spill]] }
  0x3d   : > { %p24302_p8 = pnand %p21475_p7, %p26596_p9 }
  0x3f   : > { %p23928_p12 = pneg %p24302_p8 }
  0x41   : > { %s23926_s28 = scalar_lea.hbm %s26610_s0, 147456 }
  0x42   : > { %p23927_p10 = scmp.ne.s32.totalorder %s26610_s0, %s23926_s28  ;;  %p23933_p5 = scmp.lt.u32.totalorder %s23926_s28, %s26610_s0 }
  0x44   : > { %p23929_p13 = pnand %p23928_p12, %p23927_p10 }
  0x46   : > { %p23930_p0 = pneg %p23929_p13 }
  0x48   : > { %p23935_p1 = pnand %p23933_p5, %p23930_p0 }
  0x4a   : > { %23938 = shalt.err (!%p23935_p1)
}
  0x4b   : > { %s23939_s4 = scalar_lea.vmem %s151_s9, 147456  ;;  %p23947_p11 = scmp.lt.s32.totalorder %s151_s9, %s151_s9 }
  0x4c   : > { %p23940_p4 = scmp.ne.s32.totalorder %s151_s9, %s23939_s4  ;;  %p23948_p2 = scmp.lt.s32.totalorder %s23939_s4, %s23939_s4 }
  0x4e   : > { %p23942_p7 = pnand %p23940_p4, %p23928_p12  ;;  %p23949_p3 = por %p23948_p2, %p23947_p11 }
  0x50   : > { %p23943_p9 = pneg %p23942_p7 }
  0x52   : > { %p23950_p6 = pnand %p23949_p3, %p23943_p9 }
  0x54   : > { %23953 = shalt.err (!%p23950_p6)
}
  0x55   : > { %s24121_s27 = smov 3072   ;;  %s24122_s3 = smov 192  }
  0x56   : > { %21478 = dma.hbm_to_vmem [thread:$0]  (!%p24302_p8), %s26610_s0, 147456, %s151_s9, [#allocation4], %s24121_s27, %s24121_s27, %s24122_s3  }
  0x57   : > { %s17981_s28 = sadd.s32 4294967294, %s24114_s22   ;;  %p86_p2 = scmp.eq.s32.totalorder %s24228_s30, 0 }
  0x58   : > { %s88_s7 = sadd.s32 1, %s24082_s14  ;;  %p95_p9 = scmp.ne.s32.totalorder %s24082_s14, %s24078_s13 }
  0x59   : > { %s24328_s8 = scalar_select %p86_p2, %s24082_s14, %s88_s7  }
  0x5a   : > { %p26611_p11 = scmp.eq.s32.totalorder %s24114_s22, 0  ;;  %p101_p6 = scmp.ne.s32.totalorder %s24078_s13, %s24074_s12 }
  0x5b   : > { %p26613_p10 = scmp.eq.s32.totalorder %s24280_s24, 11  ;;  %p131_p8 = scmp.eq.s32.totalorder %s17981_s28, 11 }
  0x5c   : > { %p24332_p3 = por %p95_p9, %p26611_p11  ;;  %p26615_p13 = scmp.eq.s32.totalorder %s24280_s24, 0 }
  0x5d   : > { %p24340_p12 = por %p26613_p10, %p95_p9  ;;  %s190_s9 = sand.u32 1, %s24082_s14  }
  0x5e   : > { %p24346_p0 = por %p101_p6, %p26615_p13  ;;  %p24351_p5 = por %p131_p8, %p101_p6 }
  0x5f   : > { %s26614_s15 = scalar_select %p24340_p12, 1, 0 }
  0x60   : > { %s26617_s29 = scalar_select %p24351_p5, 1, 0 }
  0x61   : > { %s17988_s4 = sshll.u32 %s190_s9, 2  ;;  %s19956_s27 = sshll.u32 %s24110_s21, 6 }
  0x62   : > { %s24359_s6 = scalar_lea.hbm %s26590_s2, %s19956_s27  ;;  %s192_s28 = scalar_lea.vmem [#allocation8], %s17988_s4 }
  0x63   : > { %s200_s7 = sshll.u32 %s192_s28, 4  ;;  %p26618_p1 = scmp.lt.s32.totalorder %s24114_s22, 12  ;;  %s24361_s7 = int_to_ptr.vmem [resolvable:$true] %s200_s7 }
  0x64   : > { %s23954_s9 = scalar_lea.hbm %s24359_s6, 64  ;;  %s23959_s3 = scalar_lea.hbm %s26590_s2, 256 }
  0x65   : > { %p24367_p4 = pnand %p26618_p1, %p24332_p3  ;;  %p23955_p7 = scmp.ne.s32.totalorder %s24359_s6, %s23954_s9 }
  0x66   : > { %p23960_p3 = scmp.lt.u32.totalorder %s24359_s6, %s26590_s2  ;;  %p23961_p6 = scmp.lt.u32.totalorder %s23959_s3, %s23954_s9 }
  0x67   : > { %p23956_p2 = pneg %p24367_p4  ;;  %p23963_p8 = scmp.lt.u32.totalorder %s23954_s9, %s24359_s6 }
  0x68   : > { %p23962_p10 = por %p23961_p6, %p23960_p3 }
  0x69   : > { %p23957_p9 = pnand %p23956_p2, %p23955_p7 }
  0x6a   : > { %p23964_p13 = por %p23963_p8, %p23962_p10 }
  0x6b   : > { %p23958_p11 = pneg %p23957_p9 }
  0x6d   : > { %p23965_p1 = pnand %p23964_p13, %p23958_p11 }
  0x6f   : > { %23968 = shalt.err (!%p23965_p1)
}
  0x70   : > { %s23969_s28 = scalar_lea.vmem %s24361_s7, 64  ;;  %s24123_s4 = smov [#allocation8]  }
  0x71   : > { %p23970_p7 = scmp.ne.s32.totalorder %s24361_s7, %s23969_s28  ;;  %s23974_s27 = sshll.u32 %s24123_s4, 4  ;;  %s23975_s27 = int_to_ptr.vmem [resolvable:$false] %s23974_s27 }
  0x72   : > { %s23976_s11 = scalar_lea.vmem %s23975_s27, 128  ;;  %p23977_p12 = scmp.lt.s32.totalorder %s24361_s7, %s23975_s27 }
  0x73   : > { %p23972_p9 = pnand %p23970_p7, %p23956_p2  ;;  %p23978_p3 = scmp.lt.s32.totalorder %s23976_s11, %s23969_s28 }
  0x75   : > { %p23973_p5 = pneg %p23972_p9  ;;  %p23979_p6 = por %p23978_p3, %p23977_p12 }
  0x77   : > { %p23980_p10 = pnand %p23979_p6, %p23973_p5 }
  0x79   : > { %23983 = shalt.err (!%p23980_p10)
}
  0x7a   : > { %21485 = dma.hbm_to_vmem [thread:$0]  (!%p24367_p4), %s24359_s6, 64, %s24361_s7, %s24251_s25  }
  0x7b   : > { %p26620_p11 = scmp.ne.s32.totalorder %s26608_s23, 0 }
  0x7c   : > { %p26621_p2 = scmp.eq.s32.totalorder (!%p26620_p11), %s24280_s24, 0 }
  0x7d   : > { %209 = sbr.rel (%p26620_p11) target bundleno = 2038 (0x7f6), region = 32 }
  0x84   : > { %24057 = dma.done.wait (%p26621_p2), [#allocation4], 147456   ;;  %p26622_p8 = pmov %p26621_p2 }
  0x85   : > { %s215_s9 = sand.u32 1, %s24280_s24   ;;  %s217_s3 = sand.u32 1, %s24090_s16  }
  0x86   : > { %24059 = vsyncadd (%p26622_p8), [#allocation4], 4294819840  ;;  %s21464_s26 = smul.u32 12288, %s217_s3  ;;  %s216_s0 = scalar_lea.sflag [#allocation7], %s215_s9 }
  0x87   : > { %p26623_p12 = scmp.ne.s32.totalorder %s26607_s5, 0 }
  0x88   : > { %s24405_s28 = scalar_lea.vmem [#allocation6], %s21464_s26 }
  0x89   : > { %24061 = dma.done.wait (%p26623_p12), %s216_s0, 196608  }
  0x8a   : > { %24063 = vsyncadd (%p26623_p12), %s216_s0, 4294770688  ;;  %s24412_s25 = sand.u32 1, %s24078_s13  }
  0x8b   : > { %s17993_s23 = sshll.u32 %s24412_s25, 2 }
  0x8c   : > { %s24415_s6 = scalar_lea.vmem [#allocation8], %s17993_s23 }
  0x8d   : > { %24065 = dma.done.wait (%p24346_p0), %s216_s0, 64  }
  0x8e   : > { %24067 = vsyncadd (%p24346_p0), %s216_s0, 4294967232  ;;  %s17994_s24 = sshll.u32 %s24412_s25, 8  ;;  %p17995_p5 = scmp.ne.s32.totalorder %s24098_s18, 0 }
  0x8f   : > { %s24422_s7 = scalar_lea.vmem [#allocation9], %s17994_s24  ;;  %v24124_v0 = vmov (!%p17995_p5), 0.0  }
  0x90   : > { %263 = sbr.rel (%p17995_p5) target bundleno = 176 (0xb0), region = 48  ;;  %264 = vst [vmem:[#allocation2] sm:$0xff] (!%p17995_p5), %v24124_v0  ;;  %265 = vst [vmem:[#allocation2 + $0x8] sm:$0xff] (!%p17995_p5), %v24124_v0 }
  0x91   : > { %266 = vst [vmem:[#allocation2 + $0x10] sm:$0xff] (!%p17995_p5), %v24124_v0  ;;  %267 = vst [vmem:[#allocation2 + $0x18] sm:$0xff] (!%p17995_p5), %v24124_v0 }
  0x92   : > { %268 = vst [vmem:[#allocation2 + $0x20] sm:$0xff] (!%p17995_p5), %v24124_v0  ;;  %269 = vst [vmem:[#allocation2 + $0x28] sm:$0xff] (!%p17995_p5), %v24124_v0 }
  0x93   : > { %270 = vst [vmem:[#allocation2 + $0x30] sm:$0xff] (!%p17995_p5), %v24124_v0  ;;  %271 = vst [vmem:[#allocation2 + $0x38] sm:$0xff] (!%p17995_p5), %v24124_v0 }
  0x94   : > { %272 = vst [vmem:[#allocation2 + $0x40] sm:$0xff] (!%p17995_p5), %v24124_v0  ;;  %273 = vst [vmem:[#allocation2 + $0x48] sm:$0xff] (!%p17995_p5), %v24124_v0 }
  0x95   : > { %274 = vst [vmem:[#allocation2 + $0x50] sm:$0xff] (!%p17995_p5), %v24124_v0  ;;  %275 = vst [vmem:[#allocation2 + $0x58] sm:$0xff] (!%p17995_p5), %v24124_v0 }
  0x96   : > { %276 = vst [vmem:[#allocation2 + $0x60] sm:$0xff] (!%p17995_p5), %v24124_v0  ;;  %277 = vst [vmem:[#allocation2 + $0x68] sm:$0xff] (!%p17995_p5), %v24124_v0 }
  0x97   : > { %278 = vst [vmem:[#allocation2 + $0x70] sm:$0xff] %v24124_v0  ;;  %279 = vst [vmem:[#allocation2 + $0x78] sm:$0xff] %v24124_v0 }
  0x98   : > { %280 = vst [vmem:[#allocation2 + $0x80] sm:$0xff] %v24124_v0  ;;  %281 = vst [vmem:[#allocation2 + $0x88] sm:$0xff] %v24124_v0 }
  0x99   : > { %282 = vst [vmem:[#allocation2 + $0x90] sm:$0xff] %v24124_v0  ;;  %283 = vst [vmem:[#allocation2 + $0x98] sm:$0xff] %v24124_v0 }
  0x9a   : > { %284 = vst [vmem:[#allocation2 + $0xa0] sm:$0xff] %v24124_v0  ;;  %285 = vst [vmem:[#allocation2 + $0xa8] sm:$0xff] %v24124_v0 }
  0x9b   : > { %286 = vst [vmem:[#allocation2 + $0xb0] sm:$0xff] %v24124_v0  ;;  %287 = vst [vmem:[#allocation2 + $0xb8] sm:$0xff] %v24124_v0 }
  0x9c   : > { %288 = vst [vmem:[#allocation2 + $0xc0] sm:$0xff] %v24124_v0  ;;  %289 = vst [vmem:[#allocation2 + $0xc8] sm:$0xff] %v24124_v0 }
  0x9d   : > { %290 = vst [vmem:[#allocation2 + $0xd0] sm:$0xff] %v24124_v0  ;;  %291 = vst [vmem:[#allocation2 + $0xd8] sm:$0xff] %v24124_v0 }
  0x9e   : > { %292 = vst [vmem:[#allocation2 + $0xe0] sm:$0xff] %v24124_v0  ;;  %293 = vst [vmem:[#allocation2 + $0xe8] sm:$0xff] %v24124_v0 }
  0x9f   : > { %294 = vst [vmem:[#allocation2 + $0xf0] sm:$0xff] %v24124_v0  ;;  %295 = vst [vmem:[#allocation2 + $0xf8] sm:$0xff] %v24124_v0 }
  0xa0   : > { %296 = vst [vmem:[#allocation2 + $0x100] sm:$0xff] %v24124_v0  ;;  %297 = vst [vmem:[#allocation2 + $0x108] sm:$0xff] %v24124_v0 }
  0xa1   : > { %298 = vst [vmem:[#allocation2 + $0x110] sm:$0xff] %v24124_v0  ;;  %299 = vst [vmem:[#allocation2 + $0x118] sm:$0xff] %v24124_v0 }
  0xa2   : > { %300 = vst [vmem:[#allocation2 + $0x120] sm:$0xff] %v24124_v0  ;;  %301 = vst [vmem:[#allocation2 + $0x128] sm:$0xff] %v24124_v0 }
  0xa3   : > { %302 = vst [vmem:[#allocation2 + $0x130] sm:$0xff] %v24124_v0  ;;  %303 = vst [vmem:[#allocation2 + $0x138] sm:$0xff] %v24124_v0 }
  0xa4   : > { %304 = vst [vmem:[#allocation2 + $0x140] sm:$0xff] %v24124_v0  ;;  %305 = vst [vmem:[#allocation2 + $0x148] sm:$0xff] %v24124_v0 }
  0xa5   : > { %306 = vst [vmem:[#allocation2 + $0x150] sm:$0xff] %v24124_v0  ;;  %307 = vst [vmem:[#allocation2 + $0x158] sm:$0xff] %v24124_v0 }
  0xa6   : > { %308 = vst [vmem:[#allocation2 + $0x160] sm:$0xff] %v24124_v0  ;;  %309 = vst [vmem:[#allocation2 + $0x168] sm:$0xff] %v24124_v0 }
  0xa7   : > { %310 = vst [vmem:[#allocation2 + $0x170] sm:$0xff] %v24124_v0  ;;  %311 = vst [vmem:[#allocation2 + $0x178] sm:$0xff] %v24124_v0 }
  0xa8   : > { %312 = vst [vmem:[#allocation2 + $0x180] sm:$0xff] %v24124_v0  ;;  %313 = vst [vmem:[#allocation2 + $0x188] sm:$0xff] %v24124_v0 }
  0xa9   : > { %314 = vst [vmem:[#allocation2 + $0x190] sm:$0xff] %v24124_v0  ;;  %315 = vst [vmem:[#allocation2 + $0x198] sm:$0xff] %v24124_v0 }
  0xaa   : > { %316 = vst [vmem:[#allocation2 + $0x1a0] sm:$0xff] %v24124_v0  ;;  %317 = vst [vmem:[#allocation2 + $0x1a8] sm:$0xff] %v24124_v0 }
  0xab   : > { %318 = vst [vmem:[#allocation2 + $0x1b0] sm:$0xff] %v24124_v0  ;;  %319 = vst [vmem:[#allocation2 + $0x1b8] sm:$0xff] %v24124_v0 }
  0xac   : > { %320 = vst [vmem:[#allocation2 + $0x1c0] sm:$0xff] %v24124_v0  ;;  %321 = vst [vmem:[#allocation2 + $0x1c8] sm:$0xff] %v24124_v0 }
  0xad   : > { %322 = vst [vmem:[#allocation2 + $0x1d0] sm:$0xff] %v24124_v0  ;;  %323 = vst [vmem:[#allocation2 + $0x1d8] sm:$0xff] %v24124_v0 }
  0xae   : > { %324 = vst [vmem:[#allocation2 + $0x1e0] sm:$0xff] %v24124_v0  ;;  %325 = vst [vmem:[#allocation2 + $0x1e8] sm:$0xff] %v24124_v0 }
  0xaf   : > { %326 = vst [vmem:[#allocation2 + $0x1f0] sm:$0xff] %v24124_v0  ;;  %327 = vst [vmem:[#allocation2 + $0x1f8] sm:$0xff] %v24124_v0 }
  0xb0 PF: > { %v21592_v1 = vld [vmem:[%s24405_s28 + $0x4] ss:$16 sps:$4 sm:$0xff]   ;;  %v21594_v2 = vld [vmem:[%s24405_s28 + $0xc] ss:$16 sps:$4 sm:$0xff]   ;;  %v21596_v3 = vld [vmem:[%s24405_s28] ss:$16 sps:$4 sm:$0xff]  }
  0xb1   : > { %11915 = vmatprep.subr.bf16.mxu0 %v21592_v1  ;;  %v21597_v4 = vld [vmem:[%s24405_s28 + $0x8] ss:$16 sps:$4 sm:$0xff]   ;;  %14627 = vmatprep.subr.bf16.mxu1 %v21594_v2  ;;  %v21598_v5 = vld [vmem:[%s24405_s28 + $0x24] ss:$16 sps:$4 sm:$0xff]   ;;  %v21600_v6 = vld [vmem:[%s24405_s28 + $0x2c] ss:$16 sps:$4 sm:$0xff]  }
  0xb2   : > { %11916 = vmatpush1.bf16.msra.mxu0 %v21596_v3  ;;  %14628 = vmatpush1.bf16.msra.mxu1 %v21597_v4  ;;  %v21602_v7 = vld [vmem:[%s24405_s28 + $0x20] ss:$16 sps:$4 sm:$0xff]   ;;  %v21603_v8 = vld [vmem:[%s24405_s28 + $0x28] ss:$16 sps:$4 sm:$0xff]   ;;  %v21604_v9 = vld [vmem:[%s24405_s28 + $0x44] ss:$16 sps:$4 sm:$0xff]  }
  0xb3   : > { %11917 = vmatprep.subr.bf16.mxu0 %v21598_v5  ;;  %14629 = vmatprep.subr.bf16.mxu1 %v21600_v6  ;;  %v21606_v10 = vld [vmem:[%s24405_s28 + $0x4c] ss:$16 sps:$4 sm:$0xff]   ;;  %v21608_v11 = vld [vmem:[%s24405_s28 + $0x40] ss:$16 sps:$4 sm:$0xff]   ;;  %v21609_v12 = vld [vmem:[%s24405_s28 + $0x48] ss:$16 sps:$4 sm:$0xff]  }
  0xb4   : > { %v21610_v13 = vld [vmem:[%s24405_s28 + $0x64] ss:$16 sps:$4 sm:$0xff]   ;;  %v21612_v14 = vld [vmem:[%s24405_s28 + $0x6c] ss:$16 sps:$4 sm:$0xff]   ;;  %v21614_v15 = vld [vmem:[%s24405_s28 + $0x60] ss:$16 sps:$4 sm:$0xff]  }
  0xb5   : > { %v21615_v16 = vld [vmem:[%s24405_s28 + $0x68] ss:$16 sps:$4 sm:$0xff]   ;;  %v21616_v17 = vld [vmem:[%s24405_s28 + $0x84] ss:$16 sps:$4 sm:$0xff]   ;;  %v21618_v18 = vld [vmem:[%s24405_s28 + $0x8c] ss:$16 sps:$4 sm:$0xff]  }
  0xb6   : > { %11918 = vmatpush1.bf16.msra.mxu0 %v21602_v7  ;;  %14630 = vmatpush1.bf16.msra.mxu1 %v21603_v8  ;;  %v21620_v19 = vld [vmem:[%s24405_s28 + $0x80] ss:$16 sps:$4 sm:$0xff]   ;;  %v21621_v20 = vld [vmem:[%s24405_s28 + $0x88] ss:$16 sps:$4 sm:$0xff]   ;;  %v21622_v21 = vld [vmem:[%s24405_s28 + $0xa4] ss:$16 sps:$4 sm:$0xff]  }
  0xb7   : > { %11919 = vmatprep.subr.bf16.mxu0 %v21604_v9  ;;  %14631 = vmatprep.subr.bf16.mxu1 %v21606_v10  ;;  %v21624_v22 = vld [vmem:[%s24405_s28 + $0xac] ss:$16 sps:$4 sm:$0xff]   ;;  %v21626_v23 = vld [vmem:[%s24405_s28 + $0xa0] ss:$16 sps:$4 sm:$0xff]   ;;  %v21627_v24 = vld [vmem:[%s24405_s28 + $0xa8] ss:$16 sps:$4 sm:$0xff]  }
  0xb8   : > { %v21628_v25 = vld [vmem:[%s24405_s28 + $0xc4] ss:$16 sps:$4 sm:$0xff]   ;;  %v21630_v26 = vld [vmem:[%s24405_s28 + $0xcc] ss:$16 sps:$4 sm:$0xff]   ;;  %v21632_v27 = vld [vmem:[%s24405_s28 + $0xc0] ss:$16 sps:$4 sm:$0xff]  }
  0xb9   : > { %v21633_v28 = vld [vmem:[%s24405_s28 + $0xc8] ss:$16 sps:$4 sm:$0xff]   ;;  %v21634_v29 = vld [vmem:[%s24405_s28 + $0xe4] ss:$16 sps:$4 sm:$0xff]   ;;  %v21636_v30 = vld [vmem:[%s24405_s28 + $0xec] ss:$16 sps:$4 sm:$0xff]  }
  0xba   : > { %11920 = vmatpush1.bf16.msra.mxu0 %v21608_v11  ;;  %14632 = vmatpush1.bf16.msra.mxu1 %v21609_v12  ;;  %v21638_v31 = vld [vmem:[%s24405_s28 + $0xe0] ss:$16 sps:$4 sm:$0xff]   ;;  %v21639_v32 = vld [vmem:[%s24405_s28 + $0xe8] ss:$16 sps:$4 sm:$0xff]   ;;  %v21640_v33 = vld [vmem:[%s24405_s28 + $0x104] ss:$16 sps:$4 sm:$0xff]  }
  0xbb   : > { %11921 = vmatprep.subr.bf16.mxu0 %v21610_v13  ;;  %14633 = vmatprep.subr.bf16.mxu1 %v21612_v14  ;;  %v21642_v34 = vld [vmem:[%s24405_s28 + $0x10c] ss:$16 sps:$4 sm:$0xff]   ;;  %v21644_v35 = vld [vmem:[%s24405_s28 + $0x100] ss:$16 sps:$4 sm:$0xff]   ;;  %v21645_v36 = vld [vmem:[%s24405_s28 + $0x108] ss:$16 sps:$4 sm:$0xff]  }
  0xbc   : > { %v21646_v37 = vld [vmem:[%s24405_s28 + $0x124] ss:$16 sps:$4 sm:$0xff]   ;;  %v21648_v38 = vld [vmem:[%s24405_s28 + $0x12c] ss:$16 sps:$4 sm:$0xff]   ;;  %v21650_v39 = vld [vmem:[%s24405_s28 + $0x120] ss:$16 sps:$4 sm:$0xff]  }
  0xbd   : > { %s19957_s5 = smul.u32 3072, %s24098_s18  ;;  %v21651_v40 = vld [vmem:[%s24405_s28 + $0x128] ss:$16 sps:$4 sm:$0xff]   ;;  %v21652_v41 = vld [vmem:[%s24405_s28 + $0x144] ss:$16 sps:$4 sm:$0xff]   ;;  %p19917_p0 = scmp.ne.s32.totalorder %s24098_s18, 2 }
  0xbe   : > { %11922 = vmatpush1.bf16.msra.mxu0 %v21614_v15  ;;  %14634 = vmatpush1.bf16.msra.mxu1 %v21615_v16  ;;  %v21654_v42 = vld [vmem:[%s24405_s28 + $0x14c] ss:$16 sps:$4 sm:$0xff]   ;;  %v21656_v43 = vld [vmem:[%s24405_s28 + $0x140] ss:$16 sps:$4 sm:$0xff]   ;;  %v21657_v44 = vld [vmem:[%s24405_s28 + $0x148] ss:$16 sps:$4 sm:$0xff]  }
  0xbf   : > { %11923 = vmatprep.subr.bf16.mxu0 %v21616_v17  ;;  %14635 = vmatprep.subr.bf16.mxu1 %v21618_v18  ;;  %v21658_v45 = vld [vmem:[%s24405_s28 + $0x164] ss:$16 sps:$4 sm:$0xff]   ;;  %v21660_v46 = vld [vmem:[%s24405_s28 + $0x16c] ss:$16 sps:$4 sm:$0xff]   ;;  %s24536_s30 = scalar_lea.vmem [#allocation3], %s19957_s5 }
  0xc0   : > { %v395_v47 = vld [vmem:[%s24536_s30] sm:$0xff]  ;;  %v21663_v50 = vld [vmem:[%s24405_s28 + $0x168] ss:$16 sps:$4 sm:$0xff]   ;;  %v21666_v53 = vld [vmem:[%s24405_s28 + $0x18c] ss:$16 sps:$4 sm:$0xff]  }
  0xc1   : > { %v419_v48 = vld [vmem:[%s24536_s30 + $0xc0] sm:$0xff]  ;;  %v21669_v55 = vld [vmem:[%s24405_s28 + $0x188] ss:$16 sps:$4 sm:$0xff]   ;;  %v21672_v57 = vld [vmem:[%s24405_s28 + $0x1ac] ss:$16 sps:$4 sm:$0xff]  }
  0xc2   : > { %11924 = vmatpush1.bf16.msra.mxu0 %v21620_v19  ;;  %14636 = vmatpush1.bf16.msra.mxu1 %v21621_v20  ;;  %v21662_v49 = vld [vmem:[%s24405_s28 + $0x160] ss:$16 sps:$4 sm:$0xff]   ;;  %v17998_v51 = vcombine.high %v395_v47, %v419_v48  ;;  %v21664_v52 = vld [vmem:[%s24405_s28 + $0x184] ss:$16 sps:$4 sm:$0xff]   ;;  %v21675_v59 = vld [vmem:[%s24405_s28 + $0x1a8] ss:$16 sps:$4 sm:$0xff]   ;;  %v17997_v8 = vcombine.low %v395_v47, %v419_v48 }
  0xc3   : > { %11925 = vmatprep.subr.bf16.mxu0 %v21622_v21  ;;  %14637 = vmatprep.subr.bf16.mxu1 %v21624_v22  ;;  %v21668_v54 = vld [vmem:[%s24405_s28 + $0x180] ss:$16 sps:$4 sm:$0xff]   ;;  %v21670_v56 = vld [vmem:[%s24405_s28 + $0x1a4] ss:$16 sps:$4 sm:$0xff]   ;;  %v21678_v61 = vld [vmem:[%s24405_s28 + $0x1cc] ss:$16 sps:$4 sm:$0xff]  }
  0xc4   : > { %11947 = vmatprep.mubr.bf16.mxu0 %v17998_v51  ;;  %14659 = vmatprep.mubr.bf16.mxu1 %v17998_v51  ;;  %v21674_v58 = vld [vmem:[%s24405_s28 + $0x1a0] ss:$16 sps:$4 sm:$0xff]   ;;  %v21676_v60 = vld [vmem:[%s24405_s28 + $0x1c4] ss:$16 sps:$4 sm:$0xff]   ;;  %v21681_v63 = vld [vmem:[%s24405_s28 + $0x1c8] ss:$16 sps:$4 sm:$0xff]  }
  0xc5   : > { %v21680_v62 = vld [vmem:[%s24405_s28 + $0x1c0] ss:$16 sps:$4 sm:$0xff]   ;;  %v21682_v0 = vld [vmem:[%s24405_s28 + $0x1e4] ss:$16 sps:$4 sm:$0xff]   ;;  %v21684_v1 = vld [vmem:[%s24405_s28 + $0x1ec] ss:$16 sps:$4 sm:$0xff]  }
  0xc6   : > { %11926 = vmatpush1.bf16.msra.mxu0 %v21626_v23  ;;  %14638 = vmatpush1.bf16.msra.mxu1 %v21627_v24  ;;  %v21686_v2 = vld [vmem:[%s24405_s28 + $0x1e0] ss:$16 sps:$4 sm:$0xff]   ;;  %v21687_v3 = vld [vmem:[%s24405_s28 + $0x1e8] ss:$16 sps:$4 sm:$0xff]   ;;  %v21690_v4 = vld [vmem:[%s24405_s28 + $0x204] ss:$16 sps:$4 sm:$0xff]  }
  0xc7   : > { %11927 = vmatprep.subr.bf16.mxu0 %v21628_v25  ;;  %14639 = vmatprep.subr.bf16.mxu1 %v21630_v26  ;;  %v21693_v5 = vld [vmem:[%s24405_s28 + $0x20c] ss:$16 sps:$4 sm:$0xff]   ;;  %v21688_v6 = vld [vmem:[%s24405_s28 + $0x200] ss:$16 sps:$4 sm:$0xff]   ;;  %v21691_v7 = vld [vmem:[%s24405_s28 + $0x208] ss:$16 sps:$4 sm:$0xff]  }
  0xc8   : > { %v443_v9 = vld [vmem:[%s24536_s30 + $0x180] sm:$0xff]  ;;  %v21699_v12 = vld [vmem:[%s24405_s28 + $0x22c] ss:$16 sps:$4 sm:$0xff]   ;;  %v21697_v15 = vld [vmem:[%s24405_s28 + $0x228] ss:$16 sps:$4 sm:$0xff]  }
  0xc9   : > { %v467_v10 = vld [vmem:[%s24536_s30 + $0x240] sm:$0xff]  ;;  %v21705_v17 = vld [vmem:[%s24405_s28 + $0x24c] ss:$16 sps:$4 sm:$0xff]   ;;  %v21703_v22 = vld [vmem:[%s24405_s28 + $0x248] ss:$16 sps:$4 sm:$0xff]  }
  0xca   : > { %11928 = vmatpush1.bf16.msra.mxu0 %v21632_v27  ;;  %14640 = vmatpush1.bf16.msra.mxu1 %v21633_v28  ;;  %v21696_v11 = vld [vmem:[%s24405_s28 + $0x224] ss:$16 sps:$4 sm:$0xff]   ;;  %v18046_v13 = vcombine.high %v443_v9, %v467_v10  ;;  %v21694_v14 = vld [vmem:[%s24405_s28 + $0x220] ss:$16 sps:$4 sm:$0xff]   ;;  %v18045_v19 = vcombine.low %v443_v9, %v467_v10  ;;  %v21711_v24 = vld [vmem:[%s24405_s28 + $0x26c] ss:$16 sps:$4 sm:$0xff]  }
  0xcb   : > { %11929 = vmatprep.subr.bf16.mxu0 %v21634_v29  ;;  %14641 = vmatprep.subr.bf16.mxu1 %v21636_v30  ;;  %v21702_v16 = vld [vmem:[%s24405_s28 + $0x244] ss:$16 sps:$4 sm:$0xff]   ;;  %v21700_v21 = vld [vmem:[%s24405_s28 + $0x240] ss:$16 sps:$4 sm:$0xff]   ;;  %v21709_v27 = vld [vmem:[%s24405_s28 + $0x268] ss:$16 sps:$4 sm:$0xff]  }
  0xcc   : > { %v491_v18 = vld [vmem:[%s24536_s30 + $0x300] sm:$0xff]  ;;  %v21717_v29 = vld [vmem:[%s24405_s28 + $0x28c] ss:$16 sps:$4 sm:$0xff]   ;;  %v21733_v51 = vld [vmem:[%s24405_s28 + $0x2e8] ss:$16 sps:$4 sm:$0xff]  }
  0xcd   : > { %v515_v20 = vld [vmem:[%s24536_s30 + $0x3c0] sm:$0xff]  ;;  %v21735_v48 = vld [vmem:[%s24405_s28 + $0x2ec] ss:$16 sps:$4 sm:$0xff]  }
  0xce   : > { %11930 = vmatpush1.bf16.msra.mxu0 %v21638_v31  ;;  %14642 = vmatpush1.bf16.msra.mxu1 %v21639_v32  ;;  %v21708_v23 = vld [vmem:[%s24405_s28 + $0x264] ss:$16 sps:$4 sm:$0xff]   ;;  %v18094_v25 = vcombine.high %v491_v18, %v515_v20  ;;  %v21706_v26 = vld [vmem:[%s24405_s28 + $0x260] ss:$16 sps:$4 sm:$0xff]   ;;  %v18093_v31 = vcombine.low %v491_v18, %v515_v20  ;;  %v21771_v20 = vld [vmem:[%s24405_s28 + $0x3ac] ss:$16 sps:$4 sm:$0xff]  }
  0xcf   : > { %11931 = vmatprep.subr.bf16.mxu0 %v21640_v33  ;;  %14643 = vmatprep.subr.bf16.mxu1 %v21642_v34  ;;  %v21714_v28 = vld [vmem:[%s24405_s28 + $0x284] ss:$16 sps:$4 sm:$0xff]   ;;  %v21712_v33 = vld [vmem:[%s24405_s28 + $0x280] ss:$16 sps:$4 sm:$0xff]   ;;  %v21715_v34 = vld [vmem:[%s24405_s28 + $0x288] ss:$16 sps:$4 sm:$0xff]  }
  0xd0   : > { %v539_v30 = vld [vmem:[%s24536_s30 + $0x480] sm:$0xff] }
  0xd1   : > { %v563_v32 = vld [vmem:[%s24536_s30 + $0x540] sm:$0xff] }
  0xd2   : > { %11932 = vmatpush1.bf16.msra.mxu0 %v21644_v35  ;;  %14644 = vmatpush1.bf16.msra.mxu1 %v21645_v36  ;;  %v21720_v35 = vld [vmem:[%s24405_s28 + $0x2a4] ss:$16 sps:$4 sm:$0xff]   ;;  %v21723_v36 = vld [vmem:[%s24405_s28 + $0x2ac] ss:$16 sps:$4 sm:$0xff]   ;;  %v21754_v10 = vld [vmem:[%s24405_s28 + $0x360] ss:$16 sps:$4 sm:$0xff]  }
  0xd3   : > { %11933 = vmatprep.subr.bf16.mxu0 %v21646_v37  ;;  %14645 = vmatprep.subr.bf16.mxu1 %v21648_v38  ;;  %v18142_v37 = vcombine.high %v539_v30, %v563_v32  ;;  %v21718_v38 = vld [vmem:[%s24405_s28 + $0x2a0] ss:$16 sps:$4 sm:$0xff]   ;;  %v21732_v47 = vld [vmem:[%s24405_s28 + $0x2e4] ss:$16 sps:$4 sm:$0xff]  }
  0xd4   : > { %v755_v18 = vld [vmem:[%s24536_s30 + $0xb40] sm:$0xff] }
  0xd6   : > { %11934 = vmatpush1.bf16.msra.mxu0 %v21650_v39  ;;  %14646 = vmatpush1.bf16.msra.mxu1 %v21651_v40  ;;  %v21721_v39 = vld [vmem:[%s24405_s28 + $0x2a8] ss:$16 sps:$4 sm:$0xff]   ;;  %v21726_v40 = vld [vmem:[%s24405_s28 + $0x2c4] ss:$16 sps:$4 sm:$0xff]  }
  0xd7   : > { %11935 = vmatprep.subr.bf16.mxu0 %v21652_v41  ;;  %14647 = vmatprep.subr.bf16.mxu1 %v21654_v42  ;;  %v21729_v41 = vld [vmem:[%s24405_s28 + $0x2cc] ss:$16 sps:$4 sm:$0xff]   ;;  %v21724_v42 = vld [vmem:[%s24405_s28 + $0x2c0] ss:$16 sps:$4 sm:$0xff]  }
  0xda   : > { %11936 = vmatpush1.bf16.msra.mxu0 %v21656_v43  ;;  %14648 = vmatpush1.bf16.msra.mxu1 %v21657_v44  ;;  %v21727_v43 = vld [vmem:[%s24405_s28 + $0x2c8] ss:$16 sps:$4 sm:$0xff]   ;;  %v18141_v44 = vcombine.low %v539_v30, %v563_v32  ;;  %v21783_v32 = vld [vmem:[%s24405_s28 + $0x3ec] ss:$16 sps:$4 sm:$0xff]  }
  0xdb   : > { %11937 = vmatprep.subr.bf16.mxu0 %v21658_v45  ;;  %14649 = vmatprep.subr.bf16.mxu1 %v21660_v46  ;;  %v587_v45 = vld [vmem:[%s24536_s30 + $0x600] sm:$0xff]  ;;  %v21775_v30 = vld [vmem:[%s24405_s28 + $0x3c8] ss:$16 sps:$4 sm:$0xff]  }
  0xdc   : > { %v611_v46 = vld [vmem:[%s24536_s30 + $0x6c0] sm:$0xff] }
  0xde   : > { %11938 = vmatpush1.bf16.msra.mxu0 %v21662_v49  ;;  %14650 = vmatpush1.bf16.msra.mxu1 %v21663_v50  ;;  %v18190_v49 = vcombine.high %v587_v45, %v611_v46  ;;  %v21730_v50 = vld [vmem:[%s24405_s28 + $0x2e0] ss:$16 sps:$4 sm:$0xff]  }
  0xdf   : > { %11939 = vmatprep.subr.bf16.mxu0 %v21664_v52  ;;  %14651 = vmatprep.subr.bf16.mxu1 %v21666_v53  ;;  %v21738_v52 = vld [vmem:[%s24405_s28 + $0x304] ss:$16 sps:$4 sm:$0xff]   ;;  %v21741_v53 = vld [vmem:[%s24405_s28 + $0x30c] ss:$16 sps:$4 sm:$0xff]  }
  0xe2   : > { %11940 = vmatpush1.bf16.msra.mxu0 %v21668_v54  ;;  %14652 = vmatpush1.bf16.msra.mxu1 %v21669_v55  ;;  %v635_v54 = vld [vmem:[%s24536_s30 + $0x780] sm:$0xff]  ;;  %v18189_v55 = vcombine.low %v587_v45, %v611_v46 }
  0xe3   : > { %11941 = vmatprep.subr.bf16.mxu0 %v21670_v56  ;;  %14653 = vmatprep.subr.bf16.mxu1 %v21672_v57  ;;  %v659_v56 = vld [vmem:[%s24536_s30 + $0x840] sm:$0xff] }
  0xe4   : > { %v21736_v57 = vld [vmem:[%s24405_s28 + $0x300] ss:$16 sps:$4 sm:$0xff]  }
  0xe5   : > { %v21790_v46 = vld [vmem:[%s24405_s28 + $0x420] ss:$16 sps:$4 sm:$0xff]  }
  0xe6   : > { %11942 = vmatpush1.bf16.msra.mxu0 %v21674_v58  ;;  %14654 = vmatpush1.bf16.msra.mxu1 %v21675_v59  ;;  %v21739_v58 = vld [vmem:[%s24405_s28 + $0x308] ss:$16 sps:$4 sm:$0xff]   ;;  %v21744_v59 = vld [vmem:[%s24405_s28 + $0x324] ss:$16 sps:$4 sm:$0xff]  }
  0xe7   : > { %11943 = vmatprep.subr.bf16.mxu0 %v21676_v60  ;;  %14655 = vmatprep.subr.bf16.mxu1 %v21678_v61  ;;  %v21747_v60 = vld [vmem:[%s24405_s28 + $0x32c] ss:$16 sps:$4 sm:$0xff]   ;;  %v18238_v61 = vcombine.high %v635_v54, %v659_v56 }
  0xea   : > { %11944 = vmatpush1.bf16.msra.mxu0 %v21680_v62  ;;  %14656 = vmatpush1.bf16.msra.mxu1 %v21681_v63  ;;  %v21742_v62 = vld [vmem:[%s24405_s28 + $0x320] ss:$16 sps:$4 sm:$0xff]   ;;  %v21745_v63 = vld [vmem:[%s24405_s28 + $0x328] ss:$16 sps:$4 sm:$0xff]  }
  0xeb   : > { %11945 = vmatprep.subr.bf16.mxu0 %v21682_v0  ;;  %14657 = vmatprep.subr.bf16.mxu1 %v21684_v1  ;;  %v21750_v0 = vld [vmem:[%s24405_s28 + $0x344] ss:$16 sps:$4 sm:$0xff]   ;;  %v21753_v1 = vld [vmem:[%s24405_s28 + $0x34c] ss:$16 sps:$4 sm:$0xff]  }
  0xee   : > { %11946 = vmatpush1.bf16.msra.mxu0 %v21686_v2  ;;  %14658 = vmatpush1.bf16.msra.mxu1 %v21687_v3  ;;  %v683_v2 = vld [vmem:[%s24536_s30 + $0x900] sm:$0xff]  ;;  %v18237_v3 = vcombine.low %v635_v54, %v659_v56  ;;  %v516_v54 = vld [vmem:[%s24536_s30 + $0x3c8] sm:$0xff] }
  0xef   : > { %12028 = vmatprep.subr.bf16.mxu0 %v21690_v4  ;;  %14740 = vmatprep.subr.bf16.mxu1 %v21693_v5  ;;  %v707_v4 = vld [vmem:[%s24536_s30 + $0x9c0] sm:$0xff]  ;;  %v21807_v56 = vld [vmem:[%s24405_s28 + $0x46c] ss:$16 sps:$4 sm:$0xff]  }
  0xf0   : > { %v21748_v5 = vld [vmem:[%s24405_s28 + $0x340] ss:$16 sps:$4 sm:$0xff]   ;;  %v18286_v9 = vcombine.high %v683_v2, %v707_v4 }
  0xf1   : > { %11948 = vmatmul.mubr.bf16.vlgmr.msra.gmra.mrb[0].mxu0 %v17997_v8  ;;  %14660 = vmatmul.mubr.bf16.vlgmr.msra.gmra.mrb[0].mxu1 %v17997_v8  ;;  %v21759_v8 = vld [vmem:[%s24405_s28 + $0x36c] ss:$16 sps:$4 sm:$0xff]  }
  0xf2   : > { %12029 = vmatpush1.bf16.msra.mxu0 %v21688_v6  ;;  %14741 = vmatpush1.bf16.msra.mxu1 %v21691_v7  ;;  %v21751_v6 = vld [vmem:[%s24405_s28 + $0x348] ss:$16 sps:$4 sm:$0xff]   ;;  %v21756_v7 = vld [vmem:[%s24405_s28 + $0x364] ss:$16 sps:$4 sm:$0xff]  }
  0xf3   : > { %12030 = vmatprep.subr.bf16.mxu0 %v21696_v11  ;;  %14742 = vmatprep.subr.bf16.mxu1 %v21699_v12  ;;  %v21757_v11 = vld [vmem:[%s24405_s28 + $0x368] ss:$16 sps:$4 sm:$0xff]   ;;  %v21762_v12 = vld [vmem:[%s24405_s28 + $0x384] ss:$16 sps:$4 sm:$0xff]  }
  0xf4   : > { %11957 = vmatprep.mubr.bf16.mxu0 %v18046_v13  ;;  %14669 = vmatprep.mubr.bf16.mxu1 %v18046_v13  ;;  %v21765_v13 = vld [vmem:[%s24405_s28 + $0x38c] ss:$16 sps:$4 sm:$0xff]  }
  0xf6   : > { %12031 = vmatpush1.bf16.msra.mxu0 %v21694_v14  ;;  %14743 = vmatpush1.bf16.msra.mxu1 %v21697_v15  ;;  %v21760_v14 = vld [vmem:[%s24405_s28 + $0x380] ss:$16 sps:$4 sm:$0xff]   ;;  %v21763_v15 = vld [vmem:[%s24405_s28 + $0x388] ss:$16 sps:$4 sm:$0xff]  }
  0xf7   : > { %12032 = vmatprep.subr.bf16.mxu0 %v21702_v16  ;;  %14744 = vmatprep.subr.bf16.mxu1 %v21705_v17  ;;  %v18285_v16 = vcombine.low %v683_v2, %v707_v4  ;;  %v731_v17 = vld [vmem:[%s24536_s30 + $0xa80] sm:$0xff]  ;;  %v21811_v2 = vld [vmem:[%s24405_s28 + $0x488] ss:$16 sps:$4 sm:$0xff]   ;;  %v21819_v4 = vld [vmem:[%s24405_s28 + $0x4ac] ss:$16 sps:$4 sm:$0xff]  }
  0xf9   : > { %11958 = vmatmul.mubr.bf16.gmra.mrb[4].mxu0 %v18045_v19  ;;  %14670 = vmatmul.mubr.bf16.gmra.mrb[4].mxu1 %v18045_v19  ;;  %v21768_v19 = vld [vmem:[%s24405_s28 + $0x3a4] ss:$16 sps:$4 sm:$0xff]  }
  0xfa   : > { %12033 = vmatpush1.bf16.msra.mxu0 %v21700_v21  ;;  %14745 = vmatpush1.bf16.msra.mxu1 %v21703_v22  ;;  %v18334_v21 = vcombine.high %v731_v17, %v755_v18  ;;  %v21766_v22 = vld [vmem:[%s24405_s28 + $0x3a0] ss:$16 sps:$4 sm:$0xff]  }
  0xfb   : > { %12034 = vmatprep.subr.bf16.mxu0 %v21708_v23  ;;  %14746 = vmatprep.subr.bf16.mxu1 %v21711_v24  ;;  %v21769_v23 = vld [vmem:[%s24405_s28 + $0x3a8] ss:$16 sps:$4 sm:$0xff]   ;;  %v21774_v24 = vld [vmem:[%s24405_s28 + $0x3c4] ss:$16 sps:$4 sm:$0xff]  }
  0xfc   : > { %11967 = vmatprep.mubr.bf16.mxu0 %v18094_v25  ;;  %14679 = vmatprep.mubr.bf16.mxu1 %v18094_v25  ;;  %v21777_v25 = vld [vmem:[%s24405_s28 + $0x3cc] ss:$16 sps:$4 sm:$0xff]  }
  0xfe   : > { %12035 = vmatpush1.bf16.msra.mxu0 %v21706_v26  ;;  %14747 = vmatpush1.bf16.msra.mxu1 %v21709_v27  ;;  %v396_v26 = vld [vmem:[%s24536_s30 + $0x8] sm:$0xff]  ;;  %v18333_v27 = vcombine.low %v731_v17, %v755_v18  ;;  %v21826_v18 = vld [vmem:[%s24405_s28 + $0x4e0] ss:$16 sps:$4 sm:$0xff]  }
  0xff   : > { %12036 = vmatprep.subr.bf16.mxu0 %v21714_v28  ;;  %14748 = vmatprep.subr.bf16.mxu1 %v21717_v29  ;;  %v420_v28 = vld [vmem:[%s24536_s30 + $0xc8] sm:$0xff]  ;;  %v21772_v29 = vld [vmem:[%s24405_s28 + $0x3c0] ss:$16 sps:$4 sm:$0xff]  }
 0x101   : > { %11968 = vmatmul.mubr.bf16.gmra.mrb[8].mxu0 %v18093_v31  ;;  %14680 = vmatmul.mubr.bf16.gmra.mrb[8].mxu1 %v18093_v31  ;;  %v21780_v31 = vld [vmem:[%s24405_s28 + $0x3e4] ss:$16 sps:$4 sm:$0xff]  }
 0x102   : > { %12037 = vmatpush1.bf16.msra.mxu0 %v21712_v33  ;;  %14749 = vmatpush1.bf16.msra.mxu1 %v21715_v34  ;;  %v18000_v33 = vcombine.high %v396_v26, %v420_v28  ;;  %v21778_v34 = vld [vmem:[%s24405_s28 + $0x3e0] ss:$16 sps:$4 sm:$0xff]  }
 0x103   : > { %12038 = vmatprep.subr.bf16.mxu0 %v21720_v35  ;;  %14750 = vmatprep.subr.bf16.mxu1 %v21723_v36  ;;  %v21781_v35 = vld [vmem:[%s24405_s28 + $0x3e8] ss:$16 sps:$4 sm:$0xff]   ;;  %v21786_v36 = vld [vmem:[%s24405_s28 + $0x404] ss:$16 sps:$4 sm:$0xff]  }
 0x104   : > { %11977 = vmatprep.mubr.bf16.mxu0 %v18142_v37  ;;  %14689 = vmatprep.mubr.bf16.mxu1 %v18142_v37  ;;  %v21789_v37 = vld [vmem:[%s24405_s28 + $0x40c] ss:$16 sps:$4 sm:$0xff]  }
 0x106   : > { %12039 = vmatpush1.bf16.msra.mxu0 %v21718_v38  ;;  %14751 = vmatpush1.bf16.msra.mxu1 %v21721_v39  ;;  %v444_v38 = vld [vmem:[%s24536_s30 + $0x188] sm:$0xff]  ;;  %v17999_v39 = vcombine.low %v396_v26, %v420_v28 }
 0x107   : > { %12040 = vmatprep.subr.bf16.mxu0 %v21726_v40  ;;  %14752 = vmatprep.subr.bf16.mxu1 %v21729_v41  ;;  %v468_v40 = vld [vmem:[%s24536_s30 + $0x248] sm:$0xff]  ;;  %v21784_v41 = vld [vmem:[%s24405_s28 + $0x400] ss:$16 sps:$4 sm:$0xff]  }
 0x108   : > { %v18048_v45 = vcombine.high %v444_v38, %v468_v40  ;;  %v660_v26 = vld [vmem:[%s24536_s30 + $0x848] sm:$0xff] }
 0x109   : > { %11978 = vmatmul.mubr.bf16.gmra.mrb[12].mxu0 %v18141_v44  ;;  %14690 = vmatmul.mubr.bf16.gmra.mrb[12].mxu1 %v18141_v44  ;;  %v21795_v44 = vld [vmem:[%s24405_s28 + $0x42c] ss:$16 sps:$4 sm:$0xff]  }
 0x10a   : > { %12041 = vmatpush1.bf16.msra.mxu0 %v21724_v42  ;;  %14753 = vmatpush1.bf16.msra.mxu1 %v21727_v43  ;;  %v21787_v42 = vld [vmem:[%s24405_s28 + $0x408] ss:$16 sps:$4 sm:$0xff]   ;;  %v21792_v43 = vld [vmem:[%s24405_s28 + $0x424] ss:$16 sps:$4 sm:$0xff]   ;;  %v21843_v28 = vld [vmem:[%s24405_s28 + $0x52c] ss:$16 sps:$4 sm:$0xff]  }
 0x10b   : > { %12042 = vmatprep.subr.bf16.mxu0 %v21732_v47  ;;  %14754 = vmatprep.subr.bf16.mxu1 %v21735_v48  ;;  %v21793_v47 = vld [vmem:[%s24405_s28 + $0x428] ss:$16 sps:$4 sm:$0xff]   ;;  %v21798_v48 = vld [vmem:[%s24405_s28 + $0x444] ss:$16 sps:$4 sm:$0xff]  }
 0x10c   : > { %11987 = vmatprep.mubr.bf16.mxu0 %v18190_v49  ;;  %14699 = vmatprep.mubr.bf16.mxu1 %v18190_v49  ;;  %v21801_v49 = vld [vmem:[%s24405_s28 + $0x44c] ss:$16 sps:$4 sm:$0xff]  }
 0x10e   : > { %12043 = vmatpush1.bf16.msra.mxu0 %v21730_v50  ;;  %14755 = vmatpush1.bf16.msra.mxu1 %v21733_v51  ;;  %v21796_v50 = vld [vmem:[%s24405_s28 + $0x440] ss:$16 sps:$4 sm:$0xff]   ;;  %v21799_v51 = vld [vmem:[%s24405_s28 + $0x448] ss:$16 sps:$4 sm:$0xff]  }
 0x10f   : > { %12044 = vmatprep.subr.bf16.mxu0 %v21738_v52  ;;  %14756 = vmatprep.subr.bf16.mxu1 %v21741_v53  ;;  %v18047_v52 = vcombine.low %v444_v38, %v468_v40  ;;  %v492_v53 = vld [vmem:[%s24536_s30 + $0x308] sm:$0xff] }
 0x110   : > { %v21847_v38 = vld [vmem:[%s24405_s28 + $0x548] ss:$16 sps:$4 sm:$0xff]   ;;  %v21855_v40 = vld [vmem:[%s24405_s28 + $0x56c] ss:$16 sps:$4 sm:$0xff]  }
 0x111   : > { %11988 = vmatmul.mubr.bf16.gmra.mrb[16].mxu0 %v18189_v55  ;;  %14700 = vmatmul.mubr.bf16.gmra.mrb[16].mxu1 %v18189_v55  ;;  %v21804_v55 = vld [vmem:[%s24405_s28 + $0x464] ss:$16 sps:$4 sm:$0xff]  }
 0x112   : > { %12045 = vmatpush1.bf16.msra.mxu0 %v21736_v57  ;;  %14757 = vmatpush1.bf16.msra.mxu1 %v21739_v58  ;;  %v18096_v57 = vcombine.high %v492_v53, %v516_v54  ;;  %v21802_v58 = vld [vmem:[%s24405_s28 + $0x460] ss:$16 sps:$4 sm:$0xff]  }
 0x113   : > { %12046 = vmatprep.subr.bf16.mxu0 %v21744_v59  ;;  %14758 = vmatprep.subr.bf16.mxu1 %v21747_v60  ;;  %v21805_v59 = vld [vmem:[%s24405_s28 + $0x468] ss:$16 sps:$4 sm:$0xff]   ;;  %v21810_v60 = vld [vmem:[%s24405_s28 + $0x484] ss:$16 sps:$4 sm:$0xff]  }
 0x114   : > { %11997 = vmatprep.mubr.bf16.mxu0 %v18238_v61  ;;  %14709 = vmatprep.mubr.bf16.mxu1 %v18238_v61  ;;  %v21813_v61 = vld [vmem:[%s24405_s28 + $0x48c] ss:$16 sps:$4 sm:$0xff]  }
 0x116   : > { %12047 = vmatpush1.bf16.msra.mxu0 %v21742_v62  ;;  %14759 = vmatpush1.bf16.msra.mxu1 %v21745_v63  ;;  %v540_v62 = vld [vmem:[%s24536_s30 + $0x488] sm:$0xff]  ;;  %v18095_v63 = vcombine.low %v492_v53, %v516_v54  ;;  %v21862_v54 = vld [vmem:[%s24405_s28 + $0x5a0] ss:$16 sps:$4 sm:$0xff]  }
 0x117   : > { %12048 = vmatprep.subr.bf16.mxu0 %v21750_v0  ;;  %14760 = vmatprep.subr.bf16.mxu1 %v21753_v1  ;;  %v564_v0 = vld [vmem:[%s24536_s30 + $0x548] sm:$0xff]  ;;  %v21808_v1 = vld [vmem:[%s24405_s28 + $0x480] ss:$16 sps:$4 sm:$0xff]  }
 0x119   : > { %11998 = vmatmul.mubr.bf16.gmra.mrb[20].mxu0 %v18237_v3  ;;  %14710 = vmatmul.mubr.bf16.gmra.mrb[20].mxu1 %v18237_v3  ;;  %v21816_v3 = vld [vmem:[%s24405_s28 + $0x4a4] ss:$16 sps:$4 sm:$0xff]  }
 0x11a   : > { %12049 = vmatpush1.bf16.msra.mxu0 %v21748_v5  ;;  %14761 = vmatpush1.bf16.msra.mxu1 %v21751_v6  ;;  %v18144_v5 = vcombine.high %v540_v62, %v564_v0  ;;  %v21814_v6 = vld [vmem:[%s24405_s28 + $0x4a0] ss:$16 sps:$4 sm:$0xff]  }
 0x11b   : > { %12050 = vmatprep.subr.bf16.mxu0 %v21756_v7  ;;  %14762 = vmatprep.subr.bf16.mxu1 %v21759_v8  ;;  %v21817_v7 = vld [vmem:[%s24405_s28 + $0x4a8] ss:$16 sps:$4 sm:$0xff]   ;;  %v21822_v8 = vld [vmem:[%s24405_s28 + $0x4c4] ss:$16 sps:$4 sm:$0xff]  }
 0x11c   : > { %12007 = vmatprep.mubr.bf16.mxu0 %v18286_v9  ;;  %14719 = vmatprep.mubr.bf16.mxu1 %v18286_v9  ;;  %v21825_v9 = vld [vmem:[%s24405_s28 + $0x4cc] ss:$16 sps:$4 sm:$0xff]  }
 0x11e   : > { %12051 = vmatpush1.bf16.msra.mxu0 %v21754_v10  ;;  %14763 = vmatpush1.bf16.msra.mxu1 %v21757_v11  ;;  %v588_v10 = vld [vmem:[%s24536_s30 + $0x608] sm:$0xff]  ;;  %v18143_v11 = vcombine.low %v540_v62, %v564_v0  ;;  %v421_v62 = vld [vmem:[%s24536_s30 + $0xd0] sm:$0xff] }
 0x11f   : > { %12052 = vmatprep.subr.bf16.mxu0 %v21762_v12  ;;  %14764 = vmatprep.subr.bf16.mxu1 %v21765_v13  ;;  %v612_v12 = vld [vmem:[%s24536_s30 + $0x6c8] sm:$0xff]  ;;  %v21820_v13 = vld [vmem:[%s24405_s28 + $0x4c0] ss:$16 sps:$4 sm:$0xff]  }
 0x120   : > { %v18192_v17 = vcombine.high %v588_v10, %v612_v12  ;;  %v21879_v0 = vld [vmem:[%s24405_s28 + $0x5ec] ss:$16 sps:$4 sm:$0xff]  }
 0x121   : > { %12008 = vmatmul.mubr.bf16.gmra.mrb[24].mxu0 %v18285_v16  ;;  %14720 = vmatmul.mubr.bf16.gmra.mrb[24].mxu1 %v18285_v16  ;;  %v21831_v16 = vld [vmem:[%s24405_s28 + $0x4ec] ss:$16 sps:$4 sm:$0xff]  }
 0x122   : > { %12053 = vmatpush1.bf16.msra.mxu0 %v21760_v14  ;;  %14765 = vmatpush1.bf16.msra.mxu1 %v21763_v15  ;;  %v21823_v14 = vld [vmem:[%s24405_s28 + $0x4c8] ss:$16 sps:$4 sm:$0xff]   ;;  %v21828_v15 = vld [vmem:[%s24405_s28 + $0x4e4] ss:$16 sps:$4 sm:$0xff]  }
 0x123   : > { %12054 = vmatprep.subr.bf16.mxu0 %v21768_v19  ;;  %14766 = vmatprep.subr.bf16.mxu1 %v21771_v20  ;;  %v21829_v19 = vld [vmem:[%s24405_s28 + $0x4e8] ss:$16 sps:$4 sm:$0xff]   ;;  %v21834_v20 = vld [vmem:[%s24405_s28 + $0x504] ss:$16 sps:$4 sm:$0xff]  }
 0x124   : > { %12017 = vmatprep.mubr.bf16.mxu0 %v18334_v21  ;;  %14729 = vmatprep.mubr.bf16.mxu1 %v18334_v21  ;;  %v21837_v21 = vld [vmem:[%s24405_s28 + $0x50c] ss:$16 sps:$4 sm:$0xff]  }
 0x126   : > { %12055 = vmatpush1.bf16.msra.mxu0 %v21766_v22  ;;  %14767 = vmatpush1.bf16.msra.mxu1 %v21769_v23  ;;  %v21832_v22 = vld [vmem:[%s24405_s28 + $0x500] ss:$16 sps:$4 sm:$0xff]   ;;  %v21835_v23 = vld [vmem:[%s24405_s28 + $0x508] ss:$16 sps:$4 sm:$0xff]  }
 0x127   : > { %12056 = vmatprep.subr.bf16.mxu0 %v21774_v24  ;;  %14768 = vmatprep.subr.bf16.mxu1 %v21777_v25  ;;  %v18191_v24 = vcombine.low %v588_v10, %v612_v12  ;;  %v636_v25 = vld [vmem:[%s24536_s30 + $0x788] sm:$0xff] }
 0x128   : > { %v21883_v10 = vld [vmem:[%s24405_s28 + $0x608] ss:$16 sps:$4 sm:$0xff]   ;;  %v21891_v12 = vld [vmem:[%s24405_s28 + $0x62c] ss:$16 sps:$4 sm:$0xff]  }
 0x129   : > { %12018 = vmatmul.mubr.bf16.gmra.mrb[28].mxu0 %v18333_v27  ;;  %14730 = vmatmul.mubr.bf16.gmra.mrb[28].mxu1 %v18333_v27  ;;  %v21840_v27 = vld [vmem:[%s24405_s28 + $0x524] ss:$16 sps:$4 sm:$0xff]  }
 0x12a   : > { %12057 = vmatpush1.bf16.msra.mxu0 %v21772_v29  ;;  %14769 = vmatpush1.bf16.msra.mxu1 %v21775_v30  ;;  %v18240_v29 = vcombine.high %v636_v25, %v660_v26  ;;  %v21838_v30 = vld [vmem:[%s24405_s28 + $0x520] ss:$16 sps:$4 sm:$0xff]  }
 0x12b   : > { %12058 = vmatprep.subr.bf16.mxu0 %v21780_v31  ;;  %14770 = vmatprep.subr.bf16.mxu1 %v21783_v32  ;;  %v21841_v31 = vld [vmem:[%s24405_s28 + $0x528] ss:$16 sps:$4 sm:$0xff]   ;;  %v21846_v32 = vld [vmem:[%s24405_s28 + $0x544] ss:$16 sps:$4 sm:$0xff]  }
 0x12c   : > { %12060 = vmatprep.mubr.bf16.mxu0 %v18000_v33  ;;  %14772 = vmatprep.mubr.bf16.mxu1 %v18000_v33  ;;  %v21849_v33 = vld [vmem:[%s24405_s28 + $0x54c] ss:$16 sps:$4 sm:$0xff]  }
 0x12e   : > { %12059 = vmatpush1.bf16.msra.mxu0 %v21778_v34  ;;  %14771 = vmatpush1.bf16.msra.mxu1 %v21781_v35  ;;  %v684_v34 = vld [vmem:[%s24536_s30 + $0x908] sm:$0xff]  ;;  %v18239_v35 = vcombine.low %v636_v25, %v660_v26  ;;  %v21898_v26 = vld [vmem:[%s24405_s28 + $0x660] ss:$16 sps:$4 sm:$0xff]  }
 0x12f   : > { %12141 = vmatprep.subr.bf16.mxu0 %v21786_v36  ;;  %14853 = vmatprep.subr.bf16.mxu1 %v21789_v37  ;;  %v708_v36 = vld [vmem:[%s24536_s30 + $0x9c8] sm:$0xff]  ;;  %v21844_v37 = vld [vmem:[%s24405_s28 + $0x540] ss:$16 sps:$4 sm:$0xff]  }
 0x131   : > { %12061 = vmatmul.mubr.bf16.vlgmr.msra.gmra.mrb[0].mxu0 %v17999_v39  ;;  %14773 = vmatmul.mubr.bf16.vlgmr.msra.gmra.mrb[0].mxu1 %v17999_v39  ;;  %v21852_v39 = vld [vmem:[%s24405_s28 + $0x564] ss:$16 sps:$4 sm:$0xff]  }
 0x132   : > { %12142 = vmatpush1.bf16.msra.mxu0 %v21784_v41  ;;  %14854 = vmatpush1.bf16.msra.mxu1 %v21787_v42  ;;  %v18288_v41 = vcombine.high %v684_v34, %v708_v36  ;;  %v21850_v42 = vld [vmem:[%s24405_s28 + $0x560] ss:$16 sps:$4 sm:$0xff]  }
 0x133   : > { %12143 = vmatprep.subr.bf16.mxu0 %v21792_v43  ;;  %14855 = vmatprep.subr.bf16.mxu1 %v21795_v44  ;;  %v21853_v43 = vld [vmem:[%s24405_s28 + $0x568] ss:$16 sps:$4 sm:$0xff]   ;;  %v21858_v44 = vld [vmem:[%s24405_s28 + $0x584] ss:$16 sps:$4 sm:$0xff]  }
 0x134   : > { %12070 = vmatprep.mubr.bf16.mxu0 %v18048_v45  ;;  %14782 = vmatprep.mubr.bf16.mxu1 %v18048_v45  ;;  %v21861_v45 = vld [vmem:[%s24405_s28 + $0x58c] ss:$16 sps:$4 sm:$0xff]  }
 0x136   : > { %12144 = vmatpush1.bf16.msra.mxu0 %v21790_v46  ;;  %14856 = vmatpush1.bf16.msra.mxu1 %v21793_v47  ;;  %v732_v46 = vld [vmem:[%s24536_s30 + $0xa88] sm:$0xff]  ;;  %v18287_v47 = vcombine.low %v684_v34, %v708_v36  ;;  %v565_v34 = vld [vmem:[%s24536_s30 + $0x550] sm:$0xff] }
 0x137   : > { %12145 = vmatprep.subr.bf16.mxu0 %v21798_v48  ;;  %14857 = vmatprep.subr.bf16.mxu1 %v21801_v49  ;;  %v756_v48 = vld [vmem:[%s24536_s30 + $0xb48] sm:$0xff]  ;;  %v21856_v49 = vld [vmem:[%s24405_s28 + $0x580] ss:$16 sps:$4 sm:$0xff]  }
 0x138   : > { %v18336_v53 = vcombine.high %v732_v46, %v756_v48  ;;  %v21915_v36 = vld [vmem:[%s24405_s28 + $0x6ac] ss:$16 sps:$4 sm:$0xff]  }
 0x139   : > { %12071 = vmatmul.mubr.bf16.gmra.mrb[4].mxu0 %v18047_v52  ;;  %14783 = vmatmul.mubr.bf16.gmra.mrb[4].mxu1 %v18047_v52  ;;  %v21867_v52 = vld [vmem:[%s24405_s28 + $0x5ac] ss:$16 sps:$4 sm:$0xff]  }
 0x13a   : > { %12146 = vmatpush1.bf16.msra.mxu0 %v21796_v50  ;;  %14858 = vmatpush1.bf16.msra.mxu1 %v21799_v51  ;;  %v21859_v50 = vld [vmem:[%s24405_s28 + $0x588] ss:$16 sps:$4 sm:$0xff]   ;;  %v21864_v51 = vld [vmem:[%s24405_s28 + $0x5a4] ss:$16 sps:$4 sm:$0xff]  }
 0x13b   : > { %12147 = vmatprep.subr.bf16.mxu0 %v21804_v55  ;;  %14859 = vmatprep.subr.bf16.mxu1 %v21807_v56  ;;  %v21865_v55 = vld [vmem:[%s24405_s28 + $0x5a8] ss:$16 sps:$4 sm:$0xff]   ;;  %v21870_v56 = vld [vmem:[%s24405_s28 + $0x5c4] ss:$16 sps:$4 sm:$0xff]  }
 0x13c   : > { %12080 = vmatprep.mubr.bf16.mxu0 %v18096_v57  ;;  %14792 = vmatprep.mubr.bf16.mxu1 %v18096_v57  ;;  %v21873_v57 = vld [vmem:[%s24405_s28 + $0x5cc] ss:$16 sps:$4 sm:$0xff]  }
 0x13e   : > { %12148 = vmatpush1.bf16.msra.mxu0 %v21802_v58  ;;  %14860 = vmatpush1.bf16.msra.mxu1 %v21805_v59  ;;  %v21868_v58 = vld [vmem:[%s24405_s28 + $0x5c0] ss:$16 sps:$4 sm:$0xff]   ;;  %v21871_v59 = vld [vmem:[%s24405_s28 + $0x5c8] ss:$16 sps:$4 sm:$0xff]  }
 0x13f   : > { %12149 = vmatprep.subr.bf16.mxu0 %v21810_v60  ;;  %14861 = vmatprep.subr.bf16.mxu1 %v21813_v61  ;;  %v18335_v60 = vcombine.low %v732_v46, %v756_v48  ;;  %v397_v61 = vld [vmem:[%s24536_s30 + $0x10] sm:$0xff]  ;;  %v21919_v46 = vld [vmem:[%s24405_s28 + $0x6c8] ss:$16 sps:$4 sm:$0xff]   ;;  %v21927_v48 = vld [vmem:[%s24405_s28 + $0x6ec] ss:$16 sps:$4 sm:$0xff]  }
 0x141   : > { %12081 = vmatmul.mubr.bf16.gmra.mrb[8].mxu0 %v18095_v63  ;;  %14793 = vmatmul.mubr.bf16.gmra.mrb[8].mxu1 %v18095_v63  ;;  %v21876_v63 = vld [vmem:[%s24405_s28 + $0x5e4] ss:$16 sps:$4 sm:$0xff]  }
 0x142   : > { %12150 = vmatpush1.bf16.msra.mxu0 %v21808_v1  ;;  %14862 = vmatpush1.bf16.msra.mxu1 %v21811_v2  ;;  %v18002_v1 = vcombine.high %v397_v61, %v421_v62  ;;  %v21874_v2 = vld [vmem:[%s24405_s28 + $0x5e0] ss:$16 sps:$4 sm:$0xff]  }
 0x143   : > { %12151 = vmatprep.subr.bf16.mxu0 %v21816_v3  ;;  %14863 = vmatprep.subr.bf16.mxu1 %v21819_v4  ;;  %v21877_v3 = vld [vmem:[%s24405_s28 + $0x5e8] ss:$16 sps:$4 sm:$0xff]   ;;  %v21882_v4 = vld [vmem:[%s24405_s28 + $0x604] ss:$16 sps:$4 sm:$0xff]  }
 0x144   : > { %12090 = vmatprep.mubr.bf16.mxu0 %v18144_v5  ;;  %14802 = vmatprep.mubr.bf16.mxu1 %v18144_v5  ;;  %v21885_v5 = vld [vmem:[%s24405_s28 + $0x60c] ss:$16 sps:$4 sm:$0xff]  }
 0x146   : > { %12152 = vmatpush1.bf16.msra.mxu0 %v21814_v6  ;;  %14864 = vmatpush1.bf16.msra.mxu1 %v21817_v7  ;;  %v445_v6 = vld [vmem:[%s24536_s30 + $0x190] sm:$0xff]  ;;  %v18001_v7 = vcombine.low %v397_v61, %v421_v62 }
 0x147   : > { %12153 = vmatprep.subr.bf16.mxu0 %v21822_v8  ;;  %14865 = vmatprep.subr.bf16.mxu1 %v21825_v9  ;;  %v469_v8 = vld [vmem:[%s24536_s30 + $0x250] sm:$0xff] }
 0x148   : > { %v21880_v9 = vld [vmem:[%s24405_s28 + $0x600] ss:$16 sps:$4 sm:$0xff]  }
 0x149   : > { %12091 = vmatmul.mubr.bf16.gmra.mrb[12].mxu0 %v18143_v11  ;;  %14803 = vmatmul.mubr.bf16.gmra.mrb[12].mxu1 %v18143_v11  ;;  %v21888_v11 = vld [vmem:[%s24405_s28 + $0x624] ss:$16 sps:$4 sm:$0xff]   ;;  %v21934_v62 = vld [vmem:[%s24405_s28 + $0x720] ss:$16 sps:$4 sm:$0xff]  }
 0x14a   : > { %12154 = vmatpush1.bf16.msra.mxu0 %v21820_v13  ;;  %14866 = vmatpush1.bf16.msra.mxu1 %v21823_v14  ;;  %v18050_v13 = vcombine.high %v445_v6, %v469_v8  ;;  %v21886_v14 = vld [vmem:[%s24405_s28 + $0x620] ss:$16 sps:$4 sm:$0xff]  }
 0x14b   : > { %12155 = vmatprep.subr.bf16.mxu0 %v21828_v15  ;;  %14867 = vmatprep.subr.bf16.mxu1 %v21831_v16  ;;  %v21889_v15 = vld [vmem:[%s24405_s28 + $0x628] ss:$16 sps:$4 sm:$0xff]   ;;  %v21894_v16 = vld [vmem:[%s24405_s28 + $0x644] ss:$16 sps:$4 sm:$0xff]  }
 0x14c   : > { %12100 = vmatprep.mubr.bf16.mxu0 %v18192_v17  ;;  %14812 = vmatprep.mubr.bf16.mxu1 %v18192_v17  ;;  %v21897_v17 = vld [vmem:[%s24405_s28 + $0x64c] ss:$16 sps:$4 sm:$0xff]  }
 0x14e   : > { %12156 = vmatpush1.bf16.msra.mxu0 %v21826_v18  ;;  %14868 = vmatpush1.bf16.msra.mxu1 %v21829_v19  ;;  %v493_v18 = vld [vmem:[%s24536_s30 + $0x310] sm:$0xff]  ;;  %v18049_v19 = vcombine.low %v445_v6, %v469_v8  ;;  %v21951_v8 = vld [vmem:[%s24405_s28 + $0x76c] ss:$16 sps:$4 sm:$0xff]  }
 0x14f   : > { %12157 = vmatprep.subr.bf16.mxu0 %v21834_v20  ;;  %14869 = vmatprep.subr.bf16.mxu1 %v21837_v21  ;;  %v517_v20 = vld [vmem:[%s24536_s30 + $0x3d0] sm:$0xff] }
 0x150   : > { %v21892_v21 = vld [vmem:[%s24405_s28 + $0x640] ss:$16 sps:$4 sm:$0xff]   ;;  %v18098_v25 = vcombine.high %v493_v18, %v517_v20 }
 0x151   : > { %12101 = vmatmul.mubr.bf16.gmra.mrb[16].mxu0 %v18191_v24  ;;  %14813 = vmatmul.mubr.bf16.gmra.mrb[16].mxu1 %v18191_v24  ;;  %v21903_v24 = vld [vmem:[%s24405_s28 + $0x66c] ss:$16 sps:$4 sm:$0xff]   ;;  %v709_v6 = vld [vmem:[%s24536_s30 + $0x9d0] sm:$0xff] }
 0x152   : > { %12158 = vmatpush1.bf16.msra.mxu0 %v21832_v22  ;;  %14870 = vmatpush1.bf16.msra.mxu1 %v21835_v23  ;;  %v21895_v22 = vld [vmem:[%s24405_s28 + $0x648] ss:$16 sps:$4 sm:$0xff]   ;;  %v21900_v23 = vld [vmem:[%s24405_s28 + $0x664] ss:$16 sps:$4 sm:$0xff]  }
 0x153   : > { %12159 = vmatprep.subr.bf16.mxu0 %v21840_v27  ;;  %14871 = vmatprep.subr.bf16.mxu1 %v21843_v28  ;;  %v21901_v27 = vld [vmem:[%s24405_s28 + $0x668] ss:$16 sps:$4 sm:$0xff]   ;;  %v21906_v28 = vld [vmem:[%s24405_s28 + $0x684] ss:$16 sps:$4 sm:$0xff]  }
 0x154   : > { %12110 = vmatprep.mubr.bf16.mxu0 %v18240_v29  ;;  %14822 = vmatprep.mubr.bf16.mxu1 %v18240_v29  ;;  %v21909_v29 = vld [vmem:[%s24405_s28 + $0x68c] ss:$16 sps:$4 sm:$0xff]  }
 0x156   : > { %12160 = vmatpush1.bf16.msra.mxu0 %v21838_v30  ;;  %14872 = vmatpush1.bf16.msra.mxu1 %v21841_v31  ;;  %v21904_v30 = vld [vmem:[%s24405_s28 + $0x680] ss:$16 sps:$4 sm:$0xff]   ;;  %v21907_v31 = vld [vmem:[%s24405_s28 + $0x688] ss:$16 sps:$4 sm:$0xff]  }
 0x157   : > { %12161 = vmatprep.subr.bf16.mxu0 %v21846_v32  ;;  %14873 = vmatprep.subr.bf16.mxu1 %v21849_v33  ;;  %v18097_v32 = vcombine.low %v493_v18, %v517_v20  ;;  %v541_v33 = vld [vmem:[%s24536_s30 + $0x490] sm:$0xff]  ;;  %v21955_v18 = vld [vmem:[%s24405_s28 + $0x788] ss:$16 sps:$4 sm:$0xff]   ;;  %v21963_v20 = vld [vmem:[%s24405_s28 + $0x7ac] ss:$16 sps:$4 sm:$0xff]  }
 0x159   : > { %12111 = vmatmul.mubr.bf16.gmra.mrb[20].mxu0 %v18239_v35  ;;  %14823 = vmatmul.mubr.bf16.gmra.mrb[20].mxu1 %v18239_v35  ;;  %v21912_v35 = vld [vmem:[%s24405_s28 + $0x6a4] ss:$16 sps:$4 sm:$0xff]  }
 0x15a   : > { %12162 = vmatpush1.bf16.msra.mxu0 %v21844_v37  ;;  %14874 = vmatpush1.bf16.msra.mxu1 %v21847_v38  ;;  %v18146_v37 = vcombine.high %v541_v33, %v565_v34  ;;  %v21910_v38 = vld [vmem:[%s24405_s28 + $0x6a0] ss:$16 sps:$4 sm:$0xff]  }
 0x15b   : > { %12163 = vmatprep.subr.bf16.mxu0 %v21852_v39  ;;  %14875 = vmatprep.subr.bf16.mxu1 %v21855_v40  ;;  %v21913_v39 = vld [vmem:[%s24405_s28 + $0x6a8] ss:$16 sps:$4 sm:$0xff]   ;;  %v21918_v40 = vld [vmem:[%s24405_s28 + $0x6c4] ss:$16 sps:$4 sm:$0xff]  }
 0x15c   : > { %12120 = vmatprep.mubr.bf16.mxu0 %v18288_v41  ;;  %14832 = vmatprep.mubr.bf16.mxu1 %v18288_v41  ;;  %v21921_v41 = vld [vmem:[%s24405_s28 + $0x6cc] ss:$16 sps:$4 sm:$0xff]  }
 0x15e   : > { %12164 = vmatpush1.bf16.msra.mxu0 %v21850_v42  ;;  %14876 = vmatpush1.bf16.msra.mxu1 %v21853_v43  ;;  %v589_v42 = vld [vmem:[%s24536_s30 + $0x610] sm:$0xff]  ;;  %v18145_v43 = vcombine.low %v541_v33, %v565_v34 }
 0x15f   : > { %12165 = vmatprep.subr.bf16.mxu0 %v21858_v44  ;;  %14877 = vmatprep.subr.bf16.mxu1 %v21861_v45  ;;  %v613_v44 = vld [vmem:[%s24536_s30 + $0x6d0] sm:$0xff] }
 0x160   : > { %v21916_v45 = vld [vmem:[%s24405_s28 + $0x6c0] ss:$16 sps:$4 sm:$0xff]  }
 0x161   : > { %12121 = vmatmul.mubr.bf16.gmra.mrb[24].mxu0 %v18287_v47  ;;  %14833 = vmatmul.mubr.bf16.gmra.mrb[24].mxu1 %v18287_v47  ;;  %v21924_v47 = vld [vmem:[%s24405_s28 + $0x6e4] ss:$16 sps:$4 sm:$0xff]   ;;  %v21970_v34 = vld [vmem:[%s24405_s28 + $0x7e0] ss:$16 sps:$4 sm:$0xff]  }
 0x162   : > { %12166 = vmatpush1.bf16.msra.mxu0 %v21856_v49  ;;  %14878 = vmatpush1.bf16.msra.mxu1 %v21859_v50  ;;  %v18194_v49 = vcombine.high %v589_v42, %v613_v44  ;;  %v21922_v50 = vld [vmem:[%s24405_s28 + $0x6e0] ss:$16 sps:$4 sm:$0xff]  }
 0x163   : > { %12167 = vmatprep.subr.bf16.mxu0 %v21864_v51  ;;  %14879 = vmatprep.subr.bf16.mxu1 %v21867_v52  ;;  %v21925_v51 = vld [vmem:[%s24405_s28 + $0x6e8] ss:$16 sps:$4 sm:$0xff]   ;;  %v21930_v52 = vld [vmem:[%s24405_s28 + $0x704] ss:$16 sps:$4 sm:$0xff]  }
 0x164   : > { %12130 = vmatprep.mubr.bf16.mxu0 %v18336_v53  ;;  %14842 = vmatprep.mubr.bf16.mxu1 %v18336_v53  ;;  %v21933_v53 = vld [vmem:[%s24405_s28 + $0x70c] ss:$16 sps:$4 sm:$0xff]  }
 0x166   : > { %12168 = vmatpush1.bf16.msra.mxu0 %v21862_v54  ;;  %14880 = vmatpush1.bf16.msra.mxu1 %v21865_v55  ;;  %v637_v54 = vld [vmem:[%s24536_s30 + $0x790] sm:$0xff]  ;;  %v18193_v55 = vcombine.low %v589_v42, %v613_v44  ;;  %v470_v42 = vld [vmem:[%s24536_s30 + $0x258] sm:$0xff] }
 0x167   : > { %12169 = vmatprep.subr.bf16.mxu0 %v21870_v56  ;;  %14881 = vmatprep.subr.bf16.mxu1 %v21873_v57  ;;  %v661_v56 = vld [vmem:[%s24536_s30 + $0x850] sm:$0xff]  ;;  %v21987_v44 = vld [vmem:[%s24405_s28 + $0x82c] ss:$16 sps:$4 sm:$0xff]  }
 0x168   : > { %v21928_v57 = vld [vmem:[%s24405_s28 + $0x700] ss:$16 sps:$4 sm:$0xff]   ;;  %v18242_v61 = vcombine.high %v637_v54, %v661_v56 }
 0x169   : > { %12131 = vmatmul.mubr.bf16.gmra.mrb[28].mxu0 %v18335_v60  ;;  %14843 = vmatmul.mubr.bf16.gmra.mrb[28].mxu1 %v18335_v60  ;;  %v21939_v60 = vld [vmem:[%s24405_s28 + $0x72c] ss:$16 sps:$4 sm:$0xff]  }
 0x16a   : > { %12170 = vmatpush1.bf16.msra.mxu0 %v21868_v58  ;;  %14882 = vmatpush1.bf16.msra.mxu1 %v21871_v59  ;;  %v21931_v58 = vld [vmem:[%s24405_s28 + $0x708] ss:$16 sps:$4 sm:$0xff]   ;;  %v21936_v59 = vld [vmem:[%s24405_s28 + $0x724] ss:$16 sps:$4 sm:$0xff]  }
 0x16b   : > { %12171 = vmatprep.subr.bf16.mxu0 %v21876_v63  ;;  %14883 = vmatprep.subr.bf16.mxu1 %v21879_v0  ;;  %v21937_v63 = vld [vmem:[%s24405_s28 + $0x728] ss:$16 sps:$4 sm:$0xff]   ;;  %v21942_v0 = vld [vmem:[%s24405_s28 + $0x744] ss:$16 sps:$4 sm:$0xff]  }
 0x16c   : > { %12173 = vmatprep.mubr.bf16.mxu0 %v18002_v1  ;;  %14885 = vmatprep.mubr.bf16.mxu1 %v18002_v1  ;;  %v21945_v1 = vld [vmem:[%s24405_s28 + $0x74c] ss:$16 sps:$4 sm:$0xff]  }
 0x16e   : > { %12172 = vmatpush1.bf16.msra.mxu0 %v21874_v2  ;;  %14884 = vmatpush1.bf16.msra.mxu1 %v21877_v3  ;;  %v21940_v2 = vld [vmem:[%s24405_s28 + $0x740] ss:$16 sps:$4 sm:$0xff]   ;;  %v21943_v3 = vld [vmem:[%s24405_s28 + $0x748] ss:$16 sps:$4 sm:$0xff]  }
 0x16f   : > { %12254 = vmatprep.subr.bf16.mxu0 %v21882_v4  ;;  %14966 = vmatprep.subr.bf16.mxu1 %v21885_v5  ;;  %v18241_v4 = vcombine.low %v637_v54, %v661_v56  ;;  %v685_v5 = vld [vmem:[%s24536_s30 + $0x910] sm:$0xff]  ;;  %v21991_v54 = vld [vmem:[%s24405_s28 + $0x848] ss:$16 sps:$4 sm:$0xff]   ;;  %v21999_v56 = vld [vmem:[%s24405_s28 + $0x86c] ss:$16 sps:$4 sm:$0xff]  }
 0x171   : > { %12174 = vmatmul.mubr.bf16.vlgmr.msra.gmra.mrb[0].mxu0 %v18001_v7  ;;  %14886 = vmatmul.mubr.bf16.vlgmr.msra.gmra.mrb[0].mxu1 %v18001_v7  ;;  %v21948_v7 = vld [vmem:[%s24405_s28 + $0x764] ss:$16 sps:$4 sm:$0xff]  }
 0x172   : > { %12255 = vmatpush1.bf16.msra.mxu0 %v21880_v9  ;;  %14967 = vmatpush1.bf16.msra.mxu1 %v21883_v10  ;;  %v18290_v9 = vcombine.high %v685_v5, %v709_v6  ;;  %v21946_v10 = vld [vmem:[%s24405_s28 + $0x760] ss:$16 sps:$4 sm:$0xff]  }
 0x173   : > { %12256 = vmatprep.subr.bf16.mxu0 %v21888_v11  ;;  %14968 = vmatprep.subr.bf16.mxu1 %v21891_v12  ;;  %v21949_v11 = vld [vmem:[%s24405_s28 + $0x768] ss:$16 sps:$4 sm:$0xff]   ;;  %v21954_v12 = vld [vmem:[%s24405_s28 + $0x784] ss:$16 sps:$4 sm:$0xff]  }
 0x174   : > { %12183 = vmatprep.mubr.bf16.mxu0 %v18050_v13  ;;  %14895 = vmatprep.mubr.bf16.mxu1 %v18050_v13  ;;  %v21957_v13 = vld [vmem:[%s24405_s28 + $0x78c] ss:$16 sps:$4 sm:$0xff]  }
 0x176   : > { %12257 = vmatpush1.bf16.msra.mxu0 %v21886_v14  ;;  %14969 = vmatpush1.bf16.msra.mxu1 %v21889_v15  ;;  %v733_v14 = vld [vmem:[%s24536_s30 + $0xa90] sm:$0xff]  ;;  %v18289_v15 = vcombine.low %v685_v5, %v709_v6 }
 0x177   : > { %12258 = vmatprep.subr.bf16.mxu0 %v21894_v16  ;;  %14970 = vmatprep.subr.bf16.mxu1 %v21897_v17  ;;  %v757_v16 = vld [vmem:[%s24536_s30 + $0xb50] sm:$0xff] }
 0x178   : > { %v21952_v17 = vld [vmem:[%s24405_s28 + $0x780] ss:$16 sps:$4 sm:$0xff]  }
 0x179   : > { %12184 = vmatmul.mubr.bf16.gmra.mrb[4].mxu0 %v18049_v19  ;;  %14896 = vmatmul.mubr.bf16.gmra.mrb[4].mxu1 %v18049_v19  ;;  %v21960_v19 = vld [vmem:[%s24405_s28 + $0x7a4] ss:$16 sps:$4 sm:$0xff]   ;;  %v22006_v6 = vld [vmem:[%s24405_s28 + $0x8a0] ss:$16 sps:$4 sm:$0xff]  }
 0x17a   : > { %12259 = vmatpush1.bf16.msra.mxu0 %v21892_v21  ;;  %14971 = vmatpush1.bf16.msra.mxu1 %v21895_v22  ;;  %v18338_v21 = vcombine.high %v733_v14, %v757_v16  ;;  %v21958_v22 = vld [vmem:[%s24405_s28 + $0x7a0] ss:$16 sps:$4 sm:$0xff]  }
 0x17b   : > { %12260 = vmatprep.subr.bf16.mxu0 %v21900_v23  ;;  %14972 = vmatprep.subr.bf16.mxu1 %v21903_v24  ;;  %v21961_v23 = vld [vmem:[%s24405_s28 + $0x7a8] ss:$16 sps:$4 sm:$0xff]   ;;  %v21966_v24 = vld [vmem:[%s24405_s28 + $0x7c4] ss:$16 sps:$4 sm:$0xff]  }
 0x17c   : > { %12193 = vmatprep.mubr.bf16.mxu0 %v18098_v25  ;;  %14905 = vmatprep.mubr.bf16.mxu1 %v18098_v25  ;;  %v21969_v25 = vld [vmem:[%s24405_s28 + $0x7cc] ss:$16 sps:$4 sm:$0xff]  }
 0x17e   : > { %12261 = vmatpush1.bf16.msra.mxu0 %v21898_v26  ;;  %14973 = vmatpush1.bf16.msra.mxu1 %v21901_v27  ;;  %v398_v26 = vld [vmem:[%s24536_s30 + $0x18] sm:$0xff]  ;;  %v18337_v27 = vcombine.low %v733_v14, %v757_v16 }
 0x17f   : > { %12262 = vmatprep.subr.bf16.mxu0 %v21906_v28  ;;  %14974 = vmatprep.subr.bf16.mxu1 %v21909_v29  ;;  %v422_v28 = vld [vmem:[%s24536_s30 + $0xd8] sm:$0xff]  ;;  %v21964_v29 = vld [vmem:[%s24405_s28 + $0x7c0] ss:$16 sps:$4 sm:$0xff]  }
 0x180   : > { %v18004_v33 = vcombine.high %v398_v26, %v422_v28  ;;  %v614_v14 = vld [vmem:[%s24536_s30 + $0x6d8] sm:$0xff] }
 0x181   : > { %12194 = vmatmul.mubr.bf16.gmra.mrb[8].mxu0 %v18097_v32  ;;  %14906 = vmatmul.mubr.bf16.gmra.mrb[8].mxu1 %v18097_v32  ;;  %v21975_v32 = vld [vmem:[%s24405_s28 + $0x7ec] ss:$16 sps:$4 sm:$0xff]  }
 0x182   : > { %12263 = vmatpush1.bf16.msra.mxu0 %v21904_v30  ;;  %14975 = vmatpush1.bf16.msra.mxu1 %v21907_v31  ;;  %v21967_v30 = vld [vmem:[%s24405_s28 + $0x7c8] ss:$16 sps:$4 sm:$0xff]   ;;  %v21972_v31 = vld [vmem:[%s24405_s28 + $0x7e4] ss:$16 sps:$4 sm:$0xff]   ;;  %v22023_v16 = vld [vmem:[%s24405_s28 + $0x8ec] ss:$16 sps:$4 sm:$0xff]  }
 0x183   : > { %12264 = vmatprep.subr.bf16.mxu0 %v21912_v35  ;;  %14976 = vmatprep.subr.bf16.mxu1 %v21915_v36  ;;  %v21973_v35 = vld [vmem:[%s24405_s28 + $0x7e8] ss:$16 sps:$4 sm:$0xff]   ;;  %v21978_v36 = vld [vmem:[%s24405_s28 + $0x804] ss:$16 sps:$4 sm:$0xff]  }
 0x184   : > { %12203 = vmatprep.mubr.bf16.mxu0 %v18146_v37  ;;  %14915 = vmatprep.mubr.bf16.mxu1 %v18146_v37  ;;  %v21981_v37 = vld [vmem:[%s24405_s28 + $0x80c] ss:$16 sps:$4 sm:$0xff]  }
 0x186   : > { %12265 = vmatpush1.bf16.msra.mxu0 %v21910_v38  ;;  %14977 = vmatpush1.bf16.msra.mxu1 %v21913_v39  ;;  %v21976_v38 = vld [vmem:[%s24405_s28 + $0x800] ss:$16 sps:$4 sm:$0xff]   ;;  %v21979_v39 = vld [vmem:[%s24405_s28 + $0x808] ss:$16 sps:$4 sm:$0xff]  }
 0x187   : > { %12266 = vmatprep.subr.bf16.mxu0 %v21918_v40  ;;  %14978 = vmatprep.subr.bf16.mxu1 %v21921_v41  ;;  %v18003_v40 = vcombine.low %v398_v26, %v422_v28  ;;  %v446_v41 = vld [vmem:[%s24536_s30 + $0x198] sm:$0xff] }
 0x188   : > { %v22027_v26 = vld [vmem:[%s24405_s28 + $0x908] ss:$16 sps:$4 sm:$0xff]   ;;  %v22035_v28 = vld [vmem:[%s24405_s28 + $0x92c] ss:$16 sps:$4 sm:$0xff]  }
 0x189   : > { %12204 = vmatmul.mubr.bf16.gmra.mrb[12].mxu0 %v18145_v43  ;;  %14916 = vmatmul.mubr.bf16.gmra.mrb[12].mxu1 %v18145_v43  ;;  %v21984_v43 = vld [vmem:[%s24405_s28 + $0x824] ss:$16 sps:$4 sm:$0xff]  }
 0x18a   : > { %12267 = vmatpush1.bf16.msra.mxu0 %v21916_v45  ;;  %14979 = vmatpush1.bf16.msra.mxu1 %v21919_v46  ;;  %v18052_v45 = vcombine.high %v446_v41, %v470_v42  ;;  %v21982_v46 = vld [vmem:[%s24405_s28 + $0x820] ss:$16 sps:$4 sm:$0xff]  }
 0x18b   : > { %12268 = vmatprep.subr.bf16.mxu0 %v21924_v47  ;;  %14980 = vmatprep.subr.bf16.mxu1 %v21927_v48  ;;  %v21985_v47 = vld [vmem:[%s24405_s28 + $0x828] ss:$16 sps:$4 sm:$0xff]   ;;  %v21990_v48 = vld [vmem:[%s24405_s28 + $0x844] ss:$16 sps:$4 sm:$0xff]  }
 0x18c   : > { %12213 = vmatprep.mubr.bf16.mxu0 %v18194_v49  ;;  %14925 = vmatprep.mubr.bf16.mxu1 %v18194_v49  ;;  %v21993_v49 = vld [vmem:[%s24405_s28 + $0x84c] ss:$16 sps:$4 sm:$0xff]  }
 0x18e   : > { %12269 = vmatpush1.bf16.msra.mxu0 %v21922_v50  ;;  %14981 = vmatpush1.bf16.msra.mxu1 %v21925_v51  ;;  %v494_v50 = vld [vmem:[%s24536_s30 + $0x318] sm:$0xff]  ;;  %v18051_v51 = vcombine.low %v446_v41, %v470_v42  ;;  %v22042_v42 = vld [vmem:[%s24405_s28 + $0x960] ss:$16 sps:$4 sm:$0xff]  }
 0x18f   : > { %12270 = vmatprep.subr.bf16.mxu0 %v21930_v52  ;;  %14982 = vmatprep.subr.bf16.mxu1 %v21933_v53  ;;  %v518_v52 = vld [vmem:[%s24536_s30 + $0x3d8] sm:$0xff]  ;;  %v21988_v53 = vld [vmem:[%s24405_s28 + $0x840] ss:$16 sps:$4 sm:$0xff]  }
 0x191   : > { %12214 = vmatmul.mubr.bf16.gmra.mrb[16].mxu0 %v18193_v55  ;;  %14926 = vmatmul.mubr.bf16.gmra.mrb[16].mxu1 %v18193_v55  ;;  %v21996_v55 = vld [vmem:[%s24405_s28 + $0x864] ss:$16 sps:$4 sm:$0xff]  }
 0x192   : > { %12271 = vmatpush1.bf16.msra.mxu0 %v21928_v57  ;;  %14983 = vmatpush1.bf16.msra.mxu1 %v21931_v58  ;;  %v18100_v57 = vcombine.high %v494_v50, %v518_v52  ;;  %v21994_v58 = vld [vmem:[%s24405_s28 + $0x860] ss:$16 sps:$4 sm:$0xff]  }
 0x193   : > { %12272 = vmatprep.subr.bf16.mxu0 %v21936_v59  ;;  %14984 = vmatprep.subr.bf16.mxu1 %v21939_v60  ;;  %v21997_v59 = vld [vmem:[%s24405_s28 + $0x868] ss:$16 sps:$4 sm:$0xff]   ;;  %v22002_v60 = vld [vmem:[%s24405_s28 + $0x884] ss:$16 sps:$4 sm:$0xff]  }
 0x194   : > { %12223 = vmatprep.mubr.bf16.mxu0 %v18242_v61  ;;  %14935 = vmatprep.mubr.bf16.mxu1 %v18242_v61  ;;  %v22005_v61 = vld [vmem:[%s24405_s28 + $0x88c] ss:$16 sps:$4 sm:$0xff]  }
 0x196   : > { %12273 = vmatpush1.bf16.msra.mxu0 %v21934_v62  ;;  %14985 = vmatpush1.bf16.msra.mxu1 %v21937_v63  ;;  %v542_v62 = vld [vmem:[%s24536_s30 + $0x498] sm:$0xff]  ;;  %v18099_v63 = vcombine.low %v494_v50, %v518_v52 }
 0x197   : > { %12274 = vmatprep.subr.bf16.mxu0 %v21942_v0  ;;  %14986 = vmatprep.subr.bf16.mxu1 %v21945_v1  ;;  %v566_v0 = vld [vmem:[%s24536_s30 + $0x558] sm:$0xff]  ;;  %v22000_v1 = vld [vmem:[%s24405_s28 + $0x880] ss:$16 sps:$4 sm:$0xff]  }
 0x198   : > { %v18148_v5 = vcombine.high %v542_v62, %v566_v0  ;;  %v758_v50 = vld [vmem:[%s24536_s30 + $0xb58] sm:$0xff] }
 0x199   : > { %12224 = vmatmul.mubr.bf16.gmra.mrb[20].mxu0 %v18241_v4  ;;  %14936 = vmatmul.mubr.bf16.gmra.mrb[20].mxu1 %v18241_v4  ;;  %v22011_v4 = vld [vmem:[%s24405_s28 + $0x8ac] ss:$16 sps:$4 sm:$0xff]  }
 0x19a   : > { %12275 = vmatpush1.bf16.msra.mxu0 %v21940_v2  ;;  %14987 = vmatpush1.bf16.msra.mxu1 %v21943_v3  ;;  %v22003_v2 = vld [vmem:[%s24405_s28 + $0x888] ss:$16 sps:$4 sm:$0xff]   ;;  %v22008_v3 = vld [vmem:[%s24405_s28 + $0x8a4] ss:$16 sps:$4 sm:$0xff]   ;;  %v22059_v52 = vld [vmem:[%s24405_s28 + $0x9ac] ss:$16 sps:$4 sm:$0xff]  }
 0x19b   : > { %12276 = vmatprep.subr.bf16.mxu0 %v21948_v7  ;;  %14988 = vmatprep.subr.bf16.mxu1 %v21951_v8  ;;  %v22009_v7 = vld [vmem:[%s24405_s28 + $0x8a8] ss:$16 sps:$4 sm:$0xff]   ;;  %v22014_v8 = vld [vmem:[%s24405_s28 + $0x8c4] ss:$16 sps:$4 sm:$0xff]  }
 0x19c   : > { %12233 = vmatprep.mubr.bf16.mxu0 %v18290_v9  ;;  %14945 = vmatprep.mubr.bf16.mxu1 %v18290_v9  ;;  %v22017_v9 = vld [vmem:[%s24405_s28 + $0x8cc] ss:$16 sps:$4 sm:$0xff]  }
 0x19e   : > { %12277 = vmatpush1.bf16.msra.mxu0 %v21946_v10  ;;  %14989 = vmatpush1.bf16.msra.mxu1 %v21949_v11  ;;  %v22012_v10 = vld [vmem:[%s24405_s28 + $0x8c0] ss:$16 sps:$4 sm:$0xff]   ;;  %v22015_v11 = vld [vmem:[%s24405_s28 + $0x8c8] ss:$16 sps:$4 sm:$0xff]  }
 0x19f   : > { %12278 = vmatprep.subr.bf16.mxu0 %v21954_v12  ;;  %14990 = vmatprep.subr.bf16.mxu1 %v21957_v13  ;;  %v18147_v12 = vcombine.low %v542_v62, %v566_v0  ;;  %v590_v13 = vld [vmem:[%s24536_s30 + $0x618] sm:$0xff] }
 0x1a0   : > { %v22063_v62 = vld [vmem:[%s24405_s28 + $0x9c8] ss:$16 sps:$4 sm:$0xff]   ;;  %v22071_v0 = vld [vmem:[%s24405_s28 + $0x9ec] ss:$16 sps:$4 sm:$0xff]  }
 0x1a1   : > { %12234 = vmatmul.mubr.bf16.gmra.mrb[24].mxu0 %v18289_v15  ;;  %14946 = vmatmul.mubr.bf16.gmra.mrb[24].mxu1 %v18289_v15  ;;  %v22020_v15 = vld [vmem:[%s24405_s28 + $0x8e4] ss:$16 sps:$4 sm:$0xff]  }
 0x1a2   : > { %12279 = vmatpush1.bf16.msra.mxu0 %v21952_v17  ;;  %14991 = vmatpush1.bf16.msra.mxu1 %v21955_v18  ;;  %v18196_v17 = vcombine.high %v590_v13, %v614_v14  ;;  %v22018_v18 = vld [vmem:[%s24405_s28 + $0x8e0] ss:$16 sps:$4 sm:$0xff]  }
 0x1a3   : > { %12280 = vmatprep.subr.bf16.mxu0 %v21960_v19  ;;  %14992 = vmatprep.subr.bf16.mxu1 %v21963_v20  ;;  %v22021_v19 = vld [vmem:[%s24405_s28 + $0x8e8] ss:$16 sps:$4 sm:$0xff]   ;;  %v22026_v20 = vld [vmem:[%s24405_s28 + $0x904] ss:$16 sps:$4 sm:$0xff]  }
 0x1a4   : > { %12243 = vmatprep.mubr.bf16.mxu0 %v18338_v21  ;;  %14955 = vmatprep.mubr.bf16.mxu1 %v18338_v21  ;;  %v22029_v21 = vld [vmem:[%s24405_s28 + $0x90c] ss:$16 sps:$4 sm:$0xff]  }
 0x1a6   : > { %12281 = vmatpush1.bf16.msra.mxu0 %v21958_v22  ;;  %14993 = vmatpush1.bf16.msra.mxu1 %v21961_v23  ;;  %v638_v22 = vld [vmem:[%s24536_s30 + $0x798] sm:$0xff]  ;;  %v18195_v23 = vcombine.low %v590_v13, %v614_v14  ;;  %v22078_v14 = vld [vmem:[%s24405_s28 + $0xa20] ss:$16 sps:$4 sm:$0xff]  }
 0x1a7   : > { %12282 = vmatprep.subr.bf16.mxu0 %v21966_v24  ;;  %14994 = vmatprep.subr.bf16.mxu1 %v21969_v25  ;;  %v662_v24 = vld [vmem:[%s24536_s30 + $0x858] sm:$0xff]  ;;  %v22024_v25 = vld [vmem:[%s24405_s28 + $0x900] ss:$16 sps:$4 sm:$0xff]  }
 0x1a9   : > { %12244 = vmatmul.mubr.bf16.gmra.mrb[28].mxu0 %v18337_v27  ;;  %14956 = vmatmul.mubr.bf16.gmra.mrb[28].mxu1 %v18337_v27  ;;  %v22032_v27 = vld [vmem:[%s24405_s28 + $0x924] ss:$16 sps:$4 sm:$0xff]  }
 0x1aa   : > { %12283 = vmatpush1.bf16.msra.mxu0 %v21964_v29  ;;  %14995 = vmatpush1.bf16.msra.mxu1 %v21967_v30  ;;  %v18244_v29 = vcombine.high %v638_v22, %v662_v24  ;;  %v22030_v30 = vld [vmem:[%s24405_s28 + $0x920] ss:$16 sps:$4 sm:$0xff]  }
 0x1ab   : > { %12284 = vmatprep.subr.bf16.mxu0 %v21972_v31  ;;  %14996 = vmatprep.subr.bf16.mxu1 %v21975_v32  ;;  %v22033_v31 = vld [vmem:[%s24405_s28 + $0x928] ss:$16 sps:$4 sm:$0xff]   ;;  %v22038_v32 = vld [vmem:[%s24405_s28 + $0x944] ss:$16 sps:$4 sm:$0xff]  }
 0x1ac   : > { %12286 = vmatprep.mubr.bf16.mxu0 %v18004_v33  ;;  %14998 = vmatprep.mubr.bf16.mxu1 %v18004_v33  ;;  %v22041_v33 = vld [vmem:[%s24405_s28 + $0x94c] ss:$16 sps:$4 sm:$0xff]  }
 0x1ae   : > { %12285 = vmatpush1.bf16.msra.mxu0 %v21970_v34  ;;  %14997 = vmatpush1.bf16.msra.mxu1 %v21973_v35  ;;  %v686_v34 = vld [vmem:[%s24536_s30 + $0x918] sm:$0xff]  ;;  %v18243_v35 = vcombine.low %v638_v22, %v662_v24  ;;  %v519_v22 = vld [vmem:[%s24536_s30 + $0x3e0] sm:$0xff] }
 0x1af   : > { %12367 = vmatprep.subr.bf16.mxu0 %v21978_v36  ;;  %15079 = vmatprep.subr.bf16.mxu1 %v21981_v37  ;;  %v710_v36 = vld [vmem:[%s24536_s30 + $0x9d8] sm:$0xff]  ;;  %v22036_v37 = vld [vmem:[%s24405_s28 + $0x940] ss:$16 sps:$4 sm:$0xff]  }
 0x1b0   : > { %v18292_v41 = vcombine.high %v686_v34, %v710_v36  ;;  %v22095_v24 = vld [vmem:[%s24405_s28 + $0xa6c] ss:$16 sps:$4 sm:$0xff]  }
 0x1b1   : > { %12287 = vmatmul.mubr.bf16.vlgmr.msra.gmra.mrb[0].mxu0 %v18003_v40  ;;  %14999 = vmatmul.mubr.bf16.vlgmr.msra.gmra.mrb[0].mxu1 %v18003_v40  ;;  %v22047_v40 = vld [vmem:[%s24405_s28 + $0x96c] ss:$16 sps:$4 sm:$0xff]  }
 0x1b2   : > { %12368 = vmatpush1.bf16.msra.mxu0 %v21976_v38  ;;  %15080 = vmatpush1.bf16.msra.mxu1 %v21979_v39  ;;  %v22039_v38 = vld [vmem:[%s24405_s28 + $0x948] ss:$16 sps:$4 sm:$0xff]   ;;  %v22044_v39 = vld [vmem:[%s24405_s28 + $0x964] ss:$16 sps:$4 sm:$0xff]  }
 0x1b3   : > { %12369 = vmatprep.subr.bf16.mxu0 %v21984_v43  ;;  %15081 = vmatprep.subr.bf16.mxu1 %v21987_v44  ;;  %v22045_v43 = vld [vmem:[%s24405_s28 + $0x968] ss:$16 sps:$4 sm:$0xff]   ;;  %v22050_v44 = vld [vmem:[%s24405_s28 + $0x984] ss:$16 sps:$4 sm:$0xff]  }
 0x1b4   : > { %12296 = vmatprep.mubr.bf16.mxu0 %v18052_v45  ;;  %15008 = vmatprep.mubr.bf16.mxu1 %v18052_v45  ;;  %v22053_v45 = vld [vmem:[%s24405_s28 + $0x98c] ss:$16 sps:$4 sm:$0xff]  }
 0x1b6   : > { %12370 = vmatpush1.bf16.msra.mxu0 %v21982_v46  ;;  %15082 = vmatpush1.bf16.msra.mxu1 %v21985_v47  ;;  %v22048_v46 = vld [vmem:[%s24405_s28 + $0x980] ss:$16 sps:$4 sm:$0xff]   ;;  %v22051_v47 = vld [vmem:[%s24405_s28 + $0x988] ss:$16 sps:$4 sm:$0xff]  }
 0x1b7   : > { %12371 = vmatprep.subr.bf16.mxu0 %v21990_v48  ;;  %15083 = vmatprep.subr.bf16.mxu1 %v21993_v49  ;;  %v18291_v48 = vcombine.low %v686_v34, %v710_v36  ;;  %v734_v49 = vld [vmem:[%s24536_s30 + $0xa98] sm:$0xff] }
 0x1b8   : > { %v22099_v34 = vld [vmem:[%s24405_s28 + $0xa88] ss:$16 sps:$4 sm:$0xff]   ;;  %v22107_v36 = vld [vmem:[%s24405_s28 + $0xaac] ss:$16 sps:$4 sm:$0xff]  }
 0x1b9   : > { %12297 = vmatmul.mubr.bf16.gmra.mrb[4].mxu0 %v18051_v51  ;;  %15009 = vmatmul.mubr.bf16.gmra.mrb[4].mxu1 %v18051_v51  ;;  %v22056_v51 = vld [vmem:[%s24405_s28 + $0x9a4] ss:$16 sps:$4 sm:$0xff]  }
 0x1ba   : > { %12372 = vmatpush1.bf16.msra.mxu0 %v21988_v53  ;;  %15084 = vmatpush1.bf16.msra.mxu1 %v21991_v54  ;;  %v18340_v53 = vcombine.high %v734_v49, %v758_v50  ;;  %v22054_v54 = vld [vmem:[%s24405_s28 + $0x9a0] ss:$16 sps:$4 sm:$0xff]  }
 0x1bb   : > { %12373 = vmatprep.subr.bf16.mxu0 %v21996_v55  ;;  %15085 = vmatprep.subr.bf16.mxu1 %v21999_v56  ;;  %v22057_v55 = vld [vmem:[%s24405_s28 + $0x9a8] ss:$16 sps:$4 sm:$0xff]   ;;  %v22062_v56 = vld [vmem:[%s24405_s28 + $0x9c4] ss:$16 sps:$4 sm:$0xff]  }
 0x1bc   : > { %12306 = vmatprep.mubr.bf16.mxu0 %v18100_v57  ;;  %15018 = vmatprep.mubr.bf16.mxu1 %v18100_v57  ;;  %v22065_v57 = vld [vmem:[%s24405_s28 + $0x9cc] ss:$16 sps:$4 sm:$0xff]  }
 0x1be   : > { %12374 = vmatpush1.bf16.msra.mxu0 %v21994_v58  ;;  %15086 = vmatpush1.bf16.msra.mxu1 %v21997_v59  ;;  %v399_v58 = vld [vmem:[%s24536_s30 + $0x20] sm:$0xff]  ;;  %v18339_v59 = vcombine.low %v734_v49, %v758_v50 }
 0x1bf   : > { %12375 = vmatprep.subr.bf16.mxu0 %v22002_v60  ;;  %15087 = vmatprep.subr.bf16.mxu1 %v22005_v61  ;;  %v423_v60 = vld [vmem:[%s24536_s30 + $0xe0] sm:$0xff] }
 0x1c0   : > { %v22060_v61 = vld [vmem:[%s24405_s28 + $0x9c0] ss:$16 sps:$4 sm:$0xff]  }
 0x1c1   : > { %12307 = vmatmul.mubr.bf16.gmra.mrb[8].mxu0 %v18099_v63  ;;  %15019 = vmatmul.mubr.bf16.gmra.mrb[8].mxu1 %v18099_v63  ;;  %v22068_v63 = vld [vmem:[%s24405_s28 + $0x9e4] ss:$16 sps:$4 sm:$0xff]   ;;  %v22114_v50 = vld [vmem:[%s24405_s28 + $0xae0] ss:$16 sps:$4 sm:$0xff]  }
 0x1c2   : > { %12376 = vmatpush1.bf16.msra.mxu0 %v22000_v1  ;;  %15088 = vmatpush1.bf16.msra.mxu1 %v22003_v2  ;;  %v18006_v1 = vcombine.high %v399_v58, %v423_v60  ;;  %v22066_v2 = vld [vmem:[%s24405_s28 + $0x9e0] ss:$16 sps:$4 sm:$0xff]  }
 0x1c3   : > { %12377 = vmatprep.subr.bf16.mxu0 %v22008_v3  ;;  %15089 = vmatprep.subr.bf16.mxu1 %v22011_v4  ;;  %v22069_v3 = vld [vmem:[%s24405_s28 + $0x9e8] ss:$16 sps:$4 sm:$0xff]   ;;  %v22074_v4 = vld [vmem:[%s24405_s28 + $0xa04] ss:$16 sps:$4 sm:$0xff]  }
 0x1c4   : > { %12316 = vmatprep.mubr.bf16.mxu0 %v18148_v5  ;;  %15028 = vmatprep.mubr.bf16.mxu1 %v18148_v5  ;;  %v22077_v5 = vld [vmem:[%s24405_s28 + $0xa0c] ss:$16 sps:$4 sm:$0xff]  }
 0x1c6   : > { %12378 = vmatpush1.bf16.msra.mxu0 %v22006_v6  ;;  %15090 = vmatpush1.bf16.msra.mxu1 %v22009_v7  ;;  %v447_v6 = vld [vmem:[%s24536_s30 + $0x1a0] sm:$0xff]  ;;  %v18005_v7 = vcombine.low %v399_v58, %v423_v60  ;;  %v22131_v60 = vld [vmem:[%s24405_s28 + $0xb2c] ss:$16 sps:$4 sm:$0xff]  }
 0x1c7   : > { %12379 = vmatprep.subr.bf16.mxu0 %v22014_v8  ;;  %15091 = vmatprep.subr.bf16.mxu1 %v22017_v9  ;;  %v471_v8 = vld [vmem:[%s24536_s30 + $0x260] sm:$0xff] }
 0x1c8   : > { %v22072_v9 = vld [vmem:[%s24405_s28 + $0xa00] ss:$16 sps:$4 sm:$0xff]   ;;  %v18054_v13 = vcombine.high %v447_v6, %v471_v8 }
 0x1c9   : > { %12317 = vmatmul.mubr.bf16.gmra.mrb[12].mxu0 %v18147_v12  ;;  %15029 = vmatmul.mubr.bf16.gmra.mrb[12].mxu1 %v18147_v12  ;;  %v22083_v12 = vld [vmem:[%s24405_s28 + $0xa2c] ss:$16 sps:$4 sm:$0xff]   ;;  %v663_v58 = vld [vmem:[%s24536_s30 + $0x860] sm:$0xff] }
 0x1ca   : > { %12380 = vmatpush1.bf16.msra.mxu0 %v22012_v10  ;;  %15092 = vmatpush1.bf16.msra.mxu1 %v22015_v11  ;;  %v22075_v10 = vld [vmem:[%s24405_s28 + $0xa08] ss:$16 sps:$4 sm:$0xff]   ;;  %v22080_v11 = vld [vmem:[%s24405_s28 + $0xa24] ss:$16 sps:$4 sm:$0xff]  }
 0x1cb   : > { %12381 = vmatprep.subr.bf16.mxu0 %v22020_v15  ;;  %15093 = vmatprep.subr.bf16.mxu1 %v22023_v16  ;;  %v22081_v15 = vld [vmem:[%s24405_s28 + $0xa28] ss:$16 sps:$4 sm:$0xff]   ;;  %v22086_v16 = vld [vmem:[%s24405_s28 + $0xa44] ss:$16 sps:$4 sm:$0xff]  }
 0x1cc   : > { %12326 = vmatprep.mubr.bf16.mxu0 %v18196_v17  ;;  %15038 = vmatprep.mubr.bf16.mxu1 %v18196_v17  ;;  %v22089_v17 = vld [vmem:[%s24405_s28 + $0xa4c] ss:$16 sps:$4 sm:$0xff]  }
 0x1ce   : > { %12382 = vmatpush1.bf16.msra.mxu0 %v22018_v18  ;;  %15094 = vmatpush1.bf16.msra.mxu1 %v22021_v19  ;;  %v22084_v18 = vld [vmem:[%s24405_s28 + $0xa40] ss:$16 sps:$4 sm:$0xff]   ;;  %v22087_v19 = vld [vmem:[%s24405_s28 + $0xa48] ss:$16 sps:$4 sm:$0xff]  }
 0x1cf   : > { %12383 = vmatprep.subr.bf16.mxu0 %v22026_v20  ;;  %15095 = vmatprep.subr.bf16.mxu1 %v22029_v21  ;;  %v18053_v20 = vcombine.low %v447_v6, %v471_v8  ;;  %v495_v21 = vld [vmem:[%s24536_s30 + $0x320] sm:$0xff]  ;;  %v22135_v6 = vld [vmem:[%s24405_s28 + $0xb48] ss:$16 sps:$4 sm:$0xff]   ;;  %v22143_v8 = vld [vmem:[%s24405_s28 + $0xb6c] ss:$16 sps:$4 sm:$0xff]  }
 0x1d1   : > { %12327 = vmatmul.mubr.bf16.gmra.mrb[16].mxu0 %v18195_v23  ;;  %15039 = vmatmul.mubr.bf16.gmra.mrb[16].mxu1 %v18195_v23  ;;  %v22092_v23 = vld [vmem:[%s24405_s28 + $0xa64] ss:$16 sps:$4 sm:$0xff]  }
 0x1d2   : > { %12384 = vmatpush1.bf16.msra.mxu0 %v22024_v25  ;;  %15096 = vmatpush1.bf16.msra.mxu1 %v22027_v26  ;;  %v18102_v25 = vcombine.high %v495_v21, %v519_v22  ;;  %v22090_v26 = vld [vmem:[%s24405_s28 + $0xa60] ss:$16 sps:$4 sm:$0xff]  }
 0x1d3   : > { %12385 = vmatprep.subr.bf16.mxu0 %v22032_v27  ;;  %15097 = vmatprep.subr.bf16.mxu1 %v22035_v28  ;;  %v22093_v27 = vld [vmem:[%s24405_s28 + $0xa68] ss:$16 sps:$4 sm:$0xff]   ;;  %v22098_v28 = vld [vmem:[%s24405_s28 + $0xa84] ss:$16 sps:$4 sm:$0xff]  }
 0x1d4   : > { %12336 = vmatprep.mubr.bf16.mxu0 %v18244_v29  ;;  %15048 = vmatprep.mubr.bf16.mxu1 %v18244_v29  ;;  %v22101_v29 = vld [vmem:[%s24405_s28 + $0xa8c] ss:$16 sps:$4 sm:$0xff]  }
 0x1d6   : > { %12386 = vmatpush1.bf16.msra.mxu0 %v22030_v30  ;;  %15098 = vmatpush1.bf16.msra.mxu1 %v22033_v31  ;;  %v543_v30 = vld [vmem:[%s24536_s30 + $0x4a0] sm:$0xff]  ;;  %v18101_v31 = vcombine.low %v495_v21, %v519_v22 }
 0x1d7   : > { %12387 = vmatprep.subr.bf16.mxu0 %v22038_v32  ;;  %15099 = vmatprep.subr.bf16.mxu1 %v22041_v33  ;;  %v567_v32 = vld [vmem:[%s24536_s30 + $0x560] sm:$0xff] }
 0x1d8   : > { %v22096_v33 = vld [vmem:[%s24405_s28 + $0xa80] ss:$16 sps:$4 sm:$0xff]  }
 0x1d9   : > { %12337 = vmatmul.mubr.bf16.gmra.mrb[20].mxu0 %v18243_v35  ;;  %15049 = vmatmul.mubr.bf16.gmra.mrb[20].mxu1 %v18243_v35  ;;  %v22104_v35 = vld [vmem:[%s24405_s28 + $0xaa4] ss:$16 sps:$4 sm:$0xff]   ;;  %v22150_v22 = vld [vmem:[%s24405_s28 + $0xba0] ss:$16 sps:$4 sm:$0xff]  }
 0x1da   : > { %12388 = vmatpush1.bf16.msra.mxu0 %v22036_v37  ;;  %15100 = vmatpush1.bf16.msra.mxu1 %v22039_v38  ;;  %v18150_v37 = vcombine.high %v543_v30, %v567_v32  ;;  %v22102_v38 = vld [vmem:[%s24405_s28 + $0xaa0] ss:$16 sps:$4 sm:$0xff]  }
 0x1db   : > { %12389 = vmatprep.subr.bf16.mxu0 %v22044_v39  ;;  %15101 = vmatprep.subr.bf16.mxu1 %v22047_v40  ;;  %v22105_v39 = vld [vmem:[%s24405_s28 + $0xaa8] ss:$16 sps:$4 sm:$0xff]   ;;  %v22110_v40 = vld [vmem:[%s24405_s28 + $0xac4] ss:$16 sps:$4 sm:$0xff]  }
 0x1dc   : > { %12346 = vmatprep.mubr.bf16.mxu0 %v18292_v41  ;;  %15058 = vmatprep.mubr.bf16.mxu1 %v18292_v41  ;;  %v22113_v41 = vld [vmem:[%s24405_s28 + $0xacc] ss:$16 sps:$4 sm:$0xff]  }
 0x1de   : > { %12390 = vmatpush1.bf16.msra.mxu0 %v22042_v42  ;;  %15102 = vmatpush1.bf16.msra.mxu1 %v22045_v43  ;;  %v591_v42 = vld [vmem:[%s24536_s30 + $0x620] sm:$0xff]  ;;  %v18149_v43 = vcombine.low %v543_v30, %v567_v32  ;;  %v424_v30 = vld [vmem:[%s24536_s30 + $0xe8] sm:$0xff] }
 0x1df   : > { %12391 = vmatprep.subr.bf16.mxu0 %v22050_v44  ;;  %15103 = vmatprep.subr.bf16.mxu1 %v22053_v45  ;;  %v615_v44 = vld [vmem:[%s24536_s30 + $0x6e0] sm:$0xff]  ;;  %v22167_v32 = vld [vmem:[%s24405_s28 + $0xbec] ss:$16 sps:$4 sm:$0xff]  }
 0x1e0   : > { %v22108_v45 = vld [vmem:[%s24405_s28 + $0xac0] ss:$16 sps:$4 sm:$0xff]   ;;  %v18198_v49 = vcombine.high %v591_v42, %v615_v44 }
 0x1e1   : > { %12347 = vmatmul.mubr.bf16.gmra.mrb[24].mxu0 %v18291_v48  ;;  %15059 = vmatmul.mubr.bf16.gmra.mrb[24].mxu1 %v18291_v48  ;;  %v22119_v48 = vld [vmem:[%s24405_s28 + $0xaec] ss:$16 sps:$4 sm:$0xff]  }
 0x1e2   : > { %12392 = vmatpush1.bf16.msra.mxu0 %v22048_v46  ;;  %15104 = vmatpush1.bf16.msra.mxu1 %v22051_v47  ;;  %v22111_v46 = vld [vmem:[%s24405_s28 + $0xac8] ss:$16 sps:$4 sm:$0xff]   ;;  %v22116_v47 = vld [vmem:[%s24405_s28 + $0xae4] ss:$16 sps:$4 sm:$0xff]  }
 0x1e3   : > { %12393 = vmatprep.subr.bf16.mxu0 %v22056_v51  ;;  %15105 = vmatprep.subr.bf16.mxu1 %v22059_v52  ;;  %v22117_v51 = vld [vmem:[%s24405_s28 + $0xae8] ss:$16 sps:$4 sm:$0xff]   ;;  %v22122_v52 = vld [vmem:[%s24405_s28 + $0xb04] ss:$16 sps:$4 sm:$0xff]  }
 0x1e4   : > { %12356 = vmatprep.mubr.bf16.mxu0 %v18340_v53  ;;  %15068 = vmatprep.mubr.bf16.mxu1 %v18340_v53  ;;  %v22125_v53 = vld [vmem:[%s24405_s28 + $0xb0c] ss:$16 sps:$4 sm:$0xff]  }
 0x1e6   : > { %12394 = vmatpush1.bf16.msra.mxu0 %v22054_v54  ;;  %15106 = vmatpush1.bf16.msra.mxu1 %v22057_v55  ;;  %v22120_v54 = vld [vmem:[%s24405_s28 + $0xb00] ss:$16 sps:$4 sm:$0xff]   ;;  %v22123_v55 = vld [vmem:[%s24405_s28 + $0xb08] ss:$16 sps:$4 sm:$0xff]  }
 0x1e7   : > { %12395 = vmatprep.subr.bf16.mxu0 %v22062_v56  ;;  %15107 = vmatprep.subr.bf16.mxu1 %v22065_v57  ;;  %v18197_v56 = vcombine.low %v591_v42, %v615_v44  ;;  %v639_v57 = vld [vmem:[%s24536_s30 + $0x7a0] sm:$0xff]  ;;  %v472_v42 = vld [vmem:[%s24536_s30 + $0x268] sm:$0xff] }
 0x1e8   : > { %v22179_v44 = vld [vmem:[%s24405_s28 + $0xc2c] ss:$16 sps:$4 sm:$0xff]  }
 0x1e9   : > { %12357 = vmatmul.mubr.bf16.gmra.mrb[28].mxu0 %v18339_v59  ;;  %15069 = vmatmul.mubr.bf16.gmra.mrb[28].mxu1 %v18339_v59  ;;  %v22128_v59 = vld [vmem:[%s24405_s28 + $0xb24] ss:$16 sps:$4 sm:$0xff]  }
 0x1ea   : > { %12396 = vmatpush1.bf16.msra.mxu0 %v22060_v61  ;;  %15108 = vmatpush1.bf16.msra.mxu1 %v22063_v62  ;;  %v18246_v61 = vcombine.high %v639_v57, %v663_v58  ;;  %v22126_v62 = vld [vmem:[%s24405_s28 + $0xb20] ss:$16 sps:$4 sm:$0xff]  }
 0x1eb   : > { %12397 = vmatprep.subr.bf16.mxu0 %v22068_v63  ;;  %15109 = vmatprep.subr.bf16.mxu1 %v22071_v0  ;;  %v22129_v63 = vld [vmem:[%s24405_s28 + $0xb28] ss:$16 sps:$4 sm:$0xff]   ;;  %v22134_v0 = vld [vmem:[%s24405_s28 + $0xb44] ss:$16 sps:$4 sm:$0xff]  }
 0x1ec   : > { %12399 = vmatprep.mubr.bf16.mxu0 %v18006_v1  ;;  %15111 = vmatprep.mubr.bf16.mxu1 %v18006_v1  ;;  %v22137_v1 = vld [vmem:[%s24405_s28 + $0xb4c] ss:$16 sps:$4 sm:$0xff]  }
 0x1ee   : > { %12398 = vmatpush1.bf16.msra.mxu0 %v22066_v2  ;;  %15110 = vmatpush1.bf16.msra.mxu1 %v22069_v3  ;;  %v687_v2 = vld [vmem:[%s24536_s30 + $0x920] sm:$0xff]  ;;  %v18245_v3 = vcombine.low %v639_v57, %v663_v58 }
 0x1ef   : > { %12480 = vmatprep.subr.bf16.mxu0 %v22074_v4  ;;  %15192 = vmatprep.subr.bf16.mxu1 %v22077_v5  ;;  %v711_v4 = vld [vmem:[%s24536_s30 + $0x9e0] sm:$0xff] }
 0x1f0   : > { %v22132_v5 = vld [vmem:[%s24405_s28 + $0xb40] ss:$16 sps:$4 sm:$0xff]  }
 0x1f1   : > { %12400 = vmatmul.mubr.bf16.vlgmr.msra.gmra.mrb[0].mxu0 %v18005_v7  ;;  %15112 = vmatmul.mubr.bf16.vlgmr.msra.gmra.mrb[0].mxu1 %v18005_v7  ;;  %v22140_v7 = vld [vmem:[%s24405_s28 + $0xb64] ss:$16 sps:$4 sm:$0xff]   ;;  %v22186_v58 = vld [vmem:[%s24405_s28 + $0xc60] ss:$16 sps:$4 sm:$0xff]  }
 0x1f2   : > { %12481 = vmatpush1.bf16.msra.mxu0 %v22072_v9  ;;  %15193 = vmatpush1.bf16.msra.mxu1 %v22075_v10  ;;  %v18294_v9 = vcombine.high %v687_v2, %v711_v4  ;;  %v22138_v10 = vld [vmem:[%s24405_s28 + $0xb60] ss:$16 sps:$4 sm:$0xff]  }
 0x1f3   : > { %12482 = vmatprep.subr.bf16.mxu0 %v22080_v11  ;;  %15194 = vmatprep.subr.bf16.mxu1 %v22083_v12  ;;  %v22141_v11 = vld [vmem:[%s24405_s28 + $0xb68] ss:$16 sps:$4 sm:$0xff]   ;;  %v22146_v12 = vld [vmem:[%s24405_s28 + $0xb84] ss:$16 sps:$4 sm:$0xff]  }
 0x1f4   : > { %12409 = vmatprep.mubr.bf16.mxu0 %v18054_v13  ;;  %15121 = vmatprep.mubr.bf16.mxu1 %v18054_v13  ;;  %v22149_v13 = vld [vmem:[%s24405_s28 + $0xb8c] ss:$16 sps:$4 sm:$0xff]  }
 0x1f6   : > { %12483 = vmatpush1.bf16.msra.mxu0 %v22078_v14  ;;  %15195 = vmatpush1.bf16.msra.mxu1 %v22081_v15  ;;  %v22144_v14 = vld [vmem:[%s24405_s28 + $0xb80] ss:$16 sps:$4 sm:$0xff]   ;;  %v22147_v15 = vld [vmem:[%s24405_s28 + $0xb88] ss:$16 sps:$4 sm:$0xff]  }
 0x1f7   : > { %12484 = vmatprep.subr.bf16.mxu0 %v22086_v16  ;;  %15196 = vmatprep.subr.bf16.mxu1 %v22089_v17  ;;  %v18293_v16 = vcombine.low %v687_v2, %v711_v4  ;;  %v735_v17 = vld [vmem:[%s24536_s30 + $0xaa0] sm:$0xff]  ;;  %v568_v2 = vld [vmem:[%s24536_s30 + $0x568] sm:$0xff] }
 0x1f8   : > { %v22203_v4 = vld [vmem:[%s24405_s28 + $0xcac] ss:$16 sps:$4 sm:$0xff]  }
 0x1f9   : > { %12410 = vmatmul.mubr.bf16.gmra.mrb[4].mxu0 %v18053_v20  ;;  %15122 = vmatmul.mubr.bf16.gmra.mrb[4].mxu1 %v18053_v20  ;;  %v22155_v20 = vld [vmem:[%s24405_s28 + $0xbac] ss:$16 sps:$4 sm:$0xff]  }
 0x1fa   : > { %12485 = vmatpush1.bf16.msra.mxu0 %v22084_v18  ;;  %15197 = vmatpush1.bf16.msra.mxu1 %v22087_v19  ;;  %v759_v18 = vld [vmem:[%s24536_s30 + $0xb60] sm:$0xff] }
 0x1fb   : > { %12486 = vmatprep.subr.bf16.mxu0 %v22092_v23  ;;  %15198 = vmatprep.subr.bf16.mxu1 %v22095_v24  ;;  %v22152_v19 = vld [vmem:[%s24405_s28 + $0xba4] ss:$16 sps:$4 sm:$0xff]   ;;  %v18342_v21 = vcombine.high %v735_v17, %v759_v18  ;;  %v22153_v23 = vld [vmem:[%s24405_s28 + $0xba8] ss:$16 sps:$4 sm:$0xff]  }
 0x1fc   : > { %12419 = vmatprep.mubr.bf16.mxu0 %v18102_v25  ;;  %15131 = vmatprep.mubr.bf16.mxu1 %v18102_v25  ;;  %v22158_v24 = vld [vmem:[%s24405_s28 + $0xbc4] ss:$16 sps:$4 sm:$0xff]   ;;  %v22161_v25 = vld [vmem:[%s24405_s28 + $0xbcc] ss:$16 sps:$4 sm:$0xff]  }
 0x1fe   : > { %12487 = vmatpush1.bf16.msra.mxu0 %v22090_v26  ;;  %15199 = vmatpush1.bf16.msra.mxu1 %v22093_v27  ;;  %v22156_v26 = vld [vmem:[%s24405_s28 + $0xbc0] ss:$16 sps:$4 sm:$0xff]   ;;  %v22159_v27 = vld [vmem:[%s24405_s28 + $0xbc8] ss:$16 sps:$4 sm:$0xff]  }
 0x1ff   : > { %12488 = vmatprep.subr.bf16.mxu0 %v22098_v28  ;;  %15200 = vmatprep.subr.bf16.mxu1 %v22101_v29  ;;  %v18341_v28 = vcombine.low %v735_v17, %v759_v18  ;;  %v400_v29 = vld [vmem:[%s24536_s30 + $0x28] sm:$0xff]  ;;  %v22210_v18 = vld [vmem:[%s24405_s28 + $0xce0] ss:$16 sps:$4 sm:$0xff]  }
 0x201   : > { %12420 = vmatmul.mubr.bf16.gmra.mrb[8].mxu0 %v18101_v31  ;;  %15132 = vmatmul.mubr.bf16.gmra.mrb[8].mxu1 %v18101_v31  ;;  %v22164_v31 = vld [vmem:[%s24405_s28 + $0xbe4] ss:$16 sps:$4 sm:$0xff]  }
 0x202   : > { %12489 = vmatpush1.bf16.msra.mxu0 %v22096_v33  ;;  %15201 = vmatpush1.bf16.msra.mxu1 %v22099_v34  ;;  %v18008_v33 = vcombine.high %v400_v29, %v424_v30  ;;  %v22162_v34 = vld [vmem:[%s24405_s28 + $0xbe0] ss:$16 sps:$4 sm:$0xff]  }
 0x203   : > { %12490 = vmatprep.subr.bf16.mxu0 %v22104_v35  ;;  %15202 = vmatprep.subr.bf16.mxu1 %v22107_v36  ;;  %v22165_v35 = vld [vmem:[%s24405_s28 + $0xbe8] ss:$16 sps:$4 sm:$0xff]   ;;  %v22170_v36 = vld [vmem:[%s24405_s28 + $0xc04] ss:$16 sps:$4 sm:$0xff]  }
 0x204   : > { %12429 = vmatprep.mubr.bf16.mxu0 %v18150_v37  ;;  %15141 = vmatprep.mubr.bf16.mxu1 %v18150_v37  ;;  %v22173_v37 = vld [vmem:[%s24405_s28 + $0xc0c] ss:$16 sps:$4 sm:$0xff]  }
 0x206   : > { %12491 = vmatpush1.bf16.msra.mxu0 %v22102_v38  ;;  %15203 = vmatpush1.bf16.msra.mxu1 %v22105_v39  ;;  %v22168_v38 = vld [vmem:[%s24405_s28 + $0xc00] ss:$16 sps:$4 sm:$0xff]   ;;  %v22171_v39 = vld [vmem:[%s24405_s28 + $0xc08] ss:$16 sps:$4 sm:$0xff]  }
 0x207   : > { %12492 = vmatprep.subr.bf16.mxu0 %v22110_v40  ;;  %15204 = vmatprep.subr.bf16.mxu1 %v22113_v41  ;;  %v18007_v40 = vcombine.low %v400_v29, %v424_v30  ;;  %v448_v41 = vld [vmem:[%s24536_s30 + $0x1a8] sm:$0xff]  ;;  %v22222_v30 = vld [vmem:[%s24405_s28 + $0xd20] ss:$16 sps:$4 sm:$0xff]  }
 0x209   : > { %12430 = vmatmul.mubr.bf16.gmra.mrb[12].mxu0 %v18149_v43  ;;  %15142 = vmatmul.mubr.bf16.gmra.mrb[12].mxu1 %v18149_v43  ;;  %v22176_v43 = vld [vmem:[%s24405_s28 + $0xc24] ss:$16 sps:$4 sm:$0xff]  }
 0x20a   : > { %12493 = vmatpush1.bf16.msra.mxu0 %v22108_v45  ;;  %15205 = vmatpush1.bf16.msra.mxu1 %v22111_v46  ;;  %v18056_v45 = vcombine.high %v448_v41, %v472_v42  ;;  %v22174_v46 = vld [vmem:[%s24405_s28 + $0xc20] ss:$16 sps:$4 sm:$0xff]  }
 0x20b   : > { %12494 = vmatprep.subr.bf16.mxu0 %v22116_v47  ;;  %15206 = vmatprep.subr.bf16.mxu1 %v22119_v48  ;;  %v22177_v47 = vld [vmem:[%s24405_s28 + $0xc28] ss:$16 sps:$4 sm:$0xff]   ;;  %v22182_v48 = vld [vmem:[%s24405_s28 + $0xc44] ss:$16 sps:$4 sm:$0xff]  }
 0x20c   : > { %12439 = vmatprep.mubr.bf16.mxu0 %v18198_v49  ;;  %15151 = vmatprep.mubr.bf16.mxu1 %v18198_v49  ;;  %v22185_v49 = vld [vmem:[%s24405_s28 + $0xc4c] ss:$16 sps:$4 sm:$0xff]  }
 0x20e   : > { %12495 = vmatpush1.bf16.msra.mxu0 %v22114_v50  ;;  %15207 = vmatpush1.bf16.msra.mxu1 %v22117_v51  ;;  %v22180_v50 = vld [vmem:[%s24405_s28 + $0xc40] ss:$16 sps:$4 sm:$0xff]   ;;  %v22183_v51 = vld [vmem:[%s24405_s28 + $0xc48] ss:$16 sps:$4 sm:$0xff]  }
 0x20f   : > { %12496 = vmatprep.subr.bf16.mxu0 %v22122_v52  ;;  %15208 = vmatprep.subr.bf16.mxu1 %v22125_v53  ;;  %v18055_v52 = vcombine.low %v448_v41, %v472_v42  ;;  %v496_v53 = vld [vmem:[%s24536_s30 + $0x328] sm:$0xff]  ;;  %v22234_v42 = vld [vmem:[%s24405_s28 + $0xd60] ss:$16 sps:$4 sm:$0xff]  }
 0x211   : > { %12440 = vmatmul.mubr.bf16.gmra.mrb[16].mxu0 %v18197_v56  ;;  %15152 = vmatmul.mubr.bf16.gmra.mrb[16].mxu1 %v18197_v56  ;;  %v22191_v56 = vld [vmem:[%s24405_s28 + $0xc6c] ss:$16 sps:$4 sm:$0xff]  }
 0x212   : > { %12497 = vmatpush1.bf16.msra.mxu0 %v22120_v54  ;;  %15209 = vmatpush1.bf16.msra.mxu1 %v22123_v55  ;;  %v520_v54 = vld [vmem:[%s24536_s30 + $0x3e8] sm:$0xff]  ;;  %v22188_v55 = vld [vmem:[%s24405_s28 + $0xc64] ss:$16 sps:$4 sm:$0xff]  }
 0x213   : > { %12498 = vmatprep.subr.bf16.mxu0 %v22128_v59  ;;  %15210 = vmatprep.subr.bf16.mxu1 %v22131_v60  ;;  %v18104_v57 = vcombine.high %v496_v53, %v520_v54  ;;  %v22189_v59 = vld [vmem:[%s24405_s28 + $0xc68] ss:$16 sps:$4 sm:$0xff]   ;;  %v22194_v60 = vld [vmem:[%s24405_s28 + $0xc84] ss:$16 sps:$4 sm:$0xff]  }
 0x214   : > { %12449 = vmatprep.mubr.bf16.mxu0 %v18246_v61  ;;  %15161 = vmatprep.mubr.bf16.mxu1 %v18246_v61  ;;  %v22197_v61 = vld [vmem:[%s24405_s28 + $0xc8c] ss:$16 sps:$4 sm:$0xff]  }
 0x216   : > { %12499 = vmatpush1.bf16.msra.mxu0 %v22126_v62  ;;  %15211 = vmatpush1.bf16.msra.mxu1 %v22129_v63  ;;  %v22192_v62 = vld [vmem:[%s24405_s28 + $0xc80] ss:$16 sps:$4 sm:$0xff]   ;;  %v22195_v63 = vld [vmem:[%s24405_s28 + $0xc88] ss:$16 sps:$4 sm:$0xff]  }
 0x217   : > { %12500 = vmatprep.subr.bf16.mxu0 %v22134_v0  ;;  %15212 = vmatprep.subr.bf16.mxu1 %v22137_v1  ;;  %v18103_v0 = vcombine.low %v496_v53, %v520_v54  ;;  %v544_v1 = vld [vmem:[%s24536_s30 + $0x4a8] sm:$0xff]  ;;  %v22246_v54 = vld [vmem:[%s24405_s28 + $0xda0] ss:$16 sps:$4 sm:$0xff]  }
 0x219   : > { %12450 = vmatmul.mubr.bf16.gmra.mrb[20].mxu0 %v18245_v3  ;;  %15162 = vmatmul.mubr.bf16.gmra.mrb[20].mxu1 %v18245_v3  ;;  %v22200_v3 = vld [vmem:[%s24405_s28 + $0xca4] ss:$16 sps:$4 sm:$0xff]  }
 0x21a   : > { %12501 = vmatpush1.bf16.msra.mxu0 %v22132_v5  ;;  %15213 = vmatpush1.bf16.msra.mxu1 %v22135_v6  ;;  %v18152_v5 = vcombine.high %v544_v1, %v568_v2  ;;  %v22198_v6 = vld [vmem:[%s24405_s28 + $0xca0] ss:$16 sps:$4 sm:$0xff]  }
 0x21b   : > { %12502 = vmatprep.subr.bf16.mxu0 %v22140_v7  ;;  %15214 = vmatprep.subr.bf16.mxu1 %v22143_v8  ;;  %v22201_v7 = vld [vmem:[%s24405_s28 + $0xca8] ss:$16 sps:$4 sm:$0xff]   ;;  %v22206_v8 = vld [vmem:[%s24405_s28 + $0xcc4] ss:$16 sps:$4 sm:$0xff]  }
 0x21c   : > { %12459 = vmatprep.mubr.bf16.mxu0 %v18294_v9  ;;  %15171 = vmatprep.mubr.bf16.mxu1 %v18294_v9  ;;  %v22209_v9 = vld [vmem:[%s24405_s28 + $0xccc] ss:$16 sps:$4 sm:$0xff]  }
 0x21e   : > { %12503 = vmatpush1.bf16.msra.mxu0 %v22138_v10  ;;  %15215 = vmatpush1.bf16.msra.mxu1 %v22141_v11  ;;  %v22204_v10 = vld [vmem:[%s24405_s28 + $0xcc0] ss:$16 sps:$4 sm:$0xff]   ;;  %v22207_v11 = vld [vmem:[%s24405_s28 + $0xcc8] ss:$16 sps:$4 sm:$0xff]  }
 0x21f   : > { %12504 = vmatprep.subr.bf16.mxu0 %v22146_v12  ;;  %15216 = vmatprep.subr.bf16.mxu1 %v22149_v13  ;;  %v18151_v12 = vcombine.low %v544_v1, %v568_v2  ;;  %v592_v13 = vld [vmem:[%s24536_s30 + $0x628] sm:$0xff]  ;;  %v22258_v2 = vld [vmem:[%s24405_s28 + $0xde0] ss:$16 sps:$4 sm:$0xff]  }
 0x221   : > { %12460 = vmatmul.mubr.bf16.gmra.mrb[24].mxu0 %v18293_v16  ;;  %15172 = vmatmul.mubr.bf16.gmra.mrb[24].mxu1 %v18293_v16  ;;  %v22215_v16 = vld [vmem:[%s24405_s28 + $0xcec] ss:$16 sps:$4 sm:$0xff]  }
 0x222   : > { %12505 = vmatpush1.bf16.msra.mxu0 %v22144_v14  ;;  %15217 = vmatpush1.bf16.msra.mxu1 %v22147_v15  ;;  %v616_v14 = vld [vmem:[%s24536_s30 + $0x6e8] sm:$0xff]  ;;  %v22212_v15 = vld [vmem:[%s24405_s28 + $0xce4] ss:$16 sps:$4 sm:$0xff]  }
 0x223   : > { %12506 = vmatprep.subr.bf16.mxu0 %v22152_v19  ;;  %15218 = vmatprep.subr.bf16.mxu1 %v22155_v20  ;;  %v18200_v17 = vcombine.high %v592_v13, %v616_v14  ;;  %v22213_v19 = vld [vmem:[%s24405_s28 + $0xce8] ss:$16 sps:$4 sm:$0xff]   ;;  %v22218_v20 = vld [vmem:[%s24405_s28 + $0xd04] ss:$16 sps:$4 sm:$0xff]  }
 0x224   : > { %12469 = vmatprep.mubr.bf16.mxu0 %v18342_v21  ;;  %15181 = vmatprep.mubr.bf16.mxu1 %v18342_v21  ;;  %v22221_v21 = vld [vmem:[%s24405_s28 + $0xd0c] ss:$16 sps:$4 sm:$0xff]  }
 0x226   : > { %12507 = vmatpush1.bf16.msra.mxu0 %v22150_v22  ;;  %15219 = vmatpush1.bf16.msra.mxu1 %v22153_v23  ;;  %v22216_v22 = vld [vmem:[%s24405_s28 + $0xd00] ss:$16 sps:$4 sm:$0xff]   ;;  %v22219_v23 = vld [vmem:[%s24405_s28 + $0xd08] ss:$16 sps:$4 sm:$0xff]  }
 0x227   : > { %12508 = vmatprep.subr.bf16.mxu0 %v22158_v24  ;;  %15220 = vmatprep.subr.bf16.mxu1 %v22161_v25  ;;  %v18199_v24 = vcombine.low %v592_v13, %v616_v14  ;;  %v640_v25 = vld [vmem:[%s24536_s30 + $0x7a8] sm:$0xff]  ;;  %v22270_v14 = vld [vmem:[%s24405_s28 + $0xe20] ss:$16 sps:$4 sm:$0xff]  }
 0x229   : > { %12470 = vmatmul.mubr.bf16.gmra.mrb[28].mxu0 %v18341_v28  ;;  %15182 = vmatmul.mubr.bf16.gmra.mrb[28].mxu1 %v18341_v28  ;;  %v22227_v28 = vld [vmem:[%s24405_s28 + $0xd2c] ss:$16 sps:$4 sm:$0xff]  }
 0x22a   : > { %12509 = vmatpush1.bf16.msra.mxu0 %v22156_v26  ;;  %15221 = vmatpush1.bf16.msra.mxu1 %v22159_v27  ;;  %v664_v26 = vld [vmem:[%s24536_s30 + $0x868] sm:$0xff]  ;;  %v22224_v27 = vld [vmem:[%s24405_s28 + $0xd24] ss:$16 sps:$4 sm:$0xff]  }
 0x22b   : > { %12510 = vmatprep.subr.bf16.mxu0 %v22164_v31  ;;  %15222 = vmatprep.subr.bf16.mxu1 %v22167_v32  ;;  %v18248_v29 = vcombine.high %v640_v25, %v664_v26  ;;  %v22225_v31 = vld [vmem:[%s24405_s28 + $0xd28] ss:$16 sps:$4 sm:$0xff]   ;;  %v22230_v32 = vld [vmem:[%s24405_s28 + $0xd44] ss:$16 sps:$4 sm:$0xff]  }
 0x22c   : > { %12512 = vmatprep.mubr.bf16.mxu0 %v18008_v33  ;;  %15224 = vmatprep.mubr.bf16.mxu1 %v18008_v33  ;;  %v22233_v33 = vld [vmem:[%s24405_s28 + $0xd4c] ss:$16 sps:$4 sm:$0xff]  }
 0x22e   : > { %12511 = vmatpush1.bf16.msra.mxu0 %v22162_v34  ;;  %15223 = vmatpush1.bf16.msra.mxu1 %v22165_v35  ;;  %v22228_v34 = vld [vmem:[%s24405_s28 + $0xd40] ss:$16 sps:$4 sm:$0xff]   ;;  %v22231_v35 = vld [vmem:[%s24405_s28 + $0xd48] ss:$16 sps:$4 sm:$0xff]  }
 0x22f   : > { %12593 = vmatprep.subr.bf16.mxu0 %v22170_v36  ;;  %15305 = vmatprep.subr.bf16.mxu1 %v22173_v37  ;;  %v18247_v36 = vcombine.low %v640_v25, %v664_v26  ;;  %v688_v37 = vld [vmem:[%s24536_s30 + $0x928] sm:$0xff]  ;;  %v22282_v26 = vld [vmem:[%s24405_s28 + $0xe60] ss:$16 sps:$4 sm:$0xff]  }
 0x231   : > { %12513 = vmatmul.mubr.bf16.vlgmr.msra.gmra.mrb[0].mxu0 %v18007_v40  ;;  %15225 = vmatmul.mubr.bf16.vlgmr.msra.gmra.mrb[0].mxu1 %v18007_v40  ;;  %v22239_v40 = vld [vmem:[%s24405_s28 + $0xd6c] ss:$16 sps:$4 sm:$0xff]  }
 0x232   : > { %12594 = vmatpush1.bf16.msra.mxu0 %v22168_v38  ;;  %15306 = vmatpush1.bf16.msra.mxu1 %v22171_v39  ;;  %v712_v38 = vld [vmem:[%s24536_s30 + $0x9e8] sm:$0xff]  ;;  %v22236_v39 = vld [vmem:[%s24405_s28 + $0xd64] ss:$16 sps:$4 sm:$0xff]  }
 0x233   : > { %12595 = vmatprep.subr.bf16.mxu0 %v22176_v43  ;;  %15307 = vmatprep.subr.bf16.mxu1 %v22179_v44  ;;  %v18296_v41 = vcombine.high %v688_v37, %v712_v38  ;;  %v22237_v43 = vld [vmem:[%s24405_s28 + $0xd68] ss:$16 sps:$4 sm:$0xff]   ;;  %v22242_v44 = vld [vmem:[%s24405_s28 + $0xd84] ss:$16 sps:$4 sm:$0xff]  }
 0x234   : > { %12522 = vmatprep.mubr.bf16.mxu0 %v18056_v45  ;;  %15234 = vmatprep.mubr.bf16.mxu1 %v18056_v45  ;;  %v22245_v45 = vld [vmem:[%s24405_s28 + $0xd8c] ss:$16 sps:$4 sm:$0xff]  }
 0x236   : > { %12596 = vmatpush1.bf16.msra.mxu0 %v22174_v46  ;;  %15308 = vmatpush1.bf16.msra.mxu1 %v22177_v47  ;;  %v22240_v46 = vld [vmem:[%s24405_s28 + $0xd80] ss:$16 sps:$4 sm:$0xff]   ;;  %v22243_v47 = vld [vmem:[%s24405_s28 + $0xd88] ss:$16 sps:$4 sm:$0xff]  }
 0x237   : > { %12597 = vmatprep.subr.bf16.mxu0 %v22182_v48  ;;  %15309 = vmatprep.subr.bf16.mxu1 %v22185_v49  ;;  %v18295_v48 = vcombine.low %v688_v37, %v712_v38  ;;  %v736_v49 = vld [vmem:[%s24536_s30 + $0xaa8] sm:$0xff]  ;;  %v22294_v38 = vld [vmem:[%s24405_s28 + $0xea0] ss:$16 sps:$4 sm:$0xff]  }
 0x239   : > { %12523 = vmatmul.mubr.bf16.gmra.mrb[4].mxu0 %v18055_v52  ;;  %15235 = vmatmul.mubr.bf16.gmra.mrb[4].mxu1 %v18055_v52  ;;  %v22251_v52 = vld [vmem:[%s24405_s28 + $0xdac] ss:$16 sps:$4 sm:$0xff]  }
 0x23a   : > { %12598 = vmatpush1.bf16.msra.mxu0 %v22180_v50  ;;  %15310 = vmatpush1.bf16.msra.mxu1 %v22183_v51  ;;  %v760_v50 = vld [vmem:[%s24536_s30 + $0xb68] sm:$0xff]  ;;  %v22248_v51 = vld [vmem:[%s24405_s28 + $0xda4] ss:$16 sps:$4 sm:$0xff]  }
 0x23b   : > { %12599 = vmatprep.subr.bf16.mxu0 %v22188_v55  ;;  %15311 = vmatprep.subr.bf16.mxu1 %v22191_v56  ;;  %v18344_v53 = vcombine.high %v736_v49, %v760_v50  ;;  %v22249_v55 = vld [vmem:[%s24405_s28 + $0xda8] ss:$16 sps:$4 sm:$0xff]   ;;  %v22254_v56 = vld [vmem:[%s24405_s28 + $0xdc4] ss:$16 sps:$4 sm:$0xff]  }
 0x23c   : > { %12532 = vmatprep.mubr.bf16.mxu0 %v18104_v57  ;;  %15244 = vmatprep.mubr.bf16.mxu1 %v18104_v57  ;;  %v22257_v57 = vld [vmem:[%s24405_s28 + $0xdcc] ss:$16 sps:$4 sm:$0xff]  }
 0x23e   : > { %12600 = vmatpush1.bf16.msra.mxu0 %v22186_v58  ;;  %15312 = vmatpush1.bf16.msra.mxu1 %v22189_v59  ;;  %v22252_v58 = vld [vmem:[%s24405_s28 + $0xdc0] ss:$16 sps:$4 sm:$0xff]   ;;  %v22255_v59 = vld [vmem:[%s24405_s28 + $0xdc8] ss:$16 sps:$4 sm:$0xff]  }
 0x23f   : > { %12601 = vmatprep.subr.bf16.mxu0 %v22194_v60  ;;  %15313 = vmatprep.subr.bf16.mxu1 %v22197_v61  ;;  %v18343_v60 = vcombine.low %v736_v49, %v760_v50  ;;  %v401_v61 = vld [vmem:[%s24536_s30 + $0x30] sm:$0xff] }
 0x240   : > { %v22306_v50 = vld [vmem:[%s24405_s28 + $0xee0] ss:$16 sps:$4 sm:$0xff]  }
 0x241   : > { %12533 = vmatmul.mubr.bf16.gmra.mrb[8].mxu0 %v18103_v0  ;;  %15245 = vmatmul.mubr.bf16.gmra.mrb[8].mxu1 %v18103_v0  ;;  %v22263_v0 = vld [vmem:[%s24405_s28 + $0xdec] ss:$16 sps:$4 sm:$0xff]  }
 0x242   : > { %12602 = vmatpush1.bf16.msra.mxu0 %v22192_v62  ;;  %15314 = vmatpush1.bf16.msra.mxu1 %v22195_v63  ;;  %v425_v62 = vld [vmem:[%s24536_s30 + $0xf0] sm:$0xff] }
 0x243   : > { %12603 = vmatprep.subr.bf16.mxu0 %v22200_v3  ;;  %15315 = vmatprep.subr.bf16.mxu1 %v22203_v4  ;;  %v22260_v63 = vld [vmem:[%s24405_s28 + $0xde4] ss:$16 sps:$4 sm:$0xff]   ;;  %v18010_v1 = vcombine.high %v401_v61, %v425_v62  ;;  %v22261_v3 = vld [vmem:[%s24405_s28 + $0xde8] ss:$16 sps:$4 sm:$0xff]  }
 0x244   : > { %12542 = vmatprep.mubr.bf16.mxu0 %v18152_v5  ;;  %15254 = vmatprep.mubr.bf16.mxu1 %v18152_v5  ;;  %v22266_v4 = vld [vmem:[%s24405_s28 + $0xe04] ss:$16 sps:$4 sm:$0xff]   ;;  %v22269_v5 = vld [vmem:[%s24405_s28 + $0xe0c] ss:$16 sps:$4 sm:$0xff]  }
 0x246   : > { %12604 = vmatpush1.bf16.msra.mxu0 %v22198_v6  ;;  %15316 = vmatpush1.bf16.msra.mxu1 %v22201_v7  ;;  %v22264_v6 = vld [vmem:[%s24405_s28 + $0xe00] ss:$16 sps:$4 sm:$0xff]   ;;  %v22267_v7 = vld [vmem:[%s24405_s28 + $0xe08] ss:$16 sps:$4 sm:$0xff]  }
 0x247   : > { %12605 = vmatprep.subr.bf16.mxu0 %v22206_v8  ;;  %15317 = vmatprep.subr.bf16.mxu1 %v22209_v9  ;;  %v18009_v8 = vcombine.low %v401_v61, %v425_v62  ;;  %v449_v9 = vld [vmem:[%s24536_s30 + $0x1b0] sm:$0xff] }
 0x248   : > { %v22318_v62 = vld [vmem:[%s24405_s28 + $0xf20] ss:$16 sps:$4 sm:$0xff]  }
 0x249   : > { %12543 = vmatmul.mubr.bf16.gmra.mrb[12].mxu0 %v18151_v12  ;;  %15255 = vmatmul.mubr.bf16.gmra.mrb[12].mxu1 %v18151_v12  ;;  %v22275_v12 = vld [vmem:[%s24405_s28 + $0xe2c] ss:$16 sps:$4 sm:$0xff]  }
 0x24a   : > { %12606 = vmatpush1.bf16.msra.mxu0 %v22204_v10  ;;  %15318 = vmatpush1.bf16.msra.mxu1 %v22207_v11  ;;  %v473_v10 = vld [vmem:[%s24536_s30 + $0x270] sm:$0xff] }
 0x24b   : > { %12607 = vmatprep.subr.bf16.mxu0 %v22212_v15  ;;  %15319 = vmatprep.subr.bf16.mxu1 %v22215_v16  ;;  %v22272_v11 = vld [vmem:[%s24405_s28 + $0xe24] ss:$16 sps:$4 sm:$0xff]   ;;  %v18058_v13 = vcombine.high %v449_v9, %v473_v10  ;;  %v22273_v15 = vld [vmem:[%s24405_s28 + $0xe28] ss:$16 sps:$4 sm:$0xff]  }
 0x24c   : > { %12552 = vmatprep.mubr.bf16.mxu0 %v18200_v17  ;;  %15264 = vmatprep.mubr.bf16.mxu1 %v18200_v17  ;;  %v22278_v16 = vld [vmem:[%s24405_s28 + $0xe44] ss:$16 sps:$4 sm:$0xff]   ;;  %v22281_v17 = vld [vmem:[%s24405_s28 + $0xe4c] ss:$16 sps:$4 sm:$0xff]  }
 0x24e   : > { %12608 = vmatpush1.bf16.msra.mxu0 %v22210_v18  ;;  %15320 = vmatpush1.bf16.msra.mxu1 %v22213_v19  ;;  %v22276_v18 = vld [vmem:[%s24405_s28 + $0xe40] ss:$16 sps:$4 sm:$0xff]   ;;  %v22279_v19 = vld [vmem:[%s24405_s28 + $0xe48] ss:$16 sps:$4 sm:$0xff]  }
 0x24f   : > { %12609 = vmatprep.subr.bf16.mxu0 %v22218_v20  ;;  %15321 = vmatprep.subr.bf16.mxu1 %v22221_v21  ;;  %v18057_v20 = vcombine.low %v449_v9, %v473_v10  ;;  %v497_v21 = vld [vmem:[%s24536_s30 + $0x330] sm:$0xff] }
 0x250   : > { %v22330_v10 = vld [vmem:[%s24405_s28 + $0xf60] ss:$16 sps:$4 sm:$0xff]  }
 0x251   : > { %12553 = vmatmul.mubr.bf16.gmra.mrb[16].mxu0 %v18199_v24  ;;  %15265 = vmatmul.mubr.bf16.gmra.mrb[16].mxu1 %v18199_v24  ;;  %v22287_v24 = vld [vmem:[%s24405_s28 + $0xe6c] ss:$16 sps:$4 sm:$0xff]  }
 0x252   : > { %12610 = vmatpush1.bf16.msra.mxu0 %v22216_v22  ;;  %15322 = vmatpush1.bf16.msra.mxu1 %v22219_v23  ;;  %v521_v22 = vld [vmem:[%s24536_s30 + $0x3f0] sm:$0xff] }
 0x253   : > { %12611 = vmatprep.subr.bf16.mxu0 %v22224_v27  ;;  %15323 = vmatprep.subr.bf16.mxu1 %v22227_v28  ;;  %v22284_v23 = vld [vmem:[%s24405_s28 + $0xe64] ss:$16 sps:$4 sm:$0xff]   ;;  %v18106_v25 = vcombine.high %v497_v21, %v521_v22  ;;  %v22285_v27 = vld [vmem:[%s24405_s28 + $0xe68] ss:$16 sps:$4 sm:$0xff]  }
 0x254   : > { %12562 = vmatprep.mubr.bf16.mxu0 %v18248_v29  ;;  %15274 = vmatprep.mubr.bf16.mxu1 %v18248_v29  ;;  %v22290_v28 = vld [vmem:[%s24405_s28 + $0xe84] ss:$16 sps:$4 sm:$0xff]   ;;  %v22293_v29 = vld [vmem:[%s24405_s28 + $0xe8c] ss:$16 sps:$4 sm:$0xff]  }
 0x256   : > { %12612 = vmatpush1.bf16.msra.mxu0 %v22222_v30  ;;  %15324 = vmatpush1.bf16.msra.mxu1 %v22225_v31  ;;  %v22288_v30 = vld [vmem:[%s24405_s28 + $0xe80] ss:$16 sps:$4 sm:$0xff]   ;;  %v22291_v31 = vld [vmem:[%s24405_s28 + $0xe88] ss:$16 sps:$4 sm:$0xff]  }
 0x257   : > { %12613 = vmatprep.subr.bf16.mxu0 %v22230_v32  ;;  %15325 = vmatprep.subr.bf16.mxu1 %v22233_v33  ;;  %v18105_v32 = vcombine.low %v497_v21, %v521_v22  ;;  %v545_v33 = vld [vmem:[%s24536_s30 + $0x4b0] sm:$0xff] }
 0x258   : > { %v22342_v22 = vld [vmem:[%s24405_s28 + $0xfa0] ss:$16 sps:$4 sm:$0xff]  }
 0x259   : > { %12563 = vmatmul.mubr.bf16.gmra.mrb[20].mxu0 %v18247_v36  ;;  %15275 = vmatmul.mubr.bf16.gmra.mrb[20].mxu1 %v18247_v36  ;;  %v22299_v36 = vld [vmem:[%s24405_s28 + $0xeac] ss:$16 sps:$4 sm:$0xff]  }
 0x25a   : > { %12614 = vmatpush1.bf16.msra.mxu0 %v22228_v34  ;;  %15326 = vmatpush1.bf16.msra.mxu1 %v22231_v35  ;;  %v569_v34 = vld [vmem:[%s24536_s30 + $0x570] sm:$0xff] }
 0x25b   : > { %12615 = vmatprep.subr.bf16.mxu0 %v22236_v39  ;;  %15327 = vmatprep.subr.bf16.mxu1 %v22239_v40  ;;  %v22296_v35 = vld [vmem:[%s24405_s28 + $0xea4] ss:$16 sps:$4 sm:$0xff]   ;;  %v18154_v37 = vcombine.high %v545_v33, %v569_v34  ;;  %v22297_v39 = vld [vmem:[%s24405_s28 + $0xea8] ss:$16 sps:$4 sm:$0xff]  }
 0x25c   : > { %12572 = vmatprep.mubr.bf16.mxu0 %v18296_v41  ;;  %15284 = vmatprep.mubr.bf16.mxu1 %v18296_v41  ;;  %v22302_v40 = vld [vmem:[%s24405_s28 + $0xec4] ss:$16 sps:$4 sm:$0xff]   ;;  %v22305_v41 = vld [vmem:[%s24405_s28 + $0xecc] ss:$16 sps:$4 sm:$0xff]  }
 0x25e   : > { %12616 = vmatpush1.bf16.msra.mxu0 %v22234_v42  ;;  %15328 = vmatpush1.bf16.msra.mxu1 %v22237_v43  ;;  %v22300_v42 = vld [vmem:[%s24405_s28 + $0xec0] ss:$16 sps:$4 sm:$0xff]   ;;  %v22303_v43 = vld [vmem:[%s24405_s28 + $0xec8] ss:$16 sps:$4 sm:$0xff]  }
 0x25f   : > { %12617 = vmatprep.subr.bf16.mxu0 %v22242_v44  ;;  %15329 = vmatprep.subr.bf16.mxu1 %v22245_v45  ;;  %v18153_v44 = vcombine.low %v545_v33, %v569_v34  ;;  %v593_v45 = vld [vmem:[%s24536_s30 + $0x630] sm:$0xff] }
 0x260   : > { %v22354_v34 = vld [vmem:[%s24405_s28 + $0xfe0] ss:$16 sps:$4 sm:$0xff]  }
 0x261   : > { %12573 = vmatmul.mubr.bf16.gmra.mrb[24].mxu0 %v18295_v48  ;;  %15285 = vmatmul.mubr.bf16.gmra.mrb[24].mxu1 %v18295_v48  ;;  %v22311_v48 = vld [vmem:[%s24405_s28 + $0xeec] ss:$16 sps:$4 sm:$0xff]  }
 0x262   : > { %12618 = vmatpush1.bf16.msra.mxu0 %v22240_v46  ;;  %15330 = vmatpush1.bf16.msra.mxu1 %v22243_v47  ;;  %v617_v46 = vld [vmem:[%s24536_s30 + $0x6f0] sm:$0xff] }
 0x263   : > { %12619 = vmatprep.subr.bf16.mxu0 %v22248_v51  ;;  %15331 = vmatprep.subr.bf16.mxu1 %v22251_v52  ;;  %v22308_v47 = vld [vmem:[%s24405_s28 + $0xee4] ss:$16 sps:$4 sm:$0xff]   ;;  %v18202_v49 = vcombine.high %v593_v45, %v617_v46  ;;  %v22309_v51 = vld [vmem:[%s24405_s28 + $0xee8] ss:$16 sps:$4 sm:$0xff]  }
 0x264   : > { %12582 = vmatprep.mubr.bf16.mxu0 %v18344_v53  ;;  %15294 = vmatprep.mubr.bf16.mxu1 %v18344_v53  ;;  %v22314_v52 = vld [vmem:[%s24405_s28 + $0xf04] ss:$16 sps:$4 sm:$0xff]   ;;  %v22317_v53 = vld [vmem:[%s24405_s28 + $0xf0c] ss:$16 sps:$4 sm:$0xff]  }
 0x266   : > { %12620 = vmatpush1.bf16.msra.mxu0 %v22246_v54  ;;  %15332 = vmatpush1.bf16.msra.mxu1 %v22249_v55  ;;  %v22312_v54 = vld [vmem:[%s24405_s28 + $0xf00] ss:$16 sps:$4 sm:$0xff]   ;;  %v22315_v55 = vld [vmem:[%s24405_s28 + $0xf08] ss:$16 sps:$4 sm:$0xff]  }
 0x267   : > { %12621 = vmatprep.subr.bf16.mxu0 %v22254_v56  ;;  %15333 = vmatprep.subr.bf16.mxu1 %v22257_v57  ;;  %v18201_v56 = vcombine.low %v593_v45, %v617_v46  ;;  %v641_v57 = vld [vmem:[%s24536_s30 + $0x7b0] sm:$0xff] }
 0x268   : > { %v22366_v46 = vld [vmem:[%s24405_s28 + $0x1020] ss:$16 sps:$4 sm:$0xff]  }
 0x269   : > { %12583 = vmatmul.mubr.bf16.gmra.mrb[28].mxu0 %v18343_v60  ;;  %15295 = vmatmul.mubr.bf16.gmra.mrb[28].mxu1 %v18343_v60  ;;  %v22323_v60 = vld [vmem:[%s24405_s28 + $0xf2c] ss:$16 sps:$4 sm:$0xff]  }
 0x26a   : > { %12622 = vmatpush1.bf16.msra.mxu0 %v22252_v58  ;;  %15334 = vmatpush1.bf16.msra.mxu1 %v22255_v59  ;;  %v665_v58 = vld [vmem:[%s24536_s30 + $0x870] sm:$0xff] }
 0x26b   : > { %12623 = vmatprep.subr.bf16.mxu0 %v22260_v63  ;;  %15335 = vmatprep.subr.bf16.mxu1 %v22263_v0  ;;  %v22320_v59 = vld [vmem:[%s24405_s28 + $0xf24] ss:$16 sps:$4 sm:$0xff]   ;;  %v18250_v61 = vcombine.high %v641_v57, %v665_v58  ;;  %v22321_v63 = vld [vmem:[%s24405_s28 + $0xf28] ss:$16 sps:$4 sm:$0xff]  }
 0x26c   : > { %12625 = vmatprep.mubr.bf16.mxu0 %v18010_v1  ;;  %15337 = vmatprep.mubr.bf16.mxu1 %v18010_v1  ;;  %v22326_v0 = vld [vmem:[%s24405_s28 + $0xf44] ss:$16 sps:$4 sm:$0xff]   ;;  %v22329_v1 = vld [vmem:[%s24405_s28 + $0xf4c] ss:$16 sps:$4 sm:$0xff]  }
 0x26e   : > { %12624 = vmatpush1.bf16.msra.mxu0 %v22258_v2  ;;  %15336 = vmatpush1.bf16.msra.mxu1 %v22261_v3  ;;  %v22324_v2 = vld [vmem:[%s24405_s28 + $0xf40] ss:$16 sps:$4 sm:$0xff]   ;;  %v22327_v3 = vld [vmem:[%s24405_s28 + $0xf48] ss:$16 sps:$4 sm:$0xff]  }
 0x26f   : > { %12706 = vmatprep.subr.bf16.mxu0 %v22266_v4  ;;  %15418 = vmatprep.subr.bf16.mxu1 %v22269_v5  ;;  %v18249_v4 = vcombine.low %v641_v57, %v665_v58  ;;  %v689_v5 = vld [vmem:[%s24536_s30 + $0x930] sm:$0xff] }
 0x270   : > { %v22378_v58 = vld [vmem:[%s24405_s28 + $0x1060] ss:$16 sps:$4 sm:$0xff]  }
 0x271   : > { %12626 = vmatmul.mubr.bf16.vlgmr.msra.gmra.mrb[0].mxu0 %v18009_v8  ;;  %15338 = vmatmul.mubr.bf16.vlgmr.msra.gmra.mrb[0].mxu1 %v18009_v8  ;;  %v22335_v8 = vld [vmem:[%s24405_s28 + $0xf6c] ss:$16 sps:$4 sm:$0xff]  }
 0x272   : > { %12707 = vmatpush1.bf16.msra.mxu0 %v22264_v6  ;;  %15419 = vmatpush1.bf16.msra.mxu1 %v22267_v7  ;;  %v713_v6 = vld [vmem:[%s24536_s30 + $0x9f0] sm:$0xff] }
 0x273   : > { %12708 = vmatprep.subr.bf16.mxu0 %v22272_v11  ;;  %15420 = vmatprep.subr.bf16.mxu1 %v22275_v12  ;;  %v22332_v7 = vld [vmem:[%s24405_s28 + $0xf64] ss:$16 sps:$4 sm:$0xff]   ;;  %v18298_v9 = vcombine.high %v689_v5, %v713_v6  ;;  %v22333_v11 = vld [vmem:[%s24405_s28 + $0xf68] ss:$16 sps:$4 sm:$0xff]  }
 0x274   : > { %12635 = vmatprep.mubr.bf16.mxu0 %v18058_v13  ;;  %15347 = vmatprep.mubr.bf16.mxu1 %v18058_v13  ;;  %v22338_v12 = vld [vmem:[%s24405_s28 + $0xf84] ss:$16 sps:$4 sm:$0xff]   ;;  %v22341_v13 = vld [vmem:[%s24405_s28 + $0xf8c] ss:$16 sps:$4 sm:$0xff]  }
 0x276   : > { %12709 = vmatpush1.bf16.msra.mxu0 %v22270_v14  ;;  %15421 = vmatpush1.bf16.msra.mxu1 %v22273_v15  ;;  %v22336_v14 = vld [vmem:[%s24405_s28 + $0xf80] ss:$16 sps:$4 sm:$0xff]   ;;  %v22339_v15 = vld [vmem:[%s24405_s28 + $0xf88] ss:$16 sps:$4 sm:$0xff]  }
 0x277   : > { %12710 = vmatprep.subr.bf16.mxu0 %v22278_v16  ;;  %15422 = vmatprep.subr.bf16.mxu1 %v22281_v17  ;;  %v18297_v16 = vcombine.low %v689_v5, %v713_v6  ;;  %v737_v17 = vld [vmem:[%s24536_s30 + $0xab0] sm:$0xff] }
 0x278   : > { %v22390_v6 = vld [vmem:[%s24405_s28 + $0x10a0] ss:$16 sps:$4 sm:$0xff]  }
 0x279   : > { %12636 = vmatmul.mubr.bf16.gmra.mrb[4].mxu0 %v18057_v20  ;;  %15348 = vmatmul.mubr.bf16.gmra.mrb[4].mxu1 %v18057_v20  ;;  %v22347_v20 = vld [vmem:[%s24405_s28 + $0xfac] ss:$16 sps:$4 sm:$0xff]  }
 0x27a   : > { %12711 = vmatpush1.bf16.msra.mxu0 %v22276_v18  ;;  %15423 = vmatpush1.bf16.msra.mxu1 %v22279_v19  ;;  %v761_v18 = vld [vmem:[%s24536_s30 + $0xb70] sm:$0xff] }
 0x27b   : > { %12712 = vmatprep.subr.bf16.mxu0 %v22284_v23  ;;  %15424 = vmatprep.subr.bf16.mxu1 %v22287_v24  ;;  %v22344_v19 = vld [vmem:[%s24405_s28 + $0xfa4] ss:$16 sps:$4 sm:$0xff]   ;;  %v18346_v21 = vcombine.high %v737_v17, %v761_v18  ;;  %v22345_v23 = vld [vmem:[%s24405_s28 + $0xfa8] ss:$16 sps:$4 sm:$0xff]  }
 0x27c   : > { %12645 = vmatprep.mubr.bf16.mxu0 %v18106_v25  ;;  %15357 = vmatprep.mubr.bf16.mxu1 %v18106_v25  ;;  %v22350_v24 = vld [vmem:[%s24405_s28 + $0xfc4] ss:$16 sps:$4 sm:$0xff]   ;;  %v22353_v25 = vld [vmem:[%s24405_s28 + $0xfcc] ss:$16 sps:$4 sm:$0xff]  }
 0x27e   : > { %12713 = vmatpush1.bf16.msra.mxu0 %v22282_v26  ;;  %15425 = vmatpush1.bf16.msra.mxu1 %v22285_v27  ;;  %v22348_v26 = vld [vmem:[%s24405_s28 + $0xfc0] ss:$16 sps:$4 sm:$0xff]   ;;  %v22351_v27 = vld [vmem:[%s24405_s28 + $0xfc8] ss:$16 sps:$4 sm:$0xff]  }
 0x27f   : > { %12714 = vmatprep.subr.bf16.mxu0 %v22290_v28  ;;  %15426 = vmatprep.subr.bf16.mxu1 %v22293_v29  ;;  %v18345_v28 = vcombine.low %v737_v17, %v761_v18  ;;  %v402_v29 = vld [vmem:[%s24536_s30 + $0x38] sm:$0xff]  ;;  %v22402_v18 = vld [vmem:[%s24405_s28 + $0x10e0] ss:$16 sps:$4 sm:$0xff]  }
 0x281   : > { %12646 = vmatmul.mubr.bf16.gmra.mrb[8].mxu0 %v18105_v32  ;;  %15358 = vmatmul.mubr.bf16.gmra.mrb[8].mxu1 %v18105_v32  ;;  %v22359_v32 = vld [vmem:[%s24405_s28 + $0xfec] ss:$16 sps:$4 sm:$0xff]  }
 0x282   : > { %12715 = vmatpush1.bf16.msra.mxu0 %v22288_v30  ;;  %15427 = vmatpush1.bf16.msra.mxu1 %v22291_v31  ;;  %v426_v30 = vld [vmem:[%s24536_s30 + $0xf8] sm:$0xff]  ;;  %v22356_v31 = vld [vmem:[%s24405_s28 + $0xfe4] ss:$16 sps:$4 sm:$0xff]  }
 0x283   : > { %12716 = vmatprep.subr.bf16.mxu0 %v22296_v35  ;;  %15428 = vmatprep.subr.bf16.mxu1 %v22299_v36  ;;  %v18012_v33 = vcombine.high %v402_v29, %v426_v30  ;;  %v22357_v35 = vld [vmem:[%s24405_s28 + $0xfe8] ss:$16 sps:$4 sm:$0xff]   ;;  %v22362_v36 = vld [vmem:[%s24405_s28 + $0x1004] ss:$16 sps:$4 sm:$0xff]  }
 0x284   : > { %12655 = vmatprep.mubr.bf16.mxu0 %v18154_v37  ;;  %15367 = vmatprep.mubr.bf16.mxu1 %v18154_v37  ;;  %v22365_v37 = vld [vmem:[%s24405_s28 + $0x100c] ss:$16 sps:$4 sm:$0xff]  }
 0x286   : > { %12717 = vmatpush1.bf16.msra.mxu0 %v22294_v38  ;;  %15429 = vmatpush1.bf16.msra.mxu1 %v22297_v39  ;;  %v22360_v38 = vld [vmem:[%s24405_s28 + $0x1000] ss:$16 sps:$4 sm:$0xff]   ;;  %v22363_v39 = vld [vmem:[%s24405_s28 + $0x1008] ss:$16 sps:$4 sm:$0xff]  }
 0x287   : > { %12718 = vmatprep.subr.bf16.mxu0 %v22302_v40  ;;  %15430 = vmatprep.subr.bf16.mxu1 %v22305_v41  ;;  %v18011_v40 = vcombine.low %v402_v29, %v426_v30  ;;  %v450_v41 = vld [vmem:[%s24536_s30 + $0x1b8] sm:$0xff]  ;;  %v22414_v30 = vld [vmem:[%s24405_s28 + $0x1120] ss:$16 sps:$4 sm:$0xff]  }
 0x289   : > { %12656 = vmatmul.mubr.bf16.gmra.mrb[12].mxu0 %v18153_v44  ;;  %15368 = vmatmul.mubr.bf16.gmra.mrb[12].mxu1 %v18153_v44  ;;  %v22371_v44 = vld [vmem:[%s24405_s28 + $0x102c] ss:$16 sps:$4 sm:$0xff]  }
 0x28a   : > { %12719 = vmatpush1.bf16.msra.mxu0 %v22300_v42  ;;  %15431 = vmatpush1.bf16.msra.mxu1 %v22303_v43  ;;  %v474_v42 = vld [vmem:[%s24536_s30 + $0x278] sm:$0xff]  ;;  %v22368_v43 = vld [vmem:[%s24405_s28 + $0x1024] ss:$16 sps:$4 sm:$0xff]  }
 0x28b   : > { %12720 = vmatprep.subr.bf16.mxu0 %v22308_v47  ;;  %15432 = vmatprep.subr.bf16.mxu1 %v22311_v48  ;;  %v18060_v45 = vcombine.high %v450_v41, %v474_v42  ;;  %v22369_v47 = vld [vmem:[%s24405_s28 + $0x1028] ss:$16 sps:$4 sm:$0xff]   ;;  %v22374_v48 = vld [vmem:[%s24405_s28 + $0x1044] ss:$16 sps:$4 sm:$0xff]  }
 0x28c   : > { %12665 = vmatprep.mubr.bf16.mxu0 %v18202_v49  ;;  %15377 = vmatprep.mubr.bf16.mxu1 %v18202_v49  ;;  %v22377_v49 = vld [vmem:[%s24405_s28 + $0x104c] ss:$16 sps:$4 sm:$0xff]  }
 0x28e   : > { %12721 = vmatpush1.bf16.msra.mxu0 %v22306_v50  ;;  %15433 = vmatpush1.bf16.msra.mxu1 %v22309_v51  ;;  %v22372_v50 = vld [vmem:[%s24405_s28 + $0x1040] ss:$16 sps:$4 sm:$0xff]   ;;  %v22375_v51 = vld [vmem:[%s24405_s28 + $0x1048] ss:$16 sps:$4 sm:$0xff]  }
 0x28f   : > { %12722 = vmatprep.subr.bf16.mxu0 %v22314_v52  ;;  %15434 = vmatprep.subr.bf16.mxu1 %v22317_v53  ;;  %v18059_v52 = vcombine.low %v450_v41, %v474_v42  ;;  %v498_v53 = vld [vmem:[%s24536_s30 + $0x338] sm:$0xff]  ;;  %v22426_v42 = vld [vmem:[%s24405_s28 + $0x1160] ss:$16 sps:$4 sm:$0xff]  }
 0x291   : > { %12666 = vmatmul.mubr.bf16.gmra.mrb[16].mxu0 %v18201_v56  ;;  %15378 = vmatmul.mubr.bf16.gmra.mrb[16].mxu1 %v18201_v56  ;;  %v22383_v56 = vld [vmem:[%s24405_s28 + $0x106c] ss:$16 sps:$4 sm:$0xff]  }
 0x292   : > { %12723 = vmatpush1.bf16.msra.mxu0 %v22312_v54  ;;  %15435 = vmatpush1.bf16.msra.mxu1 %v22315_v55  ;;  %v522_v54 = vld [vmem:[%s24536_s30 + $0x3f8] sm:$0xff]  ;;  %v22380_v55 = vld [vmem:[%s24405_s28 + $0x1064] ss:$16 sps:$4 sm:$0xff]  }
 0x293   : > { %12724 = vmatprep.subr.bf16.mxu0 %v22320_v59  ;;  %15436 = vmatprep.subr.bf16.mxu1 %v22323_v60  ;;  %v18108_v57 = vcombine.high %v498_v53, %v522_v54  ;;  %v22381_v59 = vld [vmem:[%s24405_s28 + $0x1068] ss:$16 sps:$4 sm:$0xff]   ;;  %v22386_v60 = vld [vmem:[%s24405_s28 + $0x1084] ss:$16 sps:$4 sm:$0xff]  }
 0x294   : > { %12675 = vmatprep.mubr.bf16.mxu0 %v18250_v61  ;;  %15387 = vmatprep.mubr.bf16.mxu1 %v18250_v61  ;;  %v22389_v61 = vld [vmem:[%s24405_s28 + $0x108c] ss:$16 sps:$4 sm:$0xff]  }
 0x296   : > { %12725 = vmatpush1.bf16.msra.mxu0 %v22318_v62  ;;  %15437 = vmatpush1.bf16.msra.mxu1 %v22321_v63  ;;  %v22384_v62 = vld [vmem:[%s24405_s28 + $0x1080] ss:$16 sps:$4 sm:$0xff]   ;;  %v22387_v63 = vld [vmem:[%s24405_s28 + $0x1088] ss:$16 sps:$4 sm:$0xff]  }
 0x297   : > { %12726 = vmatprep.subr.bf16.mxu0 %v22326_v0  ;;  %15438 = vmatprep.subr.bf16.mxu1 %v22329_v1  ;;  %v18107_v0 = vcombine.low %v498_v53, %v522_v54  ;;  %v546_v1 = vld [vmem:[%s24536_s30 + $0x4b8] sm:$0xff]  ;;  %v22438_v54 = vld [vmem:[%s24405_s28 + $0x11a0] ss:$16 sps:$4 sm:$0xff]  }
 0x299   : > { %12676 = vmatmul.mubr.bf16.gmra.mrb[20].mxu0 %v18249_v4  ;;  %15388 = vmatmul.mubr.bf16.gmra.mrb[20].mxu1 %v18249_v4  ;;  %v22395_v4 = vld [vmem:[%s24405_s28 + $0x10ac] ss:$16 sps:$4 sm:$0xff]  }
 0x29a   : > { %12727 = vmatpush1.bf16.msra.mxu0 %v22324_v2  ;;  %15439 = vmatpush1.bf16.msra.mxu1 %v22327_v3  ;;  %v570_v2 = vld [vmem:[%s24536_s30 + $0x578] sm:$0xff]  ;;  %v22392_v3 = vld [vmem:[%s24405_s28 + $0x10a4] ss:$16 sps:$4 sm:$0xff]  }
 0x29b   : > { %12728 = vmatprep.subr.bf16.mxu0 %v22332_v7  ;;  %15440 = vmatprep.subr.bf16.mxu1 %v22335_v8  ;;  %v18156_v5 = vcombine.high %v546_v1, %v570_v2  ;;  %v22393_v7 = vld [vmem:[%s24405_s28 + $0x10a8] ss:$16 sps:$4 sm:$0xff]   ;;  %v22398_v8 = vld [vmem:[%s24405_s28 + $0x10c4] ss:$16 sps:$4 sm:$0xff]  }
 0x29c   : > { %12685 = vmatprep.mubr.bf16.mxu0 %v18298_v9  ;;  %15397 = vmatprep.mubr.bf16.mxu1 %v18298_v9  ;;  %v22401_v9 = vld [vmem:[%s24405_s28 + $0x10cc] ss:$16 sps:$4 sm:$0xff]  }
 0x29e   : > { %12729 = vmatpush1.bf16.msra.mxu0 %v22330_v10  ;;  %15441 = vmatpush1.bf16.msra.mxu1 %v22333_v11  ;;  %v22396_v10 = vld [vmem:[%s24405_s28 + $0x10c0] ss:$16 sps:$4 sm:$0xff]   ;;  %v22399_v11 = vld [vmem:[%s24405_s28 + $0x10c8] ss:$16 sps:$4 sm:$0xff]  }
 0x29f   : > { %12730 = vmatprep.subr.bf16.mxu0 %v22338_v12  ;;  %15442 = vmatprep.subr.bf16.mxu1 %v22341_v13  ;;  %v18155_v12 = vcombine.low %v546_v1, %v570_v2  ;;  %v594_v13 = vld [vmem:[%s24536_s30 + $0x638] sm:$0xff]  ;;  %v22450_v2 = vld [vmem:[%s24405_s28 + $0x11e0] ss:$16 sps:$4 sm:$0xff]  }
 0x2a1   : > { %12686 = vmatmul.mubr.bf16.gmra.mrb[24].mxu0 %v18297_v16  ;;  %15398 = vmatmul.mubr.bf16.gmra.mrb[24].mxu1 %v18297_v16  ;;  %v22407_v16 = vld [vmem:[%s24405_s28 + $0x10ec] ss:$16 sps:$4 sm:$0xff]  }
 0x2a2   : > { %12731 = vmatpush1.bf16.msra.mxu0 %v22336_v14  ;;  %15443 = vmatpush1.bf16.msra.mxu1 %v22339_v15  ;;  %v618_v14 = vld [vmem:[%s24536_s30 + $0x6f8] sm:$0xff]  ;;  %v22404_v15 = vld [vmem:[%s24405_s28 + $0x10e4] ss:$16 sps:$4 sm:$0xff]  }
 0x2a3   : > { %12732 = vmatprep.subr.bf16.mxu0 %v22344_v19  ;;  %15444 = vmatprep.subr.bf16.mxu1 %v22347_v20  ;;  %v18204_v17 = vcombine.high %v594_v13, %v618_v14  ;;  %v22405_v19 = vld [vmem:[%s24405_s28 + $0x10e8] ss:$16 sps:$4 sm:$0xff]   ;;  %v22410_v20 = vld [vmem:[%s24405_s28 + $0x1104] ss:$16 sps:$4 sm:$0xff]  }
 0x2a4   : > { %12695 = vmatprep.mubr.bf16.mxu0 %v18346_v21  ;;  %15407 = vmatprep.mubr.bf16.mxu1 %v18346_v21  ;;  %v22413_v21 = vld [vmem:[%s24405_s28 + $0x110c] ss:$16 sps:$4 sm:$0xff]  }
 0x2a6   : > { %12733 = vmatpush1.bf16.msra.mxu0 %v22342_v22  ;;  %15445 = vmatpush1.bf16.msra.mxu1 %v22345_v23  ;;  %v22408_v22 = vld [vmem:[%s24405_s28 + $0x1100] ss:$16 sps:$4 sm:$0xff]   ;;  %v22411_v23 = vld [vmem:[%s24405_s28 + $0x1108] ss:$16 sps:$4 sm:$0xff]  }
 0x2a7   : > { %12734 = vmatprep.subr.bf16.mxu0 %v22350_v24  ;;  %15446 = vmatprep.subr.bf16.mxu1 %v22353_v25  ;;  %v18203_v24 = vcombine.low %v594_v13, %v618_v14  ;;  %v642_v25 = vld [vmem:[%s24536_s30 + $0x7b8] sm:$0xff]  ;;  %v22462_v14 = vld [vmem:[%s24405_s28 + $0x1220] ss:$16 sps:$4 sm:$0xff]  }
 0x2a9   : > { %12696 = vmatmul.mubr.bf16.gmra.mrb[28].mxu0 %v18345_v28  ;;  %15408 = vmatmul.mubr.bf16.gmra.mrb[28].mxu1 %v18345_v28  ;;  %v22419_v28 = vld [vmem:[%s24405_s28 + $0x112c] ss:$16 sps:$4 sm:$0xff]  }
 0x2aa   : > { %12735 = vmatpush1.bf16.msra.mxu0 %v22348_v26  ;;  %15447 = vmatpush1.bf16.msra.mxu1 %v22351_v27  ;;  %v666_v26 = vld [vmem:[%s24536_s30 + $0x878] sm:$0xff]  ;;  %v22416_v27 = vld [vmem:[%s24405_s28 + $0x1124] ss:$16 sps:$4 sm:$0xff]  }
 0x2ab   : > { %12736 = vmatprep.subr.bf16.mxu0 %v22356_v31  ;;  %15448 = vmatprep.subr.bf16.mxu1 %v22359_v32  ;;  %v18252_v29 = vcombine.high %v642_v25, %v666_v26  ;;  %v22417_v31 = vld [vmem:[%s24405_s28 + $0x1128] ss:$16 sps:$4 sm:$0xff]   ;;  %v22422_v32 = vld [vmem:[%s24405_s28 + $0x1144] ss:$16 sps:$4 sm:$0xff]  }
 0x2ac   : > { %12738 = vmatprep.mubr.bf16.mxu0 %v18012_v33  ;;  %15450 = vmatprep.mubr.bf16.mxu1 %v18012_v33  ;;  %v22425_v33 = vld [vmem:[%s24405_s28 + $0x114c] ss:$16 sps:$4 sm:$0xff]  }
 0x2ae   : > { %12737 = vmatpush1.bf16.msra.mxu0 %v22354_v34  ;;  %15449 = vmatpush1.bf16.msra.mxu1 %v22357_v35  ;;  %v22420_v34 = vld [vmem:[%s24405_s28 + $0x1140] ss:$16 sps:$4 sm:$0xff]   ;;  %v22423_v35 = vld [vmem:[%s24405_s28 + $0x1148] ss:$16 sps:$4 sm:$0xff]  }
 0x2af   : > { %12819 = vmatprep.subr.bf16.mxu0 %v22362_v36  ;;  %15531 = vmatprep.subr.bf16.mxu1 %v22365_v37  ;;  %v18251_v36 = vcombine.low %v642_v25, %v666_v26  ;;  %v690_v37 = vld [vmem:[%s24536_s30 + $0x938] sm:$0xff]  ;;  %v22474_v26 = vld [vmem:[%s24405_s28 + $0x1260] ss:$16 sps:$4 sm:$0xff]  }
 0x2b1   : > { %12739 = vmatmul.mubr.bf16.vlgmr.msra.gmra.mrb[0].mxu0 %v18011_v40  ;;  %15451 = vmatmul.mubr.bf16.vlgmr.msra.gmra.mrb[0].mxu1 %v18011_v40  ;;  %v22431_v40 = vld [vmem:[%s24405_s28 + $0x116c] ss:$16 sps:$4 sm:$0xff]  }
 0x2b2   : > { %12820 = vmatpush1.bf16.msra.mxu0 %v22360_v38  ;;  %15532 = vmatpush1.bf16.msra.mxu1 %v22363_v39  ;;  %v714_v38 = vld [vmem:[%s24536_s30 + $0x9f8] sm:$0xff]  ;;  %v22428_v39 = vld [vmem:[%s24405_s28 + $0x1164] ss:$16 sps:$4 sm:$0xff]  }
 0x2b3   : > { %12821 = vmatprep.subr.bf16.mxu0 %v22368_v43  ;;  %15533 = vmatprep.subr.bf16.mxu1 %v22371_v44  ;;  %v18300_v41 = vcombine.high %v690_v37, %v714_v38  ;;  %v22429_v43 = vld [vmem:[%s24405_s28 + $0x1168] ss:$16 sps:$4 sm:$0xff]   ;;  %v22434_v44 = vld [vmem:[%s24405_s28 + $0x1184] ss:$16 sps:$4 sm:$0xff]  }
 0x2b4   : > { %12748 = vmatprep.mubr.bf16.mxu0 %v18060_v45  ;;  %15460 = vmatprep.mubr.bf16.mxu1 %v18060_v45  ;;  %v22437_v45 = vld [vmem:[%s24405_s28 + $0x118c] ss:$16 sps:$4 sm:$0xff]  }
 0x2b6   : > { %12822 = vmatpush1.bf16.msra.mxu0 %v22366_v46  ;;  %15534 = vmatpush1.bf16.msra.mxu1 %v22369_v47  ;;  %v22432_v46 = vld [vmem:[%s24405_s28 + $0x1180] ss:$16 sps:$4 sm:$0xff]   ;;  %v22435_v47 = vld [vmem:[%s24405_s28 + $0x1188] ss:$16 sps:$4 sm:$0xff]  }
 0x2b7   : > { %12823 = vmatprep.subr.bf16.mxu0 %v22374_v48  ;;  %15535 = vmatprep.subr.bf16.mxu1 %v22377_v49  ;;  %v18299_v48 = vcombine.low %v690_v37, %v714_v38  ;;  %v738_v49 = vld [vmem:[%s24536_s30 + $0xab8] sm:$0xff]  ;;  %v22486_v38 = vld [vmem:[%s24405_s28 + $0x12a0] ss:$16 sps:$4 sm:$0xff]  }
 0x2b9   : > { %12749 = vmatmul.mubr.bf16.gmra.mrb[4].mxu0 %v18059_v52  ;;  %15461 = vmatmul.mubr.bf16.gmra.mrb[4].mxu1 %v18059_v52  ;;  %v22443_v52 = vld [vmem:[%s24405_s28 + $0x11ac] ss:$16 sps:$4 sm:$0xff]  }
 0x2ba   : > { %12824 = vmatpush1.bf16.msra.mxu0 %v22372_v50  ;;  %15536 = vmatpush1.bf16.msra.mxu1 %v22375_v51  ;;  %v762_v50 = vld [vmem:[%s24536_s30 + $0xb78] sm:$0xff]  ;;  %v22440_v51 = vld [vmem:[%s24405_s28 + $0x11a4] ss:$16 sps:$4 sm:$0xff]  }
 0x2bb   : > { %12825 = vmatprep.subr.bf16.mxu0 %v22380_v55  ;;  %15537 = vmatprep.subr.bf16.mxu1 %v22383_v56  ;;  %v18348_v53 = vcombine.high %v738_v49, %v762_v50  ;;  %v22441_v55 = vld [vmem:[%s24405_s28 + $0x11a8] ss:$16 sps:$4 sm:$0xff]   ;;  %v22446_v56 = vld [vmem:[%s24405_s28 + $0x11c4] ss:$16 sps:$4 sm:$0xff]  }
 0x2bc   : > { %12758 = vmatprep.mubr.bf16.mxu0 %v18108_v57  ;;  %15470 = vmatprep.mubr.bf16.mxu1 %v18108_v57  ;;  %v22449_v57 = vld [vmem:[%s24405_s28 + $0x11cc] ss:$16 sps:$4 sm:$0xff]  }
 0x2be   : > { %12826 = vmatpush1.bf16.msra.mxu0 %v22378_v58  ;;  %15538 = vmatpush1.bf16.msra.mxu1 %v22381_v59  ;;  %v22444_v58 = vld [vmem:[%s24405_s28 + $0x11c0] ss:$16 sps:$4 sm:$0xff]   ;;  %v22447_v59 = vld [vmem:[%s24405_s28 + $0x11c8] ss:$16 sps:$4 sm:$0xff]  }
 0x2bf   : > { %12827 = vmatprep.subr.bf16.mxu0 %v22386_v60  ;;  %15539 = vmatprep.subr.bf16.mxu1 %v22389_v61  ;;  %v18347_v60 = vcombine.low %v738_v49, %v762_v50  ;;  %v403_v61 = vld [vmem:[%s24536_s30 + $0x40] sm:$0xff] }
 0x2c0   : > { %v22498_v50 = vld [vmem:[%s24405_s28 + $0x12e0] ss:$16 sps:$4 sm:$0xff]  }
 0x2c1   : > { %12759 = vmatmul.mubr.bf16.gmra.mrb[8].mxu0 %v18107_v0  ;;  %15471 = vmatmul.mubr.bf16.gmra.mrb[8].mxu1 %v18107_v0  ;;  %v22455_v0 = vld [vmem:[%s24405_s28 + $0x11ec] ss:$16 sps:$4 sm:$0xff]  }
 0x2c2   : > { %12828 = vmatpush1.bf16.msra.mxu0 %v22384_v62  ;;  %15540 = vmatpush1.bf16.msra.mxu1 %v22387_v63  ;;  %v427_v62 = vld [vmem:[%s24536_s30 + $0x100] sm:$0xff] }
 0x2c3   : > { %12829 = vmatprep.subr.bf16.mxu0 %v22392_v3  ;;  %15541 = vmatprep.subr.bf16.mxu1 %v22395_v4  ;;  %v22452_v63 = vld [vmem:[%s24405_s28 + $0x11e4] ss:$16 sps:$4 sm:$0xff]   ;;  %v18014_v1 = vcombine.high %v403_v61, %v427_v62  ;;  %v22453_v3 = vld [vmem:[%s24405_s28 + $0x11e8] ss:$16 sps:$4 sm:$0xff]  }
 0x2c4   : > { %12768 = vmatprep.mubr.bf16.mxu0 %v18156_v5  ;;  %15480 = vmatprep.mubr.bf16.mxu1 %v18156_v5  ;;  %v22458_v4 = vld [vmem:[%s24405_s28 + $0x1204] ss:$16 sps:$4 sm:$0xff]   ;;  %v22461_v5 = vld [vmem:[%s24405_s28 + $0x120c] ss:$16 sps:$4 sm:$0xff]  }
 0x2c6   : > { %12830 = vmatpush1.bf16.msra.mxu0 %v22390_v6  ;;  %15542 = vmatpush1.bf16.msra.mxu1 %v22393_v7  ;;  %v22456_v6 = vld [vmem:[%s24405_s28 + $0x1200] ss:$16 sps:$4 sm:$0xff]   ;;  %v22459_v7 = vld [vmem:[%s24405_s28 + $0x1208] ss:$16 sps:$4 sm:$0xff]  }
 0x2c7   : > { %12831 = vmatprep.subr.bf16.mxu0 %v22398_v8  ;;  %15543 = vmatprep.subr.bf16.mxu1 %v22401_v9  ;;  %v18013_v8 = vcombine.low %v403_v61, %v427_v62  ;;  %v451_v9 = vld [vmem:[%s24536_s30 + $0x1c0] sm:$0xff] }
 0x2c8   : > { %v22510_v62 = vld [vmem:[%s24405_s28 + $0x1320] ss:$16 sps:$4 sm:$0xff]  }
 0x2c9   : > { %12769 = vmatmul.mubr.bf16.gmra.mrb[12].mxu0 %v18155_v12  ;;  %15481 = vmatmul.mubr.bf16.gmra.mrb[12].mxu1 %v18155_v12  ;;  %v22467_v12 = vld [vmem:[%s24405_s28 + $0x122c] ss:$16 sps:$4 sm:$0xff]  }
 0x2ca   : > { %12832 = vmatpush1.bf16.msra.mxu0 %v22396_v10  ;;  %15544 = vmatpush1.bf16.msra.mxu1 %v22399_v11  ;;  %v475_v10 = vld [vmem:[%s24536_s30 + $0x280] sm:$0xff] }
 0x2cb   : > { %12833 = vmatprep.subr.bf16.mxu0 %v22404_v15  ;;  %15545 = vmatprep.subr.bf16.mxu1 %v22407_v16  ;;  %v22464_v11 = vld [vmem:[%s24405_s28 + $0x1224] ss:$16 sps:$4 sm:$0xff]   ;;  %v18062_v13 = vcombine.high %v451_v9, %v475_v10  ;;  %v22465_v15 = vld [vmem:[%s24405_s28 + $0x1228] ss:$16 sps:$4 sm:$0xff]  }
 0x2cc   : > { %12778 = vmatprep.mubr.bf16.mxu0 %v18204_v17  ;;  %15490 = vmatprep.mubr.bf16.mxu1 %v18204_v17  ;;  %v22470_v16 = vld [vmem:[%s24405_s28 + $0x1244] ss:$16 sps:$4 sm:$0xff]   ;;  %v22473_v17 = vld [vmem:[%s24405_s28 + $0x124c] ss:$16 sps:$4 sm:$0xff]  }
 0x2ce   : > { %12834 = vmatpush1.bf16.msra.mxu0 %v22402_v18  ;;  %15546 = vmatpush1.bf16.msra.mxu1 %v22405_v19  ;;  %v22468_v18 = vld [vmem:[%s24405_s28 + $0x1240] ss:$16 sps:$4 sm:$0xff]   ;;  %v22471_v19 = vld [vmem:[%s24405_s28 + $0x1248] ss:$16 sps:$4 sm:$0xff]  }
 0x2cf   : > { %12835 = vmatprep.subr.bf16.mxu0 %v22410_v20  ;;  %15547 = vmatprep.subr.bf16.mxu1 %v22413_v21  ;;  %v18061_v20 = vcombine.low %v451_v9, %v475_v10  ;;  %v499_v21 = vld [vmem:[%s24536_s30 + $0x340] sm:$0xff] }
 0x2d0   : > { %v22522_v10 = vld [vmem:[%s24405_s28 + $0x1360] ss:$16 sps:$4 sm:$0xff]  }
 0x2d1   : > { %12779 = vmatmul.mubr.bf16.gmra.mrb[16].mxu0 %v18203_v24  ;;  %15491 = vmatmul.mubr.bf16.gmra.mrb[16].mxu1 %v18203_v24  ;;  %v22479_v24 = vld [vmem:[%s24405_s28 + $0x126c] ss:$16 sps:$4 sm:$0xff]  }
 0x2d2   : > { %12836 = vmatpush1.bf16.msra.mxu0 %v22408_v22  ;;  %15548 = vmatpush1.bf16.msra.mxu1 %v22411_v23  ;;  %v523_v22 = vld [vmem:[%s24536_s30 + $0x400] sm:$0xff] }
 0x2d3   : > { %12837 = vmatprep.subr.bf16.mxu0 %v22416_v27  ;;  %15549 = vmatprep.subr.bf16.mxu1 %v22419_v28  ;;  %v22476_v23 = vld [vmem:[%s24405_s28 + $0x1264] ss:$16 sps:$4 sm:$0xff]   ;;  %v18110_v25 = vcombine.high %v499_v21, %v523_v22  ;;  %v22477_v27 = vld [vmem:[%s24405_s28 + $0x1268] ss:$16 sps:$4 sm:$0xff]  }
 0x2d4   : > { %12788 = vmatprep.mubr.bf16.mxu0 %v18252_v29  ;;  %15500 = vmatprep.mubr.bf16.mxu1 %v18252_v29  ;;  %v22482_v28 = vld [vmem:[%s24405_s28 + $0x1284] ss:$16 sps:$4 sm:$0xff]   ;;  %v22485_v29 = vld [vmem:[%s24405_s28 + $0x128c] ss:$16 sps:$4 sm:$0xff]  }
 0x2d6   : > { %12838 = vmatpush1.bf16.msra.mxu0 %v22414_v30  ;;  %15550 = vmatpush1.bf16.msra.mxu1 %v22417_v31  ;;  %v22480_v30 = vld [vmem:[%s24405_s28 + $0x1280] ss:$16 sps:$4 sm:$0xff]   ;;  %v22483_v31 = vld [vmem:[%s24405_s28 + $0x1288] ss:$16 sps:$4 sm:$0xff]  }
 0x2d7   : > { %12839 = vmatprep.subr.bf16.mxu0 %v22422_v32  ;;  %15551 = vmatprep.subr.bf16.mxu1 %v22425_v33  ;;  %v18109_v32 = vcombine.low %v499_v21, %v523_v22  ;;  %v547_v33 = vld [vmem:[%s24536_s30 + $0x4c0] sm:$0xff] }
 0x2d8   : > { %v22534_v22 = vld [vmem:[%s24405_s28 + $0x13a0] ss:$16 sps:$4 sm:$0xff]  }
 0x2d9   : > { %12789 = vmatmul.mubr.bf16.gmra.mrb[20].mxu0 %v18251_v36  ;;  %15501 = vmatmul.mubr.bf16.gmra.mrb[20].mxu1 %v18251_v36  ;;  %v22491_v36 = vld [vmem:[%s24405_s28 + $0x12ac] ss:$16 sps:$4 sm:$0xff]  }
 0x2da   : > { %12840 = vmatpush1.bf16.msra.mxu0 %v22420_v34  ;;  %15552 = vmatpush1.bf16.msra.mxu1 %v22423_v35  ;;  %v571_v34 = vld [vmem:[%s24536_s30 + $0x580] sm:$0xff] }
 0x2db   : > { %12841 = vmatprep.subr.bf16.mxu0 %v22428_v39  ;;  %15553 = vmatprep.subr.bf16.mxu1 %v22431_v40  ;;  %v22488_v35 = vld [vmem:[%s24405_s28 + $0x12a4] ss:$16 sps:$4 sm:$0xff]   ;;  %v18158_v37 = vcombine.high %v547_v33, %v571_v34  ;;  %v22489_v39 = vld [vmem:[%s24405_s28 + $0x12a8] ss:$16 sps:$4 sm:$0xff]  }
 0x2dc   : > { %12798 = vmatprep.mubr.bf16.mxu0 %v18300_v41  ;;  %15510 = vmatprep.mubr.bf16.mxu1 %v18300_v41  ;;  %v22494_v40 = vld [vmem:[%s24405_s28 + $0x12c4] ss:$16 sps:$4 sm:$0xff]   ;;  %v22497_v41 = vld [vmem:[%s24405_s28 + $0x12cc] ss:$16 sps:$4 sm:$0xff]  }
 0x2de   : > { %12842 = vmatpush1.bf16.msra.mxu0 %v22426_v42  ;;  %15554 = vmatpush1.bf16.msra.mxu1 %v22429_v43  ;;  %v22492_v42 = vld [vmem:[%s24405_s28 + $0x12c0] ss:$16 sps:$4 sm:$0xff]   ;;  %v22495_v43 = vld [vmem:[%s24405_s28 + $0x12c8] ss:$16 sps:$4 sm:$0xff]  }
 0x2df   : > { %12843 = vmatprep.subr.bf16.mxu0 %v22434_v44  ;;  %15555 = vmatprep.subr.bf16.mxu1 %v22437_v45  ;;  %v18157_v44 = vcombine.low %v547_v33, %v571_v34  ;;  %v595_v45 = vld [vmem:[%s24536_s30 + $0x640] sm:$0xff] }
 0x2e0   : > { %v22546_v34 = vld [vmem:[%s24405_s28 + $0x13e0] ss:$16 sps:$4 sm:$0xff]  }
 0x2e1   : > { %12799 = vmatmul.mubr.bf16.gmra.mrb[24].mxu0 %v18299_v48  ;;  %15511 = vmatmul.mubr.bf16.gmra.mrb[24].mxu1 %v18299_v48  ;;  %v22503_v48 = vld [vmem:[%s24405_s28 + $0x12ec] ss:$16 sps:$4 sm:$0xff]  }
 0x2e2   : > { %12844 = vmatpush1.bf16.msra.mxu0 %v22432_v46  ;;  %15556 = vmatpush1.bf16.msra.mxu1 %v22435_v47  ;;  %v619_v46 = vld [vmem:[%s24536_s30 + $0x700] sm:$0xff] }
 0x2e3   : > { %12845 = vmatprep.subr.bf16.mxu0 %v22440_v51  ;;  %15557 = vmatprep.subr.bf16.mxu1 %v22443_v52  ;;  %v22500_v47 = vld [vmem:[%s24405_s28 + $0x12e4] ss:$16 sps:$4 sm:$0xff]   ;;  %v18206_v49 = vcombine.high %v595_v45, %v619_v46  ;;  %v22501_v51 = vld [vmem:[%s24405_s28 + $0x12e8] ss:$16 sps:$4 sm:$0xff]  }
 0x2e4   : > { %12808 = vmatprep.mubr.bf16.mxu0 %v18348_v53  ;;  %15520 = vmatprep.mubr.bf16.mxu1 %v18348_v53  ;;  %v22506_v52 = vld [vmem:[%s24405_s28 + $0x1304] ss:$16 sps:$4 sm:$0xff]   ;;  %v22509_v53 = vld [vmem:[%s24405_s28 + $0x130c] ss:$16 sps:$4 sm:$0xff]  }
 0x2e6   : > { %12846 = vmatpush1.bf16.msra.mxu0 %v22438_v54  ;;  %15558 = vmatpush1.bf16.msra.mxu1 %v22441_v55  ;;  %v22504_v54 = vld [vmem:[%s24405_s28 + $0x1300] ss:$16 sps:$4 sm:$0xff]   ;;  %v22507_v55 = vld [vmem:[%s24405_s28 + $0x1308] ss:$16 sps:$4 sm:$0xff]  }
 0x2e7   : > { %12847 = vmatprep.subr.bf16.mxu0 %v22446_v56  ;;  %15559 = vmatprep.subr.bf16.mxu1 %v22449_v57  ;;  %v18205_v56 = vcombine.low %v595_v45, %v619_v46  ;;  %v643_v57 = vld [vmem:[%s24536_s30 + $0x7c0] sm:$0xff] }
 0x2e8   : > { %v22558_v46 = vld [vmem:[%s24405_s28 + $0x1420] ss:$16 sps:$4 sm:$0xff]  }
 0x2e9   : > { %12809 = vmatmul.mubr.bf16.gmra.mrb[28].mxu0 %v18347_v60  ;;  %15521 = vmatmul.mubr.bf16.gmra.mrb[28].mxu1 %v18347_v60  ;;  %v22515_v60 = vld [vmem:[%s24405_s28 + $0x132c] ss:$16 sps:$4 sm:$0xff]  }
 0x2ea   : > { %12848 = vmatpush1.bf16.msra.mxu0 %v22444_v58  ;;  %15560 = vmatpush1.bf16.msra.mxu1 %v22447_v59  ;;  %v667_v58 = vld [vmem:[%s24536_s30 + $0x880] sm:$0xff] }
 0x2eb   : > { %12849 = vmatprep.subr.bf16.mxu0 %v22452_v63  ;;  %15561 = vmatprep.subr.bf16.mxu1 %v22455_v0  ;;  %v22512_v59 = vld [vmem:[%s24405_s28 + $0x1324] ss:$16 sps:$4 sm:$0xff]   ;;  %v18254_v61 = vcombine.high %v643_v57, %v667_v58  ;;  %v22513_v63 = vld [vmem:[%s24405_s28 + $0x1328] ss:$16 sps:$4 sm:$0xff]  }
 0x2ec   : > { %12851 = vmatprep.mubr.bf16.mxu0 %v18014_v1  ;;  %15563 = vmatprep.mubr.bf16.mxu1 %v18014_v1  ;;  %v22518_v0 = vld [vmem:[%s24405_s28 + $0x1344] ss:$16 sps:$4 sm:$0xff]   ;;  %v22521_v1 = vld [vmem:[%s24405_s28 + $0x134c] ss:$16 sps:$4 sm:$0xff]  }
 0x2ee   : > { %12850 = vmatpush1.bf16.msra.mxu0 %v22450_v2  ;;  %15562 = vmatpush1.bf16.msra.mxu1 %v22453_v3  ;;  %v22516_v2 = vld [vmem:[%s24405_s28 + $0x1340] ss:$16 sps:$4 sm:$0xff]   ;;  %v22519_v3 = vld [vmem:[%s24405_s28 + $0x1348] ss:$16 sps:$4 sm:$0xff]  }
 0x2ef   : > { %12932 = vmatprep.subr.bf16.mxu0 %v22458_v4  ;;  %15644 = vmatprep.subr.bf16.mxu1 %v22461_v5  ;;  %v18253_v4 = vcombine.low %v643_v57, %v667_v58  ;;  %v691_v5 = vld [vmem:[%s24536_s30 + $0x940] sm:$0xff] }
 0x2f0   : > { %v22570_v58 = vld [vmem:[%s24405_s28 + $0x1460] ss:$16 sps:$4 sm:$0xff]  }
 0x2f1   : > { %12852 = vmatmul.mubr.bf16.vlgmr.msra.gmra.mrb[0].mxu0 %v18013_v8  ;;  %15564 = vmatmul.mubr.bf16.vlgmr.msra.gmra.mrb[0].mxu1 %v18013_v8  ;;  %v22527_v8 = vld [vmem:[%s24405_s28 + $0x136c] ss:$16 sps:$4 sm:$0xff]  }
 0x2f2   : > { %12933 = vmatpush1.bf16.msra.mxu0 %v22456_v6  ;;  %15645 = vmatpush1.bf16.msra.mxu1 %v22459_v7  ;;  %v715_v6 = vld [vmem:[%s24536_s30 + $0xa00] sm:$0xff] }
 0x2f3   : > { %12934 = vmatprep.subr.bf16.mxu0 %v22464_v11  ;;  %15646 = vmatprep.subr.bf16.mxu1 %v22467_v12  ;;  %v22524_v7 = vld [vmem:[%s24405_s28 + $0x1364] ss:$16 sps:$4 sm:$0xff]   ;;  %v18302_v9 = vcombine.high %v691_v5, %v715_v6  ;;  %v22525_v11 = vld [vmem:[%s24405_s28 + $0x1368] ss:$16 sps:$4 sm:$0xff]  }
 0x2f4   : > { %12861 = vmatprep.mubr.bf16.mxu0 %v18062_v13  ;;  %15573 = vmatprep.mubr.bf16.mxu1 %v18062_v13  ;;  %v22530_v12 = vld [vmem:[%s24405_s28 + $0x1384] ss:$16 sps:$4 sm:$0xff]   ;;  %v22533_v13 = vld [vmem:[%s24405_s28 + $0x138c] ss:$16 sps:$4 sm:$0xff]  }
 0x2f6   : > { %12935 = vmatpush1.bf16.msra.mxu0 %v22462_v14  ;;  %15647 = vmatpush1.bf16.msra.mxu1 %v22465_v15  ;;  %v22528_v14 = vld [vmem:[%s24405_s28 + $0x1380] ss:$16 sps:$4 sm:$0xff]   ;;  %v22531_v15 = vld [vmem:[%s24405_s28 + $0x1388] ss:$16 sps:$4 sm:$0xff]  }
 0x2f7   : > { %12936 = vmatprep.subr.bf16.mxu0 %v22470_v16  ;;  %15648 = vmatprep.subr.bf16.mxu1 %v22473_v17  ;;  %v18301_v16 = vcombine.low %v691_v5, %v715_v6  ;;  %v739_v17 = vld [vmem:[%s24536_s30 + $0xac0] sm:$0xff] }
 0x2f8   : > { %v22582_v6 = vld [vmem:[%s24405_s28 + $0x14a0] ss:$16 sps:$4 sm:$0xff]  }
 0x2f9   : > { %12862 = vmatmul.mubr.bf16.gmra.mrb[4].mxu0 %v18061_v20  ;;  %15574 = vmatmul.mubr.bf16.gmra.mrb[4].mxu1 %v18061_v20  ;;  %v22539_v20 = vld [vmem:[%s24405_s28 + $0x13ac] ss:$16 sps:$4 sm:$0xff]  }
 0x2fa   : > { %12937 = vmatpush1.bf16.msra.mxu0 %v22468_v18  ;;  %15649 = vmatpush1.bf16.msra.mxu1 %v22471_v19  ;;  %v763_v18 = vld [vmem:[%s24536_s30 + $0xb80] sm:$0xff] }
 0x2fb   : > { %12938 = vmatprep.subr.bf16.mxu0 %v22476_v23  ;;  %15650 = vmatprep.subr.bf16.mxu1 %v22479_v24  ;;  %v22536_v19 = vld [vmem:[%s24405_s28 + $0x13a4] ss:$16 sps:$4 sm:$0xff]   ;;  %v18350_v21 = vcombine.high %v739_v17, %v763_v18  ;;  %v22537_v23 = vld [vmem:[%s24405_s28 + $0x13a8] ss:$16 sps:$4 sm:$0xff]  }
 0x2fc   : > { %12871 = vmatprep.mubr.bf16.mxu0 %v18110_v25  ;;  %15583 = vmatprep.mubr.bf16.mxu1 %v18110_v25  ;;  %v22542_v24 = vld [vmem:[%s24405_s28 + $0x13c4] ss:$16 sps:$4 sm:$0xff]   ;;  %v22545_v25 = vld [vmem:[%s24405_s28 + $0x13cc] ss:$16 sps:$4 sm:$0xff]  }
 0x2fe   : > { %12939 = vmatpush1.bf16.msra.mxu0 %v22474_v26  ;;  %15651 = vmatpush1.bf16.msra.mxu1 %v22477_v27  ;;  %v22540_v26 = vld [vmem:[%s24405_s28 + $0x13c0] ss:$16 sps:$4 sm:$0xff]   ;;  %v22543_v27 = vld [vmem:[%s24405_s28 + $0x13c8] ss:$16 sps:$4 sm:$0xff]  }
 0x2ff   : > { %12940 = vmatprep.subr.bf16.mxu0 %v22482_v28  ;;  %15652 = vmatprep.subr.bf16.mxu1 %v22485_v29  ;;  %v18349_v28 = vcombine.low %v739_v17, %v763_v18  ;;  %v404_v29 = vld [vmem:[%s24536_s30 + $0x48] sm:$0xff]  ;;  %v22594_v18 = vld [vmem:[%s24405_s28 + $0x14e0] ss:$16 sps:$4 sm:$0xff]  }
 0x301   : > { %12872 = vmatmul.mubr.bf16.gmra.mrb[8].mxu0 %v18109_v32  ;;  %15584 = vmatmul.mubr.bf16.gmra.mrb[8].mxu1 %v18109_v32  ;;  %v22551_v32 = vld [vmem:[%s24405_s28 + $0x13ec] ss:$16 sps:$4 sm:$0xff]  }
 0x302   : > { %12941 = vmatpush1.bf16.msra.mxu0 %v22480_v30  ;;  %15653 = vmatpush1.bf16.msra.mxu1 %v22483_v31  ;;  %v428_v30 = vld [vmem:[%s24536_s30 + $0x108] sm:$0xff]  ;;  %v22548_v31 = vld [vmem:[%s24405_s28 + $0x13e4] ss:$16 sps:$4 sm:$0xff]  }
 0x303   : > { %12942 = vmatprep.subr.bf16.mxu0 %v22488_v35  ;;  %15654 = vmatprep.subr.bf16.mxu1 %v22491_v36  ;;  %v18016_v33 = vcombine.high %v404_v29, %v428_v30  ;;  %v22549_v35 = vld [vmem:[%s24405_s28 + $0x13e8] ss:$16 sps:$4 sm:$0xff]   ;;  %v22554_v36 = vld [vmem:[%s24405_s28 + $0x1404] ss:$16 sps:$4 sm:$0xff]  }
 0x304   : > { %12881 = vmatprep.mubr.bf16.mxu0 %v18158_v37  ;;  %15593 = vmatprep.mubr.bf16.mxu1 %v18158_v37  ;;  %v22557_v37 = vld [vmem:[%s24405_s28 + $0x140c] ss:$16 sps:$4 sm:$0xff]  }
 0x306   : > { %12943 = vmatpush1.bf16.msra.mxu0 %v22486_v38  ;;  %15655 = vmatpush1.bf16.msra.mxu1 %v22489_v39  ;;  %v22552_v38 = vld [vmem:[%s24405_s28 + $0x1400] ss:$16 sps:$4 sm:$0xff]   ;;  %v22555_v39 = vld [vmem:[%s24405_s28 + $0x1408] ss:$16 sps:$4 sm:$0xff]  }
 0x307   : > { %12944 = vmatprep.subr.bf16.mxu0 %v22494_v40  ;;  %15656 = vmatprep.subr.bf16.mxu1 %v22497_v41  ;;  %v18015_v40 = vcombine.low %v404_v29, %v428_v30  ;;  %v452_v41 = vld [vmem:[%s24536_s30 + $0x1c8] sm:$0xff]  ;;  %v22606_v30 = vld [vmem:[%s24405_s28 + $0x1520] ss:$16 sps:$4 sm:$0xff]  }
 0x309   : > { %12882 = vmatmul.mubr.bf16.gmra.mrb[12].mxu0 %v18157_v44  ;;  %15594 = vmatmul.mubr.bf16.gmra.mrb[12].mxu1 %v18157_v44  ;;  %v22563_v44 = vld [vmem:[%s24405_s28 + $0x142c] ss:$16 sps:$4 sm:$0xff]  }
 0x30a   : > { %12945 = vmatpush1.bf16.msra.mxu0 %v22492_v42  ;;  %15657 = vmatpush1.bf16.msra.mxu1 %v22495_v43  ;;  %v476_v42 = vld [vmem:[%s24536_s30 + $0x288] sm:$0xff]  ;;  %v22560_v43 = vld [vmem:[%s24405_s28 + $0x1424] ss:$16 sps:$4 sm:$0xff]  }
 0x30b   : > { %12946 = vmatprep.subr.bf16.mxu0 %v22500_v47  ;;  %15658 = vmatprep.subr.bf16.mxu1 %v22503_v48  ;;  %v18064_v45 = vcombine.high %v452_v41, %v476_v42  ;;  %v22561_v47 = vld [vmem:[%s24405_s28 + $0x1428] ss:$16 sps:$4 sm:$0xff]   ;;  %v22566_v48 = vld [vmem:[%s24405_s28 + $0x1444] ss:$16 sps:$4 sm:$0xff]  }
 0x30c   : > { %12891 = vmatprep.mubr.bf16.mxu0 %v18206_v49  ;;  %15603 = vmatprep.mubr.bf16.mxu1 %v18206_v49  ;;  %v22569_v49 = vld [vmem:[%s24405_s28 + $0x144c] ss:$16 sps:$4 sm:$0xff]  }
 0x30e   : > { %12947 = vmatpush1.bf16.msra.mxu0 %v22498_v50  ;;  %15659 = vmatpush1.bf16.msra.mxu1 %v22501_v51  ;;  %v22564_v50 = vld [vmem:[%s24405_s28 + $0x1440] ss:$16 sps:$4 sm:$0xff]   ;;  %v22567_v51 = vld [vmem:[%s24405_s28 + $0x1448] ss:$16 sps:$4 sm:$0xff]  }
 0x30f   : > { %12948 = vmatprep.subr.bf16.mxu0 %v22506_v52  ;;  %15660 = vmatprep.subr.bf16.mxu1 %v22509_v53  ;;  %v18063_v52 = vcombine.low %v452_v41, %v476_v42  ;;  %v500_v53 = vld [vmem:[%s24536_s30 + $0x348] sm:$0xff]  ;;  %v22618_v42 = vld [vmem:[%s24405_s28 + $0x1560] ss:$16 sps:$4 sm:$0xff]  }
 0x311   : > { %12892 = vmatmul.mubr.bf16.gmra.mrb[16].mxu0 %v18205_v56  ;;  %15604 = vmatmul.mubr.bf16.gmra.mrb[16].mxu1 %v18205_v56  ;;  %v22575_v56 = vld [vmem:[%s24405_s28 + $0x146c] ss:$16 sps:$4 sm:$0xff]  }
 0x312   : > { %12949 = vmatpush1.bf16.msra.mxu0 %v22504_v54  ;;  %15661 = vmatpush1.bf16.msra.mxu1 %v22507_v55  ;;  %v524_v54 = vld [vmem:[%s24536_s30 + $0x408] sm:$0xff]  ;;  %v22572_v55 = vld [vmem:[%s24405_s28 + $0x1464] ss:$16 sps:$4 sm:$0xff]  }
 0x313   : > { %12950 = vmatprep.subr.bf16.mxu0 %v22512_v59  ;;  %15662 = vmatprep.subr.bf16.mxu1 %v22515_v60  ;;  %v18112_v57 = vcombine.high %v500_v53, %v524_v54  ;;  %v22573_v59 = vld [vmem:[%s24405_s28 + $0x1468] ss:$16 sps:$4 sm:$0xff]   ;;  %v22578_v60 = vld [vmem:[%s24405_s28 + $0x1484] ss:$16 sps:$4 sm:$0xff]  }
 0x314   : > { %12901 = vmatprep.mubr.bf16.mxu0 %v18254_v61  ;;  %15613 = vmatprep.mubr.bf16.mxu1 %v18254_v61  ;;  %v22581_v61 = vld [vmem:[%s24405_s28 + $0x148c] ss:$16 sps:$4 sm:$0xff]  }
 0x316   : > { %12951 = vmatpush1.bf16.msra.mxu0 %v22510_v62  ;;  %15663 = vmatpush1.bf16.msra.mxu1 %v22513_v63  ;;  %v22576_v62 = vld [vmem:[%s24405_s28 + $0x1480] ss:$16 sps:$4 sm:$0xff]   ;;  %v22579_v63 = vld [vmem:[%s24405_s28 + $0x1488] ss:$16 sps:$4 sm:$0xff]  }
 0x317   : > { %12952 = vmatprep.subr.bf16.mxu0 %v22518_v0  ;;  %15664 = vmatprep.subr.bf16.mxu1 %v22521_v1  ;;  %v18111_v0 = vcombine.low %v500_v53, %v524_v54  ;;  %v548_v1 = vld [vmem:[%s24536_s30 + $0x4c8] sm:$0xff]  ;;  %v22630_v54 = vld [vmem:[%s24405_s28 + $0x15a0] ss:$16 sps:$4 sm:$0xff]  }
 0x319   : > { %12902 = vmatmul.mubr.bf16.gmra.mrb[20].mxu0 %v18253_v4  ;;  %15614 = vmatmul.mubr.bf16.gmra.mrb[20].mxu1 %v18253_v4  ;;  %v22587_v4 = vld [vmem:[%s24405_s28 + $0x14ac] ss:$16 sps:$4 sm:$0xff]  }
 0x31a   : > { %12953 = vmatpush1.bf16.msra.mxu0 %v22516_v2  ;;  %15665 = vmatpush1.bf16.msra.mxu1 %v22519_v3  ;;  %v572_v2 = vld [vmem:[%s24536_s30 + $0x588] sm:$0xff]  ;;  %v22584_v3 = vld [vmem:[%s24405_s28 + $0x14a4] ss:$16 sps:$4 sm:$0xff]  }
 0x31b   : > { %12954 = vmatprep.subr.bf16.mxu0 %v22524_v7  ;;  %15666 = vmatprep.subr.bf16.mxu1 %v22527_v8  ;;  %v18160_v5 = vcombine.high %v548_v1, %v572_v2  ;;  %v22585_v7 = vld [vmem:[%s24405_s28 + $0x14a8] ss:$16 sps:$4 sm:$0xff]   ;;  %v22590_v8 = vld [vmem:[%s24405_s28 + $0x14c4] ss:$16 sps:$4 sm:$0xff]  }
 0x31c   : > { %12911 = vmatprep.mubr.bf16.mxu0 %v18302_v9  ;;  %15623 = vmatprep.mubr.bf16.mxu1 %v18302_v9  ;;  %v22593_v9 = vld [vmem:[%s24405_s28 + $0x14cc] ss:$16 sps:$4 sm:$0xff]  }
 0x31e   : > { %12955 = vmatpush1.bf16.msra.mxu0 %v22522_v10  ;;  %15667 = vmatpush1.bf16.msra.mxu1 %v22525_v11  ;;  %v22588_v10 = vld [vmem:[%s24405_s28 + $0x14c0] ss:$16 sps:$4 sm:$0xff]   ;;  %v22591_v11 = vld [vmem:[%s24405_s28 + $0x14c8] ss:$16 sps:$4 sm:$0xff]  }
 0x31f   : > { %12956 = vmatprep.subr.bf16.mxu0 %v22530_v12  ;;  %15668 = vmatprep.subr.bf16.mxu1 %v22533_v13  ;;  %v18159_v12 = vcombine.low %v548_v1, %v572_v2  ;;  %v596_v13 = vld [vmem:[%s24536_s30 + $0x648] sm:$0xff]  ;;  %v22642_v2 = vld [vmem:[%s24405_s28 + $0x15e0] ss:$16 sps:$4 sm:$0xff]  }
 0x321   : > { %12912 = vmatmul.mubr.bf16.gmra.mrb[24].mxu0 %v18301_v16  ;;  %15624 = vmatmul.mubr.bf16.gmra.mrb[24].mxu1 %v18301_v16  ;;  %v22599_v16 = vld [vmem:[%s24405_s28 + $0x14ec] ss:$16 sps:$4 sm:$0xff]  }
 0x322   : > { %12957 = vmatpush1.bf16.msra.mxu0 %v22528_v14  ;;  %15669 = vmatpush1.bf16.msra.mxu1 %v22531_v15  ;;  %v620_v14 = vld [vmem:[%s24536_s30 + $0x708] sm:$0xff]  ;;  %v22596_v15 = vld [vmem:[%s24405_s28 + $0x14e4] ss:$16 sps:$4 sm:$0xff]  }
 0x323   : > { %12958 = vmatprep.subr.bf16.mxu0 %v22536_v19  ;;  %15670 = vmatprep.subr.bf16.mxu1 %v22539_v20  ;;  %v18208_v17 = vcombine.high %v596_v13, %v620_v14  ;;  %v22597_v19 = vld [vmem:[%s24405_s28 + $0x14e8] ss:$16 sps:$4 sm:$0xff]   ;;  %v22602_v20 = vld [vmem:[%s24405_s28 + $0x1504] ss:$16 sps:$4 sm:$0xff]  }
 0x324   : > { %12921 = vmatprep.mubr.bf16.mxu0 %v18350_v21  ;;  %15633 = vmatprep.mubr.bf16.mxu1 %v18350_v21  ;;  %v22605_v21 = vld [vmem:[%s24405_s28 + $0x150c] ss:$16 sps:$4 sm:$0xff]  }
 0x326   : > { %12959 = vmatpush1.bf16.msra.mxu0 %v22534_v22  ;;  %15671 = vmatpush1.bf16.msra.mxu1 %v22537_v23  ;;  %v22600_v22 = vld [vmem:[%s24405_s28 + $0x1500] ss:$16 sps:$4 sm:$0xff]   ;;  %v22603_v23 = vld [vmem:[%s24405_s28 + $0x1508] ss:$16 sps:$4 sm:$0xff]  }
 0x327   : > { %12960 = vmatprep.subr.bf16.mxu0 %v22542_v24  ;;  %15672 = vmatprep.subr.bf16.mxu1 %v22545_v25  ;;  %v18207_v24 = vcombine.low %v596_v13, %v620_v14  ;;  %v644_v25 = vld [vmem:[%s24536_s30 + $0x7c8] sm:$0xff]  ;;  %v22654_v14 = vld [vmem:[%s24405_s28 + $0x1620] ss:$16 sps:$4 sm:$0xff]  }
 0x329   : > { %12922 = vmatmul.mubr.bf16.gmra.mrb[28].mxu0 %v18349_v28  ;;  %15634 = vmatmul.mubr.bf16.gmra.mrb[28].mxu1 %v18349_v28  ;;  %v22611_v28 = vld [vmem:[%s24405_s28 + $0x152c] ss:$16 sps:$4 sm:$0xff]  }
 0x32a   : > { %12961 = vmatpush1.bf16.msra.mxu0 %v22540_v26  ;;  %15673 = vmatpush1.bf16.msra.mxu1 %v22543_v27  ;;  %v668_v26 = vld [vmem:[%s24536_s30 + $0x888] sm:$0xff]  ;;  %v22608_v27 = vld [vmem:[%s24405_s28 + $0x1524] ss:$16 sps:$4 sm:$0xff]  }
 0x32b   : > { %12962 = vmatprep.subr.bf16.mxu0 %v22548_v31  ;;  %15674 = vmatprep.subr.bf16.mxu1 %v22551_v32  ;;  %v18256_v29 = vcombine.high %v644_v25, %v668_v26  ;;  %v22609_v31 = vld [vmem:[%s24405_s28 + $0x1528] ss:$16 sps:$4 sm:$0xff]   ;;  %v22614_v32 = vld [vmem:[%s24405_s28 + $0x1544] ss:$16 sps:$4 sm:$0xff]  }
 0x32c   : > { %12964 = vmatprep.mubr.bf16.mxu0 %v18016_v33  ;;  %15676 = vmatprep.mubr.bf16.mxu1 %v18016_v33  ;;  %v22617_v33 = vld [vmem:[%s24405_s28 + $0x154c] ss:$16 sps:$4 sm:$0xff]  }
 0x32e   : > { %12963 = vmatpush1.bf16.msra.mxu0 %v22546_v34  ;;  %15675 = vmatpush1.bf16.msra.mxu1 %v22549_v35  ;;  %v22612_v34 = vld [vmem:[%s24405_s28 + $0x1540] ss:$16 sps:$4 sm:$0xff]   ;;  %v22615_v35 = vld [vmem:[%s24405_s28 + $0x1548] ss:$16 sps:$4 sm:$0xff]  }
 0x32f   : > { %13045 = vmatprep.subr.bf16.mxu0 %v22554_v36  ;;  %15757 = vmatprep.subr.bf16.mxu1 %v22557_v37  ;;  %v18255_v36 = vcombine.low %v644_v25, %v668_v26  ;;  %v692_v37 = vld [vmem:[%s24536_s30 + $0x948] sm:$0xff]  ;;  %v22666_v26 = vld [vmem:[%s24405_s28 + $0x1660] ss:$16 sps:$4 sm:$0xff]  }
 0x331   : > { %12965 = vmatmul.mubr.bf16.vlgmr.msra.gmra.mrb[0].mxu0 %v18015_v40  ;;  %15677 = vmatmul.mubr.bf16.vlgmr.msra.gmra.mrb[0].mxu1 %v18015_v40  ;;  %v22623_v40 = vld [vmem:[%s24405_s28 + $0x156c] ss:$16 sps:$4 sm:$0xff]  }
 0x332   : > { %13046 = vmatpush1.bf16.msra.mxu0 %v22552_v38  ;;  %15758 = vmatpush1.bf16.msra.mxu1 %v22555_v39  ;;  %v716_v38 = vld [vmem:[%s24536_s30 + $0xa08] sm:$0xff]  ;;  %v22620_v39 = vld [vmem:[%s24405_s28 + $0x1564] ss:$16 sps:$4 sm:$0xff]  }
 0x333   : > { %13047 = vmatprep.subr.bf16.mxu0 %v22560_v43  ;;  %15759 = vmatprep.subr.bf16.mxu1 %v22563_v44  ;;  %v18304_v41 = vcombine.high %v692_v37, %v716_v38  ;;  %v22621_v43 = vld [vmem:[%s24405_s28 + $0x1568] ss:$16 sps:$4 sm:$0xff]   ;;  %v22626_v44 = vld [vmem:[%s24405_s28 + $0x1584] ss:$16 sps:$4 sm:$0xff]  }
 0x334   : > { %12974 = vmatprep.mubr.bf16.mxu0 %v18064_v45  ;;  %15686 = vmatprep.mubr.bf16.mxu1 %v18064_v45  ;;  %v22629_v45 = vld [vmem:[%s24405_s28 + $0x158c] ss:$16 sps:$4 sm:$0xff]  }
 0x336   : > { %13048 = vmatpush1.bf16.msra.mxu0 %v22558_v46  ;;  %15760 = vmatpush1.bf16.msra.mxu1 %v22561_v47  ;;  %v22624_v46 = vld [vmem:[%s24405_s28 + $0x1580] ss:$16 sps:$4 sm:$0xff]   ;;  %v22627_v47 = vld [vmem:[%s24405_s28 + $0x1588] ss:$16 sps:$4 sm:$0xff]  }
 0x337   : > { %13049 = vmatprep.subr.bf16.mxu0 %v22566_v48  ;;  %15761 = vmatprep.subr.bf16.mxu1 %v22569_v49  ;;  %v18303_v48 = vcombine.low %v692_v37, %v716_v38  ;;  %v740_v49 = vld [vmem:[%s24536_s30 + $0xac8] sm:$0xff]  ;;  %v22678_v38 = vld [vmem:[%s24405_s28 + $0x16a0] ss:$16 sps:$4 sm:$0xff]  }
 0x339   : > { %12975 = vmatmul.mubr.bf16.gmra.mrb[4].mxu0 %v18063_v52  ;;  %15687 = vmatmul.mubr.bf16.gmra.mrb[4].mxu1 %v18063_v52  ;;  %v22635_v52 = vld [vmem:[%s24405_s28 + $0x15ac] ss:$16 sps:$4 sm:$0xff]  }
 0x33a   : > { %13050 = vmatpush1.bf16.msra.mxu0 %v22564_v50  ;;  %15762 = vmatpush1.bf16.msra.mxu1 %v22567_v51  ;;  %v764_v50 = vld [vmem:[%s24536_s30 + $0xb88] sm:$0xff]  ;;  %v22632_v51 = vld [vmem:[%s24405_s28 + $0x15a4] ss:$16 sps:$4 sm:$0xff]  }
 0x33b   : > { %13051 = vmatprep.subr.bf16.mxu0 %v22572_v55  ;;  %15763 = vmatprep.subr.bf16.mxu1 %v22575_v56  ;;  %v18352_v53 = vcombine.high %v740_v49, %v764_v50  ;;  %v22633_v55 = vld [vmem:[%s24405_s28 + $0x15a8] ss:$16 sps:$4 sm:$0xff]   ;;  %v22638_v56 = vld [vmem:[%s24405_s28 + $0x15c4] ss:$16 sps:$4 sm:$0xff]  }
 0x33c   : > { %12984 = vmatprep.mubr.bf16.mxu0 %v18112_v57  ;;  %15696 = vmatprep.mubr.bf16.mxu1 %v18112_v57  ;;  %v22641_v57 = vld [vmem:[%s24405_s28 + $0x15cc] ss:$16 sps:$4 sm:$0xff]  }
 0x33e   : > { %13052 = vmatpush1.bf16.msra.mxu0 %v22570_v58  ;;  %15764 = vmatpush1.bf16.msra.mxu1 %v22573_v59  ;;  %v22636_v58 = vld [vmem:[%s24405_s28 + $0x15c0] ss:$16 sps:$4 sm:$0xff]   ;;  %v22639_v59 = vld [vmem:[%s24405_s28 + $0x15c8] ss:$16 sps:$4 sm:$0xff]  }
 0x33f   : > { %13053 = vmatprep.subr.bf16.mxu0 %v22578_v60  ;;  %15765 = vmatprep.subr.bf16.mxu1 %v22581_v61  ;;  %v18351_v60 = vcombine.low %v740_v49, %v764_v50  ;;  %v405_v61 = vld [vmem:[%s24536_s30 + $0x50] sm:$0xff] }
 0x340   : > { %v22690_v50 = vld [vmem:[%s24405_s28 + $0x16e0] ss:$16 sps:$4 sm:$0xff]  }
 0x341   : > { %12985 = vmatmul.mubr.bf16.gmra.mrb[8].mxu0 %v18111_v0  ;;  %15697 = vmatmul.mubr.bf16.gmra.mrb[8].mxu1 %v18111_v0  ;;  %v22647_v0 = vld [vmem:[%s24405_s28 + $0x15ec] ss:$16 sps:$4 sm:$0xff]  }
 0x342   : > { %13054 = vmatpush1.bf16.msra.mxu0 %v22576_v62  ;;  %15766 = vmatpush1.bf16.msra.mxu1 %v22579_v63  ;;  %v429_v62 = vld [vmem:[%s24536_s30 + $0x110] sm:$0xff] }
 0x343   : > { %13055 = vmatprep.subr.bf16.mxu0 %v22584_v3  ;;  %15767 = vmatprep.subr.bf16.mxu1 %v22587_v4  ;;  %v22644_v63 = vld [vmem:[%s24405_s28 + $0x15e4] ss:$16 sps:$4 sm:$0xff]   ;;  %v18018_v1 = vcombine.high %v405_v61, %v429_v62  ;;  %v22645_v3 = vld [vmem:[%s24405_s28 + $0x15e8] ss:$16 sps:$4 sm:$0xff]  }
 0x344   : > { %12994 = vmatprep.mubr.bf16.mxu0 %v18160_v5  ;;  %15706 = vmatprep.mubr.bf16.mxu1 %v18160_v5  ;;  %v22650_v4 = vld [vmem:[%s24405_s28 + $0x1604] ss:$16 sps:$4 sm:$0xff]   ;;  %v22653_v5 = vld [vmem:[%s24405_s28 + $0x160c] ss:$16 sps:$4 sm:$0xff]  }
 0x346   : > { %13056 = vmatpush1.bf16.msra.mxu0 %v22582_v6  ;;  %15768 = vmatpush1.bf16.msra.mxu1 %v22585_v7  ;;  %v22648_v6 = vld [vmem:[%s24405_s28 + $0x1600] ss:$16 sps:$4 sm:$0xff]   ;;  %v22651_v7 = vld [vmem:[%s24405_s28 + $0x1608] ss:$16 sps:$4 sm:$0xff]  }
 0x347   : > { %13057 = vmatprep.subr.bf16.mxu0 %v22590_v8  ;;  %15769 = vmatprep.subr.bf16.mxu1 %v22593_v9  ;;  %v18017_v8 = vcombine.low %v405_v61, %v429_v62  ;;  %v453_v9 = vld [vmem:[%s24536_s30 + $0x1d0] sm:$0xff] }
 0x348   : > { %v22702_v62 = vld [vmem:[%s24405_s28 + $0x1720] ss:$16 sps:$4 sm:$0xff]  }
 0x349   : > { %12995 = vmatmul.mubr.bf16.gmra.mrb[12].mxu0 %v18159_v12  ;;  %15707 = vmatmul.mubr.bf16.gmra.mrb[12].mxu1 %v18159_v12  ;;  %v22659_v12 = vld [vmem:[%s24405_s28 + $0x162c] ss:$16 sps:$4 sm:$0xff]  }
 0x34a   : > { %13058 = vmatpush1.bf16.msra.mxu0 %v22588_v10  ;;  %15770 = vmatpush1.bf16.msra.mxu1 %v22591_v11  ;;  %v477_v10 = vld [vmem:[%s24536_s30 + $0x290] sm:$0xff] }
 0x34b   : > { %13059 = vmatprep.subr.bf16.mxu0 %v22596_v15  ;;  %15771 = vmatprep.subr.bf16.mxu1 %v22599_v16  ;;  %v22656_v11 = vld [vmem:[%s24405_s28 + $0x1624] ss:$16 sps:$4 sm:$0xff]   ;;  %v18066_v13 = vcombine.high %v453_v9, %v477_v10  ;;  %v22657_v15 = vld [vmem:[%s24405_s28 + $0x1628] ss:$16 sps:$4 sm:$0xff]  }
 0x34c   : > { %13004 = vmatprep.mubr.bf16.mxu0 %v18208_v17  ;;  %15716 = vmatprep.mubr.bf16.mxu1 %v18208_v17  ;;  %v22662_v16 = vld [vmem:[%s24405_s28 + $0x1644] ss:$16 sps:$4 sm:$0xff]   ;;  %v22665_v17 = vld [vmem:[%s24405_s28 + $0x164c] ss:$16 sps:$4 sm:$0xff]  }
 0x34e   : > { %13060 = vmatpush1.bf16.msra.mxu0 %v22594_v18  ;;  %15772 = vmatpush1.bf16.msra.mxu1 %v22597_v19  ;;  %v22660_v18 = vld [vmem:[%s24405_s28 + $0x1640] ss:$16 sps:$4 sm:$0xff]   ;;  %v22663_v19 = vld [vmem:[%s24405_s28 + $0x1648] ss:$16 sps:$4 sm:$0xff]  }
 0x34f   : > { %13061 = vmatprep.subr.bf16.mxu0 %v22602_v20  ;;  %15773 = vmatprep.subr.bf16.mxu1 %v22605_v21  ;;  %v18065_v20 = vcombine.low %v453_v9, %v477_v10  ;;  %v501_v21 = vld [vmem:[%s24536_s30 + $0x350] sm:$0xff] }
 0x350   : > { %v22714_v10 = vld [vmem:[%s24405_s28 + $0x1760] ss:$16 sps:$4 sm:$0xff]  }
 0x351   : > { %13005 = vmatmul.mubr.bf16.gmra.mrb[16].mxu0 %v18207_v24  ;;  %15717 = vmatmul.mubr.bf16.gmra.mrb[16].mxu1 %v18207_v24  ;;  %v22671_v24 = vld [vmem:[%s24405_s28 + $0x166c] ss:$16 sps:$4 sm:$0xff]  }
 0x352   : > { %13062 = vmatpush1.bf16.msra.mxu0 %v22600_v22  ;;  %15774 = vmatpush1.bf16.msra.mxu1 %v22603_v23  ;;  %v525_v22 = vld [vmem:[%s24536_s30 + $0x410] sm:$0xff] }
 0x353   : > { %13063 = vmatprep.subr.bf16.mxu0 %v22608_v27  ;;  %15775 = vmatprep.subr.bf16.mxu1 %v22611_v28  ;;  %v22668_v23 = vld [vmem:[%s24405_s28 + $0x1664] ss:$16 sps:$4 sm:$0xff]   ;;  %v18114_v25 = vcombine.high %v501_v21, %v525_v22  ;;  %v22669_v27 = vld [vmem:[%s24405_s28 + $0x1668] ss:$16 sps:$4 sm:$0xff]  }
 0x354   : > { %13014 = vmatprep.mubr.bf16.mxu0 %v18256_v29  ;;  %15726 = vmatprep.mubr.bf16.mxu1 %v18256_v29  ;;  %v22674_v28 = vld [vmem:[%s24405_s28 + $0x1684] ss:$16 sps:$4 sm:$0xff]   ;;  %v22677_v29 = vld [vmem:[%s24405_s28 + $0x168c] ss:$16 sps:$4 sm:$0xff]  }
 0x356   : > { %13064 = vmatpush1.bf16.msra.mxu0 %v22606_v30  ;;  %15776 = vmatpush1.bf16.msra.mxu1 %v22609_v31  ;;  %v22672_v30 = vld [vmem:[%s24405_s28 + $0x1680] ss:$16 sps:$4 sm:$0xff]   ;;  %v22675_v31 = vld [vmem:[%s24405_s28 + $0x1688] ss:$16 sps:$4 sm:$0xff]  }
 0x357   : > { %13065 = vmatprep.subr.bf16.mxu0 %v22614_v32  ;;  %15777 = vmatprep.subr.bf16.mxu1 %v22617_v33  ;;  %v18113_v32 = vcombine.low %v501_v21, %v525_v22  ;;  %v549_v33 = vld [vmem:[%s24536_s30 + $0x4d0] sm:$0xff] }
 0x358   : > { %v22726_v22 = vld [vmem:[%s24405_s28 + $0x17a0] ss:$16 sps:$4 sm:$0xff]  }
 0x359   : > { %13015 = vmatmul.mubr.bf16.gmra.mrb[20].mxu0 %v18255_v36  ;;  %15727 = vmatmul.mubr.bf16.gmra.mrb[20].mxu1 %v18255_v36  ;;  %v22683_v36 = vld [vmem:[%s24405_s28 + $0x16ac] ss:$16 sps:$4 sm:$0xff]  }
 0x35a   : > { %13066 = vmatpush1.bf16.msra.mxu0 %v22612_v34  ;;  %15778 = vmatpush1.bf16.msra.mxu1 %v22615_v35  ;;  %v573_v34 = vld [vmem:[%s24536_s30 + $0x590] sm:$0xff] }
 0x35b   : > { %13067 = vmatprep.subr.bf16.mxu0 %v22620_v39  ;;  %15779 = vmatprep.subr.bf16.mxu1 %v22623_v40  ;;  %v22680_v35 = vld [vmem:[%s24405_s28 + $0x16a4] ss:$16 sps:$4 sm:$0xff]   ;;  %v18162_v37 = vcombine.high %v549_v33, %v573_v34  ;;  %v22681_v39 = vld [vmem:[%s24405_s28 + $0x16a8] ss:$16 sps:$4 sm:$0xff]  }
 0x35c   : > { %13024 = vmatprep.mubr.bf16.mxu0 %v18304_v41  ;;  %15736 = vmatprep.mubr.bf16.mxu1 %v18304_v41  ;;  %v22686_v40 = vld [vmem:[%s24405_s28 + $0x16c4] ss:$16 sps:$4 sm:$0xff]   ;;  %v22689_v41 = vld [vmem:[%s24405_s28 + $0x16cc] ss:$16 sps:$4 sm:$0xff]  }
 0x35e   : > { %13068 = vmatpush1.bf16.msra.mxu0 %v22618_v42  ;;  %15780 = vmatpush1.bf16.msra.mxu1 %v22621_v43  ;;  %v22684_v42 = vld [vmem:[%s24405_s28 + $0x16c0] ss:$16 sps:$4 sm:$0xff]   ;;  %v22687_v43 = vld [vmem:[%s24405_s28 + $0x16c8] ss:$16 sps:$4 sm:$0xff]  }
 0x35f   : > { %13069 = vmatprep.subr.bf16.mxu0 %v22626_v44  ;;  %15781 = vmatprep.subr.bf16.mxu1 %v22629_v45  ;;  %v18161_v44 = vcombine.low %v549_v33, %v573_v34  ;;  %v597_v45 = vld [vmem:[%s24536_s30 + $0x650] sm:$0xff] }
 0x360   : > { %v22738_v34 = vld [vmem:[%s24405_s28 + $0x17e0] ss:$16 sps:$4 sm:$0xff]  }
 0x361   : > { %13025 = vmatmul.mubr.bf16.gmra.mrb[24].mxu0 %v18303_v48  ;;  %15737 = vmatmul.mubr.bf16.gmra.mrb[24].mxu1 %v18303_v48  ;;  %v22695_v48 = vld [vmem:[%s24405_s28 + $0x16ec] ss:$16 sps:$4 sm:$0xff]  }
 0x362   : > { %13070 = vmatpush1.bf16.msra.mxu0 %v22624_v46  ;;  %15782 = vmatpush1.bf16.msra.mxu1 %v22627_v47  ;;  %v621_v46 = vld [vmem:[%s24536_s30 + $0x710] sm:$0xff] }
 0x363   : > { %13071 = vmatprep.subr.bf16.mxu0 %v22632_v51  ;;  %15783 = vmatprep.subr.bf16.mxu1 %v22635_v52  ;;  %v22692_v47 = vld [vmem:[%s24405_s28 + $0x16e4] ss:$16 sps:$4 sm:$0xff]   ;;  %v18210_v49 = vcombine.high %v597_v45, %v621_v46  ;;  %v22693_v51 = vld [vmem:[%s24405_s28 + $0x16e8] ss:$16 sps:$4 sm:$0xff]  }
 0x364   : > { %13034 = vmatprep.mubr.bf16.mxu0 %v18352_v53  ;;  %15746 = vmatprep.mubr.bf16.mxu1 %v18352_v53  ;;  %v22698_v52 = vld [vmem:[%s24405_s28 + $0x1704] ss:$16 sps:$4 sm:$0xff]   ;;  %v22701_v53 = vld [vmem:[%s24405_s28 + $0x170c] ss:$16 sps:$4 sm:$0xff]  }
 0x366   : > { %13072 = vmatpush1.bf16.msra.mxu0 %v22630_v54  ;;  %15784 = vmatpush1.bf16.msra.mxu1 %v22633_v55  ;;  %v22696_v54 = vld [vmem:[%s24405_s28 + $0x1700] ss:$16 sps:$4 sm:$0xff]   ;;  %v22699_v55 = vld [vmem:[%s24405_s28 + $0x1708] ss:$16 sps:$4 sm:$0xff]  }
 0x367   : > { %13073 = vmatprep.subr.bf16.mxu0 %v22638_v56  ;;  %15785 = vmatprep.subr.bf16.mxu1 %v22641_v57  ;;  %v18209_v56 = vcombine.low %v597_v45, %v621_v46  ;;  %v645_v57 = vld [vmem:[%s24536_s30 + $0x7d0] sm:$0xff] }
 0x368   : > { %v22750_v46 = vld [vmem:[%s24405_s28 + $0x1820] ss:$16 sps:$4 sm:$0xff]  }
 0x369   : > { %13035 = vmatmul.mubr.bf16.gmra.mrb[28].mxu0 %v18351_v60  ;;  %15747 = vmatmul.mubr.bf16.gmra.mrb[28].mxu1 %v18351_v60  ;;  %v22707_v60 = vld [vmem:[%s24405_s28 + $0x172c] ss:$16 sps:$4 sm:$0xff]  }
 0x36a   : > { %13074 = vmatpush1.bf16.msra.mxu0 %v22636_v58  ;;  %15786 = vmatpush1.bf16.msra.mxu1 %v22639_v59  ;;  %v669_v58 = vld [vmem:[%s24536_s30 + $0x890] sm:$0xff] }
 0x36b   : > { %13075 = vmatprep.subr.bf16.mxu0 %v22644_v63  ;;  %15787 = vmatprep.subr.bf16.mxu1 %v22647_v0  ;;  %v22704_v59 = vld [vmem:[%s24405_s28 + $0x1724] ss:$16 sps:$4 sm:$0xff]   ;;  %v18258_v61 = vcombine.high %v645_v57, %v669_v58  ;;  %v22705_v63 = vld [vmem:[%s24405_s28 + $0x1728] ss:$16 sps:$4 sm:$0xff]  }
 0x36c   : > { %13077 = vmatprep.mubr.bf16.mxu0 %v18018_v1  ;;  %15789 = vmatprep.mubr.bf16.mxu1 %v18018_v1  ;;  %v22710_v0 = vld [vmem:[%s24405_s28 + $0x1744] ss:$16 sps:$4 sm:$0xff]   ;;  %v22713_v1 = vld [vmem:[%s24405_s28 + $0x174c] ss:$16 sps:$4 sm:$0xff]  }
 0x36e   : > { %13076 = vmatpush1.bf16.msra.mxu0 %v22642_v2  ;;  %15788 = vmatpush1.bf16.msra.mxu1 %v22645_v3  ;;  %v22708_v2 = vld [vmem:[%s24405_s28 + $0x1740] ss:$16 sps:$4 sm:$0xff]   ;;  %v22711_v3 = vld [vmem:[%s24405_s28 + $0x1748] ss:$16 sps:$4 sm:$0xff]  }
 0x36f   : > { %13158 = vmatprep.subr.bf16.mxu0 %v22650_v4  ;;  %15870 = vmatprep.subr.bf16.mxu1 %v22653_v5  ;;  %v18257_v4 = vcombine.low %v645_v57, %v669_v58  ;;  %v693_v5 = vld [vmem:[%s24536_s30 + $0x950] sm:$0xff] }
 0x370   : > { %v22762_v58 = vld [vmem:[%s24405_s28 + $0x1860] ss:$16 sps:$4 sm:$0xff]  }
 0x371   : > { %13078 = vmatmul.mubr.bf16.vlgmr.msra.gmra.mrb[0].mxu0 %v18017_v8  ;;  %15790 = vmatmul.mubr.bf16.vlgmr.msra.gmra.mrb[0].mxu1 %v18017_v8  ;;  %v22719_v8 = vld [vmem:[%s24405_s28 + $0x176c] ss:$16 sps:$4 sm:$0xff]  }
 0x372   : > { %13159 = vmatpush1.bf16.msra.mxu0 %v22648_v6  ;;  %15871 = vmatpush1.bf16.msra.mxu1 %v22651_v7  ;;  %v717_v6 = vld [vmem:[%s24536_s30 + $0xa10] sm:$0xff] }
 0x373   : > { %13160 = vmatprep.subr.bf16.mxu0 %v22656_v11  ;;  %15872 = vmatprep.subr.bf16.mxu1 %v22659_v12  ;;  %v22716_v7 = vld [vmem:[%s24405_s28 + $0x1764] ss:$16 sps:$4 sm:$0xff]   ;;  %v18306_v9 = vcombine.high %v693_v5, %v717_v6  ;;  %v22717_v11 = vld [vmem:[%s24405_s28 + $0x1768] ss:$16 sps:$4 sm:$0xff]  }
 0x374   : > { %13087 = vmatprep.mubr.bf16.mxu0 %v18066_v13  ;;  %15799 = vmatprep.mubr.bf16.mxu1 %v18066_v13  ;;  %v22722_v12 = vld [vmem:[%s24405_s28 + $0x1784] ss:$16 sps:$4 sm:$0xff]   ;;  %v22725_v13 = vld [vmem:[%s24405_s28 + $0x178c] ss:$16 sps:$4 sm:$0xff]  }
 0x376   : > { %13161 = vmatpush1.bf16.msra.mxu0 %v22654_v14  ;;  %15873 = vmatpush1.bf16.msra.mxu1 %v22657_v15  ;;  %v22720_v14 = vld [vmem:[%s24405_s28 + $0x1780] ss:$16 sps:$4 sm:$0xff]   ;;  %v22723_v15 = vld [vmem:[%s24405_s28 + $0x1788] ss:$16 sps:$4 sm:$0xff]  }
 0x377   : > { %13162 = vmatprep.subr.bf16.mxu0 %v22662_v16  ;;  %15874 = vmatprep.subr.bf16.mxu1 %v22665_v17  ;;  %v18305_v16 = vcombine.low %v693_v5, %v717_v6  ;;  %v741_v17 = vld [vmem:[%s24536_s30 + $0xad0] sm:$0xff] }
 0x378   : > { %v22774_v6 = vld [vmem:[%s24405_s28 + $0x18a0] ss:$16 sps:$4 sm:$0xff]  }
 0x379   : > { %13088 = vmatmul.mubr.bf16.gmra.mrb[4].mxu0 %v18065_v20  ;;  %15800 = vmatmul.mubr.bf16.gmra.mrb[4].mxu1 %v18065_v20  ;;  %v22731_v20 = vld [vmem:[%s24405_s28 + $0x17ac] ss:$16 sps:$4 sm:$0xff]  }
 0x37a   : > { %13163 = vmatpush1.bf16.msra.mxu0 %v22660_v18  ;;  %15875 = vmatpush1.bf16.msra.mxu1 %v22663_v19  ;;  %v765_v18 = vld [vmem:[%s24536_s30 + $0xb90] sm:$0xff] }
 0x37b   : > { %13164 = vmatprep.subr.bf16.mxu0 %v22668_v23  ;;  %15876 = vmatprep.subr.bf16.mxu1 %v22671_v24  ;;  %v22728_v19 = vld [vmem:[%s24405_s28 + $0x17a4] ss:$16 sps:$4 sm:$0xff]   ;;  %v18354_v21 = vcombine.high %v741_v17, %v765_v18  ;;  %v22729_v23 = vld [vmem:[%s24405_s28 + $0x17a8] ss:$16 sps:$4 sm:$0xff]  }
 0x37c   : > { %13097 = vmatprep.mubr.bf16.mxu0 %v18114_v25  ;;  %15809 = vmatprep.mubr.bf16.mxu1 %v18114_v25  ;;  %v22734_v24 = vld [vmem:[%s24405_s28 + $0x17c4] ss:$16 sps:$4 sm:$0xff]   ;;  %v22737_v25 = vld [vmem:[%s24405_s28 + $0x17cc] ss:$16 sps:$4 sm:$0xff]  }
 0x37e   : > { %13165 = vmatpush1.bf16.msra.mxu0 %v22666_v26  ;;  %15877 = vmatpush1.bf16.msra.mxu1 %v22669_v27  ;;  %v22732_v26 = vld [vmem:[%s24405_s28 + $0x17c0] ss:$16 sps:$4 sm:$0xff]   ;;  %v22735_v27 = vld [vmem:[%s24405_s28 + $0x17c8] ss:$16 sps:$4 sm:$0xff]  }
 0x37f   : > { %13166 = vmatprep.subr.bf16.mxu0 %v22674_v28  ;;  %15878 = vmatprep.subr.bf16.mxu1 %v22677_v29  ;;  %v18353_v28 = vcombine.low %v741_v17, %v765_v18  ;;  %v406_v29 = vld [vmem:[%s24536_s30 + $0x58] sm:$0xff]  ;;  %v22786_v18 = vld [vmem:[%s24405_s28 + $0x18e0] ss:$16 sps:$4 sm:$0xff]  }
 0x381   : > { %13098 = vmatmul.mubr.bf16.gmra.mrb[8].mxu0 %v18113_v32  ;;  %15810 = vmatmul.mubr.bf16.gmra.mrb[8].mxu1 %v18113_v32  ;;  %v22743_v32 = vld [vmem:[%s24405_s28 + $0x17ec] ss:$16 sps:$4 sm:$0xff]  }
 0x382   : > { %13167 = vmatpush1.bf16.msra.mxu0 %v22672_v30  ;;  %15879 = vmatpush1.bf16.msra.mxu1 %v22675_v31  ;;  %v430_v30 = vld [vmem:[%s24536_s30 + $0x118] sm:$0xff]  ;;  %v22740_v31 = vld [vmem:[%s24405_s28 + $0x17e4] ss:$16 sps:$4 sm:$0xff]  }
 0x383   : > { %13168 = vmatprep.subr.bf16.mxu0 %v22680_v35  ;;  %15880 = vmatprep.subr.bf16.mxu1 %v22683_v36  ;;  %v18020_v33 = vcombine.high %v406_v29, %v430_v30  ;;  %v22741_v35 = vld [vmem:[%s24405_s28 + $0x17e8] ss:$16 sps:$4 sm:$0xff]   ;;  %v22746_v36 = vld [vmem:[%s24405_s28 + $0x1804] ss:$16 sps:$4 sm:$0xff]  }
 0x384   : > { %13107 = vmatprep.mubr.bf16.mxu0 %v18162_v37  ;;  %15819 = vmatprep.mubr.bf16.mxu1 %v18162_v37  ;;  %v22749_v37 = vld [vmem:[%s24405_s28 + $0x180c] ss:$16 sps:$4 sm:$0xff]  }
 0x386   : > { %13169 = vmatpush1.bf16.msra.mxu0 %v22678_v38  ;;  %15881 = vmatpush1.bf16.msra.mxu1 %v22681_v39  ;;  %v22744_v38 = vld [vmem:[%s24405_s28 + $0x1800] ss:$16 sps:$4 sm:$0xff]   ;;  %v22747_v39 = vld [vmem:[%s24405_s28 + $0x1808] ss:$16 sps:$4 sm:$0xff]  }
 0x387   : > { %13170 = vmatprep.subr.bf16.mxu0 %v22686_v40  ;;  %15882 = vmatprep.subr.bf16.mxu1 %v22689_v41  ;;  %v18019_v40 = vcombine.low %v406_v29, %v430_v30  ;;  %v454_v41 = vld [vmem:[%s24536_s30 + $0x1d8] sm:$0xff]  ;;  %v22798_v30 = vld [vmem:[%s24405_s28 + $0x1920] ss:$16 sps:$4 sm:$0xff]  }
 0x389   : > { %13108 = vmatmul.mubr.bf16.gmra.mrb[12].mxu0 %v18161_v44  ;;  %15820 = vmatmul.mubr.bf16.gmra.mrb[12].mxu1 %v18161_v44  ;;  %v22755_v44 = vld [vmem:[%s24405_s28 + $0x182c] ss:$16 sps:$4 sm:$0xff]  }
 0x38a   : > { %13171 = vmatpush1.bf16.msra.mxu0 %v22684_v42  ;;  %15883 = vmatpush1.bf16.msra.mxu1 %v22687_v43  ;;  %v478_v42 = vld [vmem:[%s24536_s30 + $0x298] sm:$0xff]  ;;  %v22752_v43 = vld [vmem:[%s24405_s28 + $0x1824] ss:$16 sps:$4 sm:$0xff]  }
 0x38b   : > { %13172 = vmatprep.subr.bf16.mxu0 %v22692_v47  ;;  %15884 = vmatprep.subr.bf16.mxu1 %v22695_v48  ;;  %v18068_v45 = vcombine.high %v454_v41, %v478_v42  ;;  %v22753_v47 = vld [vmem:[%s24405_s28 + $0x1828] ss:$16 sps:$4 sm:$0xff]   ;;  %v22758_v48 = vld [vmem:[%s24405_s28 + $0x1844] ss:$16 sps:$4 sm:$0xff]  }
 0x38c   : > { %13117 = vmatprep.mubr.bf16.mxu0 %v18210_v49  ;;  %15829 = vmatprep.mubr.bf16.mxu1 %v18210_v49  ;;  %v22761_v49 = vld [vmem:[%s24405_s28 + $0x184c] ss:$16 sps:$4 sm:$0xff]  }
 0x38e   : > { %13173 = vmatpush1.bf16.msra.mxu0 %v22690_v50  ;;  %15885 = vmatpush1.bf16.msra.mxu1 %v22693_v51  ;;  %v22756_v50 = vld [vmem:[%s24405_s28 + $0x1840] ss:$16 sps:$4 sm:$0xff]   ;;  %v22759_v51 = vld [vmem:[%s24405_s28 + $0x1848] ss:$16 sps:$4 sm:$0xff]  }
 0x38f   : > { %13174 = vmatprep.subr.bf16.mxu0 %v22698_v52  ;;  %15886 = vmatprep.subr.bf16.mxu1 %v22701_v53  ;;  %v18067_v52 = vcombine.low %v454_v41, %v478_v42  ;;  %v502_v53 = vld [vmem:[%s24536_s30 + $0x358] sm:$0xff]  ;;  %v22810_v42 = vld [vmem:[%s24405_s28 + $0x1960] ss:$16 sps:$4 sm:$0xff]  }
 0x391   : > { %13118 = vmatmul.mubr.bf16.gmra.mrb[16].mxu0 %v18209_v56  ;;  %15830 = vmatmul.mubr.bf16.gmra.mrb[16].mxu1 %v18209_v56  ;;  %v22767_v56 = vld [vmem:[%s24405_s28 + $0x186c] ss:$16 sps:$4 sm:$0xff]  }
 0x392   : > { %13175 = vmatpush1.bf16.msra.mxu0 %v22696_v54  ;;  %15887 = vmatpush1.bf16.msra.mxu1 %v22699_v55  ;;  %v526_v54 = vld [vmem:[%s24536_s30 + $0x418] sm:$0xff]  ;;  %v22764_v55 = vld [vmem:[%s24405_s28 + $0x1864] ss:$16 sps:$4 sm:$0xff]  }
 0x393   : > { %13176 = vmatprep.subr.bf16.mxu0 %v22704_v59  ;;  %15888 = vmatprep.subr.bf16.mxu1 %v22707_v60  ;;  %v18116_v57 = vcombine.high %v502_v53, %v526_v54  ;;  %v22765_v59 = vld [vmem:[%s24405_s28 + $0x1868] ss:$16 sps:$4 sm:$0xff]   ;;  %v22770_v60 = vld [vmem:[%s24405_s28 + $0x1884] ss:$16 sps:$4 sm:$0xff]  }
 0x394   : > { %13127 = vmatprep.mubr.bf16.mxu0 %v18258_v61  ;;  %15839 = vmatprep.mubr.bf16.mxu1 %v18258_v61  ;;  %v22773_v61 = vld [vmem:[%s24405_s28 + $0x188c] ss:$16 sps:$4 sm:$0xff]  }
 0x396   : > { %13177 = vmatpush1.bf16.msra.mxu0 %v22702_v62  ;;  %15889 = vmatpush1.bf16.msra.mxu1 %v22705_v63  ;;  %v22768_v62 = vld [vmem:[%s24405_s28 + $0x1880] ss:$16 sps:$4 sm:$0xff]   ;;  %v22771_v63 = vld [vmem:[%s24405_s28 + $0x1888] ss:$16 sps:$4 sm:$0xff]  }
 0x397   : > { %13178 = vmatprep.subr.bf16.mxu0 %v22710_v0  ;;  %15890 = vmatprep.subr.bf16.mxu1 %v22713_v1  ;;  %v18115_v0 = vcombine.low %v502_v53, %v526_v54  ;;  %v550_v1 = vld [vmem:[%s24536_s30 + $0x4d8] sm:$0xff]  ;;  %v22822_v54 = vld [vmem:[%s24405_s28 + $0x19a0] ss:$16 sps:$4 sm:$0xff]  }
 0x399   : > { %13128 = vmatmul.mubr.bf16.gmra.mrb[20].mxu0 %v18257_v4  ;;  %15840 = vmatmul.mubr.bf16.gmra.mrb[20].mxu1 %v18257_v4  ;;  %v22779_v4 = vld [vmem:[%s24405_s28 + $0x18ac] ss:$16 sps:$4 sm:$0xff]  }
 0x39a   : > { %13179 = vmatpush1.bf16.msra.mxu0 %v22708_v2  ;;  %15891 = vmatpush1.bf16.msra.mxu1 %v22711_v3  ;;  %v574_v2 = vld [vmem:[%s24536_s30 + $0x598] sm:$0xff]  ;;  %v22776_v3 = vld [vmem:[%s24405_s28 + $0x18a4] ss:$16 sps:$4 sm:$0xff]  }
 0x39b   : > { %13180 = vmatprep.subr.bf16.mxu0 %v22716_v7  ;;  %15892 = vmatprep.subr.bf16.mxu1 %v22719_v8  ;;  %v18164_v5 = vcombine.high %v550_v1, %v574_v2  ;;  %v22777_v7 = vld [vmem:[%s24405_s28 + $0x18a8] ss:$16 sps:$4 sm:$0xff]   ;;  %v22782_v8 = vld [vmem:[%s24405_s28 + $0x18c4] ss:$16 sps:$4 sm:$0xff]  }
 0x39c   : > { %13137 = vmatprep.mubr.bf16.mxu0 %v18306_v9  ;;  %15849 = vmatprep.mubr.bf16.mxu1 %v18306_v9  ;;  %v22785_v9 = vld [vmem:[%s24405_s28 + $0x18cc] ss:$16 sps:$4 sm:$0xff]  }
 0x39e   : > { %13181 = vmatpush1.bf16.msra.mxu0 %v22714_v10  ;;  %15893 = vmatpush1.bf16.msra.mxu1 %v22717_v11  ;;  %v22780_v10 = vld [vmem:[%s24405_s28 + $0x18c0] ss:$16 sps:$4 sm:$0xff]   ;;  %v22783_v11 = vld [vmem:[%s24405_s28 + $0x18c8] ss:$16 sps:$4 sm:$0xff]  }
 0x39f   : > { %13182 = vmatprep.subr.bf16.mxu0 %v22722_v12  ;;  %15894 = vmatprep.subr.bf16.mxu1 %v22725_v13  ;;  %v18163_v12 = vcombine.low %v550_v1, %v574_v2  ;;  %v598_v13 = vld [vmem:[%s24536_s30 + $0x658] sm:$0xff]  ;;  %v22834_v2 = vld [vmem:[%s24405_s28 + $0x19e0] ss:$16 sps:$4 sm:$0xff]  }
 0x3a1   : > { %13138 = vmatmul.mubr.bf16.gmra.mrb[24].mxu0 %v18305_v16  ;;  %15850 = vmatmul.mubr.bf16.gmra.mrb[24].mxu1 %v18305_v16  ;;  %v22791_v16 = vld [vmem:[%s24405_s28 + $0x18ec] ss:$16 sps:$4 sm:$0xff]  }
 0x3a2   : > { %13183 = vmatpush1.bf16.msra.mxu0 %v22720_v14  ;;  %15895 = vmatpush1.bf16.msra.mxu1 %v22723_v15  ;;  %v622_v14 = vld [vmem:[%s24536_s30 + $0x718] sm:$0xff]  ;;  %v22788_v15 = vld [vmem:[%s24405_s28 + $0x18e4] ss:$16 sps:$4 sm:$0xff]  }
 0x3a3   : > { %13184 = vmatprep.subr.bf16.mxu0 %v22728_v19  ;;  %15896 = vmatprep.subr.bf16.mxu1 %v22731_v20  ;;  %v18212_v17 = vcombine.high %v598_v13, %v622_v14  ;;  %v22789_v19 = vld [vmem:[%s24405_s28 + $0x18e8] ss:$16 sps:$4 sm:$0xff]   ;;  %v22794_v20 = vld [vmem:[%s24405_s28 + $0x1904] ss:$16 sps:$4 sm:$0xff]  }
 0x3a4   : > { %13147 = vmatprep.mubr.bf16.mxu0 %v18354_v21  ;;  %15859 = vmatprep.mubr.bf16.mxu1 %v18354_v21  ;;  %v22797_v21 = vld [vmem:[%s24405_s28 + $0x190c] ss:$16 sps:$4 sm:$0xff]  }
 0x3a6   : > { %13185 = vmatpush1.bf16.msra.mxu0 %v22726_v22  ;;  %15897 = vmatpush1.bf16.msra.mxu1 %v22729_v23  ;;  %v22792_v22 = vld [vmem:[%s24405_s28 + $0x1900] ss:$16 sps:$4 sm:$0xff]   ;;  %v22795_v23 = vld [vmem:[%s24405_s28 + $0x1908] ss:$16 sps:$4 sm:$0xff]  }
 0x3a7   : > { %13186 = vmatprep.subr.bf16.mxu0 %v22734_v24  ;;  %15898 = vmatprep.subr.bf16.mxu1 %v22737_v25  ;;  %v18211_v24 = vcombine.low %v598_v13, %v622_v14  ;;  %v646_v25 = vld [vmem:[%s24536_s30 + $0x7d8] sm:$0xff]  ;;  %v22846_v14 = vld [vmem:[%s24405_s28 + $0x1a20] ss:$16 sps:$4 sm:$0xff]  }
 0x3a9   : > { %13148 = vmatmul.mubr.bf16.gmra.mrb[28].mxu0 %v18353_v28  ;;  %15860 = vmatmul.mubr.bf16.gmra.mrb[28].mxu1 %v18353_v28  ;;  %v22803_v28 = vld [vmem:[%s24405_s28 + $0x192c] ss:$16 sps:$4 sm:$0xff]  }
 0x3aa   : > { %13187 = vmatpush1.bf16.msra.mxu0 %v22732_v26  ;;  %15899 = vmatpush1.bf16.msra.mxu1 %v22735_v27  ;;  %v670_v26 = vld [vmem:[%s24536_s30 + $0x898] sm:$0xff]  ;;  %v22800_v27 = vld [vmem:[%s24405_s28 + $0x1924] ss:$16 sps:$4 sm:$0xff]  }
 0x3ab   : > { %13188 = vmatprep.subr.bf16.mxu0 %v22740_v31  ;;  %15900 = vmatprep.subr.bf16.mxu1 %v22743_v32  ;;  %v18260_v29 = vcombine.high %v646_v25, %v670_v26  ;;  %v22801_v31 = vld [vmem:[%s24405_s28 + $0x1928] ss:$16 sps:$4 sm:$0xff]   ;;  %v22806_v32 = vld [vmem:[%s24405_s28 + $0x1944] ss:$16 sps:$4 sm:$0xff]  }
 0x3ac   : > { %13190 = vmatprep.mubr.bf16.mxu0 %v18020_v33  ;;  %15902 = vmatprep.mubr.bf16.mxu1 %v18020_v33  ;;  %v22809_v33 = vld [vmem:[%s24405_s28 + $0x194c] ss:$16 sps:$4 sm:$0xff]  }
 0x3ae   : > { %13189 = vmatpush1.bf16.msra.mxu0 %v22738_v34  ;;  %15901 = vmatpush1.bf16.msra.mxu1 %v22741_v35  ;;  %v22804_v34 = vld [vmem:[%s24405_s28 + $0x1940] ss:$16 sps:$4 sm:$0xff]   ;;  %v22807_v35 = vld [vmem:[%s24405_s28 + $0x1948] ss:$16 sps:$4 sm:$0xff]  }
 0x3af   : > { %13271 = vmatprep.subr.bf16.mxu0 %v22746_v36  ;;  %15983 = vmatprep.subr.bf16.mxu1 %v22749_v37  ;;  %v18259_v36 = vcombine.low %v646_v25, %v670_v26  ;;  %v694_v37 = vld [vmem:[%s24536_s30 + $0x958] sm:$0xff]  ;;  %v22858_v26 = vld [vmem:[%s24405_s28 + $0x1a60] ss:$16 sps:$4 sm:$0xff]  }
 0x3b1   : > { %13191 = vmatmul.mubr.bf16.vlgmr.msra.gmra.mrb[0].mxu0 %v18019_v40  ;;  %15903 = vmatmul.mubr.bf16.vlgmr.msra.gmra.mrb[0].mxu1 %v18019_v40  ;;  %v22815_v40 = vld [vmem:[%s24405_s28 + $0x196c] ss:$16 sps:$4 sm:$0xff]  }
 0x3b2   : > { %13272 = vmatpush1.bf16.msra.mxu0 %v22744_v38  ;;  %15984 = vmatpush1.bf16.msra.mxu1 %v22747_v39  ;;  %v718_v38 = vld [vmem:[%s24536_s30 + $0xa18] sm:$0xff]  ;;  %v22812_v39 = vld [vmem:[%s24405_s28 + $0x1964] ss:$16 sps:$4 sm:$0xff]  }
 0x3b3   : > { %13273 = vmatprep.subr.bf16.mxu0 %v22752_v43  ;;  %15985 = vmatprep.subr.bf16.mxu1 %v22755_v44  ;;  %v18308_v41 = vcombine.high %v694_v37, %v718_v38  ;;  %v22813_v43 = vld [vmem:[%s24405_s28 + $0x1968] ss:$16 sps:$4 sm:$0xff]   ;;  %v22818_v44 = vld [vmem:[%s24405_s28 + $0x1984] ss:$16 sps:$4 sm:$0xff]  }
 0x3b4   : > { %13200 = vmatprep.mubr.bf16.mxu0 %v18068_v45  ;;  %15912 = vmatprep.mubr.bf16.mxu1 %v18068_v45  ;;  %v22821_v45 = vld [vmem:[%s24405_s28 + $0x198c] ss:$16 sps:$4 sm:$0xff]  }
 0x3b6   : > { %13274 = vmatpush1.bf16.msra.mxu0 %v22750_v46  ;;  %15986 = vmatpush1.bf16.msra.mxu1 %v22753_v47  ;;  %v22816_v46 = vld [vmem:[%s24405_s28 + $0x1980] ss:$16 sps:$4 sm:$0xff]   ;;  %v22819_v47 = vld [vmem:[%s24405_s28 + $0x1988] ss:$16 sps:$4 sm:$0xff]  }
 0x3b7   : > { %13275 = vmatprep.subr.bf16.mxu0 %v22758_v48  ;;  %15987 = vmatprep.subr.bf16.mxu1 %v22761_v49  ;;  %v18307_v48 = vcombine.low %v694_v37, %v718_v38  ;;  %v742_v49 = vld [vmem:[%s24536_s30 + $0xad8] sm:$0xff]  ;;  %v22870_v38 = vld [vmem:[%s24405_s28 + $0x1aa0] ss:$16 sps:$4 sm:$0xff]  }
 0x3b9   : > { %13201 = vmatmul.mubr.bf16.gmra.mrb[4].mxu0 %v18067_v52  ;;  %15913 = vmatmul.mubr.bf16.gmra.mrb[4].mxu1 %v18067_v52  ;;  %v22827_v52 = vld [vmem:[%s24405_s28 + $0x19ac] ss:$16 sps:$4 sm:$0xff]  }
 0x3ba   : > { %13276 = vmatpush1.bf16.msra.mxu0 %v22756_v50  ;;  %15988 = vmatpush1.bf16.msra.mxu1 %v22759_v51  ;;  %v766_v50 = vld [vmem:[%s24536_s30 + $0xb98] sm:$0xff]  ;;  %v22824_v51 = vld [vmem:[%s24405_s28 + $0x19a4] ss:$16 sps:$4 sm:$0xff]  }
 0x3bb   : > { %13277 = vmatprep.subr.bf16.mxu0 %v22764_v55  ;;  %15989 = vmatprep.subr.bf16.mxu1 %v22767_v56  ;;  %v18356_v53 = vcombine.high %v742_v49, %v766_v50  ;;  %v22825_v55 = vld [vmem:[%s24405_s28 + $0x19a8] ss:$16 sps:$4 sm:$0xff]   ;;  %v22830_v56 = vld [vmem:[%s24405_s28 + $0x19c4] ss:$16 sps:$4 sm:$0xff]  }
 0x3bc   : > { %13210 = vmatprep.mubr.bf16.mxu0 %v18116_v57  ;;  %15922 = vmatprep.mubr.bf16.mxu1 %v18116_v57  ;;  %v22833_v57 = vld [vmem:[%s24405_s28 + $0x19cc] ss:$16 sps:$4 sm:$0xff]  }
 0x3be   : > { %13278 = vmatpush1.bf16.msra.mxu0 %v22762_v58  ;;  %15990 = vmatpush1.bf16.msra.mxu1 %v22765_v59  ;;  %v22828_v58 = vld [vmem:[%s24405_s28 + $0x19c0] ss:$16 sps:$4 sm:$0xff]   ;;  %v22831_v59 = vld [vmem:[%s24405_s28 + $0x19c8] ss:$16 sps:$4 sm:$0xff]  }
 0x3bf   : > { %13279 = vmatprep.subr.bf16.mxu0 %v22770_v60  ;;  %15991 = vmatprep.subr.bf16.mxu1 %v22773_v61  ;;  %v18355_v60 = vcombine.low %v742_v49, %v766_v50  ;;  %v407_v61 = vld [vmem:[%s24536_s30 + $0x60] sm:$0xff] }
 0x3c0   : > { %v22882_v50 = vld [vmem:[%s24405_s28 + $0x1ae0] ss:$16 sps:$4 sm:$0xff]  }
 0x3c1   : > { %13211 = vmatmul.mubr.bf16.gmra.mrb[8].mxu0 %v18115_v0  ;;  %15923 = vmatmul.mubr.bf16.gmra.mrb[8].mxu1 %v18115_v0  ;;  %v22839_v0 = vld [vmem:[%s24405_s28 + $0x19ec] ss:$16 sps:$4 sm:$0xff]  }
 0x3c2   : > { %13280 = vmatpush1.bf16.msra.mxu0 %v22768_v62  ;;  %15992 = vmatpush1.bf16.msra.mxu1 %v22771_v63  ;;  %v431_v62 = vld [vmem:[%s24536_s30 + $0x120] sm:$0xff] }
 0x3c3   : > { %13281 = vmatprep.subr.bf16.mxu0 %v22776_v3  ;;  %15993 = vmatprep.subr.bf16.mxu1 %v22779_v4  ;;  %v22836_v63 = vld [vmem:[%s24405_s28 + $0x19e4] ss:$16 sps:$4 sm:$0xff]   ;;  %v18022_v1 = vcombine.high %v407_v61, %v431_v62  ;;  %v22837_v3 = vld [vmem:[%s24405_s28 + $0x19e8] ss:$16 sps:$4 sm:$0xff]  }
 0x3c4   : > { %13220 = vmatprep.mubr.bf16.mxu0 %v18164_v5  ;;  %15932 = vmatprep.mubr.bf16.mxu1 %v18164_v5  ;;  %v22842_v4 = vld [vmem:[%s24405_s28 + $0x1a04] ss:$16 sps:$4 sm:$0xff]   ;;  %v22845_v5 = vld [vmem:[%s24405_s28 + $0x1a0c] ss:$16 sps:$4 sm:$0xff]  }
 0x3c6   : > { %13282 = vmatpush1.bf16.msra.mxu0 %v22774_v6  ;;  %15994 = vmatpush1.bf16.msra.mxu1 %v22777_v7  ;;  %v22840_v6 = vld [vmem:[%s24405_s28 + $0x1a00] ss:$16 sps:$4 sm:$0xff]   ;;  %v22843_v7 = vld [vmem:[%s24405_s28 + $0x1a08] ss:$16 sps:$4 sm:$0xff]  }
 0x3c7   : > { %13283 = vmatprep.subr.bf16.mxu0 %v22782_v8  ;;  %15995 = vmatprep.subr.bf16.mxu1 %v22785_v9  ;;  %v18021_v8 = vcombine.low %v407_v61, %v431_v62  ;;  %v455_v9 = vld [vmem:[%s24536_s30 + $0x1e0] sm:$0xff] }
 0x3c8   : > { %v22894_v62 = vld [vmem:[%s24405_s28 + $0x1b20] ss:$16 sps:$4 sm:$0xff]  }
 0x3c9   : > { %13221 = vmatmul.mubr.bf16.gmra.mrb[12].mxu0 %v18163_v12  ;;  %15933 = vmatmul.mubr.bf16.gmra.mrb[12].mxu1 %v18163_v12  ;;  %v22851_v12 = vld [vmem:[%s24405_s28 + $0x1a2c] ss:$16 sps:$4 sm:$0xff]  }
 0x3ca   : > { %13284 = vmatpush1.bf16.msra.mxu0 %v22780_v10  ;;  %15996 = vmatpush1.bf16.msra.mxu1 %v22783_v11  ;;  %v479_v10 = vld [vmem:[%s24536_s30 + $0x2a0] sm:$0xff] }
 0x3cb   : > { %13285 = vmatprep.subr.bf16.mxu0 %v22788_v15  ;;  %15997 = vmatprep.subr.bf16.mxu1 %v22791_v16  ;;  %v22848_v11 = vld [vmem:[%s24405_s28 + $0x1a24] ss:$16 sps:$4 sm:$0xff]   ;;  %v18070_v13 = vcombine.high %v455_v9, %v479_v10  ;;  %v22849_v15 = vld [vmem:[%s24405_s28 + $0x1a28] ss:$16 sps:$4 sm:$0xff]  }
 0x3cc   : > { %13230 = vmatprep.mubr.bf16.mxu0 %v18212_v17  ;;  %15942 = vmatprep.mubr.bf16.mxu1 %v18212_v17  ;;  %v22854_v16 = vld [vmem:[%s24405_s28 + $0x1a44] ss:$16 sps:$4 sm:$0xff]   ;;  %v22857_v17 = vld [vmem:[%s24405_s28 + $0x1a4c] ss:$16 sps:$4 sm:$0xff]  }
 0x3ce   : > { %13286 = vmatpush1.bf16.msra.mxu0 %v22786_v18  ;;  %15998 = vmatpush1.bf16.msra.mxu1 %v22789_v19  ;;  %v22852_v18 = vld [vmem:[%s24405_s28 + $0x1a40] ss:$16 sps:$4 sm:$0xff]   ;;  %v22855_v19 = vld [vmem:[%s24405_s28 + $0x1a48] ss:$16 sps:$4 sm:$0xff]  }
 0x3cf   : > { %13287 = vmatprep.subr.bf16.mxu0 %v22794_v20  ;;  %15999 = vmatprep.subr.bf16.mxu1 %v22797_v21  ;;  %v18069_v20 = vcombine.low %v455_v9, %v479_v10  ;;  %v503_v21 = vld [vmem:[%s24536_s30 + $0x360] sm:$0xff] }
 0x3d0   : > { %v22906_v10 = vld [vmem:[%s24405_s28 + $0x1b60] ss:$16 sps:$4 sm:$0xff]  }
 0x3d1   : > { %13231 = vmatmul.mubr.bf16.gmra.mrb[16].mxu0 %v18211_v24  ;;  %15943 = vmatmul.mubr.bf16.gmra.mrb[16].mxu1 %v18211_v24  ;;  %v22863_v24 = vld [vmem:[%s24405_s28 + $0x1a6c] ss:$16 sps:$4 sm:$0xff]  }
 0x3d2   : > { %13288 = vmatpush1.bf16.msra.mxu0 %v22792_v22  ;;  %16000 = vmatpush1.bf16.msra.mxu1 %v22795_v23  ;;  %v527_v22 = vld [vmem:[%s24536_s30 + $0x420] sm:$0xff] }
 0x3d3   : > { %13289 = vmatprep.subr.bf16.mxu0 %v22800_v27  ;;  %16001 = vmatprep.subr.bf16.mxu1 %v22803_v28  ;;  %v22860_v23 = vld [vmem:[%s24405_s28 + $0x1a64] ss:$16 sps:$4 sm:$0xff]   ;;  %v18118_v25 = vcombine.high %v503_v21, %v527_v22  ;;  %v22861_v27 = vld [vmem:[%s24405_s28 + $0x1a68] ss:$16 sps:$4 sm:$0xff]  }
 0x3d4   : > { %13240 = vmatprep.mubr.bf16.mxu0 %v18260_v29  ;;  %15952 = vmatprep.mubr.bf16.mxu1 %v18260_v29  ;;  %v22866_v28 = vld [vmem:[%s24405_s28 + $0x1a84] ss:$16 sps:$4 sm:$0xff]   ;;  %v22869_v29 = vld [vmem:[%s24405_s28 + $0x1a8c] ss:$16 sps:$4 sm:$0xff]  }
 0x3d6   : > { %13290 = vmatpush1.bf16.msra.mxu0 %v22798_v30  ;;  %16002 = vmatpush1.bf16.msra.mxu1 %v22801_v31  ;;  %v22864_v30 = vld [vmem:[%s24405_s28 + $0x1a80] ss:$16 sps:$4 sm:$0xff]   ;;  %v22867_v31 = vld [vmem:[%s24405_s28 + $0x1a88] ss:$16 sps:$4 sm:$0xff]  }
 0x3d7   : > { %13291 = vmatprep.subr.bf16.mxu0 %v22806_v32  ;;  %16003 = vmatprep.subr.bf16.mxu1 %v22809_v33  ;;  %v18117_v32 = vcombine.low %v503_v21, %v527_v22  ;;  %v551_v33 = vld [vmem:[%s24536_s30 + $0x4e0] sm:$0xff] }
 0x3d8   : > { %v22918_v22 = vld [vmem:[%s24405_s28 + $0x1ba0] ss:$16 sps:$4 sm:$0xff]  }
 0x3d9   : > { %13241 = vmatmul.mubr.bf16.gmra.mrb[20].mxu0 %v18259_v36  ;;  %15953 = vmatmul.mubr.bf16.gmra.mrb[20].mxu1 %v18259_v36  ;;  %v22875_v36 = vld [vmem:[%s24405_s28 + $0x1aac] ss:$16 sps:$4 sm:$0xff]  }
 0x3da   : > { %13292 = vmatpush1.bf16.msra.mxu0 %v22804_v34  ;;  %16004 = vmatpush1.bf16.msra.mxu1 %v22807_v35  ;;  %v575_v34 = vld [vmem:[%s24536_s30 + $0x5a0] sm:$0xff] }
 0x3db   : > { %13293 = vmatprep.subr.bf16.mxu0 %v22812_v39  ;;  %16005 = vmatprep.subr.bf16.mxu1 %v22815_v40  ;;  %v22872_v35 = vld [vmem:[%s24405_s28 + $0x1aa4] ss:$16 sps:$4 sm:$0xff]   ;;  %v18166_v37 = vcombine.high %v551_v33, %v575_v34  ;;  %v22873_v39 = vld [vmem:[%s24405_s28 + $0x1aa8] ss:$16 sps:$4 sm:$0xff]  }
 0x3dc   : > { %13250 = vmatprep.mubr.bf16.mxu0 %v18308_v41  ;;  %15962 = vmatprep.mubr.bf16.mxu1 %v18308_v41  ;;  %v22878_v40 = vld [vmem:[%s24405_s28 + $0x1ac4] ss:$16 sps:$4 sm:$0xff]   ;;  %v22881_v41 = vld [vmem:[%s24405_s28 + $0x1acc] ss:$16 sps:$4 sm:$0xff]  }
 0x3de   : > { %13294 = vmatpush1.bf16.msra.mxu0 %v22810_v42  ;;  %16006 = vmatpush1.bf16.msra.mxu1 %v22813_v43  ;;  %v22876_v42 = vld [vmem:[%s24405_s28 + $0x1ac0] ss:$16 sps:$4 sm:$0xff]   ;;  %v22879_v43 = vld [vmem:[%s24405_s28 + $0x1ac8] ss:$16 sps:$4 sm:$0xff]  }
 0x3df   : > { %13295 = vmatprep.subr.bf16.mxu0 %v22818_v44  ;;  %16007 = vmatprep.subr.bf16.mxu1 %v22821_v45  ;;  %v18165_v44 = vcombine.low %v551_v33, %v575_v34  ;;  %v599_v45 = vld [vmem:[%s24536_s30 + $0x660] sm:$0xff] }
 0x3e0   : > { %v22930_v34 = vld [vmem:[%s24405_s28 + $0x1be0] ss:$16 sps:$4 sm:$0xff]  }
 0x3e1   : > { %13251 = vmatmul.mubr.bf16.gmra.mrb[24].mxu0 %v18307_v48  ;;  %15963 = vmatmul.mubr.bf16.gmra.mrb[24].mxu1 %v18307_v48  ;;  %v22887_v48 = vld [vmem:[%s24405_s28 + $0x1aec] ss:$16 sps:$4 sm:$0xff]  }
 0x3e2   : > { %13296 = vmatpush1.bf16.msra.mxu0 %v22816_v46  ;;  %16008 = vmatpush1.bf16.msra.mxu1 %v22819_v47  ;;  %v623_v46 = vld [vmem:[%s24536_s30 + $0x720] sm:$0xff] }
 0x3e3   : > { %13297 = vmatprep.subr.bf16.mxu0 %v22824_v51  ;;  %16009 = vmatprep.subr.bf16.mxu1 %v22827_v52  ;;  %v22884_v47 = vld [vmem:[%s24405_s28 + $0x1ae4] ss:$16 sps:$4 sm:$0xff]   ;;  %v18214_v49 = vcombine.high %v599_v45, %v623_v46  ;;  %v22885_v51 = vld [vmem:[%s24405_s28 + $0x1ae8] ss:$16 sps:$4 sm:$0xff]  }
 0x3e4   : > { %13260 = vmatprep.mubr.bf16.mxu0 %v18356_v53  ;;  %15972 = vmatprep.mubr.bf16.mxu1 %v18356_v53  ;;  %v22890_v52 = vld [vmem:[%s24405_s28 + $0x1b04] ss:$16 sps:$4 sm:$0xff]   ;;  %v22893_v53 = vld [vmem:[%s24405_s28 + $0x1b0c] ss:$16 sps:$4 sm:$0xff]  }
 0x3e6   : > { %13298 = vmatpush1.bf16.msra.mxu0 %v22822_v54  ;;  %16010 = vmatpush1.bf16.msra.mxu1 %v22825_v55  ;;  %v22888_v54 = vld [vmem:[%s24405_s28 + $0x1b00] ss:$16 sps:$4 sm:$0xff]   ;;  %v22891_v55 = vld [vmem:[%s24405_s28 + $0x1b08] ss:$16 sps:$4 sm:$0xff]  }
 0x3e7   : > { %13299 = vmatprep.subr.bf16.mxu0 %v22830_v56  ;;  %16011 = vmatprep.subr.bf16.mxu1 %v22833_v57  ;;  %v18213_v56 = vcombine.low %v599_v45, %v623_v46  ;;  %v647_v57 = vld [vmem:[%s24536_s30 + $0x7e0] sm:$0xff] }
 0x3e8   : > { %v22942_v46 = vld [vmem:[%s24405_s28 + $0x1c20] ss:$16 sps:$4 sm:$0xff]  }
 0x3e9   : > { %13261 = vmatmul.mubr.bf16.gmra.mrb[28].mxu0 %v18355_v60  ;;  %15973 = vmatmul.mubr.bf16.gmra.mrb[28].mxu1 %v18355_v60  ;;  %v22899_v60 = vld [vmem:[%s24405_s28 + $0x1b2c] ss:$16 sps:$4 sm:$0xff]  }
 0x3ea   : > { %13300 = vmatpush1.bf16.msra.mxu0 %v22828_v58  ;;  %16012 = vmatpush1.bf16.msra.mxu1 %v22831_v59  ;;  %v671_v58 = vld [vmem:[%s24536_s30 + $0x8a0] sm:$0xff] }
 0x3eb   : > { %13301 = vmatprep.subr.bf16.mxu0 %v22836_v63  ;;  %16013 = vmatprep.subr.bf16.mxu1 %v22839_v0  ;;  %v22896_v59 = vld [vmem:[%s24405_s28 + $0x1b24] ss:$16 sps:$4 sm:$0xff]   ;;  %v18262_v61 = vcombine.high %v647_v57, %v671_v58  ;;  %v22897_v63 = vld [vmem:[%s24405_s28 + $0x1b28] ss:$16 sps:$4 sm:$0xff]  }
 0x3ec   : > { %13303 = vmatprep.mubr.bf16.mxu0 %v18022_v1  ;;  %16015 = vmatprep.mubr.bf16.mxu1 %v18022_v1  ;;  %v22902_v0 = vld [vmem:[%s24405_s28 + $0x1b44] ss:$16 sps:$4 sm:$0xff]   ;;  %v22905_v1 = vld [vmem:[%s24405_s28 + $0x1b4c] ss:$16 sps:$4 sm:$0xff]  }
 0x3ee   : > { %13302 = vmatpush1.bf16.msra.mxu0 %v22834_v2  ;;  %16014 = vmatpush1.bf16.msra.mxu1 %v22837_v3  ;;  %v22900_v2 = vld [vmem:[%s24405_s28 + $0x1b40] ss:$16 sps:$4 sm:$0xff]   ;;  %v22903_v3 = vld [vmem:[%s24405_s28 + $0x1b48] ss:$16 sps:$4 sm:$0xff]  }
 0x3ef   : > { %13384 = vmatprep.subr.bf16.mxu0 %v22842_v4  ;;  %16096 = vmatprep.subr.bf16.mxu1 %v22845_v5  ;;  %v18261_v4 = vcombine.low %v647_v57, %v671_v58  ;;  %v695_v5 = vld [vmem:[%s24536_s30 + $0x960] sm:$0xff] }
 0x3f0   : > { %v22954_v58 = vld [vmem:[%s24405_s28 + $0x1c60] ss:$16 sps:$4 sm:$0xff]  }
 0x3f1   : > { %13304 = vmatmul.mubr.bf16.vlgmr.msra.gmra.mrb[0].mxu0 %v18021_v8  ;;  %16016 = vmatmul.mubr.bf16.vlgmr.msra.gmra.mrb[0].mxu1 %v18021_v8  ;;  %v22911_v8 = vld [vmem:[%s24405_s28 + $0x1b6c] ss:$16 sps:$4 sm:$0xff]  }
 0x3f2   : > { %13385 = vmatpush1.bf16.msra.mxu0 %v22840_v6  ;;  %16097 = vmatpush1.bf16.msra.mxu1 %v22843_v7  ;;  %v719_v6 = vld [vmem:[%s24536_s30 + $0xa20] sm:$0xff] }
 0x3f3   : > { %13386 = vmatprep.subr.bf16.mxu0 %v22848_v11  ;;  %16098 = vmatprep.subr.bf16.mxu1 %v22851_v12  ;;  %v22908_v7 = vld [vmem:[%s24405_s28 + $0x1b64] ss:$16 sps:$4 sm:$0xff]   ;;  %v18310_v9 = vcombine.high %v695_v5, %v719_v6  ;;  %v22909_v11 = vld [vmem:[%s24405_s28 + $0x1b68] ss:$16 sps:$4 sm:$0xff]  }
 0x3f4   : > { %13313 = vmatprep.mubr.bf16.mxu0 %v18070_v13  ;;  %16025 = vmatprep.mubr.bf16.mxu1 %v18070_v13  ;;  %v22914_v12 = vld [vmem:[%s24405_s28 + $0x1b84] ss:$16 sps:$4 sm:$0xff]   ;;  %v22917_v13 = vld [vmem:[%s24405_s28 + $0x1b8c] ss:$16 sps:$4 sm:$0xff]  }
 0x3f6   : > { %13387 = vmatpush1.bf16.msra.mxu0 %v22846_v14  ;;  %16099 = vmatpush1.bf16.msra.mxu1 %v22849_v15  ;;  %v22912_v14 = vld [vmem:[%s24405_s28 + $0x1b80] ss:$16 sps:$4 sm:$0xff]   ;;  %v22915_v15 = vld [vmem:[%s24405_s28 + $0x1b88] ss:$16 sps:$4 sm:$0xff]  }
 0x3f7   : > { %13388 = vmatprep.subr.bf16.mxu0 %v22854_v16  ;;  %16100 = vmatprep.subr.bf16.mxu1 %v22857_v17  ;;  %v18309_v16 = vcombine.low %v695_v5, %v719_v6  ;;  %v743_v17 = vld [vmem:[%s24536_s30 + $0xae0] sm:$0xff] }
 0x3f8   : > { %v22966_v6 = vld [vmem:[%s24405_s28 + $0x1ca0] ss:$16 sps:$4 sm:$0xff]  }
 0x3f9   : > { %13314 = vmatmul.mubr.bf16.gmra.mrb[4].mxu0 %v18069_v20  ;;  %16026 = vmatmul.mubr.bf16.gmra.mrb[4].mxu1 %v18069_v20  ;;  %v22923_v20 = vld [vmem:[%s24405_s28 + $0x1bac] ss:$16 sps:$4 sm:$0xff]  }
 0x3fa   : > { %13389 = vmatpush1.bf16.msra.mxu0 %v22852_v18  ;;  %16101 = vmatpush1.bf16.msra.mxu1 %v22855_v19  ;;  %v767_v18 = vld [vmem:[%s24536_s30 + $0xba0] sm:$0xff] }
 0x3fb   : > { %13390 = vmatprep.subr.bf16.mxu0 %v22860_v23  ;;  %16102 = vmatprep.subr.bf16.mxu1 %v22863_v24  ;;  %v22920_v19 = vld [vmem:[%s24405_s28 + $0x1ba4] ss:$16 sps:$4 sm:$0xff]   ;;  %v18358_v21 = vcombine.high %v743_v17, %v767_v18  ;;  %v22921_v23 = vld [vmem:[%s24405_s28 + $0x1ba8] ss:$16 sps:$4 sm:$0xff]  }
 0x3fc   : > { %13323 = vmatprep.mubr.bf16.mxu0 %v18118_v25  ;;  %16035 = vmatprep.mubr.bf16.mxu1 %v18118_v25  ;;  %v22926_v24 = vld [vmem:[%s24405_s28 + $0x1bc4] ss:$16 sps:$4 sm:$0xff]   ;;  %v22929_v25 = vld [vmem:[%s24405_s28 + $0x1bcc] ss:$16 sps:$4 sm:$0xff]  }
 0x3fe   : > { %13391 = vmatpush1.bf16.msra.mxu0 %v22858_v26  ;;  %16103 = vmatpush1.bf16.msra.mxu1 %v22861_v27  ;;  %v22924_v26 = vld [vmem:[%s24405_s28 + $0x1bc0] ss:$16 sps:$4 sm:$0xff]   ;;  %v22927_v27 = vld [vmem:[%s24405_s28 + $0x1bc8] ss:$16 sps:$4 sm:$0xff]  }
 0x3ff   : > { %13392 = vmatprep.subr.bf16.mxu0 %v22866_v28  ;;  %16104 = vmatprep.subr.bf16.mxu1 %v22869_v29  ;;  %v18357_v28 = vcombine.low %v743_v17, %v767_v18  ;;  %v408_v29 = vld [vmem:[%s24536_s30 + $0x68] sm:$0xff]  ;;  %v22978_v18 = vld [vmem:[%s24405_s28 + $0x1ce0] ss:$16 sps:$4 sm:$0xff]  }
 0x401   : > { %13324 = vmatmul.mubr.bf16.gmra.mrb[8].mxu0 %v18117_v32  ;;  %16036 = vmatmul.mubr.bf16.gmra.mrb[8].mxu1 %v18117_v32  ;;  %v22935_v32 = vld [vmem:[%s24405_s28 + $0x1bec] ss:$16 sps:$4 sm:$0xff]  }
 0x402   : > { %13393 = vmatpush1.bf16.msra.mxu0 %v22864_v30  ;;  %16105 = vmatpush1.bf16.msra.mxu1 %v22867_v31  ;;  %v432_v30 = vld [vmem:[%s24536_s30 + $0x128] sm:$0xff]  ;;  %v22932_v31 = vld [vmem:[%s24405_s28 + $0x1be4] ss:$16 sps:$4 sm:$0xff]  }
 0x403   : > { %13394 = vmatprep.subr.bf16.mxu0 %v22872_v35  ;;  %16106 = vmatprep.subr.bf16.mxu1 %v22875_v36  ;;  %v18024_v33 = vcombine.high %v408_v29, %v432_v30  ;;  %v22933_v35 = vld [vmem:[%s24405_s28 + $0x1be8] ss:$16 sps:$4 sm:$0xff]   ;;  %v22938_v36 = vld [vmem:[%s24405_s28 + $0x1c04] ss:$16 sps:$4 sm:$0xff]  }
 0x404   : > { %13333 = vmatprep.mubr.bf16.mxu0 %v18166_v37  ;;  %16045 = vmatprep.mubr.bf16.mxu1 %v18166_v37  ;;  %v22941_v37 = vld [vmem:[%s24405_s28 + $0x1c0c] ss:$16 sps:$4 sm:$0xff]  }
 0x406   : > { %13395 = vmatpush1.bf16.msra.mxu0 %v22870_v38  ;;  %16107 = vmatpush1.bf16.msra.mxu1 %v22873_v39  ;;  %v22936_v38 = vld [vmem:[%s24405_s28 + $0x1c00] ss:$16 sps:$4 sm:$0xff]   ;;  %v22939_v39 = vld [vmem:[%s24405_s28 + $0x1c08] ss:$16 sps:$4 sm:$0xff]  }
 0x407   : > { %13396 = vmatprep.subr.bf16.mxu0 %v22878_v40  ;;  %16108 = vmatprep.subr.bf16.mxu1 %v22881_v41  ;;  %v18023_v40 = vcombine.low %v408_v29, %v432_v30  ;;  %v456_v41 = vld [vmem:[%s24536_s30 + $0x1e8] sm:$0xff]  ;;  %v22990_v30 = vld [vmem:[%s24405_s28 + $0x1d20] ss:$16 sps:$4 sm:$0xff]  }
 0x409   : > { %13334 = vmatmul.mubr.bf16.gmra.mrb[12].mxu0 %v18165_v44  ;;  %16046 = vmatmul.mubr.bf16.gmra.mrb[12].mxu1 %v18165_v44  ;;  %v22947_v44 = vld [vmem:[%s24405_s28 + $0x1c2c] ss:$16 sps:$4 sm:$0xff]  }
 0x40a   : > { %13397 = vmatpush1.bf16.msra.mxu0 %v22876_v42  ;;  %16109 = vmatpush1.bf16.msra.mxu1 %v22879_v43  ;;  %v480_v42 = vld [vmem:[%s24536_s30 + $0x2a8] sm:$0xff]  ;;  %v22944_v43 = vld [vmem:[%s24405_s28 + $0x1c24] ss:$16 sps:$4 sm:$0xff]  }
 0x40b   : > { %13398 = vmatprep.subr.bf16.mxu0 %v22884_v47  ;;  %16110 = vmatprep.subr.bf16.mxu1 %v22887_v48  ;;  %v18072_v45 = vcombine.high %v456_v41, %v480_v42  ;;  %v22945_v47 = vld [vmem:[%s24405_s28 + $0x1c28] ss:$16 sps:$4 sm:$0xff]   ;;  %v22950_v48 = vld [vmem:[%s24405_s28 + $0x1c44] ss:$16 sps:$4 sm:$0xff]  }
 0x40c   : > { %13343 = vmatprep.mubr.bf16.mxu0 %v18214_v49  ;;  %16055 = vmatprep.mubr.bf16.mxu1 %v18214_v49  ;;  %v22953_v49 = vld [vmem:[%s24405_s28 + $0x1c4c] ss:$16 sps:$4 sm:$0xff]  }
 0x40e   : > { %13399 = vmatpush1.bf16.msra.mxu0 %v22882_v50  ;;  %16111 = vmatpush1.bf16.msra.mxu1 %v22885_v51  ;;  %v22948_v50 = vld [vmem:[%s24405_s28 + $0x1c40] ss:$16 sps:$4 sm:$0xff]   ;;  %v22951_v51 = vld [vmem:[%s24405_s28 + $0x1c48] ss:$16 sps:$4 sm:$0xff]  }
 0x40f   : > { %13400 = vmatprep.subr.bf16.mxu0 %v22890_v52  ;;  %16112 = vmatprep.subr.bf16.mxu1 %v22893_v53  ;;  %v18071_v52 = vcombine.low %v456_v41, %v480_v42  ;;  %v504_v53 = vld [vmem:[%s24536_s30 + $0x368] sm:$0xff]  ;;  %v23002_v42 = vld [vmem:[%s24405_s28 + $0x1d60] ss:$16 sps:$4 sm:$0xff]  }
 0x411   : > { %13344 = vmatmul.mubr.bf16.gmra.mrb[16].mxu0 %v18213_v56  ;;  %16056 = vmatmul.mubr.bf16.gmra.mrb[16].mxu1 %v18213_v56  ;;  %v22959_v56 = vld [vmem:[%s24405_s28 + $0x1c6c] ss:$16 sps:$4 sm:$0xff]  }
 0x412   : > { %13401 = vmatpush1.bf16.msra.mxu0 %v22888_v54  ;;  %16113 = vmatpush1.bf16.msra.mxu1 %v22891_v55  ;;  %v528_v54 = vld [vmem:[%s24536_s30 + $0x428] sm:$0xff]  ;;  %v22956_v55 = vld [vmem:[%s24405_s28 + $0x1c64] ss:$16 sps:$4 sm:$0xff]  }
 0x413   : > { %13402 = vmatprep.subr.bf16.mxu0 %v22896_v59  ;;  %16114 = vmatprep.subr.bf16.mxu1 %v22899_v60  ;;  %v18120_v57 = vcombine.high %v504_v53, %v528_v54  ;;  %v22957_v59 = vld [vmem:[%s24405_s28 + $0x1c68] ss:$16 sps:$4 sm:$0xff]   ;;  %v22962_v60 = vld [vmem:[%s24405_s28 + $0x1c84] ss:$16 sps:$4 sm:$0xff]  }
 0x414   : > { %13353 = vmatprep.mubr.bf16.mxu0 %v18262_v61  ;;  %16065 = vmatprep.mubr.bf16.mxu1 %v18262_v61  ;;  %v22965_v61 = vld [vmem:[%s24405_s28 + $0x1c8c] ss:$16 sps:$4 sm:$0xff]  }
 0x416   : > { %13403 = vmatpush1.bf16.msra.mxu0 %v22894_v62  ;;  %16115 = vmatpush1.bf16.msra.mxu1 %v22897_v63  ;;  %v22960_v62 = vld [vmem:[%s24405_s28 + $0x1c80] ss:$16 sps:$4 sm:$0xff]   ;;  %v22963_v63 = vld [vmem:[%s24405_s28 + $0x1c88] ss:$16 sps:$4 sm:$0xff]  }
 0x417   : > { %13404 = vmatprep.subr.bf16.mxu0 %v22902_v0  ;;  %16116 = vmatprep.subr.bf16.mxu1 %v22905_v1  ;;  %v18119_v0 = vcombine.low %v504_v53, %v528_v54  ;;  %v552_v1 = vld [vmem:[%s24536_s30 + $0x4e8] sm:$0xff]  ;;  %v23014_v54 = vld [vmem:[%s24405_s28 + $0x1da0] ss:$16 sps:$4 sm:$0xff]  }
 0x419   : > { %13354 = vmatmul.mubr.bf16.gmra.mrb[20].mxu0 %v18261_v4  ;;  %16066 = vmatmul.mubr.bf16.gmra.mrb[20].mxu1 %v18261_v4  ;;  %v22971_v4 = vld [vmem:[%s24405_s28 + $0x1cac] ss:$16 sps:$4 sm:$0xff]  }
 0x41a   : > { %13405 = vmatpush1.bf16.msra.mxu0 %v22900_v2  ;;  %16117 = vmatpush1.bf16.msra.mxu1 %v22903_v3  ;;  %v576_v2 = vld [vmem:[%s24536_s30 + $0x5a8] sm:$0xff]  ;;  %v22968_v3 = vld [vmem:[%s24405_s28 + $0x1ca4] ss:$16 sps:$4 sm:$0xff]  }
 0x41b   : > { %13406 = vmatprep.subr.bf16.mxu0 %v22908_v7  ;;  %16118 = vmatprep.subr.bf16.mxu1 %v22911_v8  ;;  %v18168_v5 = vcombine.high %v552_v1, %v576_v2  ;;  %v22969_v7 = vld [vmem:[%s24405_s28 + $0x1ca8] ss:$16 sps:$4 sm:$0xff]   ;;  %v22974_v8 = vld [vmem:[%s24405_s28 + $0x1cc4] ss:$16 sps:$4 sm:$0xff]  }
 0x41c   : > { %13363 = vmatprep.mubr.bf16.mxu0 %v18310_v9  ;;  %16075 = vmatprep.mubr.bf16.mxu1 %v18310_v9  ;;  %v22977_v9 = vld [vmem:[%s24405_s28 + $0x1ccc] ss:$16 sps:$4 sm:$0xff]  }
 0x41e   : > { %13407 = vmatpush1.bf16.msra.mxu0 %v22906_v10  ;;  %16119 = vmatpush1.bf16.msra.mxu1 %v22909_v11  ;;  %v22972_v10 = vld [vmem:[%s24405_s28 + $0x1cc0] ss:$16 sps:$4 sm:$0xff]   ;;  %v22975_v11 = vld [vmem:[%s24405_s28 + $0x1cc8] ss:$16 sps:$4 sm:$0xff]  }
 0x41f   : > { %13408 = vmatprep.subr.bf16.mxu0 %v22914_v12  ;;  %16120 = vmatprep.subr.bf16.mxu1 %v22917_v13  ;;  %v18167_v12 = vcombine.low %v552_v1, %v576_v2  ;;  %v600_v13 = vld [vmem:[%s24536_s30 + $0x668] sm:$0xff]  ;;  %v23026_v2 = vld [vmem:[%s24405_s28 + $0x1de0] ss:$16 sps:$4 sm:$0xff]  }
 0x421   : > { %13364 = vmatmul.mubr.bf16.gmra.mrb[24].mxu0 %v18309_v16  ;;  %16076 = vmatmul.mubr.bf16.gmra.mrb[24].mxu1 %v18309_v16  ;;  %v22983_v16 = vld [vmem:[%s24405_s28 + $0x1cec] ss:$16 sps:$4 sm:$0xff]  }
 0x422   : > { %13409 = vmatpush1.bf16.msra.mxu0 %v22912_v14  ;;  %16121 = vmatpush1.bf16.msra.mxu1 %v22915_v15  ;;  %v624_v14 = vld [vmem:[%s24536_s30 + $0x728] sm:$0xff]  ;;  %v22980_v15 = vld [vmem:[%s24405_s28 + $0x1ce4] ss:$16 sps:$4 sm:$0xff]  }
 0x423   : > { %13410 = vmatprep.subr.bf16.mxu0 %v22920_v19  ;;  %16122 = vmatprep.subr.bf16.mxu1 %v22923_v20  ;;  %v18216_v17 = vcombine.high %v600_v13, %v624_v14  ;;  %v22981_v19 = vld [vmem:[%s24405_s28 + $0x1ce8] ss:$16 sps:$4 sm:$0xff]   ;;  %v22986_v20 = vld [vmem:[%s24405_s28 + $0x1d04] ss:$16 sps:$4 sm:$0xff]  }
 0x424   : > { %13373 = vmatprep.mubr.bf16.mxu0 %v18358_v21  ;;  %16085 = vmatprep.mubr.bf16.mxu1 %v18358_v21  ;;  %v22989_v21 = vld [vmem:[%s24405_s28 + $0x1d0c] ss:$16 sps:$4 sm:$0xff]  }
 0x426   : > { %13411 = vmatpush1.bf16.msra.mxu0 %v22918_v22  ;;  %16123 = vmatpush1.bf16.msra.mxu1 %v22921_v23  ;;  %v22984_v22 = vld [vmem:[%s24405_s28 + $0x1d00] ss:$16 sps:$4 sm:$0xff]   ;;  %v22987_v23 = vld [vmem:[%s24405_s28 + $0x1d08] ss:$16 sps:$4 sm:$0xff]  }
 0x427   : > { %13412 = vmatprep.subr.bf16.mxu0 %v22926_v24  ;;  %16124 = vmatprep.subr.bf16.mxu1 %v22929_v25  ;;  %v18215_v24 = vcombine.low %v600_v13, %v624_v14  ;;  %v648_v25 = vld [vmem:[%s24536_s30 + $0x7e8] sm:$0xff]  ;;  %v23038_v14 = vld [vmem:[%s24405_s28 + $0x1e20] ss:$16 sps:$4 sm:$0xff]  }
 0x429   : > { %13374 = vmatmul.mubr.bf16.gmra.mrb[28].mxu0 %v18357_v28  ;;  %16086 = vmatmul.mubr.bf16.gmra.mrb[28].mxu1 %v18357_v28  ;;  %v22995_v28 = vld [vmem:[%s24405_s28 + $0x1d2c] ss:$16 sps:$4 sm:$0xff]  }
 0x42a   : > { %13413 = vmatpush1.bf16.msra.mxu0 %v22924_v26  ;;  %16125 = vmatpush1.bf16.msra.mxu1 %v22927_v27  ;;  %v672_v26 = vld [vmem:[%s24536_s30 + $0x8a8] sm:$0xff]  ;;  %v22992_v27 = vld [vmem:[%s24405_s28 + $0x1d24] ss:$16 sps:$4 sm:$0xff]  }
 0x42b   : > { %13414 = vmatprep.subr.bf16.mxu0 %v22932_v31  ;;  %16126 = vmatprep.subr.bf16.mxu1 %v22935_v32  ;;  %v18264_v29 = vcombine.high %v648_v25, %v672_v26  ;;  %v22993_v31 = vld [vmem:[%s24405_s28 + $0x1d28] ss:$16 sps:$4 sm:$0xff]   ;;  %v22998_v32 = vld [vmem:[%s24405_s28 + $0x1d44] ss:$16 sps:$4 sm:$0xff]  }
 0x42c   : > { %13416 = vmatprep.mubr.bf16.mxu0 %v18024_v33  ;;  %16128 = vmatprep.mubr.bf16.mxu1 %v18024_v33  ;;  %v23001_v33 = vld [vmem:[%s24405_s28 + $0x1d4c] ss:$16 sps:$4 sm:$0xff]  }
 0x42e   : > { %13415 = vmatpush1.bf16.msra.mxu0 %v22930_v34  ;;  %16127 = vmatpush1.bf16.msra.mxu1 %v22933_v35  ;;  %v22996_v34 = vld [vmem:[%s24405_s28 + $0x1d40] ss:$16 sps:$4 sm:$0xff]   ;;  %v22999_v35 = vld [vmem:[%s24405_s28 + $0x1d48] ss:$16 sps:$4 sm:$0xff]  }
 0x42f   : > { %13497 = vmatprep.subr.bf16.mxu0 %v22938_v36  ;;  %16209 = vmatprep.subr.bf16.mxu1 %v22941_v37  ;;  %v18263_v36 = vcombine.low %v648_v25, %v672_v26  ;;  %v696_v37 = vld [vmem:[%s24536_s30 + $0x968] sm:$0xff]  ;;  %v23050_v26 = vld [vmem:[%s24405_s28 + $0x1e60] ss:$16 sps:$4 sm:$0xff]  }
 0x431   : > { %13417 = vmatmul.mubr.bf16.vlgmr.msra.gmra.mrb[0].mxu0 %v18023_v40  ;;  %16129 = vmatmul.mubr.bf16.vlgmr.msra.gmra.mrb[0].mxu1 %v18023_v40  ;;  %v23007_v40 = vld [vmem:[%s24405_s28 + $0x1d6c] ss:$16 sps:$4 sm:$0xff]  }
 0x432   : > { %13498 = vmatpush1.bf16.msra.mxu0 %v22936_v38  ;;  %16210 = vmatpush1.bf16.msra.mxu1 %v22939_v39  ;;  %v720_v38 = vld [vmem:[%s24536_s30 + $0xa28] sm:$0xff]  ;;  %v23004_v39 = vld [vmem:[%s24405_s28 + $0x1d64] ss:$16 sps:$4 sm:$0xff]  }
 0x433   : > { %13499 = vmatprep.subr.bf16.mxu0 %v22944_v43  ;;  %16211 = vmatprep.subr.bf16.mxu1 %v22947_v44  ;;  %v18312_v41 = vcombine.high %v696_v37, %v720_v38  ;;  %v23005_v43 = vld [vmem:[%s24405_s28 + $0x1d68] ss:$16 sps:$4 sm:$0xff]   ;;  %v23010_v44 = vld [vmem:[%s24405_s28 + $0x1d84] ss:$16 sps:$4 sm:$0xff]  }
 0x434   : > { %13426 = vmatprep.mubr.bf16.mxu0 %v18072_v45  ;;  %16138 = vmatprep.mubr.bf16.mxu1 %v18072_v45  ;;  %v23013_v45 = vld [vmem:[%s24405_s28 + $0x1d8c] ss:$16 sps:$4 sm:$0xff]  }
 0x436   : > { %13500 = vmatpush1.bf16.msra.mxu0 %v22942_v46  ;;  %16212 = vmatpush1.bf16.msra.mxu1 %v22945_v47  ;;  %v23008_v46 = vld [vmem:[%s24405_s28 + $0x1d80] ss:$16 sps:$4 sm:$0xff]   ;;  %v23011_v47 = vld [vmem:[%s24405_s28 + $0x1d88] ss:$16 sps:$4 sm:$0xff]  }
 0x437   : > { %13501 = vmatprep.subr.bf16.mxu0 %v22950_v48  ;;  %16213 = vmatprep.subr.bf16.mxu1 %v22953_v49  ;;  %v18311_v48 = vcombine.low %v696_v37, %v720_v38  ;;  %v744_v49 = vld [vmem:[%s24536_s30 + $0xae8] sm:$0xff]  ;;  %v23062_v38 = vld [vmem:[%s24405_s28 + $0x1ea0] ss:$16 sps:$4 sm:$0xff]  }
 0x439   : > { %13427 = vmatmul.mubr.bf16.gmra.mrb[4].mxu0 %v18071_v52  ;;  %16139 = vmatmul.mubr.bf16.gmra.mrb[4].mxu1 %v18071_v52  ;;  %v23019_v52 = vld [vmem:[%s24405_s28 + $0x1dac] ss:$16 sps:$4 sm:$0xff]  }
 0x43a   : > { %13502 = vmatpush1.bf16.msra.mxu0 %v22948_v50  ;;  %16214 = vmatpush1.bf16.msra.mxu1 %v22951_v51  ;;  %v768_v50 = vld [vmem:[%s24536_s30 + $0xba8] sm:$0xff]  ;;  %v23016_v51 = vld [vmem:[%s24405_s28 + $0x1da4] ss:$16 sps:$4 sm:$0xff]  }
 0x43b   : > { %13503 = vmatprep.subr.bf16.mxu0 %v22956_v55  ;;  %16215 = vmatprep.subr.bf16.mxu1 %v22959_v56  ;;  %v18360_v53 = vcombine.high %v744_v49, %v768_v50  ;;  %v23017_v55 = vld [vmem:[%s24405_s28 + $0x1da8] ss:$16 sps:$4 sm:$0xff]   ;;  %v23022_v56 = vld [vmem:[%s24405_s28 + $0x1dc4] ss:$16 sps:$4 sm:$0xff]  }
 0x43c   : > { %13436 = vmatprep.mubr.bf16.mxu0 %v18120_v57  ;;  %16148 = vmatprep.mubr.bf16.mxu1 %v18120_v57  ;;  %v23025_v57 = vld [vmem:[%s24405_s28 + $0x1dcc] ss:$16 sps:$4 sm:$0xff]  }
 0x43e   : > { %13504 = vmatpush1.bf16.msra.mxu0 %v22954_v58  ;;  %16216 = vmatpush1.bf16.msra.mxu1 %v22957_v59  ;;  %v23020_v58 = vld [vmem:[%s24405_s28 + $0x1dc0] ss:$16 sps:$4 sm:$0xff]   ;;  %v23023_v59 = vld [vmem:[%s24405_s28 + $0x1dc8] ss:$16 sps:$4 sm:$0xff]  }
 0x43f   : > { %13505 = vmatprep.subr.bf16.mxu0 %v22962_v60  ;;  %16217 = vmatprep.subr.bf16.mxu1 %v22965_v61  ;;  %v18359_v60 = vcombine.low %v744_v49, %v768_v50  ;;  %v409_v61 = vld [vmem:[%s24536_s30 + $0x70] sm:$0xff] }
 0x440   : > { %v23074_v50 = vld [vmem:[%s24405_s28 + $0x1ee0] ss:$16 sps:$4 sm:$0xff]  }
 0x441   : > { %13437 = vmatmul.mubr.bf16.gmra.mrb[8].mxu0 %v18119_v0  ;;  %16149 = vmatmul.mubr.bf16.gmra.mrb[8].mxu1 %v18119_v0  ;;  %v23031_v0 = vld [vmem:[%s24405_s28 + $0x1dec] ss:$16 sps:$4 sm:$0xff]  }
 0x442   : > { %13506 = vmatpush1.bf16.msra.mxu0 %v22960_v62  ;;  %16218 = vmatpush1.bf16.msra.mxu1 %v22963_v63  ;;  %v433_v62 = vld [vmem:[%s24536_s30 + $0x130] sm:$0xff] }
 0x443   : > { %13507 = vmatprep.subr.bf16.mxu0 %v22968_v3  ;;  %16219 = vmatprep.subr.bf16.mxu1 %v22971_v4  ;;  %v23028_v63 = vld [vmem:[%s24405_s28 + $0x1de4] ss:$16 sps:$4 sm:$0xff]   ;;  %v18026_v1 = vcombine.high %v409_v61, %v433_v62  ;;  %v23029_v3 = vld [vmem:[%s24405_s28 + $0x1de8] ss:$16 sps:$4 sm:$0xff]  }
 0x444   : > { %13446 = vmatprep.mubr.bf16.mxu0 %v18168_v5  ;;  %16158 = vmatprep.mubr.bf16.mxu1 %v18168_v5  ;;  %v23034_v4 = vld [vmem:[%s24405_s28 + $0x1e04] ss:$16 sps:$4 sm:$0xff]   ;;  %v23037_v5 = vld [vmem:[%s24405_s28 + $0x1e0c] ss:$16 sps:$4 sm:$0xff]  }
 0x446   : > { %13508 = vmatpush1.bf16.msra.mxu0 %v22966_v6  ;;  %16220 = vmatpush1.bf16.msra.mxu1 %v22969_v7  ;;  %v23032_v6 = vld [vmem:[%s24405_s28 + $0x1e00] ss:$16 sps:$4 sm:$0xff]   ;;  %v18025_v7 = vcombine.low %v409_v61, %v433_v62 }
 0x447   : > { %13509 = vmatprep.subr.bf16.mxu0 %v22974_v8  ;;  %16221 = vmatprep.subr.bf16.mxu1 %v22977_v9  ;;  %v457_v8 = vld [vmem:[%s24536_s30 + $0x1f0] sm:$0xff] }
 0x448   : > { %v481_v9 = vld [vmem:[%s24536_s30 + $0x2b0] sm:$0xff] }
 0x449   : > { %13447 = vmatmul.mubr.bf16.gmra.mrb[12].mxu0 %v18167_v12  ;;  %16159 = vmatmul.mubr.bf16.gmra.mrb[12].mxu1 %v18167_v12  ;;  %v23043_v12 = vld [vmem:[%s24405_s28 + $0x1e2c] ss:$16 sps:$4 sm:$0xff]   ;;  %v18074_v13 = vcombine.high %v457_v8, %v481_v9  ;;  %v23086_v62 = vld [vmem:[%s24405_s28 + $0x1f20] ss:$16 sps:$4 sm:$0xff]  }
 0x44a   : > { %13510 = vmatpush1.bf16.msra.mxu0 %v22972_v10  ;;  %16222 = vmatpush1.bf16.msra.mxu1 %v22975_v11  ;;  %v23035_v10 = vld [vmem:[%s24405_s28 + $0x1e08] ss:$16 sps:$4 sm:$0xff]   ;;  %v23040_v11 = vld [vmem:[%s24405_s28 + $0x1e24] ss:$16 sps:$4 sm:$0xff]  }
 0x44b   : > { %13511 = vmatprep.subr.bf16.mxu0 %v22980_v15  ;;  %16223 = vmatprep.subr.bf16.mxu1 %v22983_v16  ;;  %v23041_v15 = vld [vmem:[%s24405_s28 + $0x1e28] ss:$16 sps:$4 sm:$0xff]   ;;  %v23046_v16 = vld [vmem:[%s24405_s28 + $0x1e44] ss:$16 sps:$4 sm:$0xff]  }
 0x44c   : > { %13456 = vmatprep.mubr.bf16.mxu0 %v18216_v17  ;;  %16168 = vmatprep.mubr.bf16.mxu1 %v18216_v17  ;;  %v23049_v17 = vld [vmem:[%s24405_s28 + $0x1e4c] ss:$16 sps:$4 sm:$0xff]  }
 0x44e   : > { %13512 = vmatpush1.bf16.msra.mxu0 %v22978_v18  ;;  %16224 = vmatpush1.bf16.msra.mxu1 %v22981_v19  ;;  %v18073_v18 = vcombine.low %v457_v8, %v481_v9  ;;  %v505_v19 = vld [vmem:[%s24536_s30 + $0x370] sm:$0xff]  ;;  %v23103_v8 = vld [vmem:[%s24405_s28 + $0x1f6c] ss:$16 sps:$4 sm:$0xff]  }
 0x44f   : > { %13513 = vmatprep.subr.bf16.mxu0 %v22986_v20  ;;  %16225 = vmatprep.subr.bf16.mxu1 %v22989_v21  ;;  %v529_v20 = vld [vmem:[%s24536_s30 + $0x430] sm:$0xff] }
 0x450   : > { %v23044_v21 = vld [vmem:[%s24405_s28 + $0x1e40] ss:$16 sps:$4 sm:$0xff]   ;;  %v18122_v25 = vcombine.high %v505_v19, %v529_v20 }
 0x451   : > { %13457 = vmatmul.mubr.bf16.gmra.mrb[16].mxu0 %v18215_v24  ;;  %16169 = vmatmul.mubr.bf16.gmra.mrb[16].mxu1 %v18215_v24  ;;  %v23055_v24 = vld [vmem:[%s24405_s28 + $0x1e6c] ss:$16 sps:$4 sm:$0xff]  }
 0x452   : > { %13514 = vmatpush1.bf16.msra.mxu0 %v22984_v22  ;;  %16226 = vmatpush1.bf16.msra.mxu1 %v22987_v23  ;;  %v23047_v22 = vld [vmem:[%s24405_s28 + $0x1e48] ss:$16 sps:$4 sm:$0xff]   ;;  %v23052_v23 = vld [vmem:[%s24405_s28 + $0x1e64] ss:$16 sps:$4 sm:$0xff]  }
 0x453   : > { %13515 = vmatprep.subr.bf16.mxu0 %v22992_v27  ;;  %16227 = vmatprep.subr.bf16.mxu1 %v22995_v28  ;;  %v23053_v27 = vld [vmem:[%s24405_s28 + $0x1e68] ss:$16 sps:$4 sm:$0xff]   ;;  %v23058_v28 = vld [vmem:[%s24405_s28 + $0x1e84] ss:$16 sps:$4 sm:$0xff]  }
 0x454   : > { %13466 = vmatprep.mubr.bf16.mxu0 %v18264_v29  ;;  %16178 = vmatprep.mubr.bf16.mxu1 %v18264_v29  ;;  %v23061_v29 = vld [vmem:[%s24405_s28 + $0x1e8c] ss:$16 sps:$4 sm:$0xff]  }
 0x456   : > { %13516 = vmatpush1.bf16.msra.mxu0 %v22990_v30  ;;  %16228 = vmatpush1.bf16.msra.mxu1 %v22993_v31  ;;  %v18121_v30 = vcombine.low %v505_v19, %v529_v20  ;;  %v553_v31 = vld [vmem:[%s24536_s30 + $0x4f0] sm:$0xff]  ;;  %v23115_v20 = vld [vmem:[%s24405_s28 + $0x1fac] ss:$16 sps:$4 sm:$0xff]  }
 0x457   : > { %13517 = vmatprep.subr.bf16.mxu0 %v22998_v32  ;;  %16229 = vmatprep.subr.bf16.mxu1 %v23001_v33  ;;  %v577_v32 = vld [vmem:[%s24536_s30 + $0x5b0] sm:$0xff] }
 0x458   : > { %v23056_v33 = vld [vmem:[%s24405_s28 + $0x1e80] ss:$16 sps:$4 sm:$0xff]   ;;  %v18170_v37 = vcombine.high %v553_v31, %v577_v32  ;;  %v23112_v19 = vld [vmem:[%s24405_s28 + $0x1fa4] ss:$16 sps:$4 sm:$0xff]  }
 0x459   : > { %13467 = vmatmul.mubr.bf16.gmra.mrb[20].mxu0 %v18263_v36  ;;  %16179 = vmatmul.mubr.bf16.gmra.mrb[20].mxu1 %v18263_v36  ;;  %v23067_v36 = vld [vmem:[%s24405_s28 + $0x1eac] ss:$16 sps:$4 sm:$0xff]  }
 0x45a   : > { %13518 = vmatpush1.bf16.msra.mxu0 %v22996_v34  ;;  %16230 = vmatpush1.bf16.msra.mxu1 %v22999_v35  ;;  %v23059_v34 = vld [vmem:[%s24405_s28 + $0x1e88] ss:$16 sps:$4 sm:$0xff]   ;;  %v23064_v35 = vld [vmem:[%s24405_s28 + $0x1ea4] ss:$16 sps:$4 sm:$0xff]  }
 0x45b   : > { %13519 = vmatprep.subr.bf16.mxu0 %v23004_v39  ;;  %16231 = vmatprep.subr.bf16.mxu1 %v23007_v40  ;;  %v23065_v39 = vld [vmem:[%s24405_s28 + $0x1ea8] ss:$16 sps:$4 sm:$0xff]   ;;  %v23070_v40 = vld [vmem:[%s24405_s28 + $0x1ec4] ss:$16 sps:$4 sm:$0xff]  }
 0x45c   : > { %13476 = vmatprep.mubr.bf16.mxu0 %v18312_v41  ;;  %16188 = vmatprep.mubr.bf16.mxu1 %v18312_v41  ;;  %v23073_v41 = vld [vmem:[%s24405_s28 + $0x1ecc] ss:$16 sps:$4 sm:$0xff]  }
 0x45e   : > { %13520 = vmatpush1.bf16.msra.mxu0 %v23002_v42  ;;  %16232 = vmatpush1.bf16.msra.mxu1 %v23005_v43  ;;  %v18169_v42 = vcombine.low %v553_v31, %v577_v32  ;;  %v601_v43 = vld [vmem:[%s24536_s30 + $0x670] sm:$0xff]  ;;  %v23127_v32 = vld [vmem:[%s24405_s28 + $0x1fec] ss:$16 sps:$4 sm:$0xff]  }
 0x45f   : > { %13521 = vmatprep.subr.bf16.mxu0 %v23010_v44  ;;  %16233 = vmatprep.subr.bf16.mxu1 %v23013_v45  ;;  %v625_v44 = vld [vmem:[%s24536_s30 + $0x730] sm:$0xff] }
 0x460   : > { %v23068_v45 = vld [vmem:[%s24405_s28 + $0x1ec0] ss:$16 sps:$4 sm:$0xff]   ;;  %v18218_v49 = vcombine.high %v601_v43, %v625_v44  ;;  %v23124_v31 = vld [vmem:[%s24405_s28 + $0x1fe4] ss:$16 sps:$4 sm:$0xff]  }
 0x461   : > { %13477 = vmatmul.mubr.bf16.gmra.mrb[24].mxu0 %v18311_v48  ;;  %16189 = vmatmul.mubr.bf16.gmra.mrb[24].mxu1 %v18311_v48  ;;  %v23079_v48 = vld [vmem:[%s24405_s28 + $0x1eec] ss:$16 sps:$4 sm:$0xff]  }
 0x462   : > { %13522 = vmatpush1.bf16.msra.mxu0 %v23008_v46  ;;  %16234 = vmatpush1.bf16.msra.mxu1 %v23011_v47  ;;  %v23071_v46 = vld [vmem:[%s24405_s28 + $0x1ec8] ss:$16 sps:$4 sm:$0xff]   ;;  %v23076_v47 = vld [vmem:[%s24405_s28 + $0x1ee4] ss:$16 sps:$4 sm:$0xff]  }
 0x463   : > { %13523 = vmatprep.subr.bf16.mxu0 %v23016_v51  ;;  %16235 = vmatprep.subr.bf16.mxu1 %v23019_v52  ;;  %v23077_v51 = vld [vmem:[%s24405_s28 + $0x1ee8] ss:$16 sps:$4 sm:$0xff]   ;;  %v23082_v52 = vld [vmem:[%s24405_s28 + $0x1f04] ss:$16 sps:$4 sm:$0xff]  }
 0x464   : > { %13486 = vmatprep.mubr.bf16.mxu0 %v18360_v53  ;;  %16198 = vmatprep.mubr.bf16.mxu1 %v18360_v53  ;;  %v23085_v53 = vld [vmem:[%s24405_s28 + $0x1f0c] ss:$16 sps:$4 sm:$0xff]  }
 0x466   : > { %13524 = vmatpush1.bf16.msra.mxu0 %v23014_v54  ;;  %16236 = vmatpush1.bf16.msra.mxu1 %v23017_v55  ;;  %v18217_v54 = vcombine.low %v601_v43, %v625_v44  ;;  %v649_v55 = vld [vmem:[%s24536_s30 + $0x7f0] sm:$0xff]  ;;  %v23139_v44 = vld [vmem:[%s24405_s28 + $0x202c] ss:$16 sps:$4 sm:$0xff]  }
 0x467   : > { %13525 = vmatprep.subr.bf16.mxu0 %v23022_v56  ;;  %16237 = vmatprep.subr.bf16.mxu1 %v23025_v57  ;;  %v673_v56 = vld [vmem:[%s24536_s30 + $0x8b0] sm:$0xff] }
 0x468   : > { %v23080_v57 = vld [vmem:[%s24405_s28 + $0x1f00] ss:$16 sps:$4 sm:$0xff]   ;;  %v18266_v61 = vcombine.high %v649_v55, %v673_v56  ;;  %v23136_v43 = vld [vmem:[%s24405_s28 + $0x2024] ss:$16 sps:$4 sm:$0xff]  }
 0x469   : > { %13487 = vmatmul.mubr.bf16.gmra.mrb[28].mxu0 %v18359_v60  ;;  %16199 = vmatmul.mubr.bf16.gmra.mrb[28].mxu1 %v18359_v60  ;;  %v23091_v60 = vld [vmem:[%s24405_s28 + $0x1f2c] ss:$16 sps:$4 sm:$0xff]  }
 0x46a   : > { %13526 = vmatpush1.bf16.msra.mxu0 %v23020_v58  ;;  %16238 = vmatpush1.bf16.msra.mxu1 %v23023_v59  ;;  %v23083_v58 = vld [vmem:[%s24405_s28 + $0x1f08] ss:$16 sps:$4 sm:$0xff]   ;;  %v23088_v59 = vld [vmem:[%s24405_s28 + $0x1f24] ss:$16 sps:$4 sm:$0xff]  }
 0x46b   : > { %13527 = vmatprep.subr.bf16.mxu0 %v23028_v63  ;;  %16239 = vmatprep.subr.bf16.mxu1 %v23031_v0  ;;  %v23089_v63 = vld [vmem:[%s24405_s28 + $0x1f28] ss:$16 sps:$4 sm:$0xff]   ;;  %v23094_v0 = vld [vmem:[%s24405_s28 + $0x1f44] ss:$16 sps:$4 sm:$0xff]  }
 0x46c   : > { %13529 = vmatprep.mubr.bf16.mxu0 %v18026_v1  ;;  %16241 = vmatprep.mubr.bf16.mxu1 %v18026_v1  ;;  %v23097_v1 = vld [vmem:[%s24405_s28 + $0x1f4c] ss:$16 sps:$4 sm:$0xff]  }
 0x46e   : > { %13528 = vmatpush1.bf16.msra.mxu0 %v23026_v2  ;;  %16240 = vmatpush1.bf16.msra.mxu1 %v23029_v3  ;;  %v18265_v2 = vcombine.low %v649_v55, %v673_v56  ;;  %v697_v3 = vld [vmem:[%s24536_s30 + $0x970] sm:$0xff]  ;;  %v23151_v56 = vld [vmem:[%s24405_s28 + $0x206c] ss:$16 sps:$4 sm:$0xff]  }
 0x46f   : > { %13610 = vmatprep.subr.bf16.mxu0 %v23034_v4  ;;  %16322 = vmatprep.subr.bf16.mxu1 %v23037_v5  ;;  %v721_v4 = vld [vmem:[%s24536_s30 + $0xa30] sm:$0xff] }
 0x470   : > { %v23092_v5 = vld [vmem:[%s24405_s28 + $0x1f40] ss:$16 sps:$4 sm:$0xff]   ;;  %v18314_v9 = vcombine.high %v697_v3, %v721_v4  ;;  %v23148_v55 = vld [vmem:[%s24405_s28 + $0x2064] ss:$16 sps:$4 sm:$0xff]  }
 0x471   : > { %13530 = vmatmul.mubr.bf16.vlgmr.msra.gmra.mrb[0].mxu0 %v18025_v7  ;;  %16242 = vmatmul.mubr.bf16.vlgmr.msra.gmra.mrb[0].mxu1 %v18025_v7  ;;  %v23100_v7 = vld [vmem:[%s24405_s28 + $0x1f64] ss:$16 sps:$4 sm:$0xff]  }
 0x472   : > { %13611 = vmatpush1.bf16.msra.mxu0 %v23032_v6  ;;  %16323 = vmatpush1.bf16.msra.mxu1 %v23035_v10  ;;  %v23095_v6 = vld [vmem:[%s24405_s28 + $0x1f48] ss:$16 sps:$4 sm:$0xff]   ;;  %v23098_v10 = vld [vmem:[%s24405_s28 + $0x1f60] ss:$16 sps:$4 sm:$0xff]  }
 0x473   : > { %13612 = vmatprep.subr.bf16.mxu0 %v23040_v11  ;;  %16324 = vmatprep.subr.bf16.mxu1 %v23043_v12  ;;  %v23101_v11 = vld [vmem:[%s24405_s28 + $0x1f68] ss:$16 sps:$4 sm:$0xff]   ;;  %v23106_v12 = vld [vmem:[%s24405_s28 + $0x1f84] ss:$16 sps:$4 sm:$0xff]  }
 0x474   : > { %13539 = vmatprep.mubr.bf16.mxu0 %v18074_v13  ;;  %16251 = vmatprep.mubr.bf16.mxu1 %v18074_v13  ;;  %v23109_v13 = vld [vmem:[%s24405_s28 + $0x1f8c] ss:$16 sps:$4 sm:$0xff]  }
 0x476   : > { %13613 = vmatpush1.bf16.msra.mxu0 %v23038_v14  ;;  %16325 = vmatpush1.bf16.msra.mxu1 %v23041_v15  ;;  %v18313_v14 = vcombine.low %v697_v3, %v721_v4  ;;  %v745_v15 = vld [vmem:[%s24536_s30 + $0xaf0] sm:$0xff]  ;;  %v23163_v4 = vld [vmem:[%s24405_s28 + $0x20ac] ss:$16 sps:$4 sm:$0xff]  }
 0x477   : > { %13614 = vmatprep.subr.bf16.mxu0 %v23046_v16  ;;  %16326 = vmatprep.subr.bf16.mxu1 %v23049_v17  ;;  %v769_v16 = vld [vmem:[%s24536_s30 + $0xbb0] sm:$0xff] }
 0x478   : > { %v23104_v17 = vld [vmem:[%s24405_s28 + $0x1f80] ss:$16 sps:$4 sm:$0xff]   ;;  %v23160_v3 = vld [vmem:[%s24405_s28 + $0x20a4] ss:$16 sps:$4 sm:$0xff]  }
 0x479   : > { %13540 = vmatmul.mubr.bf16.gmra.mrb[4].mxu0 %v18073_v18  ;;  %16252 = vmatmul.mubr.bf16.gmra.mrb[4].mxu1 %v18073_v18  ;;  %v23107_v18 = vld [vmem:[%s24405_s28 + $0x1f88] ss:$16 sps:$4 sm:$0xff]  }
 0x47a   : > { %13615 = vmatpush1.bf16.msra.mxu0 %v23044_v21  ;;  %16327 = vmatpush1.bf16.msra.mxu1 %v23047_v22  ;;  %v18362_v21 = vcombine.high %v745_v15, %v769_v16  ;;  %v23110_v22 = vld [vmem:[%s24405_s28 + $0x1fa0] ss:$16 sps:$4 sm:$0xff]  }
 0x47b   : > { %13616 = vmatprep.subr.bf16.mxu0 %v23052_v23  ;;  %16328 = vmatprep.subr.bf16.mxu1 %v23055_v24  ;;  %v23113_v23 = vld [vmem:[%s24405_s28 + $0x1fa8] ss:$16 sps:$4 sm:$0xff]   ;;  %v23118_v24 = vld [vmem:[%s24405_s28 + $0x1fc4] ss:$16 sps:$4 sm:$0xff]  }
 0x47c   : > { %13549 = vmatprep.mubr.bf16.mxu0 %v18122_v25  ;;  %16261 = vmatprep.mubr.bf16.mxu1 %v18122_v25  ;;  %v23121_v25 = vld [vmem:[%s24405_s28 + $0x1fcc] ss:$16 sps:$4 sm:$0xff]  }
 0x47e   : > { %13617 = vmatpush1.bf16.msra.mxu0 %v23050_v26  ;;  %16329 = vmatpush1.bf16.msra.mxu1 %v23053_v27  ;;  %v18361_v26 = vcombine.low %v745_v15, %v769_v16  ;;  %v410_v27 = vld [vmem:[%s24536_s30 + $0x78] sm:$0xff]  ;;  %v23172_v15 = vld [vmem:[%s24405_s28 + $0x20e4] ss:$16 sps:$4 sm:$0xff]  }
 0x47f   : > { %13618 = vmatprep.subr.bf16.mxu0 %v23058_v28  ;;  %16330 = vmatprep.subr.bf16.mxu1 %v23061_v29  ;;  %v434_v28 = vld [vmem:[%s24536_s30 + $0x138] sm:$0xff]  ;;  %v23116_v29 = vld [vmem:[%s24405_s28 + $0x1fc0] ss:$16 sps:$4 sm:$0xff]  }
 0x480   : > { %v23175_v16 = vld [vmem:[%s24405_s28 + $0x20ec] ss:$16 sps:$4 sm:$0xff]  }
 0x481   : > { %13550 = vmatmul.mubr.bf16.gmra.mrb[8].mxu0 %v18121_v30  ;;  %16262 = vmatmul.mubr.bf16.gmra.mrb[8].mxu1 %v18121_v30  ;;  %v23119_v30 = vld [vmem:[%s24405_s28 + $0x1fc8] ss:$16 sps:$4 sm:$0xff]  }
 0x482   : > { %13619 = vmatpush1.bf16.msra.mxu0 %v23056_v33  ;;  %16331 = vmatpush1.bf16.msra.mxu1 %v23059_v34  ;;  %v18028_v33 = vcombine.high %v410_v27, %v434_v28  ;;  %v23122_v34 = vld [vmem:[%s24405_s28 + $0x1fe0] ss:$16 sps:$4 sm:$0xff]  }
 0x483   : > { %13620 = vmatprep.subr.bf16.mxu0 %v23064_v35  ;;  %16332 = vmatprep.subr.bf16.mxu1 %v23067_v36  ;;  %v23125_v35 = vld [vmem:[%s24405_s28 + $0x1fe8] ss:$16 sps:$4 sm:$0xff]   ;;  %v23130_v36 = vld [vmem:[%s24405_s28 + $0x2004] ss:$16 sps:$4 sm:$0xff]  }
 0x484   : > { %13559 = vmatprep.mubr.bf16.mxu0 %v18170_v37  ;;  %16271 = vmatprep.mubr.bf16.mxu1 %v18170_v37  ;;  %v23133_v37 = vld [vmem:[%s24405_s28 + $0x200c] ss:$16 sps:$4 sm:$0xff]  }
 0x486   : > { %13621 = vmatpush1.bf16.msra.mxu0 %v23062_v38  ;;  %16333 = vmatpush1.bf16.msra.mxu1 %v23065_v39  ;;  %v18027_v38 = vcombine.low %v410_v27, %v434_v28  ;;  %v458_v39 = vld [vmem:[%s24536_s30 + $0x1f8] sm:$0xff]  ;;  %v23184_v27 = vld [vmem:[%s24405_s28 + $0x2124] ss:$16 sps:$4 sm:$0xff]  }
 0x487   : > { %13622 = vmatprep.subr.bf16.mxu0 %v23070_v40  ;;  %16334 = vmatprep.subr.bf16.mxu1 %v23073_v41  ;;  %v482_v40 = vld [vmem:[%s24536_s30 + $0x2b8] sm:$0xff]  ;;  %v23128_v41 = vld [vmem:[%s24405_s28 + $0x2000] ss:$16 sps:$4 sm:$0xff]  }
 0x488   : > { %v23187_v28 = vld [vmem:[%s24405_s28 + $0x212c] ss:$16 sps:$4 sm:$0xff]  }
 0x489   : > { %13560 = vmatmul.mubr.bf16.gmra.mrb[12].mxu0 %v18169_v42  ;;  %16272 = vmatmul.mubr.bf16.gmra.mrb[12].mxu1 %v18169_v42  ;;  %v23131_v42 = vld [vmem:[%s24405_s28 + $0x2008] ss:$16 sps:$4 sm:$0xff]  }
 0x48a   : > { %13623 = vmatpush1.bf16.msra.mxu0 %v23068_v45  ;;  %16335 = vmatpush1.bf16.msra.mxu1 %v23071_v46  ;;  %v18076_v45 = vcombine.high %v458_v39, %v482_v40  ;;  %v23134_v46 = vld [vmem:[%s24405_s28 + $0x2020] ss:$16 sps:$4 sm:$0xff]  }
 0x48b   : > { %13624 = vmatprep.subr.bf16.mxu0 %v23076_v47  ;;  %16336 = vmatprep.subr.bf16.mxu1 %v23079_v48  ;;  %v23137_v47 = vld [vmem:[%s24405_s28 + $0x2028] ss:$16 sps:$4 sm:$0xff]   ;;  %v23142_v48 = vld [vmem:[%s24405_s28 + $0x2044] ss:$16 sps:$4 sm:$0xff]  }
 0x48c   : > { %13569 = vmatprep.mubr.bf16.mxu0 %v18218_v49  ;;  %16281 = vmatprep.mubr.bf16.mxu1 %v18218_v49  ;;  %v23145_v49 = vld [vmem:[%s24405_s28 + $0x204c] ss:$16 sps:$4 sm:$0xff]  }
 0x48e   : > { %13625 = vmatpush1.bf16.msra.mxu0 %v23074_v50  ;;  %16337 = vmatpush1.bf16.msra.mxu1 %v23077_v51  ;;  %v18075_v50 = vcombine.low %v458_v39, %v482_v40  ;;  %v506_v51 = vld [vmem:[%s24536_s30 + $0x378] sm:$0xff]  ;;  %v23196_v39 = vld [vmem:[%s24405_s28 + $0x2164] ss:$16 sps:$4 sm:$0xff]  }
 0x48f   : > { %13626 = vmatprep.subr.bf16.mxu0 %v23082_v52  ;;  %16338 = vmatprep.subr.bf16.mxu1 %v23085_v53  ;;  %v530_v52 = vld [vmem:[%s24536_s30 + $0x438] sm:$0xff]  ;;  %v23140_v53 = vld [vmem:[%s24405_s28 + $0x2040] ss:$16 sps:$4 sm:$0xff]  }
 0x490   : > { %v23199_v40 = vld [vmem:[%s24405_s28 + $0x216c] ss:$16 sps:$4 sm:$0xff]  }
 0x491   : > { %13570 = vmatmul.mubr.bf16.gmra.mrb[16].mxu0 %v18217_v54  ;;  %16282 = vmatmul.mubr.bf16.gmra.mrb[16].mxu1 %v18217_v54  ;;  %v23143_v54 = vld [vmem:[%s24405_s28 + $0x2048] ss:$16 sps:$4 sm:$0xff]  }
 0x492   : > { %13627 = vmatpush1.bf16.msra.mxu0 %v23080_v57  ;;  %16339 = vmatpush1.bf16.msra.mxu1 %v23083_v58  ;;  %v18124_v57 = vcombine.high %v506_v51, %v530_v52  ;;  %v23146_v58 = vld [vmem:[%s24405_s28 + $0x2060] ss:$16 sps:$4 sm:$0xff]  }
 0x493   : > { %13628 = vmatprep.subr.bf16.mxu0 %v23088_v59  ;;  %16340 = vmatprep.subr.bf16.mxu1 %v23091_v60  ;;  %v23149_v59 = vld [vmem:[%s24405_s28 + $0x2068] ss:$16 sps:$4 sm:$0xff]   ;;  %v23154_v60 = vld [vmem:[%s24405_s28 + $0x2084] ss:$16 sps:$4 sm:$0xff]  }
 0x494   : > { %13579 = vmatprep.mubr.bf16.mxu0 %v18266_v61  ;;  %16291 = vmatprep.mubr.bf16.mxu1 %v18266_v61  ;;  %v23157_v61 = vld [vmem:[%s24405_s28 + $0x208c] ss:$16 sps:$4 sm:$0xff]  }
 0x496   : > { %13629 = vmatpush1.bf16.msra.mxu0 %v23086_v62  ;;  %16341 = vmatpush1.bf16.msra.mxu1 %v23089_v63  ;;  %v18123_v62 = vcombine.low %v506_v51, %v530_v52  ;;  %v554_v63 = vld [vmem:[%s24536_s30 + $0x4f8] sm:$0xff]  ;;  %v23208_v51 = vld [vmem:[%s24405_s28 + $0x21a4] ss:$16 sps:$4 sm:$0xff]  }
 0x497   : > { %13630 = vmatprep.subr.bf16.mxu0 %v23094_v0  ;;  %16342 = vmatprep.subr.bf16.mxu1 %v23097_v1  ;;  %v578_v0 = vld [vmem:[%s24536_s30 + $0x5b8] sm:$0xff]  ;;  %v23152_v1 = vld [vmem:[%s24405_s28 + $0x2080] ss:$16 sps:$4 sm:$0xff]  }
 0x498   : > { %v23211_v52 = vld [vmem:[%s24405_s28 + $0x21ac] ss:$16 sps:$4 sm:$0xff]  }
 0x499   : > { %13580 = vmatmul.mubr.bf16.gmra.mrb[20].mxu0 %v18265_v2  ;;  %16292 = vmatmul.mubr.bf16.gmra.mrb[20].mxu1 %v18265_v2  ;;  %v23155_v2 = vld [vmem:[%s24405_s28 + $0x2088] ss:$16 sps:$4 sm:$0xff]  }
 0x49a   : > { %13631 = vmatpush1.bf16.msra.mxu0 %v23092_v5  ;;  %16343 = vmatpush1.bf16.msra.mxu1 %v23095_v6  ;;  %v18172_v5 = vcombine.high %v554_v63, %v578_v0  ;;  %v23158_v6 = vld [vmem:[%s24405_s28 + $0x20a0] ss:$16 sps:$4 sm:$0xff]  }
 0x49b   : > { %13632 = vmatprep.subr.bf16.mxu0 %v23100_v7  ;;  %16344 = vmatprep.subr.bf16.mxu1 %v23103_v8  ;;  %v23161_v7 = vld [vmem:[%s24405_s28 + $0x20a8] ss:$16 sps:$4 sm:$0xff]   ;;  %v23166_v8 = vld [vmem:[%s24405_s28 + $0x20c4] ss:$16 sps:$4 sm:$0xff]  }
 0x49c   : > { %13589 = vmatprep.mubr.bf16.mxu0 %v18314_v9  ;;  %16301 = vmatprep.mubr.bf16.mxu1 %v18314_v9  ;;  %v23169_v9 = vld [vmem:[%s24405_s28 + $0x20cc] ss:$16 sps:$4 sm:$0xff]  }
 0x49e   : > { %13633 = vmatpush1.bf16.msra.mxu0 %v23098_v10  ;;  %16345 = vmatpush1.bf16.msra.mxu1 %v23101_v11  ;;  %v18171_v10 = vcombine.low %v554_v63, %v578_v0  ;;  %v602_v11 = vld [vmem:[%s24536_s30 + $0x678] sm:$0xff]  ;;  %v23220_v63 = vld [vmem:[%s24405_s28 + $0x21e4] ss:$16 sps:$4 sm:$0xff]  }
 0x49f   : > { %13634 = vmatprep.subr.bf16.mxu0 %v23106_v12  ;;  %16346 = vmatprep.subr.bf16.mxu1 %v23109_v13  ;;  %v626_v12 = vld [vmem:[%s24536_s30 + $0x738] sm:$0xff]  ;;  %v23164_v13 = vld [vmem:[%s24405_s28 + $0x20c0] ss:$16 sps:$4 sm:$0xff]  }
 0x4a0   : > { %v23223_v0 = vld [vmem:[%s24405_s28 + $0x21ec] ss:$16 sps:$4 sm:$0xff]  }
 0x4a1   : > { %13590 = vmatmul.mubr.bf16.gmra.mrb[24].mxu0 %v18313_v14  ;;  %16302 = vmatmul.mubr.bf16.gmra.mrb[24].mxu1 %v18313_v14  ;;  %v23167_v14 = vld [vmem:[%s24405_s28 + $0x20c8] ss:$16 sps:$4 sm:$0xff]  }
 0x4a2   : > { %13635 = vmatpush1.bf16.msra.mxu0 %v23104_v17  ;;  %16347 = vmatpush1.bf16.msra.mxu1 %v23107_v18  ;;  %v18220_v17 = vcombine.high %v602_v11, %v626_v12  ;;  %v23170_v18 = vld [vmem:[%s24405_s28 + $0x20e0] ss:$16 sps:$4 sm:$0xff]  }
 0x4a3   : > { %13636 = vmatprep.subr.bf16.mxu0 %v23112_v19  ;;  %16348 = vmatprep.subr.bf16.mxu1 %v23115_v20  ;;  %v23173_v19 = vld [vmem:[%s24405_s28 + $0x20e8] ss:$16 sps:$4 sm:$0xff]   ;;  %v23178_v20 = vld [vmem:[%s24405_s28 + $0x2104] ss:$16 sps:$4 sm:$0xff]  }
 0x4a4   : > { %13599 = vmatprep.mubr.bf16.mxu0 %v18362_v21  ;;  %16311 = vmatprep.mubr.bf16.mxu1 %v18362_v21  ;;  %v23181_v21 = vld [vmem:[%s24405_s28 + $0x210c] ss:$16 sps:$4 sm:$0xff]  }
 0x4a6   : > { %13637 = vmatpush1.bf16.msra.mxu0 %v23110_v22  ;;  %16349 = vmatpush1.bf16.msra.mxu1 %v23113_v23  ;;  %v18219_v22 = vcombine.low %v602_v11, %v626_v12  ;;  %v650_v23 = vld [vmem:[%s24536_s30 + $0x7f8] sm:$0xff]  ;;  %v23232_v11 = vld [vmem:[%s24405_s28 + $0x2224] ss:$16 sps:$4 sm:$0xff]  }
 0x4a7   : > { %13638 = vmatprep.subr.bf16.mxu0 %v23118_v24  ;;  %16350 = vmatprep.subr.bf16.mxu1 %v23121_v25  ;;  %v674_v24 = vld [vmem:[%s24536_s30 + $0x8b8] sm:$0xff]  ;;  %v23176_v25 = vld [vmem:[%s24405_s28 + $0x2100] ss:$16 sps:$4 sm:$0xff]  }
 0x4a8   : > { %v23235_v12 = vld [vmem:[%s24405_s28 + $0x222c] ss:$16 sps:$4 sm:$0xff]  }
 0x4a9   : > { %13600 = vmatmul.mubr.bf16.gmra.mrb[28].mxu0 %v18361_v26  ;;  %16312 = vmatmul.mubr.bf16.gmra.mrb[28].mxu1 %v18361_v26  ;;  %v23179_v26 = vld [vmem:[%s24405_s28 + $0x2108] ss:$16 sps:$4 sm:$0xff]  }
 0x4aa   : > { %13639 = vmatpush1.bf16.msra.mxu0 %v23116_v29  ;;  %16351 = vmatpush1.bf16.msra.mxu1 %v23119_v30  ;;  %v18268_v29 = vcombine.high %v650_v23, %v674_v24  ;;  %v23182_v30 = vld [vmem:[%s24405_s28 + $0x2120] ss:$16 sps:$4 sm:$0xff]  }
 0x4ab   : > { %13640 = vmatprep.subr.bf16.mxu0 %v23124_v31  ;;  %16352 = vmatprep.subr.bf16.mxu1 %v23127_v32  ;;  %v23185_v31 = vld [vmem:[%s24405_s28 + $0x2128] ss:$16 sps:$4 sm:$0xff]   ;;  %v23190_v32 = vld [vmem:[%s24405_s28 + $0x2144] ss:$16 sps:$4 sm:$0xff]  }
 0x4ac   : > { %13642 = vmatprep.mubr.bf16.mxu0 %v18028_v33  ;;  %16354 = vmatprep.mubr.bf16.mxu1 %v18028_v33  ;;  %v23193_v33 = vld [vmem:[%s24405_s28 + $0x214c] ss:$16 sps:$4 sm:$0xff]  }
 0x4ae   : > { %13641 = vmatpush1.bf16.msra.mxu0 %v23122_v34  ;;  %16353 = vmatpush1.bf16.msra.mxu1 %v23125_v35  ;;  %v18267_v34 = vcombine.low %v650_v23, %v674_v24  ;;  %v698_v35 = vld [vmem:[%s24536_s30 + $0x978] sm:$0xff]  ;;  %v23244_v23 = vld [vmem:[%s24405_s28 + $0x2264] ss:$16 sps:$4 sm:$0xff]  }
 0x4af   : > { %13723 = vmatprep.subr.bf16.mxu0 %v23130_v36  ;;  %16435 = vmatprep.subr.bf16.mxu1 %v23133_v37  ;;  %v722_v36 = vld [vmem:[%s24536_s30 + $0xa38] sm:$0xff]  ;;  %v23188_v37 = vld [vmem:[%s24405_s28 + $0x2140] ss:$16 sps:$4 sm:$0xff]  }
 0x4b0   : > { %v23247_v24 = vld [vmem:[%s24405_s28 + $0x226c] ss:$16 sps:$4 sm:$0xff]  }
 0x4b1   : > { %13643 = vmatmul.mubr.bf16.vlgmr.msra.gmra.mrb[0].mxu0 %v18027_v38  ;;  %16355 = vmatmul.mubr.bf16.vlgmr.msra.gmra.mrb[0].mxu1 %v18027_v38  ;;  %v23191_v38 = vld [vmem:[%s24405_s28 + $0x2148] ss:$16 sps:$4 sm:$0xff]  }
 0x4b2   : > { %13724 = vmatpush1.bf16.msra.mxu0 %v23128_v41  ;;  %16436 = vmatpush1.bf16.msra.mxu1 %v23131_v42  ;;  %v18316_v41 = vcombine.high %v698_v35, %v722_v36  ;;  %v23194_v42 = vld [vmem:[%s24405_s28 + $0x2160] ss:$16 sps:$4 sm:$0xff]  }
 0x4b3   : > { %13725 = vmatprep.subr.bf16.mxu0 %v23136_v43  ;;  %16437 = vmatprep.subr.bf16.mxu1 %v23139_v44  ;;  %v23197_v43 = vld [vmem:[%s24405_s28 + $0x2168] ss:$16 sps:$4 sm:$0xff]   ;;  %v23202_v44 = vld [vmem:[%s24405_s28 + $0x2184] ss:$16 sps:$4 sm:$0xff]  }
 0x4b4   : > { %13652 = vmatprep.mubr.bf16.mxu0 %v18076_v45  ;;  %16364 = vmatprep.mubr.bf16.mxu1 %v18076_v45  ;;  %v23205_v45 = vld [vmem:[%s24405_s28 + $0x218c] ss:$16 sps:$4 sm:$0xff]  }
 0x4b6   : > { %13726 = vmatpush1.bf16.msra.mxu0 %v23134_v46  ;;  %16438 = vmatpush1.bf16.msra.mxu1 %v23137_v47  ;;  %v18315_v46 = vcombine.low %v698_v35, %v722_v36  ;;  %v746_v47 = vld [vmem:[%s24536_s30 + $0xaf8] sm:$0xff]  ;;  %v23256_v35 = vld [vmem:[%s24405_s28 + $0x22a4] ss:$16 sps:$4 sm:$0xff]  }
 0x4b7   : > { %13727 = vmatprep.subr.bf16.mxu0 %v23142_v48  ;;  %16439 = vmatprep.subr.bf16.mxu1 %v23145_v49  ;;  %v770_v48 = vld [vmem:[%s24536_s30 + $0xbb8] sm:$0xff]  ;;  %v23200_v49 = vld [vmem:[%s24405_s28 + $0x2180] ss:$16 sps:$4 sm:$0xff]  }
 0x4b8   : > { %v23259_v36 = vld [vmem:[%s24405_s28 + $0x22ac] ss:$16 sps:$4 sm:$0xff]  }
 0x4b9   : > { %13653 = vmatmul.mubr.bf16.gmra.mrb[4].mxu0 %v18075_v50  ;;  %16365 = vmatmul.mubr.bf16.gmra.mrb[4].mxu1 %v18075_v50  ;;  %v23203_v50 = vld [vmem:[%s24405_s28 + $0x2188] ss:$16 sps:$4 sm:$0xff]  }
 0x4ba   : > { %13728 = vmatpush1.bf16.msra.mxu0 %v23140_v53  ;;  %16440 = vmatpush1.bf16.msra.mxu1 %v23143_v54  ;;  %v18364_v53 = vcombine.high %v746_v47, %v770_v48  ;;  %v23206_v54 = vld [vmem:[%s24405_s28 + $0x21a0] ss:$16 sps:$4 sm:$0xff]  }
 0x4bb   : > { %13729 = vmatprep.subr.bf16.mxu0 %v23148_v55  ;;  %16441 = vmatprep.subr.bf16.mxu1 %v23151_v56  ;;  %v23209_v55 = vld [vmem:[%s24405_s28 + $0x21a8] ss:$16 sps:$4 sm:$0xff]   ;;  %v23214_v56 = vld [vmem:[%s24405_s28 + $0x21c4] ss:$16 sps:$4 sm:$0xff]  }
 0x4bc   : > { %13662 = vmatprep.mubr.bf16.mxu0 %v18124_v57  ;;  %16374 = vmatprep.mubr.bf16.mxu1 %v18124_v57  ;;  %v23217_v57 = vld [vmem:[%s24405_s28 + $0x21cc] ss:$16 sps:$4 sm:$0xff]  }
 0x4be   : > { %13730 = vmatpush1.bf16.msra.mxu0 %v23146_v58  ;;  %16442 = vmatpush1.bf16.msra.mxu1 %v23149_v59  ;;  %v18363_v58 = vcombine.low %v746_v47, %v770_v48  ;;  %v411_v59 = vld [vmem:[%s24536_s30 + $0x80] sm:$0xff]  ;;  %v23271_v48 = vld [vmem:[%s24405_s28 + $0x22ec] ss:$16 sps:$4 sm:$0xff]  }
 0x4bf   : > { %13731 = vmatprep.subr.bf16.mxu0 %v23154_v60  ;;  %16443 = vmatprep.subr.bf16.mxu1 %v23157_v61  ;;  %v435_v60 = vld [vmem:[%s24536_s30 + $0x140] sm:$0xff] }
 0x4c0   : > { %v23212_v61 = vld [vmem:[%s24405_s28 + $0x21c0] ss:$16 sps:$4 sm:$0xff]   ;;  %v23268_v47 = vld [vmem:[%s24405_s28 + $0x22e4] ss:$16 sps:$4 sm:$0xff]  }
 0x4c1   : > { %13663 = vmatmul.mubr.bf16.gmra.mrb[8].mxu0 %v18123_v62  ;;  %16375 = vmatmul.mubr.bf16.gmra.mrb[8].mxu1 %v18123_v62  ;;  %v23215_v62 = vld [vmem:[%s24405_s28 + $0x21c8] ss:$16 sps:$4 sm:$0xff]  }
 0x4c2   : > { %13732 = vmatpush1.bf16.msra.mxu0 %v23152_v1  ;;  %16444 = vmatpush1.bf16.msra.mxu1 %v23155_v2  ;;  %v18030_v1 = vcombine.high %v411_v59, %v435_v60  ;;  %v23218_v2 = vld [vmem:[%s24405_s28 + $0x21e0] ss:$16 sps:$4 sm:$0xff]  }
 0x4c3   : > { %13733 = vmatprep.subr.bf16.mxu0 %v23160_v3  ;;  %16445 = vmatprep.subr.bf16.mxu1 %v23163_v4  ;;  %v23221_v3 = vld [vmem:[%s24405_s28 + $0x21e8] ss:$16 sps:$4 sm:$0xff]   ;;  %v23226_v4 = vld [vmem:[%s24405_s28 + $0x2204] ss:$16 sps:$4 sm:$0xff]  }
 0x4c4   : > { %13672 = vmatprep.mubr.bf16.mxu0 %v18172_v5  ;;  %16384 = vmatprep.mubr.bf16.mxu1 %v18172_v5  ;;  %v23229_v5 = vld [vmem:[%s24405_s28 + $0x220c] ss:$16 sps:$4 sm:$0xff]  }
 0x4c6   : > { %13734 = vmatpush1.bf16.msra.mxu0 %v23158_v6  ;;  %16446 = vmatpush1.bf16.msra.mxu1 %v23161_v7  ;;  %v18029_v6 = vcombine.low %v411_v59, %v435_v60  ;;  %v459_v7 = vld [vmem:[%s24536_s30 + $0x200] sm:$0xff]  ;;  %v23283_v60 = vld [vmem:[%s24405_s28 + $0x232c] ss:$16 sps:$4 sm:$0xff]  }
 0x4c7   : > { %13735 = vmatprep.subr.bf16.mxu0 %v23166_v8  ;;  %16447 = vmatprep.subr.bf16.mxu1 %v23169_v9  ;;  %v483_v8 = vld [vmem:[%s24536_s30 + $0x2c0] sm:$0xff] }
 0x4c8   : > { %v23224_v9 = vld [vmem:[%s24405_s28 + $0x2200] ss:$16 sps:$4 sm:$0xff]   ;;  %v23280_v59 = vld [vmem:[%s24405_s28 + $0x2324] ss:$16 sps:$4 sm:$0xff]  }
 0x4c9   : > { %13673 = vmatmul.mubr.bf16.gmra.mrb[12].mxu0 %v18171_v10  ;;  %16385 = vmatmul.mubr.bf16.gmra.mrb[12].mxu1 %v18171_v10  ;;  %v23227_v10 = vld [vmem:[%s24405_s28 + $0x2208] ss:$16 sps:$4 sm:$0xff]  }
 0x4ca   : > { %13736 = vmatpush1.bf16.msra.mxu0 %v23164_v13  ;;  %16448 = vmatpush1.bf16.msra.mxu1 %v23167_v14  ;;  %v18078_v13 = vcombine.high %v459_v7, %v483_v8  ;;  %v23230_v14 = vld [vmem:[%s24405_s28 + $0x2220] ss:$16 sps:$4 sm:$0xff]  }
 0x4cb   : > { %13737 = vmatprep.subr.bf16.mxu0 %v23172_v15  ;;  %16449 = vmatprep.subr.bf16.mxu1 %v23175_v16  ;;  %v23233_v15 = vld [vmem:[%s24405_s28 + $0x2228] ss:$16 sps:$4 sm:$0xff]   ;;  %v23238_v16 = vld [vmem:[%s24405_s28 + $0x2244] ss:$16 sps:$4 sm:$0xff]  }
 0x4cc   : > { %13682 = vmatprep.mubr.bf16.mxu0 %v18220_v17  ;;  %16394 = vmatprep.mubr.bf16.mxu1 %v18220_v17  ;;  %v23241_v17 = vld [vmem:[%s24405_s28 + $0x224c] ss:$16 sps:$4 sm:$0xff]  }
 0x4ce   : > { %13738 = vmatpush1.bf16.msra.mxu0 %v23170_v18  ;;  %16450 = vmatpush1.bf16.msra.mxu1 %v23173_v19  ;;  %v18077_v18 = vcombine.low %v459_v7, %v483_v8  ;;  %v507_v19 = vld [vmem:[%s24536_s30 + $0x380] sm:$0xff]  ;;  %v23295_v8 = vld [vmem:[%s24405_s28 + $0x236c] ss:$16 sps:$4 sm:$0xff]  }
 0x4cf   : > { %13739 = vmatprep.subr.bf16.mxu0 %v23178_v20  ;;  %16451 = vmatprep.subr.bf16.mxu1 %v23181_v21  ;;  %v531_v20 = vld [vmem:[%s24536_s30 + $0x440] sm:$0xff] }
 0x4d0   : > { %v23236_v21 = vld [vmem:[%s24405_s28 + $0x2240] ss:$16 sps:$4 sm:$0xff]   ;;  %v23292_v7 = vld [vmem:[%s24405_s28 + $0x2364] ss:$16 sps:$4 sm:$0xff]  }
 0x4d1   : > { %13683 = vmatmul.mubr.bf16.gmra.mrb[16].mxu0 %v18219_v22  ;;  %16395 = vmatmul.mubr.bf16.gmra.mrb[16].mxu1 %v18219_v22  ;;  %v23239_v22 = vld [vmem:[%s24405_s28 + $0x2248] ss:$16 sps:$4 sm:$0xff]  }
 0x4d2   : > { %13740 = vmatpush1.bf16.msra.mxu0 %v23176_v25  ;;  %16452 = vmatpush1.bf16.msra.mxu1 %v23179_v26  ;;  %v18126_v25 = vcombine.high %v507_v19, %v531_v20  ;;  %v23242_v26 = vld [vmem:[%s24405_s28 + $0x2260] ss:$16 sps:$4 sm:$0xff]  }
 0x4d3   : > { %13741 = vmatprep.subr.bf16.mxu0 %v23184_v27  ;;  %16453 = vmatprep.subr.bf16.mxu1 %v23187_v28  ;;  %v23245_v27 = vld [vmem:[%s24405_s28 + $0x2268] ss:$16 sps:$4 sm:$0xff]   ;;  %v23250_v28 = vld [vmem:[%s24405_s28 + $0x2284] ss:$16 sps:$4 sm:$0xff]  }
 0x4d4   : > { %13692 = vmatprep.mubr.bf16.mxu0 %v18268_v29  ;;  %16404 = vmatprep.mubr.bf16.mxu1 %v18268_v29  ;;  %v23253_v29 = vld [vmem:[%s24405_s28 + $0x228c] ss:$16 sps:$4 sm:$0xff]  }
 0x4d6   : > { %13742 = vmatpush1.bf16.msra.mxu0 %v23182_v30  ;;  %16454 = vmatpush1.bf16.msra.mxu1 %v23185_v31  ;;  %v18125_v30 = vcombine.low %v507_v19, %v531_v20  ;;  %v555_v31 = vld [vmem:[%s24536_s30 + $0x500] sm:$0xff]  ;;  %v23307_v20 = vld [vmem:[%s24405_s28 + $0x23ac] ss:$16 sps:$4 sm:$0xff]  }
 0x4d7   : > { %13743 = vmatprep.subr.bf16.mxu0 %v23190_v32  ;;  %16455 = vmatprep.subr.bf16.mxu1 %v23193_v33  ;;  %v579_v32 = vld [vmem:[%s24536_s30 + $0x5c0] sm:$0xff] }
 0x4d8   : > { %v23248_v33 = vld [vmem:[%s24405_s28 + $0x2280] ss:$16 sps:$4 sm:$0xff]   ;;  %v23304_v19 = vld [vmem:[%s24405_s28 + $0x23a4] ss:$16 sps:$4 sm:$0xff]  }
 0x4d9   : > { %13693 = vmatmul.mubr.bf16.gmra.mrb[20].mxu0 %v18267_v34  ;;  %16405 = vmatmul.mubr.bf16.gmra.mrb[20].mxu1 %v18267_v34  ;;  %v23251_v34 = vld [vmem:[%s24405_s28 + $0x2288] ss:$16 sps:$4 sm:$0xff]  }
 0x4da   : > { %13744 = vmatpush1.bf16.msra.mxu0 %v23188_v37  ;;  %16456 = vmatpush1.bf16.msra.mxu1 %v23191_v38  ;;  %v18174_v37 = vcombine.high %v555_v31, %v579_v32  ;;  %v23254_v38 = vld [vmem:[%s24405_s28 + $0x22a0] ss:$16 sps:$4 sm:$0xff]  }
 0x4db   : > { %13745 = vmatprep.subr.bf16.mxu0 %v23196_v39  ;;  %16457 = vmatprep.subr.bf16.mxu1 %v23199_v40  ;;  %v23257_v39 = vld [vmem:[%s24405_s28 + $0x22a8] ss:$16 sps:$4 sm:$0xff]   ;;  %v23262_v40 = vld [vmem:[%s24405_s28 + $0x22c4] ss:$16 sps:$4 sm:$0xff]  }
 0x4dc   : > { %13702 = vmatprep.mubr.bf16.mxu0 %v18316_v41  ;;  %16414 = vmatprep.mubr.bf16.mxu1 %v18316_v41  ;;  %v23265_v41 = vld [vmem:[%s24405_s28 + $0x22cc] ss:$16 sps:$4 sm:$0xff]  }
 0x4de   : > { %13746 = vmatpush1.bf16.msra.mxu0 %v23194_v42  ;;  %16458 = vmatpush1.bf16.msra.mxu1 %v23197_v43  ;;  %v18173_v42 = vcombine.low %v555_v31, %v579_v32  ;;  %v603_v43 = vld [vmem:[%s24536_s30 + $0x680] sm:$0xff]  ;;  %v23319_v32 = vld [vmem:[%s24405_s28 + $0x23ec] ss:$16 sps:$4 sm:$0xff]  }
 0x4df   : > { %13747 = vmatprep.subr.bf16.mxu0 %v23202_v44  ;;  %16459 = vmatprep.subr.bf16.mxu1 %v23205_v45  ;;  %v627_v44 = vld [vmem:[%s24536_s30 + $0x740] sm:$0xff] }
 0x4e0   : > { %v23260_v45 = vld [vmem:[%s24405_s28 + $0x22c0] ss:$16 sps:$4 sm:$0xff]   ;;  %v23316_v31 = vld [vmem:[%s24405_s28 + $0x23e4] ss:$16 sps:$4 sm:$0xff]  }
 0x4e1   : > { %13703 = vmatmul.mubr.bf16.gmra.mrb[24].mxu0 %v18315_v46  ;;  %16415 = vmatmul.mubr.bf16.gmra.mrb[24].mxu1 %v18315_v46  ;;  %v23263_v46 = vld [vmem:[%s24405_s28 + $0x22c8] ss:$16 sps:$4 sm:$0xff]  }
 0x4e2   : > { %13748 = vmatpush1.bf16.msra.mxu0 %v23200_v49  ;;  %16460 = vmatpush1.bf16.msra.mxu1 %v23203_v50  ;;  %v18222_v49 = vcombine.high %v603_v43, %v627_v44  ;;  %v23266_v50 = vld [vmem:[%s24405_s28 + $0x22e0] ss:$16 sps:$4 sm:$0xff]  }
 0x4e3   : > { %13749 = vmatprep.subr.bf16.mxu0 %v23208_v51  ;;  %16461 = vmatprep.subr.bf16.mxu1 %v23211_v52  ;;  %v23269_v51 = vld [vmem:[%s24405_s28 + $0x22e8] ss:$16 sps:$4 sm:$0xff]   ;;  %v23274_v52 = vld [vmem:[%s24405_s28 + $0x2304] ss:$16 sps:$4 sm:$0xff]  }
 0x4e4   : > { %13712 = vmatprep.mubr.bf16.mxu0 %v18364_v53  ;;  %16424 = vmatprep.mubr.bf16.mxu1 %v18364_v53  ;;  %v23277_v53 = vld [vmem:[%s24405_s28 + $0x230c] ss:$16 sps:$4 sm:$0xff]  }
 0x4e6   : > { %13750 = vmatpush1.bf16.msra.mxu0 %v23206_v54  ;;  %16462 = vmatpush1.bf16.msra.mxu1 %v23209_v55  ;;  %v18221_v54 = vcombine.low %v603_v43, %v627_v44  ;;  %v651_v55 = vld [vmem:[%s24536_s30 + $0x800] sm:$0xff]  ;;  %v23331_v44 = vld [vmem:[%s24405_s28 + $0x242c] ss:$16 sps:$4 sm:$0xff]  }
 0x4e7   : > { %13751 = vmatprep.subr.bf16.mxu0 %v23214_v56  ;;  %16463 = vmatprep.subr.bf16.mxu1 %v23217_v57  ;;  %v675_v56 = vld [vmem:[%s24536_s30 + $0x8c0] sm:$0xff] }
 0x4e8   : > { %v23272_v57 = vld [vmem:[%s24405_s28 + $0x2300] ss:$16 sps:$4 sm:$0xff]   ;;  %v23328_v43 = vld [vmem:[%s24405_s28 + $0x2424] ss:$16 sps:$4 sm:$0xff]  }
 0x4e9   : > { %13713 = vmatmul.mubr.bf16.gmra.mrb[28].mxu0 %v18363_v58  ;;  %16425 = vmatmul.mubr.bf16.gmra.mrb[28].mxu1 %v18363_v58  ;;  %v23275_v58 = vld [vmem:[%s24405_s28 + $0x2308] ss:$16 sps:$4 sm:$0xff]  }
 0x4ea   : > { %13752 = vmatpush1.bf16.msra.mxu0 %v23212_v61  ;;  %16464 = vmatpush1.bf16.msra.mxu1 %v23215_v62  ;;  %v18270_v61 = vcombine.high %v651_v55, %v675_v56  ;;  %v23278_v62 = vld [vmem:[%s24405_s28 + $0x2320] ss:$16 sps:$4 sm:$0xff]  }
 0x4eb   : > { %13753 = vmatprep.subr.bf16.mxu0 %v23220_v63  ;;  %16465 = vmatprep.subr.bf16.mxu1 %v23223_v0  ;;  %v23281_v63 = vld [vmem:[%s24405_s28 + $0x2328] ss:$16 sps:$4 sm:$0xff]   ;;  %v23286_v0 = vld [vmem:[%s24405_s28 + $0x2344] ss:$16 sps:$4 sm:$0xff]  }
 0x4ec   : > { %13755 = vmatprep.mubr.bf16.mxu0 %v18030_v1  ;;  %16467 = vmatprep.mubr.bf16.mxu1 %v18030_v1  ;;  %v23289_v1 = vld [vmem:[%s24405_s28 + $0x234c] ss:$16 sps:$4 sm:$0xff]  }
 0x4ee   : > { %13754 = vmatpush1.bf16.msra.mxu0 %v23218_v2  ;;  %16466 = vmatpush1.bf16.msra.mxu1 %v23221_v3  ;;  %v18269_v2 = vcombine.low %v651_v55, %v675_v56  ;;  %v699_v3 = vld [vmem:[%s24536_s30 + $0x980] sm:$0xff]  ;;  %v23343_v56 = vld [vmem:[%s24405_s28 + $0x246c] ss:$16 sps:$4 sm:$0xff]  }
 0x4ef   : > { %13836 = vmatprep.subr.bf16.mxu0 %v23226_v4  ;;  %16548 = vmatprep.subr.bf16.mxu1 %v23229_v5  ;;  %v723_v4 = vld [vmem:[%s24536_s30 + $0xa40] sm:$0xff] }
 0x4f0   : > { %v23284_v5 = vld [vmem:[%s24405_s28 + $0x2340] ss:$16 sps:$4 sm:$0xff]   ;;  %v23340_v55 = vld [vmem:[%s24405_s28 + $0x2464] ss:$16 sps:$4 sm:$0xff]  }
 0x4f1   : > { %13756 = vmatmul.mubr.bf16.vlgmr.msra.gmra.mrb[0].mxu0 %v18029_v6  ;;  %16468 = vmatmul.mubr.bf16.vlgmr.msra.gmra.mrb[0].mxu1 %v18029_v6  ;;  %v23287_v6 = vld [vmem:[%s24405_s28 + $0x2348] ss:$16 sps:$4 sm:$0xff]  }
 0x4f2   : > { %13837 = vmatpush1.bf16.msra.mxu0 %v23224_v9  ;;  %16549 = vmatpush1.bf16.msra.mxu1 %v23227_v10  ;;  %v18318_v9 = vcombine.high %v699_v3, %v723_v4  ;;  %v23290_v10 = vld [vmem:[%s24405_s28 + $0x2360] ss:$16 sps:$4 sm:$0xff]  }
 0x4f3   : > { %13838 = vmatprep.subr.bf16.mxu0 %v23232_v11  ;;  %16550 = vmatprep.subr.bf16.mxu1 %v23235_v12  ;;  %v23293_v11 = vld [vmem:[%s24405_s28 + $0x2368] ss:$16 sps:$4 sm:$0xff]   ;;  %v23298_v12 = vld [vmem:[%s24405_s28 + $0x2384] ss:$16 sps:$4 sm:$0xff]  }
 0x4f4   : > { %13765 = vmatprep.mubr.bf16.mxu0 %v18078_v13  ;;  %16477 = vmatprep.mubr.bf16.mxu1 %v18078_v13  ;;  %v23301_v13 = vld [vmem:[%s24405_s28 + $0x238c] ss:$16 sps:$4 sm:$0xff]  }
 0x4f6   : > { %13839 = vmatpush1.bf16.msra.mxu0 %v23230_v14  ;;  %16551 = vmatpush1.bf16.msra.mxu1 %v23233_v15  ;;  %v18317_v14 = vcombine.low %v699_v3, %v723_v4  ;;  %v747_v15 = vld [vmem:[%s24536_s30 + $0xb00] sm:$0xff]  ;;  %v23355_v4 = vld [vmem:[%s24405_s28 + $0x24ac] ss:$16 sps:$4 sm:$0xff]  }
 0x4f7   : > { %13840 = vmatprep.subr.bf16.mxu0 %v23238_v16  ;;  %16552 = vmatprep.subr.bf16.mxu1 %v23241_v17  ;;  %v771_v16 = vld [vmem:[%s24536_s30 + $0xbc0] sm:$0xff] }
 0x4f8   : > { %v23296_v17 = vld [vmem:[%s24405_s28 + $0x2380] ss:$16 sps:$4 sm:$0xff]   ;;  %v23352_v3 = vld [vmem:[%s24405_s28 + $0x24a4] ss:$16 sps:$4 sm:$0xff]  }
 0x4f9   : > { %13766 = vmatmul.mubr.bf16.gmra.mrb[4].mxu0 %v18077_v18  ;;  %16478 = vmatmul.mubr.bf16.gmra.mrb[4].mxu1 %v18077_v18  ;;  %v23299_v18 = vld [vmem:[%s24405_s28 + $0x2388] ss:$16 sps:$4 sm:$0xff]  }
 0x4fa   : > { %13841 = vmatpush1.bf16.msra.mxu0 %v23236_v21  ;;  %16553 = vmatpush1.bf16.msra.mxu1 %v23239_v22  ;;  %v18366_v21 = vcombine.high %v747_v15, %v771_v16  ;;  %v23302_v22 = vld [vmem:[%s24405_s28 + $0x23a0] ss:$16 sps:$4 sm:$0xff]  }
 0x4fb   : > { %13842 = vmatprep.subr.bf16.mxu0 %v23244_v23  ;;  %16554 = vmatprep.subr.bf16.mxu1 %v23247_v24  ;;  %v23305_v23 = vld [vmem:[%s24405_s28 + $0x23a8] ss:$16 sps:$4 sm:$0xff]   ;;  %v23310_v24 = vld [vmem:[%s24405_s28 + $0x23c4] ss:$16 sps:$4 sm:$0xff]  }
 0x4fc   : > { %13775 = vmatprep.mubr.bf16.mxu0 %v18126_v25  ;;  %16487 = vmatprep.mubr.bf16.mxu1 %v18126_v25  ;;  %v23313_v25 = vld [vmem:[%s24405_s28 + $0x23cc] ss:$16 sps:$4 sm:$0xff]  }
 0x4fe   : > { %13843 = vmatpush1.bf16.msra.mxu0 %v23242_v26  ;;  %16555 = vmatpush1.bf16.msra.mxu1 %v23245_v27  ;;  %v18365_v26 = vcombine.low %v747_v15, %v771_v16  ;;  %v412_v27 = vld [vmem:[%s24536_s30 + $0x88] sm:$0xff]  ;;  %v23364_v15 = vld [vmem:[%s24405_s28 + $0x24e4] ss:$16 sps:$4 sm:$0xff]  }
 0x4ff   : > { %13844 = vmatprep.subr.bf16.mxu0 %v23250_v28  ;;  %16556 = vmatprep.subr.bf16.mxu1 %v23253_v29  ;;  %v436_v28 = vld [vmem:[%s24536_s30 + $0x148] sm:$0xff]  ;;  %v23308_v29 = vld [vmem:[%s24405_s28 + $0x23c0] ss:$16 sps:$4 sm:$0xff]  }
 0x500   : > { %v23367_v16 = vld [vmem:[%s24405_s28 + $0x24ec] ss:$16 sps:$4 sm:$0xff]  }
 0x501   : > { %13776 = vmatmul.mubr.bf16.gmra.mrb[8].mxu0 %v18125_v30  ;;  %16488 = vmatmul.mubr.bf16.gmra.mrb[8].mxu1 %v18125_v30  ;;  %v23311_v30 = vld [vmem:[%s24405_s28 + $0x23c8] ss:$16 sps:$4 sm:$0xff]  }
 0x502   : > { %13845 = vmatpush1.bf16.msra.mxu0 %v23248_v33  ;;  %16557 = vmatpush1.bf16.msra.mxu1 %v23251_v34  ;;  %v18032_v33 = vcombine.high %v412_v27, %v436_v28  ;;  %v23314_v34 = vld [vmem:[%s24405_s28 + $0x23e0] ss:$16 sps:$4 sm:$0xff]  }
 0x503   : > { %13846 = vmatprep.subr.bf16.mxu0 %v23256_v35  ;;  %16558 = vmatprep.subr.bf16.mxu1 %v23259_v36  ;;  %v23317_v35 = vld [vmem:[%s24405_s28 + $0x23e8] ss:$16 sps:$4 sm:$0xff]   ;;  %v23322_v36 = vld [vmem:[%s24405_s28 + $0x2404] ss:$16 sps:$4 sm:$0xff]  }
 0x504   : > { %13785 = vmatprep.mubr.bf16.mxu0 %v18174_v37  ;;  %16497 = vmatprep.mubr.bf16.mxu1 %v18174_v37  ;;  %v23325_v37 = vld [vmem:[%s24405_s28 + $0x240c] ss:$16 sps:$4 sm:$0xff]  }
 0x506   : > { %13847 = vmatpush1.bf16.msra.mxu0 %v23254_v38  ;;  %16559 = vmatpush1.bf16.msra.mxu1 %v23257_v39  ;;  %v18031_v38 = vcombine.low %v412_v27, %v436_v28  ;;  %v460_v39 = vld [vmem:[%s24536_s30 + $0x208] sm:$0xff]  ;;  %v23376_v27 = vld [vmem:[%s24405_s28 + $0x2524] ss:$16 sps:$4 sm:$0xff]  }
 0x507   : > { %13848 = vmatprep.subr.bf16.mxu0 %v23262_v40  ;;  %16560 = vmatprep.subr.bf16.mxu1 %v23265_v41  ;;  %v484_v40 = vld [vmem:[%s24536_s30 + $0x2c8] sm:$0xff]  ;;  %v23320_v41 = vld [vmem:[%s24405_s28 + $0x2400] ss:$16 sps:$4 sm:$0xff]  }
 0x508   : > { %v23379_v28 = vld [vmem:[%s24405_s28 + $0x252c] ss:$16 sps:$4 sm:$0xff]  }
 0x509   : > { %13786 = vmatmul.mubr.bf16.gmra.mrb[12].mxu0 %v18173_v42  ;;  %16498 = vmatmul.mubr.bf16.gmra.mrb[12].mxu1 %v18173_v42  ;;  %v23323_v42 = vld [vmem:[%s24405_s28 + $0x2408] ss:$16 sps:$4 sm:$0xff]  }
 0x50a   : > { %13849 = vmatpush1.bf16.msra.mxu0 %v23260_v45  ;;  %16561 = vmatpush1.bf16.msra.mxu1 %v23263_v46  ;;  %v18080_v45 = vcombine.high %v460_v39, %v484_v40  ;;  %v23326_v46 = vld [vmem:[%s24405_s28 + $0x2420] ss:$16 sps:$4 sm:$0xff]  }
 0x50b   : > { %13850 = vmatprep.subr.bf16.mxu0 %v23268_v47  ;;  %16562 = vmatprep.subr.bf16.mxu1 %v23271_v48  ;;  %v23329_v47 = vld [vmem:[%s24405_s28 + $0x2428] ss:$16 sps:$4 sm:$0xff]   ;;  %v23334_v48 = vld [vmem:[%s24405_s28 + $0x2444] ss:$16 sps:$4 sm:$0xff]  }
 0x50c   : > { %13795 = vmatprep.mubr.bf16.mxu0 %v18222_v49  ;;  %16507 = vmatprep.mubr.bf16.mxu1 %v18222_v49  ;;  %v23337_v49 = vld [vmem:[%s24405_s28 + $0x244c] ss:$16 sps:$4 sm:$0xff]  }
 0x50e   : > { %13851 = vmatpush1.bf16.msra.mxu0 %v23266_v50  ;;  %16563 = vmatpush1.bf16.msra.mxu1 %v23269_v51  ;;  %v18079_v50 = vcombine.low %v460_v39, %v484_v40  ;;  %v508_v51 = vld [vmem:[%s24536_s30 + $0x388] sm:$0xff]  ;;  %v23388_v39 = vld [vmem:[%s24405_s28 + $0x2564] ss:$16 sps:$4 sm:$0xff]  }
 0x50f   : > { %13852 = vmatprep.subr.bf16.mxu0 %v23274_v52  ;;  %16564 = vmatprep.subr.bf16.mxu1 %v23277_v53  ;;  %v532_v52 = vld [vmem:[%s24536_s30 + $0x448] sm:$0xff]  ;;  %v23332_v53 = vld [vmem:[%s24405_s28 + $0x2440] ss:$16 sps:$4 sm:$0xff]  }
 0x510   : > { %v23391_v40 = vld [vmem:[%s24405_s28 + $0x256c] ss:$16 sps:$4 sm:$0xff]  }
 0x511   : > { %13796 = vmatmul.mubr.bf16.gmra.mrb[16].mxu0 %v18221_v54  ;;  %16508 = vmatmul.mubr.bf16.gmra.mrb[16].mxu1 %v18221_v54  ;;  %v23335_v54 = vld [vmem:[%s24405_s28 + $0x2448] ss:$16 sps:$4 sm:$0xff]  }
 0x512   : > { %13853 = vmatpush1.bf16.msra.mxu0 %v23272_v57  ;;  %16565 = vmatpush1.bf16.msra.mxu1 %v23275_v58  ;;  %v18128_v57 = vcombine.high %v508_v51, %v532_v52  ;;  %v23338_v58 = vld [vmem:[%s24405_s28 + $0x2460] ss:$16 sps:$4 sm:$0xff]  }
 0x513   : > { %13854 = vmatprep.subr.bf16.mxu0 %v23280_v59  ;;  %16566 = vmatprep.subr.bf16.mxu1 %v23283_v60  ;;  %v23341_v59 = vld [vmem:[%s24405_s28 + $0x2468] ss:$16 sps:$4 sm:$0xff]   ;;  %v23346_v60 = vld [vmem:[%s24405_s28 + $0x2484] ss:$16 sps:$4 sm:$0xff]  }
 0x514   : > { %13805 = vmatprep.mubr.bf16.mxu0 %v18270_v61  ;;  %16517 = vmatprep.mubr.bf16.mxu1 %v18270_v61  ;;  %v23349_v61 = vld [vmem:[%s24405_s28 + $0x248c] ss:$16 sps:$4 sm:$0xff]  }
 0x516   : > { %13855 = vmatpush1.bf16.msra.mxu0 %v23278_v62  ;;  %16567 = vmatpush1.bf16.msra.mxu1 %v23281_v63  ;;  %v18127_v62 = vcombine.low %v508_v51, %v532_v52  ;;  %v556_v63 = vld [vmem:[%s24536_s30 + $0x508] sm:$0xff]  ;;  %v23400_v51 = vld [vmem:[%s24405_s28 + $0x25a4] ss:$16 sps:$4 sm:$0xff]  }
 0x517   : > { %13856 = vmatprep.subr.bf16.mxu0 %v23286_v0  ;;  %16568 = vmatprep.subr.bf16.mxu1 %v23289_v1  ;;  %v580_v0 = vld [vmem:[%s24536_s30 + $0x5c8] sm:$0xff]  ;;  %v23344_v1 = vld [vmem:[%s24405_s28 + $0x2480] ss:$16 sps:$4 sm:$0xff]  }
 0x518   : > { %v23403_v52 = vld [vmem:[%s24405_s28 + $0x25ac] ss:$16 sps:$4 sm:$0xff]  }
 0x519   : > { %13806 = vmatmul.mubr.bf16.gmra.mrb[20].mxu0 %v18269_v2  ;;  %16518 = vmatmul.mubr.bf16.gmra.mrb[20].mxu1 %v18269_v2  ;;  %v23347_v2 = vld [vmem:[%s24405_s28 + $0x2488] ss:$16 sps:$4 sm:$0xff]  }
 0x51a   : > { %13857 = vmatpush1.bf16.msra.mxu0 %v23284_v5  ;;  %16569 = vmatpush1.bf16.msra.mxu1 %v23287_v6  ;;  %v18176_v5 = vcombine.high %v556_v63, %v580_v0  ;;  %v23350_v6 = vld [vmem:[%s24405_s28 + $0x24a0] ss:$16 sps:$4 sm:$0xff]  }
 0x51b   : > { %13858 = vmatprep.subr.bf16.mxu0 %v23292_v7  ;;  %16570 = vmatprep.subr.bf16.mxu1 %v23295_v8  ;;  %v23353_v7 = vld [vmem:[%s24405_s28 + $0x24a8] ss:$16 sps:$4 sm:$0xff]   ;;  %v23358_v8 = vld [vmem:[%s24405_s28 + $0x24c4] ss:$16 sps:$4 sm:$0xff]  }
 0x51c   : > { %13815 = vmatprep.mubr.bf16.mxu0 %v18318_v9  ;;  %16527 = vmatprep.mubr.bf16.mxu1 %v18318_v9  ;;  %v23361_v9 = vld [vmem:[%s24405_s28 + $0x24cc] ss:$16 sps:$4 sm:$0xff]  }
 0x51e   : > { %13859 = vmatpush1.bf16.msra.mxu0 %v23290_v10  ;;  %16571 = vmatpush1.bf16.msra.mxu1 %v23293_v11  ;;  %v18175_v10 = vcombine.low %v556_v63, %v580_v0  ;;  %v604_v11 = vld [vmem:[%s24536_s30 + $0x688] sm:$0xff]  ;;  %v23412_v63 = vld [vmem:[%s24405_s28 + $0x25e4] ss:$16 sps:$4 sm:$0xff]  }
 0x51f   : > { %13860 = vmatprep.subr.bf16.mxu0 %v23298_v12  ;;  %16572 = vmatprep.subr.bf16.mxu1 %v23301_v13  ;;  %v628_v12 = vld [vmem:[%s24536_s30 + $0x748] sm:$0xff]  ;;  %v23356_v13 = vld [vmem:[%s24405_s28 + $0x24c0] ss:$16 sps:$4 sm:$0xff]  }
 0x520   : > { %v23415_v0 = vld [vmem:[%s24405_s28 + $0x25ec] ss:$16 sps:$4 sm:$0xff]  }
 0x521   : > { %13816 = vmatmul.mubr.bf16.gmra.mrb[24].mxu0 %v18317_v14  ;;  %16528 = vmatmul.mubr.bf16.gmra.mrb[24].mxu1 %v18317_v14  ;;  %v23359_v14 = vld [vmem:[%s24405_s28 + $0x24c8] ss:$16 sps:$4 sm:$0xff]  }
 0x522   : > { %13861 = vmatpush1.bf16.msra.mxu0 %v23296_v17  ;;  %16573 = vmatpush1.bf16.msra.mxu1 %v23299_v18  ;;  %v18224_v17 = vcombine.high %v604_v11, %v628_v12  ;;  %v23362_v18 = vld [vmem:[%s24405_s28 + $0x24e0] ss:$16 sps:$4 sm:$0xff]  }
 0x523   : > { %13862 = vmatprep.subr.bf16.mxu0 %v23304_v19  ;;  %16574 = vmatprep.subr.bf16.mxu1 %v23307_v20  ;;  %v23365_v19 = vld [vmem:[%s24405_s28 + $0x24e8] ss:$16 sps:$4 sm:$0xff]   ;;  %v23370_v20 = vld [vmem:[%s24405_s28 + $0x2504] ss:$16 sps:$4 sm:$0xff]  }
 0x524   : > { %13825 = vmatprep.mubr.bf16.mxu0 %v18366_v21  ;;  %16537 = vmatprep.mubr.bf16.mxu1 %v18366_v21  ;;  %v23373_v21 = vld [vmem:[%s24405_s28 + $0x250c] ss:$16 sps:$4 sm:$0xff]  }
 0x526   : > { %13863 = vmatpush1.bf16.msra.mxu0 %v23302_v22  ;;  %16575 = vmatpush1.bf16.msra.mxu1 %v23305_v23  ;;  %v18223_v22 = vcombine.low %v604_v11, %v628_v12  ;;  %v652_v23 = vld [vmem:[%s24536_s30 + $0x808] sm:$0xff]  ;;  %v23424_v11 = vld [vmem:[%s24405_s28 + $0x2624] ss:$16 sps:$4 sm:$0xff]  }
 0x527   : > { %13864 = vmatprep.subr.bf16.mxu0 %v23310_v24  ;;  %16576 = vmatprep.subr.bf16.mxu1 %v23313_v25  ;;  %v676_v24 = vld [vmem:[%s24536_s30 + $0x8c8] sm:$0xff]  ;;  %v23368_v25 = vld [vmem:[%s24405_s28 + $0x2500] ss:$16 sps:$4 sm:$0xff]  }
 0x528   : > { %v23427_v12 = vld [vmem:[%s24405_s28 + $0x262c] ss:$16 sps:$4 sm:$0xff]  }
 0x529   : > { %13826 = vmatmul.mubr.bf16.gmra.mrb[28].mxu0 %v18365_v26  ;;  %16538 = vmatmul.mubr.bf16.gmra.mrb[28].mxu1 %v18365_v26  ;;  %v23371_v26 = vld [vmem:[%s24405_s28 + $0x2508] ss:$16 sps:$4 sm:$0xff]  }
 0x52a   : > { %13865 = vmatpush1.bf16.msra.mxu0 %v23308_v29  ;;  %16577 = vmatpush1.bf16.msra.mxu1 %v23311_v30  ;;  %v18272_v29 = vcombine.high %v652_v23, %v676_v24  ;;  %v23374_v30 = vld [vmem:[%s24405_s28 + $0x2520] ss:$16 sps:$4 sm:$0xff]  }
 0x52b   : > { %13866 = vmatprep.subr.bf16.mxu0 %v23316_v31  ;;  %16578 = vmatprep.subr.bf16.mxu1 %v23319_v32  ;;  %v23377_v31 = vld [vmem:[%s24405_s28 + $0x2528] ss:$16 sps:$4 sm:$0xff]   ;;  %v23382_v32 = vld [vmem:[%s24405_s28 + $0x2544] ss:$16 sps:$4 sm:$0xff]  }
 0x52c   : > { %13868 = vmatprep.mubr.bf16.mxu0 %v18032_v33  ;;  %16580 = vmatprep.mubr.bf16.mxu1 %v18032_v33  ;;  %v23385_v33 = vld [vmem:[%s24405_s28 + $0x254c] ss:$16 sps:$4 sm:$0xff]  }
 0x52e   : > { %13867 = vmatpush1.bf16.msra.mxu0 %v23314_v34  ;;  %16579 = vmatpush1.bf16.msra.mxu1 %v23317_v35  ;;  %v18271_v34 = vcombine.low %v652_v23, %v676_v24  ;;  %v700_v35 = vld [vmem:[%s24536_s30 + $0x988] sm:$0xff]  ;;  %v23436_v23 = vld [vmem:[%s24405_s28 + $0x2664] ss:$16 sps:$4 sm:$0xff]  }
 0x52f   : > { %13949 = vmatprep.subr.bf16.mxu0 %v23322_v36  ;;  %16661 = vmatprep.subr.bf16.mxu1 %v23325_v37  ;;  %v724_v36 = vld [vmem:[%s24536_s30 + $0xa48] sm:$0xff]  ;;  %v23380_v37 = vld [vmem:[%s24405_s28 + $0x2540] ss:$16 sps:$4 sm:$0xff]  }
 0x530   : > { %v23439_v24 = vld [vmem:[%s24405_s28 + $0x266c] ss:$16 sps:$4 sm:$0xff]  }
 0x531   : > { %13869 = vmatmul.mubr.bf16.vlgmr.msra.gmra.mrb[0].mxu0 %v18031_v38  ;;  %16581 = vmatmul.mubr.bf16.vlgmr.msra.gmra.mrb[0].mxu1 %v18031_v38  ;;  %v23383_v38 = vld [vmem:[%s24405_s28 + $0x2548] ss:$16 sps:$4 sm:$0xff]  }
 0x532   : > { %13950 = vmatpush1.bf16.msra.mxu0 %v23320_v41  ;;  %16662 = vmatpush1.bf16.msra.mxu1 %v23323_v42  ;;  %v18320_v41 = vcombine.high %v700_v35, %v724_v36  ;;  %v23386_v42 = vld [vmem:[%s24405_s28 + $0x2560] ss:$16 sps:$4 sm:$0xff]  }
 0x533   : > { %13951 = vmatprep.subr.bf16.mxu0 %v23328_v43  ;;  %16663 = vmatprep.subr.bf16.mxu1 %v23331_v44  ;;  %v23389_v43 = vld [vmem:[%s24405_s28 + $0x2568] ss:$16 sps:$4 sm:$0xff]   ;;  %v23394_v44 = vld [vmem:[%s24405_s28 + $0x2584] ss:$16 sps:$4 sm:$0xff]  }
 0x534   : > { %13878 = vmatprep.mubr.bf16.mxu0 %v18080_v45  ;;  %16590 = vmatprep.mubr.bf16.mxu1 %v18080_v45  ;;  %v23397_v45 = vld [vmem:[%s24405_s28 + $0x258c] ss:$16 sps:$4 sm:$0xff]  }
 0x536   : > { %13952 = vmatpush1.bf16.msra.mxu0 %v23326_v46  ;;  %16664 = vmatpush1.bf16.msra.mxu1 %v23329_v47  ;;  %v18319_v46 = vcombine.low %v700_v35, %v724_v36  ;;  %v748_v47 = vld [vmem:[%s24536_s30 + $0xb08] sm:$0xff]  ;;  %v23448_v35 = vld [vmem:[%s24405_s28 + $0x26a4] ss:$16 sps:$4 sm:$0xff]  }
 0x537   : > { %13953 = vmatprep.subr.bf16.mxu0 %v23334_v48  ;;  %16665 = vmatprep.subr.bf16.mxu1 %v23337_v49  ;;  %v772_v48 = vld [vmem:[%s24536_s30 + $0xbc8] sm:$0xff]  ;;  %v23392_v49 = vld [vmem:[%s24405_s28 + $0x2580] ss:$16 sps:$4 sm:$0xff]  }
 0x538   : > { %v23451_v36 = vld [vmem:[%s24405_s28 + $0x26ac] ss:$16 sps:$4 sm:$0xff]  }
 0x539   : > { %13879 = vmatmul.mubr.bf16.gmra.mrb[4].mxu0 %v18079_v50  ;;  %16591 = vmatmul.mubr.bf16.gmra.mrb[4].mxu1 %v18079_v50  ;;  %v23395_v50 = vld [vmem:[%s24405_s28 + $0x2588] ss:$16 sps:$4 sm:$0xff]  }
 0x53a   : > { %13954 = vmatpush1.bf16.msra.mxu0 %v23332_v53  ;;  %16666 = vmatpush1.bf16.msra.mxu1 %v23335_v54  ;;  %v18368_v53 = vcombine.high %v748_v47, %v772_v48  ;;  %v23398_v54 = vld [vmem:[%s24405_s28 + $0x25a0] ss:$16 sps:$4 sm:$0xff]  }
 0x53b   : > { %13955 = vmatprep.subr.bf16.mxu0 %v23340_v55  ;;  %16667 = vmatprep.subr.bf16.mxu1 %v23343_v56  ;;  %v23401_v55 = vld [vmem:[%s24405_s28 + $0x25a8] ss:$16 sps:$4 sm:$0xff]   ;;  %v23406_v56 = vld [vmem:[%s24405_s28 + $0x25c4] ss:$16 sps:$4 sm:$0xff]  }
 0x53c   : > { %13888 = vmatprep.mubr.bf16.mxu0 %v18128_v57  ;;  %16600 = vmatprep.mubr.bf16.mxu1 %v18128_v57  ;;  %v23409_v57 = vld [vmem:[%s24405_s28 + $0x25cc] ss:$16 sps:$4 sm:$0xff]  }
 0x53e   : > { %13956 = vmatpush1.bf16.msra.mxu0 %v23338_v58  ;;  %16668 = vmatpush1.bf16.msra.mxu1 %v23341_v59  ;;  %v18367_v58 = vcombine.low %v748_v47, %v772_v48  ;;  %v413_v59 = vld [vmem:[%s24536_s30 + $0x90] sm:$0xff]  ;;  %v23463_v48 = vld [vmem:[%s24405_s28 + $0x26ec] ss:$16 sps:$4 sm:$0xff]  }
 0x53f   : > { %13957 = vmatprep.subr.bf16.mxu0 %v23346_v60  ;;  %16669 = vmatprep.subr.bf16.mxu1 %v23349_v61  ;;  %v437_v60 = vld [vmem:[%s24536_s30 + $0x150] sm:$0xff] }
 0x540   : > { %v23404_v61 = vld [vmem:[%s24405_s28 + $0x25c0] ss:$16 sps:$4 sm:$0xff]   ;;  %v23460_v47 = vld [vmem:[%s24405_s28 + $0x26e4] ss:$16 sps:$4 sm:$0xff]  }
 0x541   : > { %13889 = vmatmul.mubr.bf16.gmra.mrb[8].mxu0 %v18127_v62  ;;  %16601 = vmatmul.mubr.bf16.gmra.mrb[8].mxu1 %v18127_v62  ;;  %v23407_v62 = vld [vmem:[%s24405_s28 + $0x25c8] ss:$16 sps:$4 sm:$0xff]  }
 0x542   : > { %13958 = vmatpush1.bf16.msra.mxu0 %v23344_v1  ;;  %16670 = vmatpush1.bf16.msra.mxu1 %v23347_v2  ;;  %v18034_v1 = vcombine.high %v413_v59, %v437_v60  ;;  %v23410_v2 = vld [vmem:[%s24405_s28 + $0x25e0] ss:$16 sps:$4 sm:$0xff]  }
 0x543   : > { %13959 = vmatprep.subr.bf16.mxu0 %v23352_v3  ;;  %16671 = vmatprep.subr.bf16.mxu1 %v23355_v4  ;;  %v23413_v3 = vld [vmem:[%s24405_s28 + $0x25e8] ss:$16 sps:$4 sm:$0xff]   ;;  %v23418_v4 = vld [vmem:[%s24405_s28 + $0x2604] ss:$16 sps:$4 sm:$0xff]  }
 0x544   : > { %13898 = vmatprep.mubr.bf16.mxu0 %v18176_v5  ;;  %16610 = vmatprep.mubr.bf16.mxu1 %v18176_v5  ;;  %v23421_v5 = vld [vmem:[%s24405_s28 + $0x260c] ss:$16 sps:$4 sm:$0xff]  }
 0x546   : > { %13960 = vmatpush1.bf16.msra.mxu0 %v23350_v6  ;;  %16672 = vmatpush1.bf16.msra.mxu1 %v23353_v7  ;;  %v18033_v6 = vcombine.low %v413_v59, %v437_v60  ;;  %v461_v7 = vld [vmem:[%s24536_s30 + $0x210] sm:$0xff]  ;;  %v23475_v60 = vld [vmem:[%s24405_s28 + $0x272c] ss:$16 sps:$4 sm:$0xff]  }
 0x547   : > { %13961 = vmatprep.subr.bf16.mxu0 %v23358_v8  ;;  %16673 = vmatprep.subr.bf16.mxu1 %v23361_v9  ;;  %v485_v8 = vld [vmem:[%s24536_s30 + $0x2d0] sm:$0xff] }
 0x548   : > { %v23416_v9 = vld [vmem:[%s24405_s28 + $0x2600] ss:$16 sps:$4 sm:$0xff]   ;;  %v23472_v59 = vld [vmem:[%s24405_s28 + $0x2724] ss:$16 sps:$4 sm:$0xff]  }
 0x549   : > { %13899 = vmatmul.mubr.bf16.gmra.mrb[12].mxu0 %v18175_v10  ;;  %16611 = vmatmul.mubr.bf16.gmra.mrb[12].mxu1 %v18175_v10  ;;  %v23419_v10 = vld [vmem:[%s24405_s28 + $0x2608] ss:$16 sps:$4 sm:$0xff]  }
 0x54a   : > { %13962 = vmatpush1.bf16.msra.mxu0 %v23356_v13  ;;  %16674 = vmatpush1.bf16.msra.mxu1 %v23359_v14  ;;  %v18082_v13 = vcombine.high %v461_v7, %v485_v8  ;;  %v23422_v14 = vld [vmem:[%s24405_s28 + $0x2620] ss:$16 sps:$4 sm:$0xff]  }
 0x54b   : > { %13963 = vmatprep.subr.bf16.mxu0 %v23364_v15  ;;  %16675 = vmatprep.subr.bf16.mxu1 %v23367_v16  ;;  %v23425_v15 = vld [vmem:[%s24405_s28 + $0x2628] ss:$16 sps:$4 sm:$0xff]   ;;  %v23430_v16 = vld [vmem:[%s24405_s28 + $0x2644] ss:$16 sps:$4 sm:$0xff]  }
 0x54c   : > { %13908 = vmatprep.mubr.bf16.mxu0 %v18224_v17  ;;  %16620 = vmatprep.mubr.bf16.mxu1 %v18224_v17  ;;  %v23433_v17 = vld [vmem:[%s24405_s28 + $0x264c] ss:$16 sps:$4 sm:$0xff]  }
 0x54e   : > { %13964 = vmatpush1.bf16.msra.mxu0 %v23362_v18  ;;  %16676 = vmatpush1.bf16.msra.mxu1 %v23365_v19  ;;  %v18081_v18 = vcombine.low %v461_v7, %v485_v8  ;;  %v509_v19 = vld [vmem:[%s24536_s30 + $0x390] sm:$0xff]  ;;  %v23487_v8 = vld [vmem:[%s24405_s28 + $0x276c] ss:$16 sps:$4 sm:$0xff]  }
 0x54f   : > { %13965 = vmatprep.subr.bf16.mxu0 %v23370_v20  ;;  %16677 = vmatprep.subr.bf16.mxu1 %v23373_v21  ;;  %v533_v20 = vld [vmem:[%s24536_s30 + $0x450] sm:$0xff] }
 0x550   : > { %v23428_v21 = vld [vmem:[%s24405_s28 + $0x2640] ss:$16 sps:$4 sm:$0xff]   ;;  %v23484_v7 = vld [vmem:[%s24405_s28 + $0x2764] ss:$16 sps:$4 sm:$0xff]  }
 0x551   : > { %13909 = vmatmul.mubr.bf16.gmra.mrb[16].mxu0 %v18223_v22  ;;  %16621 = vmatmul.mubr.bf16.gmra.mrb[16].mxu1 %v18223_v22  ;;  %v23431_v22 = vld [vmem:[%s24405_s28 + $0x2648] ss:$16 sps:$4 sm:$0xff]  }
 0x552   : > { %13966 = vmatpush1.bf16.msra.mxu0 %v23368_v25  ;;  %16678 = vmatpush1.bf16.msra.mxu1 %v23371_v26  ;;  %v18130_v25 = vcombine.high %v509_v19, %v533_v20  ;;  %v23434_v26 = vld [vmem:[%s24405_s28 + $0x2660] ss:$16 sps:$4 sm:$0xff]  }
 0x553   : > { %13967 = vmatprep.subr.bf16.mxu0 %v23376_v27  ;;  %16679 = vmatprep.subr.bf16.mxu1 %v23379_v28  ;;  %v23437_v27 = vld [vmem:[%s24405_s28 + $0x2668] ss:$16 sps:$4 sm:$0xff]   ;;  %v23442_v28 = vld [vmem:[%s24405_s28 + $0x2684] ss:$16 sps:$4 sm:$0xff]  }
 0x554   : > { %13918 = vmatprep.mubr.bf16.mxu0 %v18272_v29  ;;  %16630 = vmatprep.mubr.bf16.mxu1 %v18272_v29  ;;  %v23445_v29 = vld [vmem:[%s24405_s28 + $0x268c] ss:$16 sps:$4 sm:$0xff]  }
 0x556   : > { %13968 = vmatpush1.bf16.msra.mxu0 %v23374_v30  ;;  %16680 = vmatpush1.bf16.msra.mxu1 %v23377_v31  ;;  %v18129_v30 = vcombine.low %v509_v19, %v533_v20  ;;  %v557_v31 = vld [vmem:[%s24536_s30 + $0x510] sm:$0xff]  ;;  %v23499_v20 = vld [vmem:[%s24405_s28 + $0x27ac] ss:$16 sps:$4 sm:$0xff]  }
 0x557   : > { %13969 = vmatprep.subr.bf16.mxu0 %v23382_v32  ;;  %16681 = vmatprep.subr.bf16.mxu1 %v23385_v33  ;;  %v581_v32 = vld [vmem:[%s24536_s30 + $0x5d0] sm:$0xff] }
 0x558   : > { %v23440_v33 = vld [vmem:[%s24405_s28 + $0x2680] ss:$16 sps:$4 sm:$0xff]   ;;  %v23496_v19 = vld [vmem:[%s24405_s28 + $0x27a4] ss:$16 sps:$4 sm:$0xff]  }
 0x559   : > { %13919 = vmatmul.mubr.bf16.gmra.mrb[20].mxu0 %v18271_v34  ;;  %16631 = vmatmul.mubr.bf16.gmra.mrb[20].mxu1 %v18271_v34  ;;  %v23443_v34 = vld [vmem:[%s24405_s28 + $0x2688] ss:$16 sps:$4 sm:$0xff]  }
 0x55a   : > { %13970 = vmatpush1.bf16.msra.mxu0 %v23380_v37  ;;  %16682 = vmatpush1.bf16.msra.mxu1 %v23383_v38  ;;  %v18178_v37 = vcombine.high %v557_v31, %v581_v32  ;;  %v23446_v38 = vld [vmem:[%s24405_s28 + $0x26a0] ss:$16 sps:$4 sm:$0xff]  }
 0x55b   : > { %13971 = vmatprep.subr.bf16.mxu0 %v23388_v39  ;;  %16683 = vmatprep.subr.bf16.mxu1 %v23391_v40  ;;  %v23449_v39 = vld [vmem:[%s24405_s28 + $0x26a8] ss:$16 sps:$4 sm:$0xff]   ;;  %v23454_v40 = vld [vmem:[%s24405_s28 + $0x26c4] ss:$16 sps:$4 sm:$0xff]  }
 0x55c   : > { %13928 = vmatprep.mubr.bf16.mxu0 %v18320_v41  ;;  %16640 = vmatprep.mubr.bf16.mxu1 %v18320_v41  ;;  %v23457_v41 = vld [vmem:[%s24405_s28 + $0x26cc] ss:$16 sps:$4 sm:$0xff]  }
 0x55e   : > { %13972 = vmatpush1.bf16.msra.mxu0 %v23386_v42  ;;  %16684 = vmatpush1.bf16.msra.mxu1 %v23389_v43  ;;  %v18177_v42 = vcombine.low %v557_v31, %v581_v32  ;;  %v605_v43 = vld [vmem:[%s24536_s30 + $0x690] sm:$0xff]  ;;  %v23511_v32 = vld [vmem:[%s24405_s28 + $0x27ec] ss:$16 sps:$4 sm:$0xff]  }
 0x55f   : > { %13973 = vmatprep.subr.bf16.mxu0 %v23394_v44  ;;  %16685 = vmatprep.subr.bf16.mxu1 %v23397_v45  ;;  %v629_v44 = vld [vmem:[%s24536_s30 + $0x750] sm:$0xff] }
 0x560   : > { %v23452_v45 = vld [vmem:[%s24405_s28 + $0x26c0] ss:$16 sps:$4 sm:$0xff]   ;;  %v23508_v31 = vld [vmem:[%s24405_s28 + $0x27e4] ss:$16 sps:$4 sm:$0xff]  }
 0x561   : > { %13929 = vmatmul.mubr.bf16.gmra.mrb[24].mxu0 %v18319_v46  ;;  %16641 = vmatmul.mubr.bf16.gmra.mrb[24].mxu1 %v18319_v46  ;;  %v23455_v46 = vld [vmem:[%s24405_s28 + $0x26c8] ss:$16 sps:$4 sm:$0xff]  }
 0x562   : > { %13974 = vmatpush1.bf16.msra.mxu0 %v23392_v49  ;;  %16686 = vmatpush1.bf16.msra.mxu1 %v23395_v50  ;;  %v18226_v49 = vcombine.high %v605_v43, %v629_v44  ;;  %v23458_v50 = vld [vmem:[%s24405_s28 + $0x26e0] ss:$16 sps:$4 sm:$0xff]  }
 0x563   : > { %13975 = vmatprep.subr.bf16.mxu0 %v23400_v51  ;;  %16687 = vmatprep.subr.bf16.mxu1 %v23403_v52  ;;  %v23461_v51 = vld [vmem:[%s24405_s28 + $0x26e8] ss:$16 sps:$4 sm:$0xff]   ;;  %v23466_v52 = vld [vmem:[%s24405_s28 + $0x2704] ss:$16 sps:$4 sm:$0xff]  }
 0x564   : > { %13938 = vmatprep.mubr.bf16.mxu0 %v18368_v53  ;;  %16650 = vmatprep.mubr.bf16.mxu1 %v18368_v53  ;;  %v23469_v53 = vld [vmem:[%s24405_s28 + $0x270c] ss:$16 sps:$4 sm:$0xff]  }
 0x566   : > { %13976 = vmatpush1.bf16.msra.mxu0 %v23398_v54  ;;  %16688 = vmatpush1.bf16.msra.mxu1 %v23401_v55  ;;  %v18225_v54 = vcombine.low %v605_v43, %v629_v44  ;;  %v653_v55 = vld [vmem:[%s24536_s30 + $0x810] sm:$0xff]  ;;  %v23523_v44 = vld [vmem:[%s24405_s28 + $0x282c] ss:$16 sps:$4 sm:$0xff]  }
 0x567   : > { %13977 = vmatprep.subr.bf16.mxu0 %v23406_v56  ;;  %16689 = vmatprep.subr.bf16.mxu1 %v23409_v57  ;;  %v677_v56 = vld [vmem:[%s24536_s30 + $0x8d0] sm:$0xff] }
 0x568   : > { %v23464_v57 = vld [vmem:[%s24405_s28 + $0x2700] ss:$16 sps:$4 sm:$0xff]   ;;  %v23520_v43 = vld [vmem:[%s24405_s28 + $0x2824] ss:$16 sps:$4 sm:$0xff]  }
 0x569   : > { %13939 = vmatmul.mubr.bf16.gmra.mrb[28].mxu0 %v18367_v58  ;;  %16651 = vmatmul.mubr.bf16.gmra.mrb[28].mxu1 %v18367_v58  ;;  %v23467_v58 = vld [vmem:[%s24405_s28 + $0x2708] ss:$16 sps:$4 sm:$0xff]  }
 0x56a   : > { %13978 = vmatpush1.bf16.msra.mxu0 %v23404_v61  ;;  %16690 = vmatpush1.bf16.msra.mxu1 %v23407_v62  ;;  %v18274_v61 = vcombine.high %v653_v55, %v677_v56  ;;  %v23470_v62 = vld [vmem:[%s24405_s28 + $0x2720] ss:$16 sps:$4 sm:$0xff]  }
 0x56b   : > { %13979 = vmatprep.subr.bf16.mxu0 %v23412_v63  ;;  %16691 = vmatprep.subr.bf16.mxu1 %v23415_v0  ;;  %v23473_v63 = vld [vmem:[%s24405_s28 + $0x2728] ss:$16 sps:$4 sm:$0xff]   ;;  %v23478_v0 = vld [vmem:[%s24405_s28 + $0x2744] ss:$16 sps:$4 sm:$0xff]  }
 0x56c   : > { %13981 = vmatprep.mubr.bf16.mxu0 %v18034_v1  ;;  %16693 = vmatprep.mubr.bf16.mxu1 %v18034_v1  ;;  %v23481_v1 = vld [vmem:[%s24405_s28 + $0x274c] ss:$16 sps:$4 sm:$0xff]  }
 0x56e   : > { %13980 = vmatpush1.bf16.msra.mxu0 %v23410_v2  ;;  %16692 = vmatpush1.bf16.msra.mxu1 %v23413_v3  ;;  %v18273_v2 = vcombine.low %v653_v55, %v677_v56  ;;  %v701_v3 = vld [vmem:[%s24536_s30 + $0x990] sm:$0xff]  ;;  %v23535_v56 = vld [vmem:[%s24405_s28 + $0x286c] ss:$16 sps:$4 sm:$0xff]  }
 0x56f   : > { %14062 = vmatprep.subr.bf16.mxu0 %v23418_v4  ;;  %16774 = vmatprep.subr.bf16.mxu1 %v23421_v5  ;;  %v725_v4 = vld [vmem:[%s24536_s30 + $0xa50] sm:$0xff] }
 0x570   : > { %v23476_v5 = vld [vmem:[%s24405_s28 + $0x2740] ss:$16 sps:$4 sm:$0xff]   ;;  %v23532_v55 = vld [vmem:[%s24405_s28 + $0x2864] ss:$16 sps:$4 sm:$0xff]  }
 0x571   : > { %13982 = vmatmul.mubr.bf16.vlgmr.msra.gmra.mrb[0].mxu0 %v18033_v6  ;;  %16694 = vmatmul.mubr.bf16.vlgmr.msra.gmra.mrb[0].mxu1 %v18033_v6  ;;  %v23479_v6 = vld [vmem:[%s24405_s28 + $0x2748] ss:$16 sps:$4 sm:$0xff]  }
 0x572   : > { %14063 = vmatpush1.bf16.msra.mxu0 %v23416_v9  ;;  %16775 = vmatpush1.bf16.msra.mxu1 %v23419_v10  ;;  %v18322_v9 = vcombine.high %v701_v3, %v725_v4  ;;  %v23482_v10 = vld [vmem:[%s24405_s28 + $0x2760] ss:$16 sps:$4 sm:$0xff]  }
 0x573   : > { %14064 = vmatprep.subr.bf16.mxu0 %v23424_v11  ;;  %16776 = vmatprep.subr.bf16.mxu1 %v23427_v12  ;;  %v23485_v11 = vld [vmem:[%s24405_s28 + $0x2768] ss:$16 sps:$4 sm:$0xff]   ;;  %v23490_v12 = vld [vmem:[%s24405_s28 + $0x2784] ss:$16 sps:$4 sm:$0xff]  }
 0x574   : > { %13991 = vmatprep.mubr.bf16.mxu0 %v18082_v13  ;;  %16703 = vmatprep.mubr.bf16.mxu1 %v18082_v13  ;;  %v23493_v13 = vld [vmem:[%s24405_s28 + $0x278c] ss:$16 sps:$4 sm:$0xff]  }
 0x576   : > { %14065 = vmatpush1.bf16.msra.mxu0 %v23422_v14  ;;  %16777 = vmatpush1.bf16.msra.mxu1 %v23425_v15  ;;  %v18321_v14 = vcombine.low %v701_v3, %v725_v4  ;;  %v749_v15 = vld [vmem:[%s24536_s30 + $0xb10] sm:$0xff]  ;;  %v23547_v4 = vld [vmem:[%s24405_s28 + $0x28ac] ss:$16 sps:$4 sm:$0xff]  }
 0x577   : > { %14066 = vmatprep.subr.bf16.mxu0 %v23430_v16  ;;  %16778 = vmatprep.subr.bf16.mxu1 %v23433_v17  ;;  %v773_v16 = vld [vmem:[%s24536_s30 + $0xbd0] sm:$0xff] }
 0x578   : > { %v23488_v17 = vld [vmem:[%s24405_s28 + $0x2780] ss:$16 sps:$4 sm:$0xff]   ;;  %v23544_v3 = vld [vmem:[%s24405_s28 + $0x28a4] ss:$16 sps:$4 sm:$0xff]  }
 0x579   : > { %13992 = vmatmul.mubr.bf16.gmra.mrb[4].mxu0 %v18081_v18  ;;  %16704 = vmatmul.mubr.bf16.gmra.mrb[4].mxu1 %v18081_v18  ;;  %v23491_v18 = vld [vmem:[%s24405_s28 + $0x2788] ss:$16 sps:$4 sm:$0xff]  }
 0x57a   : > { %14067 = vmatpush1.bf16.msra.mxu0 %v23428_v21  ;;  %16779 = vmatpush1.bf16.msra.mxu1 %v23431_v22  ;;  %v18370_v21 = vcombine.high %v749_v15, %v773_v16  ;;  %v23494_v22 = vld [vmem:[%s24405_s28 + $0x27a0] ss:$16 sps:$4 sm:$0xff]  }
 0x57b   : > { %14068 = vmatprep.subr.bf16.mxu0 %v23436_v23  ;;  %16780 = vmatprep.subr.bf16.mxu1 %v23439_v24  ;;  %v23497_v23 = vld [vmem:[%s24405_s28 + $0x27a8] ss:$16 sps:$4 sm:$0xff]   ;;  %v23502_v24 = vld [vmem:[%s24405_s28 + $0x27c4] ss:$16 sps:$4 sm:$0xff]  }
 0x57c   : > { %14001 = vmatprep.mubr.bf16.mxu0 %v18130_v25  ;;  %16713 = vmatprep.mubr.bf16.mxu1 %v18130_v25  ;;  %v23505_v25 = vld [vmem:[%s24405_s28 + $0x27cc] ss:$16 sps:$4 sm:$0xff]  }
 0x57e   : > { %14069 = vmatpush1.bf16.msra.mxu0 %v23434_v26  ;;  %16781 = vmatpush1.bf16.msra.mxu1 %v23437_v27  ;;  %v18369_v26 = vcombine.low %v749_v15, %v773_v16  ;;  %v414_v27 = vld [vmem:[%s24536_s30 + $0x98] sm:$0xff]  ;;  %v23556_v15 = vld [vmem:[%s24405_s28 + $0x28e4] ss:$16 sps:$4 sm:$0xff]  }
 0x57f   : > { %14070 = vmatprep.subr.bf16.mxu0 %v23442_v28  ;;  %16782 = vmatprep.subr.bf16.mxu1 %v23445_v29  ;;  %v438_v28 = vld [vmem:[%s24536_s30 + $0x158] sm:$0xff]  ;;  %v23500_v29 = vld [vmem:[%s24405_s28 + $0x27c0] ss:$16 sps:$4 sm:$0xff]  }
 0x580   : > { %v23559_v16 = vld [vmem:[%s24405_s28 + $0x28ec] ss:$16 sps:$4 sm:$0xff]  }
 0x581   : > { %14002 = vmatmul.mubr.bf16.gmra.mrb[8].mxu0 %v18129_v30  ;;  %16714 = vmatmul.mubr.bf16.gmra.mrb[8].mxu1 %v18129_v30  ;;  %v23503_v30 = vld [vmem:[%s24405_s28 + $0x27c8] ss:$16 sps:$4 sm:$0xff]  }
 0x582   : > { %14071 = vmatpush1.bf16.msra.mxu0 %v23440_v33  ;;  %16783 = vmatpush1.bf16.msra.mxu1 %v23443_v34  ;;  %v18036_v33 = vcombine.high %v414_v27, %v438_v28  ;;  %v23506_v34 = vld [vmem:[%s24405_s28 + $0x27e0] ss:$16 sps:$4 sm:$0xff]  }
 0x583   : > { %14072 = vmatprep.subr.bf16.mxu0 %v23448_v35  ;;  %16784 = vmatprep.subr.bf16.mxu1 %v23451_v36  ;;  %v23509_v35 = vld [vmem:[%s24405_s28 + $0x27e8] ss:$16 sps:$4 sm:$0xff]   ;;  %v23514_v36 = vld [vmem:[%s24405_s28 + $0x2804] ss:$16 sps:$4 sm:$0xff]  }
 0x584   : > { %14011 = vmatprep.mubr.bf16.mxu0 %v18178_v37  ;;  %16723 = vmatprep.mubr.bf16.mxu1 %v18178_v37  ;;  %v23517_v37 = vld [vmem:[%s24405_s28 + $0x280c] ss:$16 sps:$4 sm:$0xff]  }
 0x586   : > { %14073 = vmatpush1.bf16.msra.mxu0 %v23446_v38  ;;  %16785 = vmatpush1.bf16.msra.mxu1 %v23449_v39  ;;  %v18035_v38 = vcombine.low %v414_v27, %v438_v28  ;;  %v462_v39 = vld [vmem:[%s24536_s30 + $0x218] sm:$0xff]  ;;  %v23568_v27 = vld [vmem:[%s24405_s28 + $0x2924] ss:$16 sps:$4 sm:$0xff]  }
 0x587   : > { %14074 = vmatprep.subr.bf16.mxu0 %v23454_v40  ;;  %16786 = vmatprep.subr.bf16.mxu1 %v23457_v41  ;;  %v486_v40 = vld [vmem:[%s24536_s30 + $0x2d8] sm:$0xff]  ;;  %v23512_v41 = vld [vmem:[%s24405_s28 + $0x2800] ss:$16 sps:$4 sm:$0xff]  }
 0x588   : > { %v23571_v28 = vld [vmem:[%s24405_s28 + $0x292c] ss:$16 sps:$4 sm:$0xff]  }
 0x589   : > { %14012 = vmatmul.mubr.bf16.gmra.mrb[12].mxu0 %v18177_v42  ;;  %16724 = vmatmul.mubr.bf16.gmra.mrb[12].mxu1 %v18177_v42  ;;  %v23515_v42 = vld [vmem:[%s24405_s28 + $0x2808] ss:$16 sps:$4 sm:$0xff]  }
 0x58a   : > { %14075 = vmatpush1.bf16.msra.mxu0 %v23452_v45  ;;  %16787 = vmatpush1.bf16.msra.mxu1 %v23455_v46  ;;  %v18084_v45 = vcombine.high %v462_v39, %v486_v40  ;;  %v23518_v46 = vld [vmem:[%s24405_s28 + $0x2820] ss:$16 sps:$4 sm:$0xff]  }
 0x58b   : > { %14076 = vmatprep.subr.bf16.mxu0 %v23460_v47  ;;  %16788 = vmatprep.subr.bf16.mxu1 %v23463_v48  ;;  %v23521_v47 = vld [vmem:[%s24405_s28 + $0x2828] ss:$16 sps:$4 sm:$0xff]   ;;  %v23526_v48 = vld [vmem:[%s24405_s28 + $0x2844] ss:$16 sps:$4 sm:$0xff]  }
 0x58c   : > { %14021 = vmatprep.mubr.bf16.mxu0 %v18226_v49  ;;  %16733 = vmatprep.mubr.bf16.mxu1 %v18226_v49  ;;  %v23529_v49 = vld [vmem:[%s24405_s28 + $0x284c] ss:$16 sps:$4 sm:$0xff]  }
 0x58e   : > { %14077 = vmatpush1.bf16.msra.mxu0 %v23458_v50  ;;  %16789 = vmatpush1.bf16.msra.mxu1 %v23461_v51  ;;  %v18083_v50 = vcombine.low %v462_v39, %v486_v40  ;;  %v510_v51 = vld [vmem:[%s24536_s30 + $0x398] sm:$0xff]  ;;  %v23580_v39 = vld [vmem:[%s24405_s28 + $0x2964] ss:$16 sps:$4 sm:$0xff]  }
 0x58f   : > { %14078 = vmatprep.subr.bf16.mxu0 %v23466_v52  ;;  %16790 = vmatprep.subr.bf16.mxu1 %v23469_v53  ;;  %v534_v52 = vld [vmem:[%s24536_s30 + $0x458] sm:$0xff]  ;;  %v23524_v53 = vld [vmem:[%s24405_s28 + $0x2840] ss:$16 sps:$4 sm:$0xff]  }
 0x590   : > { %v23583_v40 = vld [vmem:[%s24405_s28 + $0x296c] ss:$16 sps:$4 sm:$0xff]  }
 0x591   : > { %14022 = vmatmul.mubr.bf16.gmra.mrb[16].mxu0 %v18225_v54  ;;  %16734 = vmatmul.mubr.bf16.gmra.mrb[16].mxu1 %v18225_v54  ;;  %v23527_v54 = vld [vmem:[%s24405_s28 + $0x2848] ss:$16 sps:$4 sm:$0xff]  }
 0x592   : > { %14079 = vmatpush1.bf16.msra.mxu0 %v23464_v57  ;;  %16791 = vmatpush1.bf16.msra.mxu1 %v23467_v58  ;;  %v18132_v57 = vcombine.high %v510_v51, %v534_v52  ;;  %v23530_v58 = vld [vmem:[%s24405_s28 + $0x2860] ss:$16 sps:$4 sm:$0xff]  }
 0x593   : > { %14080 = vmatprep.subr.bf16.mxu0 %v23472_v59  ;;  %16792 = vmatprep.subr.bf16.mxu1 %v23475_v60  ;;  %v23533_v59 = vld [vmem:[%s24405_s28 + $0x2868] ss:$16 sps:$4 sm:$0xff]   ;;  %v23538_v60 = vld [vmem:[%s24405_s28 + $0x2884] ss:$16 sps:$4 sm:$0xff]  }
 0x594   : > { %14031 = vmatprep.mubr.bf16.mxu0 %v18274_v61  ;;  %16743 = vmatprep.mubr.bf16.mxu1 %v18274_v61  ;;  %v23541_v61 = vld [vmem:[%s24405_s28 + $0x288c] ss:$16 sps:$4 sm:$0xff]  }
 0x596   : > { %14081 = vmatpush1.bf16.msra.mxu0 %v23470_v62  ;;  %16793 = vmatpush1.bf16.msra.mxu1 %v23473_v63  ;;  %v18131_v62 = vcombine.low %v510_v51, %v534_v52  ;;  %v558_v63 = vld [vmem:[%s24536_s30 + $0x518] sm:$0xff]  ;;  %v23592_v51 = vld [vmem:[%s24405_s28 + $0x29a4] ss:$16 sps:$4 sm:$0xff]  }
 0x597   : > { %14082 = vmatprep.subr.bf16.mxu0 %v23478_v0  ;;  %16794 = vmatprep.subr.bf16.mxu1 %v23481_v1  ;;  %v582_v0 = vld [vmem:[%s24536_s30 + $0x5d8] sm:$0xff]  ;;  %v23536_v1 = vld [vmem:[%s24405_s28 + $0x2880] ss:$16 sps:$4 sm:$0xff]  }
 0x598   : > { %v23595_v52 = vld [vmem:[%s24405_s28 + $0x29ac] ss:$16 sps:$4 sm:$0xff]  }
 0x599   : > { %14032 = vmatmul.mubr.bf16.gmra.mrb[20].mxu0 %v18273_v2  ;;  %16744 = vmatmul.mubr.bf16.gmra.mrb[20].mxu1 %v18273_v2  ;;  %v23539_v2 = vld [vmem:[%s24405_s28 + $0x2888] ss:$16 sps:$4 sm:$0xff]  }
 0x59a   : > { %14083 = vmatpush1.bf16.msra.mxu0 %v23476_v5  ;;  %16795 = vmatpush1.bf16.msra.mxu1 %v23479_v6  ;;  %v18180_v5 = vcombine.high %v558_v63, %v582_v0  ;;  %v23542_v6 = vld [vmem:[%s24405_s28 + $0x28a0] ss:$16 sps:$4 sm:$0xff]  }
 0x59b   : > { %14084 = vmatprep.subr.bf16.mxu0 %v23484_v7  ;;  %16796 = vmatprep.subr.bf16.mxu1 %v23487_v8  ;;  %v23545_v7 = vld [vmem:[%s24405_s28 + $0x28a8] ss:$16 sps:$4 sm:$0xff]   ;;  %v23550_v8 = vld [vmem:[%s24405_s28 + $0x28c4] ss:$16 sps:$4 sm:$0xff]  }
 0x59c   : > { %14041 = vmatprep.mubr.bf16.mxu0 %v18322_v9  ;;  %16753 = vmatprep.mubr.bf16.mxu1 %v18322_v9  ;;  %v23553_v9 = vld [vmem:[%s24405_s28 + $0x28cc] ss:$16 sps:$4 sm:$0xff]  }
 0x59e   : > { %14085 = vmatpush1.bf16.msra.mxu0 %v23482_v10  ;;  %16797 = vmatpush1.bf16.msra.mxu1 %v23485_v11  ;;  %v18179_v10 = vcombine.low %v558_v63, %v582_v0  ;;  %v606_v11 = vld [vmem:[%s24536_s30 + $0x698] sm:$0xff]  ;;  %v23604_v63 = vld [vmem:[%s24405_s28 + $0x29e4] ss:$16 sps:$4 sm:$0xff]  }
 0x59f   : > { %14086 = vmatprep.subr.bf16.mxu0 %v23490_v12  ;;  %16798 = vmatprep.subr.bf16.mxu1 %v23493_v13  ;;  %v630_v12 = vld [vmem:[%s24536_s30 + $0x758] sm:$0xff]  ;;  %v23548_v13 = vld [vmem:[%s24405_s28 + $0x28c0] ss:$16 sps:$4 sm:$0xff]  }
 0x5a0   : > { %v23607_v0 = vld [vmem:[%s24405_s28 + $0x29ec] ss:$16 sps:$4 sm:$0xff]  }
 0x5a1   : > { %14042 = vmatmul.mubr.bf16.gmra.mrb[24].mxu0 %v18321_v14  ;;  %16754 = vmatmul.mubr.bf16.gmra.mrb[24].mxu1 %v18321_v14  ;;  %v23551_v14 = vld [vmem:[%s24405_s28 + $0x28c8] ss:$16 sps:$4 sm:$0xff]  }
 0x5a2   : > { %14087 = vmatpush1.bf16.msra.mxu0 %v23488_v17  ;;  %16799 = vmatpush1.bf16.msra.mxu1 %v23491_v18  ;;  %v18228_v17 = vcombine.high %v606_v11, %v630_v12  ;;  %v23554_v18 = vld [vmem:[%s24405_s28 + $0x28e0] ss:$16 sps:$4 sm:$0xff]  }
 0x5a3   : > { %14088 = vmatprep.subr.bf16.mxu0 %v23496_v19  ;;  %16800 = vmatprep.subr.bf16.mxu1 %v23499_v20  ;;  %v23557_v19 = vld [vmem:[%s24405_s28 + $0x28e8] ss:$16 sps:$4 sm:$0xff]   ;;  %v23562_v20 = vld [vmem:[%s24405_s28 + $0x2904] ss:$16 sps:$4 sm:$0xff]  }
 0x5a4   : > { %14051 = vmatprep.mubr.bf16.mxu0 %v18370_v21  ;;  %16763 = vmatprep.mubr.bf16.mxu1 %v18370_v21  ;;  %v23565_v21 = vld [vmem:[%s24405_s28 + $0x290c] ss:$16 sps:$4 sm:$0xff]  }
 0x5a6   : > { %14089 = vmatpush1.bf16.msra.mxu0 %v23494_v22  ;;  %16801 = vmatpush1.bf16.msra.mxu1 %v23497_v23  ;;  %v18227_v22 = vcombine.low %v606_v11, %v630_v12  ;;  %v654_v23 = vld [vmem:[%s24536_s30 + $0x818] sm:$0xff]  ;;  %v23616_v11 = vld [vmem:[%s24405_s28 + $0x2a24] ss:$16 sps:$4 sm:$0xff]  }
 0x5a7   : > { %14090 = vmatprep.subr.bf16.mxu0 %v23502_v24  ;;  %16802 = vmatprep.subr.bf16.mxu1 %v23505_v25  ;;  %v678_v24 = vld [vmem:[%s24536_s30 + $0x8d8] sm:$0xff]  ;;  %v23560_v25 = vld [vmem:[%s24405_s28 + $0x2900] ss:$16 sps:$4 sm:$0xff]  }
 0x5a8   : > { %v23619_v12 = vld [vmem:[%s24405_s28 + $0x2a2c] ss:$16 sps:$4 sm:$0xff]  }
 0x5a9   : > { %14052 = vmatmul.mubr.bf16.gmra.mrb[28].mxu0 %v18369_v26  ;;  %16764 = vmatmul.mubr.bf16.gmra.mrb[28].mxu1 %v18369_v26  ;;  %v23563_v26 = vld [vmem:[%s24405_s28 + $0x2908] ss:$16 sps:$4 sm:$0xff]  }
 0x5aa   : > { %14091 = vmatpush1.bf16.msra.mxu0 %v23500_v29  ;;  %16803 = vmatpush1.bf16.msra.mxu1 %v23503_v30  ;;  %v18276_v29 = vcombine.high %v654_v23, %v678_v24  ;;  %v23566_v30 = vld [vmem:[%s24405_s28 + $0x2920] ss:$16 sps:$4 sm:$0xff]  }
 0x5ab   : > { %14092 = vmatprep.subr.bf16.mxu0 %v23508_v31  ;;  %16804 = vmatprep.subr.bf16.mxu1 %v23511_v32  ;;  %v23569_v31 = vld [vmem:[%s24405_s28 + $0x2928] ss:$16 sps:$4 sm:$0xff]   ;;  %v23574_v32 = vld [vmem:[%s24405_s28 + $0x2944] ss:$16 sps:$4 sm:$0xff]  }
 0x5ac   : > { %14094 = vmatprep.mubr.bf16.mxu0 %v18036_v33  ;;  %16806 = vmatprep.mubr.bf16.mxu1 %v18036_v33  ;;  %v23577_v33 = vld [vmem:[%s24405_s28 + $0x294c] ss:$16 sps:$4 sm:$0xff]  }
 0x5ae   : > { %14093 = vmatpush1.bf16.msra.mxu0 %v23506_v34  ;;  %16805 = vmatpush1.bf16.msra.mxu1 %v23509_v35  ;;  %v18275_v34 = vcombine.low %v654_v23, %v678_v24  ;;  %v702_v35 = vld [vmem:[%s24536_s30 + $0x998] sm:$0xff]  ;;  %v23628_v23 = vld [vmem:[%s24405_s28 + $0x2a64] ss:$16 sps:$4 sm:$0xff]  }
 0x5af   : > { %14175 = vmatprep.subr.bf16.mxu0 %v23514_v36  ;;  %16887 = vmatprep.subr.bf16.mxu1 %v23517_v37  ;;  %v726_v36 = vld [vmem:[%s24536_s30 + $0xa58] sm:$0xff]  ;;  %v23572_v37 = vld [vmem:[%s24405_s28 + $0x2940] ss:$16 sps:$4 sm:$0xff]  }
 0x5b0   : > { %v23631_v24 = vld [vmem:[%s24405_s28 + $0x2a6c] ss:$16 sps:$4 sm:$0xff]  }
 0x5b1   : > { %14095 = vmatmul.mubr.bf16.vlgmr.msra.gmra.mrb[0].mxu0 %v18035_v38  ;;  %16807 = vmatmul.mubr.bf16.vlgmr.msra.gmra.mrb[0].mxu1 %v18035_v38  ;;  %v23575_v38 = vld [vmem:[%s24405_s28 + $0x2948] ss:$16 sps:$4 sm:$0xff]  }
 0x5b2   : > { %14176 = vmatpush1.bf16.msra.mxu0 %v23512_v41  ;;  %16888 = vmatpush1.bf16.msra.mxu1 %v23515_v42  ;;  %v18324_v41 = vcombine.high %v702_v35, %v726_v36  ;;  %v23578_v42 = vld [vmem:[%s24405_s28 + $0x2960] ss:$16 sps:$4 sm:$0xff]  }
 0x5b3   : > { %14177 = vmatprep.subr.bf16.mxu0 %v23520_v43  ;;  %16889 = vmatprep.subr.bf16.mxu1 %v23523_v44  ;;  %v23581_v43 = vld [vmem:[%s24405_s28 + $0x2968] ss:$16 sps:$4 sm:$0xff]   ;;  %v23586_v44 = vld [vmem:[%s24405_s28 + $0x2984] ss:$16 sps:$4 sm:$0xff]  }
 0x5b4   : > { %14104 = vmatprep.mubr.bf16.mxu0 %v18084_v45  ;;  %16816 = vmatprep.mubr.bf16.mxu1 %v18084_v45  ;;  %v23589_v45 = vld [vmem:[%s24405_s28 + $0x298c] ss:$16 sps:$4 sm:$0xff]  }
 0x5b6   : > { %14178 = vmatpush1.bf16.msra.mxu0 %v23518_v46  ;;  %16890 = vmatpush1.bf16.msra.mxu1 %v23521_v47  ;;  %v18323_v46 = vcombine.low %v702_v35, %v726_v36  ;;  %v750_v47 = vld [vmem:[%s24536_s30 + $0xb18] sm:$0xff]  ;;  %v23640_v35 = vld [vmem:[%s24405_s28 + $0x2aa4] ss:$16 sps:$4 sm:$0xff]  }
 0x5b7   : > { %14179 = vmatprep.subr.bf16.mxu0 %v23526_v48  ;;  %16891 = vmatprep.subr.bf16.mxu1 %v23529_v49  ;;  %v774_v48 = vld [vmem:[%s24536_s30 + $0xbd8] sm:$0xff]  ;;  %v23584_v49 = vld [vmem:[%s24405_s28 + $0x2980] ss:$16 sps:$4 sm:$0xff]  }
 0x5b8   : > { %v23643_v36 = vld [vmem:[%s24405_s28 + $0x2aac] ss:$16 sps:$4 sm:$0xff]  }
 0x5b9   : > { %14105 = vmatmul.mubr.bf16.gmra.mrb[4].mxu0 %v18083_v50  ;;  %16817 = vmatmul.mubr.bf16.gmra.mrb[4].mxu1 %v18083_v50  ;;  %v23587_v50 = vld [vmem:[%s24405_s28 + $0x2988] ss:$16 sps:$4 sm:$0xff]  }
 0x5ba   : > { %14180 = vmatpush1.bf16.msra.mxu0 %v23524_v53  ;;  %16892 = vmatpush1.bf16.msra.mxu1 %v23527_v54  ;;  %v18372_v53 = vcombine.high %v750_v47, %v774_v48  ;;  %v23590_v54 = vld [vmem:[%s24405_s28 + $0x29a0] ss:$16 sps:$4 sm:$0xff]  }
 0x5bb   : > { %14181 = vmatprep.subr.bf16.mxu0 %v23532_v55  ;;  %16893 = vmatprep.subr.bf16.mxu1 %v23535_v56  ;;  %v23593_v55 = vld [vmem:[%s24405_s28 + $0x29a8] ss:$16 sps:$4 sm:$0xff]   ;;  %v23598_v56 = vld [vmem:[%s24405_s28 + $0x29c4] ss:$16 sps:$4 sm:$0xff]  }
 0x5bc   : > { %14114 = vmatprep.mubr.bf16.mxu0 %v18132_v57  ;;  %16826 = vmatprep.mubr.bf16.mxu1 %v18132_v57  ;;  %v23601_v57 = vld [vmem:[%s24405_s28 + $0x29cc] ss:$16 sps:$4 sm:$0xff]  }
 0x5be   : > { %14182 = vmatpush1.bf16.msra.mxu0 %v23530_v58  ;;  %16894 = vmatpush1.bf16.msra.mxu1 %v23533_v59  ;;  %v18371_v58 = vcombine.low %v750_v47, %v774_v48  ;;  %v415_v59 = vld [vmem:[%s24536_s30 + $0xa0] sm:$0xff]  ;;  %v23655_v48 = vld [vmem:[%s24405_s28 + $0x2aec] ss:$16 sps:$4 sm:$0xff]  }
 0x5bf   : > { %14183 = vmatprep.subr.bf16.mxu0 %v23538_v60  ;;  %16895 = vmatprep.subr.bf16.mxu1 %v23541_v61  ;;  %v439_v60 = vld [vmem:[%s24536_s30 + $0x160] sm:$0xff] }
 0x5c0   : > { %v23596_v61 = vld [vmem:[%s24405_s28 + $0x29c0] ss:$16 sps:$4 sm:$0xff]   ;;  %v23652_v47 = vld [vmem:[%s24405_s28 + $0x2ae4] ss:$16 sps:$4 sm:$0xff]  }
 0x5c1   : > { %14115 = vmatmul.mubr.bf16.gmra.mrb[8].mxu0 %v18131_v62  ;;  %16827 = vmatmul.mubr.bf16.gmra.mrb[8].mxu1 %v18131_v62  ;;  %v23599_v62 = vld [vmem:[%s24405_s28 + $0x29c8] ss:$16 sps:$4 sm:$0xff]  }
 0x5c2   : > { %14184 = vmatpush1.bf16.msra.mxu0 %v23536_v1  ;;  %16896 = vmatpush1.bf16.msra.mxu1 %v23539_v2  ;;  %v18038_v1 = vcombine.high %v415_v59, %v439_v60  ;;  %v23602_v2 = vld [vmem:[%s24405_s28 + $0x29e0] ss:$16 sps:$4 sm:$0xff]  }
 0x5c3   : > { %14185 = vmatprep.subr.bf16.mxu0 %v23544_v3  ;;  %16897 = vmatprep.subr.bf16.mxu1 %v23547_v4  ;;  %v23605_v3 = vld [vmem:[%s24405_s28 + $0x29e8] ss:$16 sps:$4 sm:$0xff]   ;;  %v23610_v4 = vld [vmem:[%s24405_s28 + $0x2a04] ss:$16 sps:$4 sm:$0xff]  }
 0x5c4   : > { %14124 = vmatprep.mubr.bf16.mxu0 %v18180_v5  ;;  %16836 = vmatprep.mubr.bf16.mxu1 %v18180_v5  ;;  %v23613_v5 = vld [vmem:[%s24405_s28 + $0x2a0c] ss:$16 sps:$4 sm:$0xff]  }
 0x5c6   : > { %14186 = vmatpush1.bf16.msra.mxu0 %v23542_v6  ;;  %16898 = vmatpush1.bf16.msra.mxu1 %v23545_v7  ;;  %v18037_v6 = vcombine.low %v415_v59, %v439_v60  ;;  %v463_v7 = vld [vmem:[%s24536_s30 + $0x220] sm:$0xff]  ;;  %v23667_v60 = vld [vmem:[%s24405_s28 + $0x2b2c] ss:$16 sps:$4 sm:$0xff]  }
 0x5c7   : > { %14187 = vmatprep.subr.bf16.mxu0 %v23550_v8  ;;  %16899 = vmatprep.subr.bf16.mxu1 %v23553_v9  ;;  %v487_v8 = vld [vmem:[%s24536_s30 + $0x2e0] sm:$0xff] }
 0x5c8   : > { %v23608_v9 = vld [vmem:[%s24405_s28 + $0x2a00] ss:$16 sps:$4 sm:$0xff]   ;;  %v23664_v59 = vld [vmem:[%s24405_s28 + $0x2b24] ss:$16 sps:$4 sm:$0xff]  }
 0x5c9   : > { %14125 = vmatmul.mubr.bf16.gmra.mrb[12].mxu0 %v18179_v10  ;;  %16837 = vmatmul.mubr.bf16.gmra.mrb[12].mxu1 %v18179_v10  ;;  %v23611_v10 = vld [vmem:[%s24405_s28 + $0x2a08] ss:$16 sps:$4 sm:$0xff]  }
 0x5ca   : > { %14188 = vmatpush1.bf16.msra.mxu0 %v23548_v13  ;;  %16900 = vmatpush1.bf16.msra.mxu1 %v23551_v14  ;;  %v18086_v13 = vcombine.high %v463_v7, %v487_v8  ;;  %v23614_v14 = vld [vmem:[%s24405_s28 + $0x2a20] ss:$16 sps:$4 sm:$0xff]  }
 0x5cb   : > { %14189 = vmatprep.subr.bf16.mxu0 %v23556_v15  ;;  %16901 = vmatprep.subr.bf16.mxu1 %v23559_v16  ;;  %v23617_v15 = vld [vmem:[%s24405_s28 + $0x2a28] ss:$16 sps:$4 sm:$0xff]   ;;  %v23622_v16 = vld [vmem:[%s24405_s28 + $0x2a44] ss:$16 sps:$4 sm:$0xff]  }
 0x5cc   : > { %14134 = vmatprep.mubr.bf16.mxu0 %v18228_v17  ;;  %16846 = vmatprep.mubr.bf16.mxu1 %v18228_v17  ;;  %v23625_v17 = vld [vmem:[%s24405_s28 + $0x2a4c] ss:$16 sps:$4 sm:$0xff]  }
 0x5ce   : > { %14190 = vmatpush1.bf16.msra.mxu0 %v23554_v18  ;;  %16902 = vmatpush1.bf16.msra.mxu1 %v23557_v19  ;;  %v18085_v18 = vcombine.low %v463_v7, %v487_v8  ;;  %v511_v19 = vld [vmem:[%s24536_s30 + $0x3a0] sm:$0xff]  ;;  %v23679_v8 = vld [vmem:[%s24405_s28 + $0x2b6c] ss:$16 sps:$4 sm:$0xff]  }
 0x5cf   : > { %14191 = vmatprep.subr.bf16.mxu0 %v23562_v20  ;;  %16903 = vmatprep.subr.bf16.mxu1 %v23565_v21  ;;  %v535_v20 = vld [vmem:[%s24536_s30 + $0x460] sm:$0xff] }
 0x5d0   : > { %v23620_v21 = vld [vmem:[%s24405_s28 + $0x2a40] ss:$16 sps:$4 sm:$0xff]   ;;  %v23676_v7 = vld [vmem:[%s24405_s28 + $0x2b64] ss:$16 sps:$4 sm:$0xff]  }
 0x5d1   : > { %14135 = vmatmul.mubr.bf16.gmra.mrb[16].mxu0 %v18227_v22  ;;  %16847 = vmatmul.mubr.bf16.gmra.mrb[16].mxu1 %v18227_v22  ;;  %v23623_v22 = vld [vmem:[%s24405_s28 + $0x2a48] ss:$16 sps:$4 sm:$0xff]  }
 0x5d2   : > { %14192 = vmatpush1.bf16.msra.mxu0 %v23560_v25  ;;  %16904 = vmatpush1.bf16.msra.mxu1 %v23563_v26  ;;  %v18134_v25 = vcombine.high %v511_v19, %v535_v20  ;;  %v23626_v26 = vld [vmem:[%s24405_s28 + $0x2a60] ss:$16 sps:$4 sm:$0xff]  }
 0x5d3   : > { %14193 = vmatprep.subr.bf16.mxu0 %v23568_v27  ;;  %16905 = vmatprep.subr.bf16.mxu1 %v23571_v28  ;;  %v23629_v27 = vld [vmem:[%s24405_s28 + $0x2a68] ss:$16 sps:$4 sm:$0xff]   ;;  %v23634_v28 = vld [vmem:[%s24405_s28 + $0x2a84] ss:$16 sps:$4 sm:$0xff]  }
 0x5d4   : > { %14144 = vmatprep.mubr.bf16.mxu0 %v18276_v29  ;;  %16856 = vmatprep.mubr.bf16.mxu1 %v18276_v29  ;;  %v23637_v29 = vld [vmem:[%s24405_s28 + $0x2a8c] ss:$16 sps:$4 sm:$0xff]  }
 0x5d6   : > { %14194 = vmatpush1.bf16.msra.mxu0 %v23566_v30  ;;  %16906 = vmatpush1.bf16.msra.mxu1 %v23569_v31  ;;  %v18133_v30 = vcombine.low %v511_v19, %v535_v20  ;;  %v559_v31 = vld [vmem:[%s24536_s30 + $0x520] sm:$0xff]  ;;  %v23691_v20 = vld [vmem:[%s24405_s28 + $0x2bac] ss:$16 sps:$4 sm:$0xff]  }
 0x5d7   : > { %14195 = vmatprep.subr.bf16.mxu0 %v23574_v32  ;;  %16907 = vmatprep.subr.bf16.mxu1 %v23577_v33  ;;  %v583_v32 = vld [vmem:[%s24536_s30 + $0x5e0] sm:$0xff] }
 0x5d8   : > { %v23632_v33 = vld [vmem:[%s24405_s28 + $0x2a80] ss:$16 sps:$4 sm:$0xff]   ;;  %v23688_v19 = vld [vmem:[%s24405_s28 + $0x2ba4] ss:$16 sps:$4 sm:$0xff]  }
 0x5d9   : > { %14145 = vmatmul.mubr.bf16.gmra.mrb[20].mxu0 %v18275_v34  ;;  %16857 = vmatmul.mubr.bf16.gmra.mrb[20].mxu1 %v18275_v34  ;;  %v23635_v34 = vld [vmem:[%s24405_s28 + $0x2a88] ss:$16 sps:$4 sm:$0xff]  }
 0x5da   : > { %14196 = vmatpush1.bf16.msra.mxu0 %v23572_v37  ;;  %16908 = vmatpush1.bf16.msra.mxu1 %v23575_v38  ;;  %v18182_v37 = vcombine.high %v559_v31, %v583_v32  ;;  %v23638_v38 = vld [vmem:[%s24405_s28 + $0x2aa0] ss:$16 sps:$4 sm:$0xff]  }
 0x5db   : > { %14197 = vmatprep.subr.bf16.mxu0 %v23580_v39  ;;  %16909 = vmatprep.subr.bf16.mxu1 %v23583_v40  ;;  %v23641_v39 = vld [vmem:[%s24405_s28 + $0x2aa8] ss:$16 sps:$4 sm:$0xff]   ;;  %v23646_v40 = vld [vmem:[%s24405_s28 + $0x2ac4] ss:$16 sps:$4 sm:$0xff]  }
 0x5dc   : > { %14154 = vmatprep.mubr.bf16.mxu0 %v18324_v41  ;;  %16866 = vmatprep.mubr.bf16.mxu1 %v18324_v41  ;;  %v23649_v41 = vld [vmem:[%s24405_s28 + $0x2acc] ss:$16 sps:$4 sm:$0xff]  }
 0x5de   : > { %14198 = vmatpush1.bf16.msra.mxu0 %v23578_v42  ;;  %16910 = vmatpush1.bf16.msra.mxu1 %v23581_v43  ;;  %v18181_v42 = vcombine.low %v559_v31, %v583_v32  ;;  %v607_v43 = vld [vmem:[%s24536_s30 + $0x6a0] sm:$0xff]  ;;  %v23703_v32 = vld [vmem:[%s24405_s28 + $0x2bec] ss:$16 sps:$4 sm:$0xff]  }
 0x5df   : > { %14199 = vmatprep.subr.bf16.mxu0 %v23586_v44  ;;  %16911 = vmatprep.subr.bf16.mxu1 %v23589_v45  ;;  %v631_v44 = vld [vmem:[%s24536_s30 + $0x760] sm:$0xff] }
 0x5e0   : > { %v23644_v45 = vld [vmem:[%s24405_s28 + $0x2ac0] ss:$16 sps:$4 sm:$0xff]   ;;  %v23700_v31 = vld [vmem:[%s24405_s28 + $0x2be4] ss:$16 sps:$4 sm:$0xff]  }
 0x5e1   : > { %14155 = vmatmul.mubr.bf16.gmra.mrb[24].mxu0 %v18323_v46  ;;  %16867 = vmatmul.mubr.bf16.gmra.mrb[24].mxu1 %v18323_v46  ;;  %v23647_v46 = vld [vmem:[%s24405_s28 + $0x2ac8] ss:$16 sps:$4 sm:$0xff]  }
 0x5e2   : > { %14200 = vmatpush1.bf16.msra.mxu0 %v23584_v49  ;;  %16912 = vmatpush1.bf16.msra.mxu1 %v23587_v50  ;;  %v18230_v49 = vcombine.high %v607_v43, %v631_v44  ;;  %v23650_v50 = vld [vmem:[%s24405_s28 + $0x2ae0] ss:$16 sps:$4 sm:$0xff]  }
 0x5e3   : > { %14201 = vmatprep.subr.bf16.mxu0 %v23592_v51  ;;  %16913 = vmatprep.subr.bf16.mxu1 %v23595_v52  ;;  %v23653_v51 = vld [vmem:[%s24405_s28 + $0x2ae8] ss:$16 sps:$4 sm:$0xff]   ;;  %v23658_v52 = vld [vmem:[%s24405_s28 + $0x2b04] ss:$16 sps:$4 sm:$0xff]  }
 0x5e4   : > { %14164 = vmatprep.mubr.bf16.mxu0 %v18372_v53  ;;  %16876 = vmatprep.mubr.bf16.mxu1 %v18372_v53  ;;  %v23661_v53 = vld [vmem:[%s24405_s28 + $0x2b0c] ss:$16 sps:$4 sm:$0xff]  }
 0x5e6   : > { %14202 = vmatpush1.bf16.msra.mxu0 %v23590_v54  ;;  %16914 = vmatpush1.bf16.msra.mxu1 %v23593_v55  ;;  %v18229_v54 = vcombine.low %v607_v43, %v631_v44  ;;  %v655_v55 = vld [vmem:[%s24536_s30 + $0x820] sm:$0xff]  ;;  %v23715_v44 = vld [vmem:[%s24405_s28 + $0x2c2c] ss:$16 sps:$4 sm:$0xff]  }
 0x5e7   : > { %14203 = vmatprep.subr.bf16.mxu0 %v23598_v56  ;;  %16915 = vmatprep.subr.bf16.mxu1 %v23601_v57  ;;  %v679_v56 = vld [vmem:[%s24536_s30 + $0x8e0] sm:$0xff] }
 0x5e8   : > { %v23656_v57 = vld [vmem:[%s24405_s28 + $0x2b00] ss:$16 sps:$4 sm:$0xff]   ;;  %v23712_v43 = vld [vmem:[%s24405_s28 + $0x2c24] ss:$16 sps:$4 sm:$0xff]  }
 0x5e9   : > { %14165 = vmatmul.mubr.bf16.gmra.mrb[28].mxu0 %v18371_v58  ;;  %16877 = vmatmul.mubr.bf16.gmra.mrb[28].mxu1 %v18371_v58  ;;  %v23659_v58 = vld [vmem:[%s24405_s28 + $0x2b08] ss:$16 sps:$4 sm:$0xff]  }
 0x5ea   : > { %14204 = vmatpush1.bf16.msra.mxu0 %v23596_v61  ;;  %16916 = vmatpush1.bf16.msra.mxu1 %v23599_v62  ;;  %v18278_v61 = vcombine.high %v655_v55, %v679_v56  ;;  %v23662_v62 = vld [vmem:[%s24405_s28 + $0x2b20] ss:$16 sps:$4 sm:$0xff]  }
 0x5eb   : > { %14205 = vmatprep.subr.bf16.mxu0 %v23604_v63  ;;  %16917 = vmatprep.subr.bf16.mxu1 %v23607_v0  ;;  %v23665_v63 = vld [vmem:[%s24405_s28 + $0x2b28] ss:$16 sps:$4 sm:$0xff]   ;;  %v23670_v0 = vld [vmem:[%s24405_s28 + $0x2b44] ss:$16 sps:$4 sm:$0xff]  }
 0x5ec   : > { %14207 = vmatprep.mubr.bf16.mxu0 %v18038_v1  ;;  %16919 = vmatprep.mubr.bf16.mxu1 %v18038_v1  ;;  %v23673_v1 = vld [vmem:[%s24405_s28 + $0x2b4c] ss:$16 sps:$4 sm:$0xff]  }
 0x5ee   : > { %14206 = vmatpush1.bf16.msra.mxu0 %v23602_v2  ;;  %16918 = vmatpush1.bf16.msra.mxu1 %v23605_v3  ;;  %v18277_v2 = vcombine.low %v655_v55, %v679_v56  ;;  %v703_v3 = vld [vmem:[%s24536_s30 + $0x9a0] sm:$0xff]  ;;  %v23727_v56 = vld [vmem:[%s24405_s28 + $0x2c6c] ss:$16 sps:$4 sm:$0xff]  }
 0x5ef   : > { %14288 = vmatprep.subr.bf16.mxu0 %v23610_v4  ;;  %17000 = vmatprep.subr.bf16.mxu1 %v23613_v5  ;;  %v727_v4 = vld [vmem:[%s24536_s30 + $0xa60] sm:$0xff] }
 0x5f0   : > { %v23668_v5 = vld [vmem:[%s24405_s28 + $0x2b40] ss:$16 sps:$4 sm:$0xff]   ;;  %v23724_v55 = vld [vmem:[%s24405_s28 + $0x2c64] ss:$16 sps:$4 sm:$0xff]  }
 0x5f1   : > { %14208 = vmatmul.mubr.bf16.vlgmr.msra.gmra.mrb[0].mxu0 %v18037_v6  ;;  %16920 = vmatmul.mubr.bf16.vlgmr.msra.gmra.mrb[0].mxu1 %v18037_v6  ;;  %v23671_v6 = vld [vmem:[%s24405_s28 + $0x2b48] ss:$16 sps:$4 sm:$0xff]  }
 0x5f2   : > { %14289 = vmatpush1.bf16.msra.mxu0 %v23608_v9  ;;  %17001 = vmatpush1.bf16.msra.mxu1 %v23611_v10  ;;  %v18326_v9 = vcombine.high %v703_v3, %v727_v4  ;;  %v23674_v10 = vld [vmem:[%s24405_s28 + $0x2b60] ss:$16 sps:$4 sm:$0xff]  }
 0x5f3   : > { %14290 = vmatprep.subr.bf16.mxu0 %v23616_v11  ;;  %17002 = vmatprep.subr.bf16.mxu1 %v23619_v12  ;;  %v23677_v11 = vld [vmem:[%s24405_s28 + $0x2b68] ss:$16 sps:$4 sm:$0xff]   ;;  %v23682_v12 = vld [vmem:[%s24405_s28 + $0x2b84] ss:$16 sps:$4 sm:$0xff]  }
 0x5f4   : > { %14217 = vmatprep.mubr.bf16.mxu0 %v18086_v13  ;;  %16929 = vmatprep.mubr.bf16.mxu1 %v18086_v13  ;;  %v23685_v13 = vld [vmem:[%s24405_s28 + $0x2b8c] ss:$16 sps:$4 sm:$0xff]  }
 0x5f6   : > { %14291 = vmatpush1.bf16.msra.mxu0 %v23614_v14  ;;  %17003 = vmatpush1.bf16.msra.mxu1 %v23617_v15  ;;  %v18325_v14 = vcombine.low %v703_v3, %v727_v4  ;;  %v751_v15 = vld [vmem:[%s24536_s30 + $0xb20] sm:$0xff]  ;;  %v23739_v4 = vld [vmem:[%s24405_s28 + $0x2cac] ss:$16 sps:$4 sm:$0xff]  }
 0x5f7   : > { %14292 = vmatprep.subr.bf16.mxu0 %v23622_v16  ;;  %17004 = vmatprep.subr.bf16.mxu1 %v23625_v17  ;;  %v775_v16 = vld [vmem:[%s24536_s30 + $0xbe0] sm:$0xff] }
 0x5f8   : > { %v23680_v17 = vld [vmem:[%s24405_s28 + $0x2b80] ss:$16 sps:$4 sm:$0xff]   ;;  %v23736_v3 = vld [vmem:[%s24405_s28 + $0x2ca4] ss:$16 sps:$4 sm:$0xff]  }
 0x5f9   : > { %14218 = vmatmul.mubr.bf16.gmra.mrb[4].mxu0 %v18085_v18  ;;  %16930 = vmatmul.mubr.bf16.gmra.mrb[4].mxu1 %v18085_v18  ;;  %v23683_v18 = vld [vmem:[%s24405_s28 + $0x2b88] ss:$16 sps:$4 sm:$0xff]  }
 0x5fa   : > { %14293 = vmatpush1.bf16.msra.mxu0 %v23620_v21  ;;  %17005 = vmatpush1.bf16.msra.mxu1 %v23623_v22  ;;  %v18374_v21 = vcombine.high %v751_v15, %v775_v16  ;;  %v23686_v22 = vld [vmem:[%s24405_s28 + $0x2ba0] ss:$16 sps:$4 sm:$0xff]  }
 0x5fb   : > { %14294 = vmatprep.subr.bf16.mxu0 %v23628_v23  ;;  %17006 = vmatprep.subr.bf16.mxu1 %v23631_v24  ;;  %v23689_v23 = vld [vmem:[%s24405_s28 + $0x2ba8] ss:$16 sps:$4 sm:$0xff]   ;;  %v23694_v24 = vld [vmem:[%s24405_s28 + $0x2bc4] ss:$16 sps:$4 sm:$0xff]  }
 0x5fc   : > { %14227 = vmatprep.mubr.bf16.mxu0 %v18134_v25  ;;  %16939 = vmatprep.mubr.bf16.mxu1 %v18134_v25  ;;  %v23697_v25 = vld [vmem:[%s24405_s28 + $0x2bcc] ss:$16 sps:$4 sm:$0xff]  }
 0x5fe   : > { %14295 = vmatpush1.bf16.msra.mxu0 %v23626_v26  ;;  %17007 = vmatpush1.bf16.msra.mxu1 %v23629_v27  ;;  %v18373_v26 = vcombine.low %v751_v15, %v775_v16  ;;  %v416_v27 = vld [vmem:[%s24536_s30 + $0xa8] sm:$0xff]  ;;  %v23748_v15 = vld [vmem:[%s24405_s28 + $0x2ce4] ss:$16 sps:$4 sm:$0xff]  }
 0x5ff   : > { %14296 = vmatprep.subr.bf16.mxu0 %v23634_v28  ;;  %17008 = vmatprep.subr.bf16.mxu1 %v23637_v29  ;;  %v440_v28 = vld [vmem:[%s24536_s30 + $0x168] sm:$0xff]  ;;  %v23692_v29 = vld [vmem:[%s24405_s28 + $0x2bc0] ss:$16 sps:$4 sm:$0xff]  }
 0x600   : > { %v23751_v16 = vld [vmem:[%s24405_s28 + $0x2cec] ss:$16 sps:$4 sm:$0xff]  }
 0x601   : > { %14228 = vmatmul.mubr.bf16.gmra.mrb[8].mxu0 %v18133_v30  ;;  %16940 = vmatmul.mubr.bf16.gmra.mrb[8].mxu1 %v18133_v30  ;;  %v23695_v30 = vld [vmem:[%s24405_s28 + $0x2bc8] ss:$16 sps:$4 sm:$0xff]  }
 0x602   : > { %14297 = vmatpush1.bf16.msra.mxu0 %v23632_v33  ;;  %17009 = vmatpush1.bf16.msra.mxu1 %v23635_v34  ;;  %v18040_v33 = vcombine.high %v416_v27, %v440_v28  ;;  %v23698_v34 = vld [vmem:[%s24405_s28 + $0x2be0] ss:$16 sps:$4 sm:$0xff]  }
 0x603   : > { %14298 = vmatprep.subr.bf16.mxu0 %v23640_v35  ;;  %17010 = vmatprep.subr.bf16.mxu1 %v23643_v36  ;;  %v23701_v35 = vld [vmem:[%s24405_s28 + $0x2be8] ss:$16 sps:$4 sm:$0xff]   ;;  %v23706_v36 = vld [vmem:[%s24405_s28 + $0x2c04] ss:$16 sps:$4 sm:$0xff]  }
 0x604   : > { %14237 = vmatprep.mubr.bf16.mxu0 %v18182_v37  ;;  %16949 = vmatprep.mubr.bf16.mxu1 %v18182_v37  ;;  %v23709_v37 = vld [vmem:[%s24405_s28 + $0x2c0c] ss:$16 sps:$4 sm:$0xff]  }
 0x606   : > { %14299 = vmatpush1.bf16.msra.mxu0 %v23638_v38  ;;  %17011 = vmatpush1.bf16.msra.mxu1 %v23641_v39  ;;  %v18039_v38 = vcombine.low %v416_v27, %v440_v28  ;;  %v464_v39 = vld [vmem:[%s24536_s30 + $0x228] sm:$0xff]  ;;  %v23760_v27 = vld [vmem:[%s24405_s28 + $0x2d24] ss:$16 sps:$4 sm:$0xff]  }
 0x607   : > { %14300 = vmatprep.subr.bf16.mxu0 %v23646_v40  ;;  %17012 = vmatprep.subr.bf16.mxu1 %v23649_v41  ;;  %v488_v40 = vld [vmem:[%s24536_s30 + $0x2e8] sm:$0xff]  ;;  %v23704_v41 = vld [vmem:[%s24405_s28 + $0x2c00] ss:$16 sps:$4 sm:$0xff]  }
 0x608   : > { %v23763_v28 = vld [vmem:[%s24405_s28 + $0x2d2c] ss:$16 sps:$4 sm:$0xff]  }
 0x609   : > { %14238 = vmatmul.mubr.bf16.gmra.mrb[12].mxu0 %v18181_v42  ;;  %16950 = vmatmul.mubr.bf16.gmra.mrb[12].mxu1 %v18181_v42  ;;  %v23707_v42 = vld [vmem:[%s24405_s28 + $0x2c08] ss:$16 sps:$4 sm:$0xff]  }
 0x60a   : > { %14301 = vmatpush1.bf16.msra.mxu0 %v23644_v45  ;;  %17013 = vmatpush1.bf16.msra.mxu1 %v23647_v46  ;;  %v18088_v45 = vcombine.high %v464_v39, %v488_v40  ;;  %v23710_v46 = vld [vmem:[%s24405_s28 + $0x2c20] ss:$16 sps:$4 sm:$0xff]  }
 0x60b   : > { %14302 = vmatprep.subr.bf16.mxu0 %v23652_v47  ;;  %17014 = vmatprep.subr.bf16.mxu1 %v23655_v48  ;;  %v23713_v47 = vld [vmem:[%s24405_s28 + $0x2c28] ss:$16 sps:$4 sm:$0xff]   ;;  %v23718_v48 = vld [vmem:[%s24405_s28 + $0x2c44] ss:$16 sps:$4 sm:$0xff]  }
 0x60c   : > { %14247 = vmatprep.mubr.bf16.mxu0 %v18230_v49  ;;  %16959 = vmatprep.mubr.bf16.mxu1 %v18230_v49  ;;  %v23721_v49 = vld [vmem:[%s24405_s28 + $0x2c4c] ss:$16 sps:$4 sm:$0xff]  }
 0x60e   : > { %14303 = vmatpush1.bf16.msra.mxu0 %v23650_v50  ;;  %17015 = vmatpush1.bf16.msra.mxu1 %v23653_v51  ;;  %v18087_v50 = vcombine.low %v464_v39, %v488_v40  ;;  %v512_v51 = vld [vmem:[%s24536_s30 + $0x3a8] sm:$0xff]  ;;  %v23772_v39 = vld [vmem:[%s24405_s28 + $0x2d64] ss:$16 sps:$4 sm:$0xff]  }
 0x60f   : > { %14304 = vmatprep.subr.bf16.mxu0 %v23658_v52  ;;  %17016 = vmatprep.subr.bf16.mxu1 %v23661_v53  ;;  %v536_v52 = vld [vmem:[%s24536_s30 + $0x468] sm:$0xff]  ;;  %v23716_v53 = vld [vmem:[%s24405_s28 + $0x2c40] ss:$16 sps:$4 sm:$0xff]  }
 0x610   : > { %v23775_v40 = vld [vmem:[%s24405_s28 + $0x2d6c] ss:$16 sps:$4 sm:$0xff]  }
 0x611   : > { %14248 = vmatmul.mubr.bf16.gmra.mrb[16].mxu0 %v18229_v54  ;;  %16960 = vmatmul.mubr.bf16.gmra.mrb[16].mxu1 %v18229_v54  ;;  %v23719_v54 = vld [vmem:[%s24405_s28 + $0x2c48] ss:$16 sps:$4 sm:$0xff]  }
 0x612   : > { %14305 = vmatpush1.bf16.msra.mxu0 %v23656_v57  ;;  %17017 = vmatpush1.bf16.msra.mxu1 %v23659_v58  ;;  %v18136_v57 = vcombine.high %v512_v51, %v536_v52  ;;  %v23722_v58 = vld [vmem:[%s24405_s28 + $0x2c60] ss:$16 sps:$4 sm:$0xff]  }
 0x613   : > { %14306 = vmatprep.subr.bf16.mxu0 %v23664_v59  ;;  %17018 = vmatprep.subr.bf16.mxu1 %v23667_v60  ;;  %v23725_v59 = vld [vmem:[%s24405_s28 + $0x2c68] ss:$16 sps:$4 sm:$0xff]   ;;  %v23730_v60 = vld [vmem:[%s24405_s28 + $0x2c84] ss:$16 sps:$4 sm:$0xff]  }
 0x614   : > { %14257 = vmatprep.mubr.bf16.mxu0 %v18278_v61  ;;  %16969 = vmatprep.mubr.bf16.mxu1 %v18278_v61  ;;  %v23733_v61 = vld [vmem:[%s24405_s28 + $0x2c8c] ss:$16 sps:$4 sm:$0xff]  }
 0x616   : > { %14307 = vmatpush1.bf16.msra.mxu0 %v23662_v62  ;;  %17019 = vmatpush1.bf16.msra.mxu1 %v23665_v63  ;;  %v18135_v62 = vcombine.low %v512_v51, %v536_v52  ;;  %v560_v63 = vld [vmem:[%s24536_s30 + $0x528] sm:$0xff]  ;;  %v23784_v51 = vld [vmem:[%s24405_s28 + $0x2da4] ss:$16 sps:$4 sm:$0xff]  }
 0x617   : > { %14308 = vmatprep.subr.bf16.mxu0 %v23670_v0  ;;  %17020 = vmatprep.subr.bf16.mxu1 %v23673_v1  ;;  %v584_v0 = vld [vmem:[%s24536_s30 + $0x5e8] sm:$0xff]  ;;  %v23728_v1 = vld [vmem:[%s24405_s28 + $0x2c80] ss:$16 sps:$4 sm:$0xff]  }
 0x618   : > { %v23787_v52 = vld [vmem:[%s24405_s28 + $0x2dac] ss:$16 sps:$4 sm:$0xff]  }
 0x619   : > { %14258 = vmatmul.mubr.bf16.gmra.mrb[20].mxu0 %v18277_v2  ;;  %16970 = vmatmul.mubr.bf16.gmra.mrb[20].mxu1 %v18277_v2  ;;  %v23731_v2 = vld [vmem:[%s24405_s28 + $0x2c88] ss:$16 sps:$4 sm:$0xff]  }
 0x61a   : > { %14309 = vmatpush1.bf16.msra.mxu0 %v23668_v5  ;;  %17021 = vmatpush1.bf16.msra.mxu1 %v23671_v6  ;;  %v18184_v5 = vcombine.high %v560_v63, %v584_v0  ;;  %v23734_v6 = vld [vmem:[%s24405_s28 + $0x2ca0] ss:$16 sps:$4 sm:$0xff]  }
 0x61b   : > { %14310 = vmatprep.subr.bf16.mxu0 %v23676_v7  ;;  %17022 = vmatprep.subr.bf16.mxu1 %v23679_v8  ;;  %v23737_v7 = vld [vmem:[%s24405_s28 + $0x2ca8] ss:$16 sps:$4 sm:$0xff]   ;;  %v23742_v8 = vld [vmem:[%s24405_s28 + $0x2cc4] ss:$16 sps:$4 sm:$0xff]  }
 0x61c   : > { %14267 = vmatprep.mubr.bf16.mxu0 %v18326_v9  ;;  %16979 = vmatprep.mubr.bf16.mxu1 %v18326_v9  ;;  %v23745_v9 = vld [vmem:[%s24405_s28 + $0x2ccc] ss:$16 sps:$4 sm:$0xff]  }
 0x61e   : > { %14311 = vmatpush1.bf16.msra.mxu0 %v23674_v10  ;;  %17023 = vmatpush1.bf16.msra.mxu1 %v23677_v11  ;;  %v18183_v10 = vcombine.low %v560_v63, %v584_v0  ;;  %v608_v11 = vld [vmem:[%s24536_s30 + $0x6a8] sm:$0xff]  ;;  %v23796_v63 = vld [vmem:[%s24405_s28 + $0x2de4] ss:$16 sps:$4 sm:$0xff]  }
 0x61f   : > { %14312 = vmatprep.subr.bf16.mxu0 %v23682_v12  ;;  %17024 = vmatprep.subr.bf16.mxu1 %v23685_v13  ;;  %v632_v12 = vld [vmem:[%s24536_s30 + $0x768] sm:$0xff]  ;;  %v23740_v13 = vld [vmem:[%s24405_s28 + $0x2cc0] ss:$16 sps:$4 sm:$0xff]  }
 0x620   : > { %v23799_v0 = vld [vmem:[%s24405_s28 + $0x2dec] ss:$16 sps:$4 sm:$0xff]  }
 0x621   : > { %14268 = vmatmul.mubr.bf16.gmra.mrb[24].mxu0 %v18325_v14  ;;  %16980 = vmatmul.mubr.bf16.gmra.mrb[24].mxu1 %v18325_v14  ;;  %v23743_v14 = vld [vmem:[%s24405_s28 + $0x2cc8] ss:$16 sps:$4 sm:$0xff]  }
 0x622   : > { %14313 = vmatpush1.bf16.msra.mxu0 %v23680_v17  ;;  %17025 = vmatpush1.bf16.msra.mxu1 %v23683_v18  ;;  %v18232_v17 = vcombine.high %v608_v11, %v632_v12  ;;  %v23746_v18 = vld [vmem:[%s24405_s28 + $0x2ce0] ss:$16 sps:$4 sm:$0xff]  }
 0x623   : > { %14314 = vmatprep.subr.bf16.mxu0 %v23688_v19  ;;  %17026 = vmatprep.subr.bf16.mxu1 %v23691_v20  ;;  %v23749_v19 = vld [vmem:[%s24405_s28 + $0x2ce8] ss:$16 sps:$4 sm:$0xff]   ;;  %v23754_v20 = vld [vmem:[%s24405_s28 + $0x2d04] ss:$16 sps:$4 sm:$0xff]  }
 0x624   : > { %14277 = vmatprep.mubr.bf16.mxu0 %v18374_v21  ;;  %16989 = vmatprep.mubr.bf16.mxu1 %v18374_v21  ;;  %v23757_v21 = vld [vmem:[%s24405_s28 + $0x2d0c] ss:$16 sps:$4 sm:$0xff]  }
 0x626   : > { %14315 = vmatpush1.bf16.msra.mxu0 %v23686_v22  ;;  %17027 = vmatpush1.bf16.msra.mxu1 %v23689_v23  ;;  %v18231_v22 = vcombine.low %v608_v11, %v632_v12  ;;  %v656_v23 = vld [vmem:[%s24536_s30 + $0x828] sm:$0xff]  ;;  %v23808_v11 = vld [vmem:[%s24405_s28 + $0x2e24] ss:$16 sps:$4 sm:$0xff]  }
 0x627   : > { %14316 = vmatprep.subr.bf16.mxu0 %v23694_v24  ;;  %17028 = vmatprep.subr.bf16.mxu1 %v23697_v25  ;;  %v680_v24 = vld [vmem:[%s24536_s30 + $0x8e8] sm:$0xff]  ;;  %v23752_v25 = vld [vmem:[%s24405_s28 + $0x2d00] ss:$16 sps:$4 sm:$0xff]  }
 0x628   : > { %v23811_v12 = vld [vmem:[%s24405_s28 + $0x2e2c] ss:$16 sps:$4 sm:$0xff]  }
 0x629   : > { %14278 = vmatmul.mubr.bf16.gmra.mrb[28].mxu0 %v18373_v26  ;;  %16990 = vmatmul.mubr.bf16.gmra.mrb[28].mxu1 %v18373_v26  ;;  %v23755_v26 = vld [vmem:[%s24405_s28 + $0x2d08] ss:$16 sps:$4 sm:$0xff]  }
 0x62a   : > { %14317 = vmatpush1.bf16.msra.mxu0 %v23692_v29  ;;  %17029 = vmatpush1.bf16.msra.mxu1 %v23695_v30  ;;  %v18280_v29 = vcombine.high %v656_v23, %v680_v24  ;;  %v23758_v30 = vld [vmem:[%s24405_s28 + $0x2d20] ss:$16 sps:$4 sm:$0xff]  }
 0x62b   : > { %14318 = vmatprep.subr.bf16.mxu0 %v23700_v31  ;;  %17030 = vmatprep.subr.bf16.mxu1 %v23703_v32  ;;  %v23761_v31 = vld [vmem:[%s24405_s28 + $0x2d28] ss:$16 sps:$4 sm:$0xff]   ;;  %v23766_v32 = vld [vmem:[%s24405_s28 + $0x2d44] ss:$16 sps:$4 sm:$0xff]  }
 0x62c   : > { %14320 = vmatprep.mubr.bf16.mxu0 %v18040_v33  ;;  %17032 = vmatprep.mubr.bf16.mxu1 %v18040_v33  ;;  %v23769_v33 = vld [vmem:[%s24405_s28 + $0x2d4c] ss:$16 sps:$4 sm:$0xff]  }
 0x62e   : > { %14319 = vmatpush1.bf16.msra.mxu0 %v23698_v34  ;;  %17031 = vmatpush1.bf16.msra.mxu1 %v23701_v35  ;;  %v18279_v34 = vcombine.low %v656_v23, %v680_v24  ;;  %v704_v35 = vld [vmem:[%s24536_s30 + $0x9a8] sm:$0xff]  ;;  %v23820_v23 = vld [vmem:[%s24405_s28 + $0x2e64] ss:$16 sps:$4 sm:$0xff]  }
 0x62f   : > { %14401 = vmatprep.subr.bf16.mxu0 %v23706_v36  ;;  %17113 = vmatprep.subr.bf16.mxu1 %v23709_v37  ;;  %v728_v36 = vld [vmem:[%s24536_s30 + $0xa68] sm:$0xff]  ;;  %v23764_v37 = vld [vmem:[%s24405_s28 + $0x2d40] ss:$16 sps:$4 sm:$0xff]  }
 0x630   : > { %v23823_v24 = vld [vmem:[%s24405_s28 + $0x2e6c] ss:$16 sps:$4 sm:$0xff]  }
 0x631   : > { %14321 = vmatmul.mubr.bf16.vlgmr.msra.gmra.mrb[0].mxu0 %v18039_v38  ;;  %17033 = vmatmul.mubr.bf16.vlgmr.msra.gmra.mrb[0].mxu1 %v18039_v38  ;;  %v23767_v38 = vld [vmem:[%s24405_s28 + $0x2d48] ss:$16 sps:$4 sm:$0xff]  }
 0x632   : > { %14402 = vmatpush1.bf16.msra.mxu0 %v23704_v41  ;;  %17114 = vmatpush1.bf16.msra.mxu1 %v23707_v42  ;;  %v18328_v41 = vcombine.high %v704_v35, %v728_v36  ;;  %v23770_v42 = vld [vmem:[%s24405_s28 + $0x2d60] ss:$16 sps:$4 sm:$0xff]  }
 0x633   : > { %14403 = vmatprep.subr.bf16.mxu0 %v23712_v43  ;;  %17115 = vmatprep.subr.bf16.mxu1 %v23715_v44  ;;  %v23773_v43 = vld [vmem:[%s24405_s28 + $0x2d68] ss:$16 sps:$4 sm:$0xff]   ;;  %v23778_v44 = vld [vmem:[%s24405_s28 + $0x2d84] ss:$16 sps:$4 sm:$0xff]  }
 0x634   : > { %14330 = vmatprep.mubr.bf16.mxu0 %v18088_v45  ;;  %17042 = vmatprep.mubr.bf16.mxu1 %v18088_v45  ;;  %v23781_v45 = vld [vmem:[%s24405_s28 + $0x2d8c] ss:$16 sps:$4 sm:$0xff]  }
 0x636   : > { %14404 = vmatpush1.bf16.msra.mxu0 %v23710_v46  ;;  %17116 = vmatpush1.bf16.msra.mxu1 %v23713_v47  ;;  %v18327_v46 = vcombine.low %v704_v35, %v728_v36  ;;  %v752_v47 = vld [vmem:[%s24536_s30 + $0xb28] sm:$0xff]  ;;  %v23832_v35 = vld [vmem:[%s24405_s28 + $0x2ea4] ss:$16 sps:$4 sm:$0xff]  }
 0x637   : > { %14405 = vmatprep.subr.bf16.mxu0 %v23718_v48  ;;  %17117 = vmatprep.subr.bf16.mxu1 %v23721_v49  ;;  %v776_v48 = vld [vmem:[%s24536_s30 + $0xbe8] sm:$0xff]  ;;  %v23776_v49 = vld [vmem:[%s24405_s28 + $0x2d80] ss:$16 sps:$4 sm:$0xff]  }
 0x638   : > { %v23835_v36 = vld [vmem:[%s24405_s28 + $0x2eac] ss:$16 sps:$4 sm:$0xff]  }
 0x639   : > { %14331 = vmatmul.mubr.bf16.gmra.mrb[4].mxu0 %v18087_v50  ;;  %17043 = vmatmul.mubr.bf16.gmra.mrb[4].mxu1 %v18087_v50  ;;  %v23779_v50 = vld [vmem:[%s24405_s28 + $0x2d88] ss:$16 sps:$4 sm:$0xff]  }
 0x63a   : > { %14406 = vmatpush1.bf16.msra.mxu0 %v23716_v53  ;;  %17118 = vmatpush1.bf16.msra.mxu1 %v23719_v54  ;;  %v18376_v53 = vcombine.high %v752_v47, %v776_v48  ;;  %v23782_v54 = vld [vmem:[%s24405_s28 + $0x2da0] ss:$16 sps:$4 sm:$0xff]  }
 0x63b   : > { %14407 = vmatprep.subr.bf16.mxu0 %v23724_v55  ;;  %17119 = vmatprep.subr.bf16.mxu1 %v23727_v56  ;;  %v23785_v55 = vld [vmem:[%s24405_s28 + $0x2da8] ss:$16 sps:$4 sm:$0xff]   ;;  %v23790_v56 = vld [vmem:[%s24405_s28 + $0x2dc4] ss:$16 sps:$4 sm:$0xff]  }
 0x63c   : > { %14340 = vmatprep.mubr.bf16.mxu0 %v18136_v57  ;;  %17052 = vmatprep.mubr.bf16.mxu1 %v18136_v57  ;;  %v23793_v57 = vld [vmem:[%s24405_s28 + $0x2dcc] ss:$16 sps:$4 sm:$0xff]  }
 0x63e   : > { %14408 = vmatpush1.bf16.msra.mxu0 %v23722_v58  ;;  %17120 = vmatpush1.bf16.msra.mxu1 %v23725_v59  ;;  %v18375_v58 = vcombine.low %v752_v47, %v776_v48  ;;  %v417_v59 = vld [vmem:[%s24536_s30 + $0xb0] sm:$0xff]  ;;  %v23847_v48 = vld [vmem:[%s24405_s28 + $0x2eec] ss:$16 sps:$4 sm:$0xff]  }
 0x63f   : > { %14409 = vmatprep.subr.bf16.mxu0 %v23730_v60  ;;  %17121 = vmatprep.subr.bf16.mxu1 %v23733_v61  ;;  %v441_v60 = vld [vmem:[%s24536_s30 + $0x170] sm:$0xff] }
 0x640   : > { %v23788_v61 = vld [vmem:[%s24405_s28 + $0x2dc0] ss:$16 sps:$4 sm:$0xff]   ;;  %v23844_v47 = vld [vmem:[%s24405_s28 + $0x2ee4] ss:$16 sps:$4 sm:$0xff]  }
 0x641   : > { %14341 = vmatmul.mubr.bf16.gmra.mrb[8].mxu0 %v18135_v62  ;;  %17053 = vmatmul.mubr.bf16.gmra.mrb[8].mxu1 %v18135_v62  ;;  %v23791_v62 = vld [vmem:[%s24405_s28 + $0x2dc8] ss:$16 sps:$4 sm:$0xff]  }
 0x642   : > { %14410 = vmatpush1.bf16.msra.mxu0 %v23728_v1  ;;  %17122 = vmatpush1.bf16.msra.mxu1 %v23731_v2  ;;  %v18042_v1 = vcombine.high %v417_v59, %v441_v60  ;;  %v23794_v2 = vld [vmem:[%s24405_s28 + $0x2de0] ss:$16 sps:$4 sm:$0xff]  }
 0x643   : > { %14411 = vmatprep.subr.bf16.mxu0 %v23736_v3  ;;  %17123 = vmatprep.subr.bf16.mxu1 %v23739_v4  ;;  %v23797_v3 = vld [vmem:[%s24405_s28 + $0x2de8] ss:$16 sps:$4 sm:$0xff]   ;;  %v23802_v4 = vld [vmem:[%s24405_s28 + $0x2e04] ss:$16 sps:$4 sm:$0xff]  }
 0x644   : > { %14350 = vmatprep.mubr.bf16.mxu0 %v18184_v5  ;;  %17062 = vmatprep.mubr.bf16.mxu1 %v18184_v5  ;;  %v23805_v5 = vld [vmem:[%s24405_s28 + $0x2e0c] ss:$16 sps:$4 sm:$0xff]  }
 0x646   : > { %14412 = vmatpush1.bf16.msra.mxu0 %v23734_v6  ;;  %17124 = vmatpush1.bf16.msra.mxu1 %v23737_v7  ;;  %v18041_v6 = vcombine.low %v417_v59, %v441_v60  ;;  %v465_v7 = vld [vmem:[%s24536_s30 + $0x230] sm:$0xff]  ;;  %v23859_v60 = vld [vmem:[%s24405_s28 + $0x2f2c] ss:$16 sps:$4 sm:$0xff]  }
 0x647   : > { %14413 = vmatprep.subr.bf16.mxu0 %v23742_v8  ;;  %17125 = vmatprep.subr.bf16.mxu1 %v23745_v9  ;;  %v489_v8 = vld [vmem:[%s24536_s30 + $0x2f0] sm:$0xff] }
 0x648   : > { %v23800_v9 = vld [vmem:[%s24405_s28 + $0x2e00] ss:$16 sps:$4 sm:$0xff]   ;;  %v23856_v59 = vld [vmem:[%s24405_s28 + $0x2f24] ss:$16 sps:$4 sm:$0xff]  }
 0x649   : > { %14351 = vmatmul.mubr.bf16.gmra.mrb[12].mxu0 %v18183_v10  ;;  %17063 = vmatmul.mubr.bf16.gmra.mrb[12].mxu1 %v18183_v10  ;;  %v23803_v10 = vld [vmem:[%s24405_s28 + $0x2e08] ss:$16 sps:$4 sm:$0xff]  }
 0x64a   : > { %14414 = vmatpush1.bf16.msra.mxu0 %v23740_v13  ;;  %17126 = vmatpush1.bf16.msra.mxu1 %v23743_v14  ;;  %v18090_v13 = vcombine.high %v465_v7, %v489_v8  ;;  %v23806_v14 = vld [vmem:[%s24405_s28 + $0x2e20] ss:$16 sps:$4 sm:$0xff]  }
 0x64b   : > { %14415 = vmatprep.subr.bf16.mxu0 %v23748_v15  ;;  %17127 = vmatprep.subr.bf16.mxu1 %v23751_v16  ;;  %v23809_v15 = vld [vmem:[%s24405_s28 + $0x2e28] ss:$16 sps:$4 sm:$0xff]   ;;  %v23814_v16 = vld [vmem:[%s24405_s28 + $0x2e44] ss:$16 sps:$4 sm:$0xff]  }
 0x64c   : > { %14360 = vmatprep.mubr.bf16.mxu0 %v18232_v17  ;;  %17072 = vmatprep.mubr.bf16.mxu1 %v18232_v17  ;;  %v23817_v17 = vld [vmem:[%s24405_s28 + $0x2e4c] ss:$16 sps:$4 sm:$0xff]  }
 0x64e   : > { %14416 = vmatpush1.bf16.msra.mxu0 %v23746_v18  ;;  %17128 = vmatpush1.bf16.msra.mxu1 %v23749_v19  ;;  %v18089_v18 = vcombine.low %v465_v7, %v489_v8  ;;  %v513_v19 = vld [vmem:[%s24536_s30 + $0x3b0] sm:$0xff]  ;;  %v23871_v8 = vld [vmem:[%s24405_s28 + $0x2f6c] ss:$16 sps:$4 sm:$0xff]  }
 0x64f   : > { %14417 = vmatprep.subr.bf16.mxu0 %v23754_v20  ;;  %17129 = vmatprep.subr.bf16.mxu1 %v23757_v21  ;;  %v537_v20 = vld [vmem:[%s24536_s30 + $0x470] sm:$0xff] }
 0x650   : > { %v23812_v21 = vld [vmem:[%s24405_s28 + $0x2e40] ss:$16 sps:$4 sm:$0xff]   ;;  %v23868_v7 = vld [vmem:[%s24405_s28 + $0x2f64] ss:$16 sps:$4 sm:$0xff]  }
 0x651   : > { %14361 = vmatmul.mubr.bf16.gmra.mrb[16].mxu0 %v18231_v22  ;;  %17073 = vmatmul.mubr.bf16.gmra.mrb[16].mxu1 %v18231_v22  ;;  %v23815_v22 = vld [vmem:[%s24405_s28 + $0x2e48] ss:$16 sps:$4 sm:$0xff]  }
 0x652   : > { %14418 = vmatpush1.bf16.msra.mxu0 %v23752_v25  ;;  %17130 = vmatpush1.bf16.msra.mxu1 %v23755_v26  ;;  %v18138_v25 = vcombine.high %v513_v19, %v537_v20  ;;  %v23818_v26 = vld [vmem:[%s24405_s28 + $0x2e60] ss:$16 sps:$4 sm:$0xff]  }
 0x653   : > { %14419 = vmatprep.subr.bf16.mxu0 %v23760_v27  ;;  %17131 = vmatprep.subr.bf16.mxu1 %v23763_v28  ;;  %v23821_v27 = vld [vmem:[%s24405_s28 + $0x2e68] ss:$16 sps:$4 sm:$0xff]   ;;  %v23826_v28 = vld [vmem:[%s24405_s28 + $0x2e84] ss:$16 sps:$4 sm:$0xff]  }
 0x654   : > { %14370 = vmatprep.mubr.bf16.mxu0 %v18280_v29  ;;  %17082 = vmatprep.mubr.bf16.mxu1 %v18280_v29  ;;  %v23829_v29 = vld [vmem:[%s24405_s28 + $0x2e8c] ss:$16 sps:$4 sm:$0xff]  }
 0x656   : > { %14420 = vmatpush1.bf16.msra.mxu0 %v23758_v30  ;;  %17132 = vmatpush1.bf16.msra.mxu1 %v23761_v31  ;;  %v18137_v30 = vcombine.low %v513_v19, %v537_v20  ;;  %v561_v31 = vld [vmem:[%s24536_s30 + $0x530] sm:$0xff]  ;;  %v23883_v20 = vld [vmem:[%s24405_s28 + $0x2fac] ss:$16 sps:$4 sm:$0xff]  }
 0x657   : > { %14421 = vmatprep.subr.bf16.mxu0 %v23766_v32  ;;  %17133 = vmatprep.subr.bf16.mxu1 %v23769_v33  ;;  %v585_v32 = vld [vmem:[%s24536_s30 + $0x5f0] sm:$0xff] }
 0x658   : > { %v23824_v33 = vld [vmem:[%s24405_s28 + $0x2e80] ss:$16 sps:$4 sm:$0xff]   ;;  %v23880_v19 = vld [vmem:[%s24405_s28 + $0x2fa4] ss:$16 sps:$4 sm:$0xff]  }
 0x659   : > { %14371 = vmatmul.mubr.bf16.gmra.mrb[20].mxu0 %v18279_v34  ;;  %17083 = vmatmul.mubr.bf16.gmra.mrb[20].mxu1 %v18279_v34  ;;  %v23827_v34 = vld [vmem:[%s24405_s28 + $0x2e88] ss:$16 sps:$4 sm:$0xff]  }
 0x65a   : > { %14422 = vmatpush1.bf16.msra.mxu0 %v23764_v37  ;;  %17134 = vmatpush1.bf16.msra.mxu1 %v23767_v38  ;;  %v18186_v37 = vcombine.high %v561_v31, %v585_v32  ;;  %v23830_v38 = vld [vmem:[%s24405_s28 + $0x2ea0] ss:$16 sps:$4 sm:$0xff]  }
 0x65b   : > { %14423 = vmatprep.subr.bf16.mxu0 %v23772_v39  ;;  %17135 = vmatprep.subr.bf16.mxu1 %v23775_v40  ;;  %v23833_v39 = vld [vmem:[%s24405_s28 + $0x2ea8] ss:$16 sps:$4 sm:$0xff]   ;;  %v23838_v40 = vld [vmem:[%s24405_s28 + $0x2ec4] ss:$16 sps:$4 sm:$0xff]  }
 0x65c   : > { %14380 = vmatprep.mubr.bf16.mxu0 %v18328_v41  ;;  %17092 = vmatprep.mubr.bf16.mxu1 %v18328_v41  ;;  %v23841_v41 = vld [vmem:[%s24405_s28 + $0x2ecc] ss:$16 sps:$4 sm:$0xff]  }
 0x65e   : > { %14424 = vmatpush1.bf16.msra.mxu0 %v23770_v42  ;;  %17136 = vmatpush1.bf16.msra.mxu1 %v23773_v43  ;;  %v18185_v42 = vcombine.low %v561_v31, %v585_v32  ;;  %v609_v43 = vld [vmem:[%s24536_s30 + $0x6b0] sm:$0xff]  ;;  %v23895_v32 = vld [vmem:[%s24405_s28 + $0x2fec] ss:$16 sps:$4 sm:$0xff]  }
 0x65f   : > { %14425 = vmatprep.subr.bf16.mxu0 %v23778_v44  ;;  %17137 = vmatprep.subr.bf16.mxu1 %v23781_v45  ;;  %v633_v44 = vld [vmem:[%s24536_s30 + $0x770] sm:$0xff] }
 0x660   : > { %v23836_v45 = vld [vmem:[%s24405_s28 + $0x2ec0] ss:$16 sps:$4 sm:$0xff]   ;;  %v23892_v31 = vld [vmem:[%s24405_s28 + $0x2fe4] ss:$16 sps:$4 sm:$0xff]  }
 0x661   : > { %14381 = vmatmul.mubr.bf16.gmra.mrb[24].mxu0 %v18327_v46  ;;  %17093 = vmatmul.mubr.bf16.gmra.mrb[24].mxu1 %v18327_v46  ;;  %v23839_v46 = vld [vmem:[%s24405_s28 + $0x2ec8] ss:$16 sps:$4 sm:$0xff]  }
 0x662   : > { %14426 = vmatpush1.bf16.msra.mxu0 %v23776_v49  ;;  %17138 = vmatpush1.bf16.msra.mxu1 %v23779_v50  ;;  %v18234_v49 = vcombine.high %v609_v43, %v633_v44  ;;  %v23842_v50 = vld [vmem:[%s24405_s28 + $0x2ee0] ss:$16 sps:$4 sm:$0xff]  }
 0x663   : > { %14427 = vmatprep.subr.bf16.mxu0 %v23784_v51  ;;  %17139 = vmatprep.subr.bf16.mxu1 %v23787_v52  ;;  %v23845_v51 = vld [vmem:[%s24405_s28 + $0x2ee8] ss:$16 sps:$4 sm:$0xff]   ;;  %v23850_v52 = vld [vmem:[%s24405_s28 + $0x2f04] ss:$16 sps:$4 sm:$0xff]  }
 0x664   : > { %14390 = vmatprep.mubr.bf16.mxu0 %v18376_v53  ;;  %17102 = vmatprep.mubr.bf16.mxu1 %v18376_v53  ;;  %v23853_v53 = vld [vmem:[%s24405_s28 + $0x2f0c] ss:$16 sps:$4 sm:$0xff]  }
 0x666   : > { %14428 = vmatpush1.bf16.msra.mxu0 %v23782_v54  ;;  %17140 = vmatpush1.bf16.msra.mxu1 %v23785_v55  ;;  %v18233_v54 = vcombine.low %v609_v43, %v633_v44  ;;  %v657_v55 = vld [vmem:[%s24536_s30 + $0x830] sm:$0xff]  ;;  %v562_v44 = vld [vmem:[%s24536_s30 + $0x538] sm:$0xff] }
 0x667   : > { %14429 = vmatprep.subr.bf16.mxu0 %v23790_v56  ;;  %17141 = vmatprep.subr.bf16.mxu1 %v23793_v57  ;;  %v681_v56 = vld [vmem:[%s24536_s30 + $0x8f0] sm:$0xff] }
 0x668   : > { %v23848_v57 = vld [vmem:[%s24405_s28 + $0x2f00] ss:$16 sps:$4 sm:$0xff]  }
 0x669   : > { %14391 = vmatmul.mubr.bf16.gmra.mrb[28].mxu0 %v18375_v58  ;;  %17103 = vmatmul.mubr.bf16.gmra.mrb[28].mxu1 %v18375_v58  ;;  %v23851_v58 = vld [vmem:[%s24405_s28 + $0x2f08] ss:$16 sps:$4 sm:$0xff]  }
 0x66a   : > { %14430 = vmatpush1.bf16.msra.mxu0 %v23788_v61  ;;  %17142 = vmatpush1.bf16.msra.mxu1 %v23791_v62  ;;  %v18282_v61 = vcombine.high %v657_v55, %v681_v56  ;;  %v23854_v62 = vld [vmem:[%s24405_s28 + $0x2f20] ss:$16 sps:$4 sm:$0xff]  }
 0x66b   : > { %14431 = vmatprep.subr.bf16.mxu0 %v23796_v63  ;;  %17143 = vmatprep.subr.bf16.mxu1 %v23799_v0  ;;  %v23857_v63 = vld [vmem:[%s24405_s28 + $0x2f28] ss:$16 sps:$4 sm:$0xff]   ;;  %v23862_v0 = vld [vmem:[%s24405_s28 + $0x2f44] ss:$16 sps:$4 sm:$0xff]  }
 0x66c   : > { %14433 = vmatprep.mubr.bf16.mxu0 %v18042_v1  ;;  %17145 = vmatprep.mubr.bf16.mxu1 %v18042_v1  ;;  %v23865_v1 = vld [vmem:[%s24405_s28 + $0x2f4c] ss:$16 sps:$4 sm:$0xff]  }
 0x66e   : > { %14432 = vmatpush1.bf16.msra.mxu0 %v23794_v2  ;;  %17144 = vmatpush1.bf16.msra.mxu1 %v23797_v3  ;;  %v18281_v2 = vcombine.low %v657_v55, %v681_v56  ;;  %v705_v3 = vld [vmem:[%s24536_s30 + $0x9b0] sm:$0xff]  ;;  %v706_v56 = vld [vmem:[%s24536_s30 + $0x9b8] sm:$0xff] }
 0x66f   : > { %14514 = vmatprep.subr.bf16.mxu0 %v23802_v4  ;;  %17226 = vmatprep.subr.bf16.mxu1 %v23805_v5  ;;  %v729_v4 = vld [vmem:[%s24536_s30 + $0xa70] sm:$0xff] }
 0x670   : > { %v23860_v5 = vld [vmem:[%s24405_s28 + $0x2f40] ss:$16 sps:$4 sm:$0xff]  }
 0x671   : > { %14434 = vmatmul.mubr.bf16.vlgmr.msra.gmra.mrb[0].mxu0 %v18041_v6  ;;  %17146 = vmatmul.mubr.bf16.vlgmr.msra.gmra.mrb[0].mxu1 %v18041_v6  ;;  %v23863_v6 = vld [vmem:[%s24405_s28 + $0x2f48] ss:$16 sps:$4 sm:$0xff]  }
 0x672   : > { %14515 = vmatpush1.bf16.msra.mxu0 %v23800_v9  ;;  %17227 = vmatpush1.bf16.msra.mxu1 %v23803_v10  ;;  %v18330_v9 = vcombine.high %v705_v3, %v729_v4  ;;  %v23866_v10 = vld [vmem:[%s24405_s28 + $0x2f60] ss:$16 sps:$4 sm:$0xff]  }
 0x673   : > { %14516 = vmatprep.subr.bf16.mxu0 %v23808_v11  ;;  %17228 = vmatprep.subr.bf16.mxu1 %v23811_v12  ;;  %v23869_v11 = vld [vmem:[%s24405_s28 + $0x2f68] ss:$16 sps:$4 sm:$0xff]   ;;  %v23874_v12 = vld [vmem:[%s24405_s28 + $0x2f84] ss:$16 sps:$4 sm:$0xff]  }
 0x674   : > { %14443 = vmatprep.mubr.bf16.mxu0 %v18090_v13  ;;  %17155 = vmatprep.mubr.bf16.mxu1 %v18090_v13  ;;  %v23877_v13 = vld [vmem:[%s24405_s28 + $0x2f8c] ss:$16 sps:$4 sm:$0xff]  }
 0x676   : > { %14517 = vmatpush1.bf16.msra.mxu0 %v23806_v14  ;;  %17229 = vmatpush1.bf16.msra.mxu1 %v23809_v15  ;;  %v18329_v14 = vcombine.low %v705_v3, %v729_v4  ;;  %v753_v15 = vld [vmem:[%s24536_s30 + $0xb30] sm:$0xff]  ;;  %v329_v3 = vld [vmem:[#allocation2 + $0x8] sm:$0xff]  ;;  %v331_v4 = vld [vmem:[#allocation2 + $0x18] sm:$0xff] }
 0x677   : > { %14518 = vmatprep.subr.bf16.mxu0 %v23814_v16  ;;  %17230 = vmatprep.subr.bf16.mxu1 %v23817_v17  ;;  %v777_v16 = vld [vmem:[%s24536_s30 + $0xbf0] sm:$0xff] }
 0x678   : > { %v23872_v17 = vld [vmem:[%s24405_s28 + $0x2f80] ss:$16 sps:$4 sm:$0xff]  }
 0x679   : > { %14444 = vmatmul.mubr.bf16.gmra.mrb[4].mxu0 %v18089_v18  ;;  %17156 = vmatmul.mubr.bf16.gmra.mrb[4].mxu1 %v18089_v18  ;;  %v23875_v18 = vld [vmem:[%s24405_s28 + $0x2f88] ss:$16 sps:$4 sm:$0xff]  }
 0x67a   : > { %14519 = vmatpush1.bf16.msra.mxu0 %v23812_v21  ;;  %17231 = vmatpush1.bf16.msra.mxu1 %v23815_v22  ;;  %v18378_v21 = vcombine.high %v753_v15, %v777_v16  ;;  %v23878_v22 = vld [vmem:[%s24405_s28 + $0x2fa0] ss:$16 sps:$4 sm:$0xff]  }
 0x67b   : > { %14520 = vmatprep.subr.bf16.mxu0 %v23820_v23  ;;  %17232 = vmatprep.subr.bf16.mxu1 %v23823_v24  ;;  %v23881_v23 = vld [vmem:[%s24405_s28 + $0x2fa8] ss:$16 sps:$4 sm:$0xff]   ;;  %v23886_v24 = vld [vmem:[%s24405_s28 + $0x2fc4] ss:$16 sps:$4 sm:$0xff]  }
 0x67c   : > { %14453 = vmatprep.mubr.bf16.mxu0 %v18138_v25  ;;  %17165 = vmatprep.mubr.bf16.mxu1 %v18138_v25  ;;  %v23889_v25 = vld [vmem:[%s24405_s28 + $0x2fcc] ss:$16 sps:$4 sm:$0xff]  }
 0x67e   : > { %14521 = vmatpush1.bf16.msra.mxu0 %v23818_v26  ;;  %17233 = vmatpush1.bf16.msra.mxu1 %v23821_v27  ;;  %v18377_v26 = vcombine.low %v753_v15, %v777_v16  ;;  %v418_v27 = vld [vmem:[%s24536_s30 + $0xb8] sm:$0xff] }
 0x67f   : > { %14522 = vmatprep.subr.bf16.mxu0 %v23826_v28  ;;  %17234 = vmatprep.subr.bf16.mxu1 %v23829_v29  ;;  %v442_v28 = vld [vmem:[%s24536_s30 + $0x178] sm:$0xff]  ;;  %v23884_v29 = vld [vmem:[%s24405_s28 + $0x2fc0] ss:$16 sps:$4 sm:$0xff]  }
 0x681   : > { %14454 = vmatmul.mubr.bf16.gmra.mrb[8].mxu0 %v18137_v30  ;;  %17166 = vmatmul.mubr.bf16.gmra.mrb[8].mxu1 %v18137_v30  ;;  %v23887_v30 = vld [vmem:[%s24405_s28 + $0x2fc8] ss:$16 sps:$4 sm:$0xff]  }
 0x682   : > { %14523 = vmatpush1.bf16.msra.mxu0 %v23824_v33  ;;  %17235 = vmatpush1.bf16.msra.mxu1 %v23827_v34  ;;  %v18044_v33 = vcombine.high %v418_v27, %v442_v28  ;;  %v23890_v34 = vld [vmem:[%s24405_s28 + $0x2fe0] ss:$16 sps:$4 sm:$0xff]  }
 0x683   : > { %14524 = vmatprep.subr.bf16.mxu0 %v23832_v35  ;;  %17236 = vmatprep.subr.bf16.mxu1 %v23835_v36  ;;  %v23893_v35 = vld [vmem:[%s24405_s28 + $0x2fe8] ss:$16 sps:$4 sm:$0xff]  }
 0x684   : > { %14463 = vmatprep.mubr.bf16.mxu0 %v18186_v37  ;;  %17175 = vmatprep.mubr.bf16.mxu1 %v18186_v37  ;;  %v466_v36 = vld [vmem:[%s24536_s30 + $0x238] sm:$0xff] }
 0x685   : > { %v490_v37 = vld [vmem:[%s24536_s30 + $0x2f8] sm:$0xff] }
 0x686   : > { %14525 = vmatpush1.bf16.msra.mxu0 %v23830_v38  ;;  %17237 = vmatpush1.bf16.msra.mxu1 %v23833_v39  ;;  %v18043_v38 = vcombine.low %v418_v27, %v442_v28  ;;  %v18092_v39 = vcombine.high %v466_v36, %v490_v37  ;;  %v337_v27 = vld [vmem:[#allocation2 + $0x48] sm:$0xff]  ;;  %v339_v28 = vld [vmem:[#allocation2 + $0x58] sm:$0xff] }
 0x687   : > { %14526 = vmatprep.subr.bf16.mxu0 %v23838_v40  ;;  %17238 = vmatprep.subr.bf16.mxu1 %v23841_v41  ;;  %v514_v40 = vld [vmem:[%s24536_s30 + $0x3b8] sm:$0xff] }
 0x688   : > { %v538_v41 = vld [vmem:[%s24536_s30 + $0x478] sm:$0xff] }
 0x689   : > { %14464 = vmatmul.mubr.bf16.gmra.mrb[12].mxu0 %v18185_v42  ;;  %17176 = vmatmul.mubr.bf16.gmra.mrb[12].mxu1 %v18185_v42  ;;  %v18091_v42 = vcombine.low %v466_v36, %v490_v37  ;;  %v18140_v43 = vcombine.high %v514_v40, %v538_v41  ;;  %v341_v37 = vld [vmem:[#allocation2 + $0x68] sm:$0xff] }
 0x68a   : > { %14527 = vmatpush1.bf16.msra.mxu0 %v23836_v45  ;;  %17239 = vmatpush1.bf16.msra.mxu1 %v23839_v46  ;;  %v586_v45 = vld [vmem:[%s24536_s30 + $0x5f8] sm:$0xff]  ;;  %v18139_v46 = vcombine.low %v514_v40, %v538_v41 }
 0x68b   : > { %14528 = vmatprep.subr.bf16.mxu0 %v23844_v47  ;;  %17240 = vmatprep.subr.bf16.mxu1 %v23847_v48  ;;  %v18188_v47 = vcombine.high %v562_v44, %v586_v45  ;;  %v610_v48 = vld [vmem:[%s24536_s30 + $0x6b8] sm:$0xff] }
 0x68c   : > { %14473 = vmatprep.mubr.bf16.mxu0 %v18234_v49  ;;  %17185 = vmatprep.mubr.bf16.mxu1 %v18234_v49  ;;  %v634_v49 = vld [vmem:[%s24536_s30 + $0x778] sm:$0xff] }
 0x68e   : > { %14529 = vmatpush1.bf16.msra.mxu0 %v23842_v50  ;;  %17241 = vmatpush1.bf16.msra.mxu1 %v23845_v51  ;;  %v18187_v50 = vcombine.low %v562_v44, %v586_v45  ;;  %v18236_v51 = vcombine.high %v610_v48, %v634_v49 }
 0x68f   : > { %14530 = vmatprep.subr.bf16.mxu0 %v23850_v52  ;;  %17242 = vmatprep.subr.bf16.mxu1 %v23853_v53  ;;  %v658_v52 = vld [vmem:[%s24536_s30 + $0x838] sm:$0xff] }
 0x690   : > { %v682_v53 = vld [vmem:[%s24536_s30 + $0x8f8] sm:$0xff] }
 0x691   : > { %14474 = vmatmul.mubr.bf16.gmra.mrb[16].mxu0 %v18233_v54  ;;  %17186 = vmatmul.mubr.bf16.gmra.mrb[16].mxu1 %v18233_v54  ;;  %v18235_v54 = vcombine.low %v610_v48, %v634_v49  ;;  %v18284_v55 = vcombine.high %v658_v52, %v682_v53  ;;  %v344_v49 = vld [vmem:[#allocation2 + $0x80] sm:$0xff] }
 0x692   : > { %14531 = vmatpush1.bf16.msra.mxu0 %v23848_v57  ;;  %17243 = vmatpush1.bf16.msra.mxu1 %v23851_v58  ;;  %v730_v57 = vld [vmem:[%s24536_s30 + $0xa78] sm:$0xff]  ;;  %v18283_v58 = vcombine.low %v658_v52, %v682_v53 }
 0x693   : > { %14532 = vmatprep.subr.bf16.mxu0 %v23856_v59  ;;  %17244 = vmatprep.subr.bf16.mxu1 %v23859_v60  ;;  %v18332_v59 = vcombine.high %v706_v56, %v730_v57  ;;  %v754_v60 = vld [vmem:[%s24536_s30 + $0xb38] sm:$0xff] }
 0x694   : > { %14483 = vmatprep.mubr.bf16.mxu0 %v18282_v61  ;;  %17195 = vmatprep.mubr.bf16.mxu1 %v18282_v61  ;;  %v778_v61 = vld [vmem:[%s24536_s30 + $0xbf8] sm:$0xff] }
 0x695   : > { %v347_v52 = vld [vmem:[#allocation2 + $0x98] sm:$0xff] }
 0x696   : > { %14533 = vmatpush1.bf16.msra.mxu0 %v23854_v62  ;;  %17245 = vmatpush1.bf16.msra.mxu1 %v23857_v63  ;;  %v18331_v62 = vcombine.low %v706_v56, %v730_v57  ;;  %v18380_v63 = vcombine.high %v754_v60, %v778_v61  ;;  %v350_v56 = vld [vmem:[#allocation2 + $0xb0] sm:$0xff] }
 0x697   : > { %14534 = vmatprep.subr.bf16.mxu0 %v23862_v0  ;;  %17246 = vmatprep.subr.bf16.mxu1 %v23865_v1  ;;  %v18379_v0 = vcombine.low %v754_v60, %v778_v61  ;;  %v328_v1 = vld [vmem:[#allocation2] sm:$0xff]  ;;  %v349_v61 = vld [vmem:[#allocation2 + $0xa8] sm:$0xff] }
 0x699   : > { %14484 = vmatmul.mubr.bf16.gmra.mrb[20].mxu0 %v18281_v2  ;;  %17196 = vmatmul.mubr.bf16.gmra.mrb[20].mxu1 %v18281_v2  ;;  %v330_v2 = vld [vmem:[#allocation2 + $0x10] sm:$0xff] }
 0x69a   : > { %14535 = vmatpush1.bf16.msra.mxu0 %v23860_v5  ;;  %17247 = vmatpush1.bf16.msra.mxu1 %v23863_v6 }
 0x69b   : > { %14536 = vmatprep.subr.bf16.mxu0 %v23868_v7  ;;  %17248 = vmatprep.subr.bf16.mxu1 %v23871_v8  ;;  %v332_v7 = vld [vmem:[#allocation2 + $0x20] sm:$0xff]  ;;  %v334_v8 = vld [vmem:[#allocation2 + $0x30] sm:$0xff] }
 0x69c   : > { %14493 = vmatprep.mubr.bf16.mxu0 %v18330_v9  ;;  %17205 = vmatprep.mubr.bf16.mxu1 %v18330_v9 }
 0x69e   : > { %14537 = vmatpush1.bf16.msra.mxu0 %v23866_v10  ;;  %17249 = vmatpush1.bf16.msra.mxu1 %v23869_v11 }
 0x69f   : > { %14538 = vmatprep.subr.bf16.mxu0 %v23874_v12  ;;  %17250 = vmatprep.subr.bf16.mxu1 %v23877_v13  ;;  %v333_v13 = vld [vmem:[#allocation2 + $0x28] sm:$0xff] }
 0x6a1   : > { %14494 = vmatmul.mubr.bf16.gmra.mrb[24].mxu0 %v18329_v14  ;;  %17206 = vmatmul.mubr.bf16.gmra.mrb[24].mxu1 %v18329_v14  ;;  %v335_v14 = vld [vmem:[#allocation2 + $0x38] sm:$0xff] }
 0x6a2   : > { %14539 = vmatpush1.bf16.msra.mxu0 %v23872_v17  ;;  %17251 = vmatpush1.bf16.msra.mxu1 %v23875_v18 }
 0x6a3   : > { %14540 = vmatprep.subr.bf16.mxu0 %v23880_v19  ;;  %17252 = vmatprep.subr.bf16.mxu1 %v23883_v20 }
 0x6a4   : > { %14503 = vmatprep.mubr.bf16.mxu0 %v18378_v21  ;;  %17215 = vmatprep.mubr.bf16.mxu1 %v18378_v21 }
 0x6a6   : > { %14541 = vmatpush1.bf16.msra.mxu0 %v23878_v22  ;;  %17253 = vmatpush1.bf16.msra.mxu1 %v23881_v23 }
 0x6a7   : > { %14542 = vmatprep.subr.bf16.mxu0 %v23886_v24  ;;  %17254 = vmatprep.subr.bf16.mxu1 %v23889_v25  ;;  %v336_v25 = vld [vmem:[#allocation2 + $0x40] sm:$0xff] }
 0x6a9   : > { %14504 = vmatmul.mubr.bf16.gmra.mrb[28].mxu0 %v18377_v26  ;;  %17216 = vmatmul.mubr.bf16.gmra.mrb[28].mxu1 %v18377_v26  ;;  %v338_v26 = vld [vmem:[#allocation2 + $0x50] sm:$0xff] }
 0x6aa   : > { %14543 = vmatpush1.bf16.msra.mxu0 %v23884_v29  ;;  %17255 = vmatpush1.bf16.msra.mxu1 %v23887_v30 }
 0x6ab   : > { %14544 = vmatprep.subr.bf16.mxu0 %v23892_v31  ;;  %17256 = vmatprep.subr.bf16.mxu1 %v23895_v32  ;;  %v340_v31 = vld [vmem:[#allocation2 + $0x60] sm:$0xff]  ;;  %v342_v32 = vld [vmem:[#allocation2 + $0x70] sm:$0xff] }
 0x6ac   : > { %14546 = vmatprep.mubr.bf16.mxu0 %v18044_v33  ;;  %17258 = vmatprep.mubr.bf16.mxu1 %v18044_v33 }
 0x6ae   : > { %14545 = vmatpush1.bf16.msra.mxu0 %v23890_v34  ;;  %17257 = vmatpush1.bf16.msra.mxu1 %v23893_v35 }
 0x6b1   : > { %14547 = vmatmul.mubr.bf16.vlgmr.msra.gmra.mrb[0].mxu0 %v18043_v38  ;;  %17259 = vmatmul.mubr.bf16.vlgmr.msra.gmra.mrb[0].mxu1 %v18043_v38  ;;  %v343_v38 = vld [vmem:[#allocation2 + $0x78] sm:$0xff] }
 0x6b2   : > { %14556 = vmatprep.mubr.bf16.mxu0 %v18092_v39  ;;  %17268 = vmatprep.mubr.bf16.mxu1 %v18092_v39 }
 0x6b9   : > { %14557 = vmatmul.mubr.bf16.gmra.mrb[4].mxu0 %v18091_v42  ;;  %17269 = vmatmul.mubr.bf16.gmra.mrb[4].mxu1 %v18091_v42 }
 0x6ba   : > { %14566 = vmatprep.mubr.bf16.mxu0 %v18140_v43  ;;  %17278 = vmatprep.mubr.bf16.mxu1 %v18140_v43 }
 0x6c1   : > { %14567 = vmatmul.mubr.bf16.gmra.mrb[8].mxu0 %v18139_v46  ;;  %17279 = vmatmul.mubr.bf16.gmra.mrb[8].mxu1 %v18139_v46 }
 0x6c2   : > { %14576 = vmatprep.mubr.bf16.mxu0 %v18188_v47  ;;  %17288 = vmatprep.mubr.bf16.mxu1 %v18188_v47 }
 0x6c9   : > { %14577 = vmatmul.mubr.bf16.gmra.mrb[12].mxu0 %v18187_v50  ;;  %17289 = vmatmul.mubr.bf16.gmra.mrb[12].mxu1 %v18187_v50  ;;  %v346_v50 = vld [vmem:[#allocation2 + $0x90] sm:$0xff] }
 0x6ca   : > { %14586 = vmatprep.mubr.bf16.mxu0 %v18236_v51  ;;  %17298 = vmatprep.mubr.bf16.mxu1 %v18236_v51  ;;  %v345_v51 = vld [vmem:[#allocation2 + $0x88] sm:$0xff] }
 0x6d1   : > { %14587 = vmatmul.mubr.bf16.gmra.mrb[16].mxu0 %v18235_v54  ;;  %17299 = vmatmul.mubr.bf16.gmra.mrb[16].mxu1 %v18235_v54 }
 0x6d2   : > { %14596 = vmatprep.mubr.bf16.mxu0 %v18284_v55  ;;  %17308 = vmatprep.mubr.bf16.mxu1 %v18284_v55  ;;  %v348_v55 = vld [vmem:[#allocation2 + $0xa0] sm:$0xff] }
 0x6d9   : > { %14597 = vmatmul.mubr.bf16.gmra.mrb[20].mxu0 %v18283_v58  ;;  %17309 = vmatmul.mubr.bf16.gmra.mrb[20].mxu1 %v18283_v58 }
 0x6da   : > { %14606 = vmatprep.mubr.bf16.mxu0 %v18332_v59  ;;  %17318 = vmatprep.mubr.bf16.mxu1 %v18332_v59 }
 0x6e1   : > { %14607 = vmatmul.mubr.bf16.gmra.mrb[24].mxu0 %v18331_v62  ;;  %17319 = vmatmul.mubr.bf16.gmra.mrb[24].mxu1 %v18331_v62  ;;  %v351_v62 = vld [vmem:[#allocation2 + $0xb8] sm:$0xff] }
 0x6e2   : > { %14616 = vmatprep.mubr.bf16.mxu0 %v18380_v63  ;;  %17328 = vmatprep.mubr.bf16.mxu1 %v18380_v63 }
 0x6e9   : > { %14617 = vmatmul.mubr.bf16.gmra.mrb[28].mxu0 %v18379_v0  ;;  %17329 = vmatmul.mubr.bf16.gmra.mrb[28].mxu1 %v18379_v0 }
 0x784   : > { %v14548_v5 = vpop.f32.mrb[0].mxu0  ;;  %v17260_v6 = vpop.f32.mrb[0].mxu1 }
 0x785   : > { %v17339_v9 = vadd.f32 %v14548_v5, %v328_v1  ;;  %v17341_v10 = vadd.f32 %v17260_v6, %v330_v2  ;;  %v14550_v11 = vpop.f32.mrb[1].mxu0  ;;  %v17262_v12 = vpop.f32.mrb[1].mxu1 }
 0x786   : > { %v17340_v15 = vadd.f32 %v14550_v11, %v329_v3  ;;  %v17342_v16 = vadd.f32 %v17262_v12, %v331_v4  ;;  %v14552_v17 = vpop.f32.mrb[2].mxu0  ;;  %v17264_v18 = vpop.f32.mrb[2].mxu1  ;;  %v353_v11 = vld [vmem:[#allocation2 + $0xc8] sm:$0xff]  ;;  %v355_v12 = vld [vmem:[#allocation2 + $0xd8] sm:$0xff] }
 0x787   : > { %17403 = vst [vmem:[#allocation2] sm:$0xff] %v17339_v9  ;;  %17405 = vst [vmem:[#allocation2 + $0x10] sm:$0xff] %v17341_v10  ;;  %v17343_v19 = vadd.f32 %v14552_v17, %v332_v7  ;;  %v17345_v20 = vadd.f32 %v17264_v18, %v334_v8  ;;  %v14554_v21 = vpop.f32.mrb[3].mxu0  ;;  %v17266_v22 = vpop.f32.mrb[3].mxu1  ;;  %v352_v9 = vld [vmem:[#allocation2 + $0xc0] sm:$0xff]  ;;  %v354_v10 = vld [vmem:[#allocation2 + $0xd0] sm:$0xff] }
 0x788   : > { %17404 = vst [vmem:[#allocation2 + $0x8] sm:$0xff] %v17340_v15  ;;  %17406 = vst [vmem:[#allocation2 + $0x18] sm:$0xff] %v17342_v16  ;;  %v17344_v23 = vadd.f32 %v14554_v21, %v333_v13  ;;  %v17346_v24 = vadd.f32 %v17266_v22, %v335_v14  ;;  %v356_v15 = vld [vmem:[#allocation2 + $0xe0] sm:$0xff]  ;;  %v358_v16 = vld [vmem:[#allocation2 + $0xf0] sm:$0xff] }
 0x789   : > { %17407 = vst [vmem:[#allocation2 + $0x20] sm:$0xff] %v17343_v19  ;;  %17409 = vst [vmem:[#allocation2 + $0x30] sm:$0xff] %v17345_v20  ;;  %v357_v21 = vld [vmem:[#allocation2 + $0xe8] sm:$0xff]  ;;  %v359_v22 = vld [vmem:[#allocation2 + $0xf8] sm:$0xff] }
 0x78a   : > { %17408 = vst [vmem:[#allocation2 + $0x28] sm:$0xff] %v17344_v23  ;;  %17410 = vst [vmem:[#allocation2 + $0x38] sm:$0xff] %v17346_v24 }
 0x78c   : > { %v14558_v29 = vpop.f32.mrb[4].mxu0  ;;  %v17270_v30 = vpop.f32.mrb[4].mxu1 }
 0x78d   : > { %v17347_v33 = vadd.f32 %v14558_v29, %v336_v25  ;;  %v17349_v34 = vadd.f32 %v17270_v30, %v338_v26  ;;  %v14560_v35 = vpop.f32.mrb[5].mxu0  ;;  %v17272_v36 = vpop.f32.mrb[5].mxu1 }
 0x78e   : > { %v17348_v39 = vadd.f32 %v14560_v35, %v337_v27  ;;  %v17350_v40 = vadd.f32 %v17272_v36, %v339_v28  ;;  %v14562_v41 = vpop.f32.mrb[6].mxu0  ;;  %v17274_v42 = vpop.f32.mrb[6].mxu1  ;;  %v361_v35 = vld [vmem:[#allocation2 + $0x108] sm:$0xff]  ;;  %v363_v36 = vld [vmem:[#allocation2 + $0x118] sm:$0xff] }
 0x78f   : > { %17411 = vst [vmem:[#allocation2 + $0x40] sm:$0xff] %v17347_v33  ;;  %17413 = vst [vmem:[#allocation2 + $0x50] sm:$0xff] %v17349_v34  ;;  %v17351_v43 = vadd.f32 %v14562_v41, %v340_v31  ;;  %v17353_v44 = vadd.f32 %v17274_v42, %v342_v32  ;;  %v14564_v45 = vpop.f32.mrb[7].mxu0  ;;  %v17276_v46 = vpop.f32.mrb[7].mxu1  ;;  %v360_v33 = vld [vmem:[#allocation2 + $0x100] sm:$0xff]  ;;  %v362_v34 = vld [vmem:[#allocation2 + $0x110] sm:$0xff] }
 0x790   : > { %17412 = vst [vmem:[#allocation2 + $0x48] sm:$0xff] %v17348_v39  ;;  %17414 = vst [vmem:[#allocation2 + $0x58] sm:$0xff] %v17350_v40  ;;  %v17352_v47 = vadd.f32 %v14564_v45, %v341_v37  ;;  %v17354_v48 = vadd.f32 %v17276_v46, %v343_v38  ;;  %v364_v39 = vld [vmem:[#allocation2 + $0x120] sm:$0xff]  ;;  %v366_v40 = vld [vmem:[#allocation2 + $0x130] sm:$0xff] }
 0x791   : > { %17415 = vst [vmem:[#allocation2 + $0x60] sm:$0xff] %v17351_v43  ;;  %17417 = vst [vmem:[#allocation2 + $0x70] sm:$0xff] %v17353_v44  ;;  %v365_v45 = vld [vmem:[#allocation2 + $0x128] sm:$0xff]  ;;  %v367_v46 = vld [vmem:[#allocation2 + $0x138] sm:$0xff] }
 0x792   : > { %17416 = vst [vmem:[#allocation2 + $0x68] sm:$0xff] %v17352_v47  ;;  %17418 = vst [vmem:[#allocation2 + $0x78] sm:$0xff] %v17354_v48 }
 0x794   : > { %v14568_v53 = vpop.f32.mrb[8].mxu0  ;;  %v17280_v54 = vpop.f32.mrb[8].mxu1 }
 0x795   : > { %v17355_v57 = vadd.f32 %v14568_v53, %v344_v49  ;;  %v17357_v58 = vadd.f32 %v17280_v54, %v346_v50  ;;  %v14570_v59 = vpop.f32.mrb[9].mxu0  ;;  %v17282_v60 = vpop.f32.mrb[9].mxu1 }
 0x796   : > { %v17356_v63 = vadd.f32 %v14570_v59, %v345_v51  ;;  %v17358_v0 = vadd.f32 %v17282_v60, %v347_v52  ;;  %v14572_v1 = vpop.f32.mrb[10].mxu0  ;;  %v17284_v2 = vpop.f32.mrb[10].mxu1  ;;  %v369_v59 = vld [vmem:[#allocation2 + $0x148] sm:$0xff]  ;;  %v371_v60 = vld [vmem:[#allocation2 + $0x158] sm:$0xff] }
 0x797   : > { %17419 = vst [vmem:[#allocation2 + $0x80] sm:$0xff] %v17355_v57  ;;  %17421 = vst [vmem:[#allocation2 + $0x90] sm:$0xff] %v17357_v58  ;;  %v17359_v3 = vadd.f32 %v14572_v1, %v348_v55  ;;  %v17361_v4 = vadd.f32 %v17284_v2, %v350_v56  ;;  %v14574_v5 = vpop.f32.mrb[11].mxu0  ;;  %v17286_v6 = vpop.f32.mrb[11].mxu1  ;;  %v368_v57 = vld [vmem:[#allocation2 + $0x140] sm:$0xff]  ;;  %v370_v58 = vld [vmem:[#allocation2 + $0x150] sm:$0xff] }
 0x798   : > { %17420 = vst [vmem:[#allocation2 + $0x88] sm:$0xff] %v17356_v63  ;;  %17422 = vst [vmem:[#allocation2 + $0x98] sm:$0xff] %v17358_v0  ;;  %v17360_v7 = vadd.f32 %v14574_v5, %v349_v61  ;;  %v17362_v8 = vadd.f32 %v17286_v6, %v351_v62  ;;  %v372_v63 = vld [vmem:[#allocation2 + $0x160] sm:$0xff]  ;;  %v374_v0 = vld [vmem:[#allocation2 + $0x170] sm:$0xff] }
 0x799   : > { %17423 = vst [vmem:[#allocation2 + $0xa0] sm:$0xff] %v17359_v3  ;;  %17425 = vst [vmem:[#allocation2 + $0xb0] sm:$0xff] %v17361_v4  ;;  %v373_v5 = vld [vmem:[#allocation2 + $0x168] sm:$0xff]  ;;  %v375_v6 = vld [vmem:[#allocation2 + $0x178] sm:$0xff] }
 0x79a   : > { %17424 = vst [vmem:[#allocation2 + $0xa8] sm:$0xff] %v17360_v7  ;;  %17426 = vst [vmem:[#allocation2 + $0xb8] sm:$0xff] %v17362_v8 }
 0x79c   : > { %v14578_v13 = vpop.f32.mrb[12].mxu0  ;;  %v17290_v14 = vpop.f32.mrb[12].mxu1 }
 0x79d   : > { %v17363_v17 = vadd.f32 %v14578_v13, %v352_v9  ;;  %v17365_v18 = vadd.f32 %v17290_v14, %v354_v10  ;;  %v14580_v19 = vpop.f32.mrb[13].mxu0  ;;  %v17292_v20 = vpop.f32.mrb[13].mxu1 }
 0x79e   : > { %v17364_v23 = vadd.f32 %v14580_v19, %v353_v11  ;;  %v17366_v24 = vadd.f32 %v17292_v20, %v355_v12  ;;  %v14582_v25 = vpop.f32.mrb[14].mxu0  ;;  %v17294_v26 = vpop.f32.mrb[14].mxu1  ;;  %v377_v19 = vld [vmem:[#allocation2 + $0x188] sm:$0xff]  ;;  %v379_v20 = vld [vmem:[#allocation2 + $0x198] sm:$0xff] }
 0x79f   : > { %17427 = vst [vmem:[#allocation2 + $0xc0] sm:$0xff] %v17363_v17  ;;  %17429 = vst [vmem:[#allocation2 + $0xd0] sm:$0xff] %v17365_v18  ;;  %v17367_v27 = vadd.f32 %v14582_v25, %v356_v15  ;;  %v17369_v28 = vadd.f32 %v17294_v26, %v358_v16  ;;  %v14584_v29 = vpop.f32.mrb[15].mxu0  ;;  %v17296_v30 = vpop.f32.mrb[15].mxu1  ;;  %v376_v17 = vld [vmem:[#allocation2 + $0x180] sm:$0xff]  ;;  %v378_v18 = vld [vmem:[#allocation2 + $0x190] sm:$0xff] }
 0x7a0   : > { %17428 = vst [vmem:[#allocation2 + $0xc8] sm:$0xff] %v17364_v23  ;;  %17430 = vst [vmem:[#allocation2 + $0xd8] sm:$0xff] %v17366_v24  ;;  %v17368_v31 = vadd.f32 %v14584_v29, %v357_v21  ;;  %v17370_v32 = vadd.f32 %v17296_v30, %v359_v22  ;;  %v380_v23 = vld [vmem:[#allocation2 + $0x1a0] sm:$0xff]  ;;  %v382_v24 = vld [vmem:[#allocation2 + $0x1b0] sm:$0xff] }
 0x7a1   : > { %17431 = vst [vmem:[#allocation2 + $0xe0] sm:$0xff] %v17367_v27  ;;  %17433 = vst [vmem:[#allocation2 + $0xf0] sm:$0xff] %v17369_v28  ;;  %v381_v29 = vld [vmem:[#allocation2 + $0x1a8] sm:$0xff]  ;;  %v383_v30 = vld [vmem:[#allocation2 + $0x1b8] sm:$0xff] }
 0x7a2   : > { %17432 = vst [vmem:[#allocation2 + $0xe8] sm:$0xff] %v17368_v31  ;;  %17434 = vst [vmem:[#allocation2 + $0xf8] sm:$0xff] %v17370_v32 }
 0x7a4   : > { %v14588_v37 = vpop.f32.mrb[16].mxu0  ;;  %v17300_v38 = vpop.f32.mrb[16].mxu1 }
 0x7a5   : > { %v17371_v41 = vadd.f32 %v14588_v37, %v360_v33  ;;  %v17373_v42 = vadd.f32 %v17300_v38, %v362_v34  ;;  %v14590_v43 = vpop.f32.mrb[17].mxu0  ;;  %v17302_v44 = vpop.f32.mrb[17].mxu1 }
 0x7a6   : > { %v17372_v47 = vadd.f32 %v14590_v43, %v361_v35  ;;  %v17374_v48 = vadd.f32 %v17302_v44, %v363_v36  ;;  %v14592_v49 = vpop.f32.mrb[18].mxu0  ;;  %v17304_v50 = vpop.f32.mrb[18].mxu1  ;;  %v385_v43 = vld [vmem:[#allocation2 + $0x1c8] sm:$0xff]  ;;  %v387_v44 = vld [vmem:[#allocation2 + $0x1d8] sm:$0xff] }
 0x7a7   : > { %17435 = vst [vmem:[#allocation2 + $0x100] sm:$0xff] %v17371_v41  ;;  %17437 = vst [vmem:[#allocation2 + $0x110] sm:$0xff] %v17373_v42  ;;  %v17375_v51 = vadd.f32 %v14592_v49, %v364_v39  ;;  %v17377_v52 = vadd.f32 %v17304_v50, %v366_v40  ;;  %v14594_v53 = vpop.f32.mrb[19].mxu0  ;;  %v17306_v54 = vpop.f32.mrb[19].mxu1  ;;  %v384_v41 = vld [vmem:[#allocation2 + $0x1c0] sm:$0xff]  ;;  %v386_v42 = vld [vmem:[#allocation2 + $0x1d0] sm:$0xff] }
 0x7a8   : > { %17436 = vst [vmem:[#allocation2 + $0x108] sm:$0xff] %v17372_v47  ;;  %17438 = vst [vmem:[#allocation2 + $0x118] sm:$0xff] %v17374_v48  ;;  %v17376_v55 = vadd.f32 %v14594_v53, %v365_v45  ;;  %v17378_v56 = vadd.f32 %v17306_v54, %v367_v46  ;;  %v388_v47 = vld [vmem:[#allocation2 + $0x1e0] sm:$0xff]  ;;  %v390_v48 = vld [vmem:[#allocation2 + $0x1f0] sm:$0xff] }
 0x7a9   : > { %17439 = vst [vmem:[#allocation2 + $0x120] sm:$0xff] %v17375_v51  ;;  %17441 = vst [vmem:[#allocation2 + $0x130] sm:$0xff] %v17377_v52  ;;  %v389_v53 = vld [vmem:[#allocation2 + $0x1e8] sm:$0xff]  ;;  %v391_v54 = vld [vmem:[#allocation2 + $0x1f8] sm:$0xff] }
 0x7aa   : > { %17440 = vst [vmem:[#allocation2 + $0x128] sm:$0xff] %v17376_v55  ;;  %17442 = vst [vmem:[#allocation2 + $0x138] sm:$0xff] %v17378_v56 }
 0x7ac   : > { %v14598_v61 = vpop.f32.mrb[20].mxu0  ;;  %v17310_v62 = vpop.f32.mrb[20].mxu1 }
 0x7ad   : > { %v17379_v1 = vadd.f32 %v14598_v61, %v368_v57  ;;  %v17381_v2 = vadd.f32 %v17310_v62, %v370_v58  ;;  %v14600_v3 = vpop.f32.mrb[21].mxu0  ;;  %v17312_v4 = vpop.f32.mrb[21].mxu1 }
 0x7ae   : > { %v17380_v7 = vadd.f32 %v14600_v3, %v369_v59  ;;  %v17382_v8 = vadd.f32 %v17312_v4, %v371_v60  ;;  %v14602_v9 = vpop.f32.mrb[22].mxu0  ;;  %v17314_v10 = vpop.f32.mrb[22].mxu1  ;;  %v17535_v3 = vld [vmem:[%s24415_s6] sm:$0xf] (!%p19917_p0) }
 0x7af   : > { %17443 = vst [vmem:[#allocation2 + $0x140] sm:$0xff] %v17379_v1  ;;  %17445 = vst [vmem:[#allocation2 + $0x150] sm:$0xff] %v17381_v2  ;;  %v17383_v11 = vadd.f32 %v14602_v9, %v372_v63  ;;  %v17385_v12 = vadd.f32 %v17314_v10, %v374_v0  ;;  %v14604_v13 = vpop.f32.mrb[23].mxu0  ;;  %v17316_v14 = vpop.f32.mrb[23].mxu1  ;;  %v17537_v1 = vlaneseq (!%p19917_p0)  ;;  %v17471_v4 = vld [vmem:[#allocation2] sm:$0xff] (!%p19917_p0)  ;;  %v17473_v10 = vld [vmem:[#allocation2 + $0x10] sm:$0xff] (!%p19917_p0) }
 0x7b0   : > { %17444 = vst [vmem:[#allocation2 + $0x148] sm:$0xff] %v17380_v7  ;;  %17446 = vst [vmem:[#allocation2 + $0x158] sm:$0xff] %v17382_v8  ;;  %v17384_v15 = vadd.f32 %v14604_v13, %v373_v5  ;;  %v17386_v16 = vadd.f32 %v17316_v14, %v375_v6  ;;  %v17472_v5 = vld [vmem:[#allocation2 + $0x8] sm:$0xff] (!%p19917_p0) }
 0x7b1   : > { %17447 = vst [vmem:[#allocation2 + $0x160] sm:$0xff] %v17383_v11  ;;  %17449 = vst [vmem:[#allocation2 + $0x170] sm:$0xff] %v17385_v12  ;;  %v17538_v2 = vshrl.u32 (!%p19917_p0), %v17537_v1, 7  ;;  %v17474_v11 = vld [vmem:[#allocation2 + $0x18] sm:$0xff] (!%p19917_p0)  ;;  %v17475_v12 = vld [vmem:[#allocation2 + $0x20] sm:$0xff] (!%p19917_p0) }
 0x7b2   : > { %17448 = vst [vmem:[#allocation2 + $0x168] sm:$0xff] %v17384_v15  ;;  %17450 = vst [vmem:[#allocation2 + $0x178] sm:$0xff] %v17386_v16 }
 0x7b3   : > { %v17539_v6 = vsub.s32 (!%p19917_p0), 0, %v17538_v2  ;;  %v17543_v7 = vsub.s32 (!%p19917_p0), 1, %v17538_v2  ;;  %v17547_v8 = vsub.s32 (!%p19917_p0), 2, %v17538_v2  ;;  %v17551_v9 = vsub.s32 (!%p19917_p0), 3, %v17538_v2  ;;  %v17497_v2 = vld [vmem:[#allocation2 + $0xd0] sm:$0xff] (!%p19917_p0) }
 0x7b4   : > { %v14608_v21 = vpop.f32.mrb[24].mxu0  ;;  %v17320_v22 = vpop.f32.mrb[24].mxu1 }
 0x7b5   : > { %v17387_v25 = vadd.f32 %v14608_v21, %v376_v17  ;;  %v17389_v26 = vadd.f32 %v17320_v22, %v378_v18  ;;  %v14610_v27 = vpop.f32.mrb[25].mxu0  ;;  %v17322_v28 = vpop.f32.mrb[25].mxu1  ;;  %v26414_v13 = vrot.slane (!%p19917_p0), %v17535_v3, %v17539_v6  ;;  %v26416_v14 = vrot.slane (!%p19917_p0), %v17535_v3, %v17543_v7  ;;  %v17476_v17 = vld [vmem:[#allocation2 + $0x28] sm:$0xff] (!%p19917_p0)  ;;  %v17477_v18 = vld [vmem:[#allocation2 + $0x30] sm:$0xff] (!%p19917_p0) }
 0x7b6   : > { %v17388_v31 = vadd.f32 %v14610_v27, %v377_v19  ;;  %v17390_v32 = vadd.f32 %v17322_v28, %v379_v20  ;;  %v14612_v33 = vpop.f32.mrb[26].mxu0  ;;  %v17324_v34 = vpop.f32.mrb[26].mxu1  ;;  %v26418_v15 = vrot.slane (!%p19917_p0), %v17535_v3, %v17547_v8  ;;  %v26420_v16 = vrot.slane (!%p19917_p0), %v17535_v3, %v17551_v9  ;;  %v17478_v19 = vld [vmem:[#allocation2 + $0x38] sm:$0xff] (!%p19917_p0)  ;;  %v17479_v20 = vld [vmem:[#allocation2 + $0x40] sm:$0xff] (!%p19917_p0)  ;;  %v17480_v21 = vld [vmem:[#allocation2 + $0x48] sm:$0xff] (!%p19917_p0) }
 0x7b7   : > { %17451 = vst [vmem:[#allocation2 + $0x180] sm:$0xff] %v17387_v25  ;;  %17453 = vst [vmem:[#allocation2 + $0x190] sm:$0xff] %v17389_v26  ;;  %v17391_v35 = vadd.f32 %v14612_v33, %v380_v23  ;;  %v17393_v36 = vadd.f32 %v17324_v34, %v382_v24  ;;  %v14614_v37 = vpop.f32.mrb[27].mxu0  ;;  %v17326_v38 = vpop.f32.mrb[27].mxu1  ;;  %v17557_v22 = vadd.f32 (!%p19917_p0), %v26414_v13, %v17471_v4  ;;  %v17481_v26 = vld [vmem:[#allocation2 + $0x50] sm:$0xff] (!%p19917_p0)  ;;  %v17482_v27 = vld [vmem:[#allocation2 + $0x58] sm:$0xff] (!%p19917_p0) }
 0x7b8   : > { %17452 = vst [vmem:[#allocation2 + $0x188] sm:$0xff] %v17388_v31  ;;  %17454 = vst [vmem:[#allocation2 + $0x198] sm:$0xff] %v17390_v32  ;;  %v17392_v39 = vadd.f32 %v14614_v37, %v381_v29  ;;  %v17394_v40 = vadd.f32 %v17326_v38, %v383_v30  ;;  %v17558_v23 = vadd.f32 (!%p19917_p0), %v26416_v14, %v17472_v5  ;;  %v17483_v32 = vld [vmem:[#allocation2 + $0x60] sm:$0xff] (!%p19917_p0)  ;;  %v17484_v33 = vld [vmem:[#allocation2 + $0x68] sm:$0xff] (!%p19917_p0) }
 0x7b9   : > { %17455 = vst [vmem:[#allocation2 + $0x1a0] sm:$0xff] %v17391_v35  ;;  %17457 = vst [vmem:[#allocation2 + $0x1b0] sm:$0xff] %v17393_v36  ;;  %v17559_v24 = vadd.f32 (!%p19917_p0), %v26418_v15, %v17473_v10  ;;  %v17560_v25 = vadd.f32 (!%p19917_p0), %v26420_v16, %v17474_v11  ;;  %v17561_v28 = vadd.f32 (!%p19917_p0), %v26414_v13, %v17475_v12  ;;  %v17485_v34 = vld [vmem:[#allocation2 + $0x70] sm:$0xff] (!%p19917_p0)  ;;  %v17498_v3 = vld [vmem:[#allocation2 + $0xd8] sm:$0xff] (!%p19917_p0) }
 0x7ba   : > { %17456 = vst [vmem:[#allocation2 + $0x1a8] sm:$0xff] %v17392_v39  ;;  %17458 = vst [vmem:[#allocation2 + $0x1b8] sm:$0xff] %v17394_v40  ;;  %v17562_v29 = vadd.f32 (!%p19917_p0), %v26416_v14, %v17476_v17  ;;  %v17563_v30 = vadd.f32 (!%p19917_p0), %v26418_v15, %v17477_v18  ;;  %v17564_v31 = vadd.f32 (!%p19917_p0), %v26420_v16, %v17478_v19  ;;  %v17486_v39 = vld [vmem:[#allocation2 + $0x78] sm:$0xff] (!%p19917_p0)  ;;  %v17487_v40 = vld [vmem:[#allocation2 + $0x80] sm:$0xff] (!%p19917_p0) }
 0x7bb   : > { %v19958_v35 = vpack.c.bf16 (!%p19917_p0), %v17558_v23, %v17557_v22  ;;  %v19959_v36 = vpack.c.bf16 (!%p19917_p0), %v17560_v25, %v17559_v24  ;;  %v17565_v37 = vadd.f32 (!%p19917_p0), %v26414_v13, %v17479_v20  ;;  %v17566_v38 = vadd.f32 (!%p19917_p0), %v26416_v14, %v17480_v21  ;;  %v17499_v4 = vld [vmem:[#allocation2 + $0xe0] sm:$0xff] (!%p19917_p0)  ;;  %v17500_v9 = vld [vmem:[#allocation2 + $0xe8] sm:$0xff] (!%p19917_p0)  ;;  %v17501_v10 = vld [vmem:[#allocation2 + $0xf0] sm:$0xff] (!%p19917_p0) }
 0x7bc   : > { %v14618_v45 = vpop.f32.mrb[28].mxu0  ;;  %v17330_v46 = vpop.f32.mrb[28].mxu1  ;;  %17470 = sbr.rel (%p19917_p0) target bundleno = 2010 (0x7da), region = 52  ;;  %v17502_v19 = vld [vmem:[#allocation2 + $0xf8] sm:$0xff] (!%p19917_p0)  ;;  %v17503_v20 = vld [vmem:[#allocation2 + $0x100] sm:$0xff] (!%p19917_p0)  ;;  %v17504_v21 = vld [vmem:[#allocation2 + $0x108] sm:$0xff] (!%p19917_p0)  ;;  %v17583_v23 = vadd.f32 (!%p19917_p0), %v26418_v15, %v17497_v2  ;;  %v17584_v24 = vadd.f32 (!%p19917_p0), %v26420_v16, %v17498_v3  ;;  %v17585_v25 = vadd.f32 (!%p19917_p0), %v26414_v13, %v17499_v4 }
 0x7bd   : > { %v17395_v49 = vadd.f32 %v14618_v45, %v384_v41  ;;  %v17397_v50 = vadd.f32 %v17330_v46, %v386_v42  ;;  %v14620_v51 = vpop.f32.mrb[29].mxu0  ;;  %v17332_v52 = vpop.f32.mrb[29].mxu1  ;;  %v17488_v41 = vld [vmem:[#allocation2 + $0x88] sm:$0xff] (!%p19917_p0)  ;;  %v19960_v42 = vpack.c.bf16 (!%p19917_p0), %v17562_v29, %v17561_v28  ;;  %v17568_v45 = vadd.f32 (!%p19917_p0), %v26420_v16, %v17482_v27  ;;  %v17489_v46 = vld [vmem:[#allocation2 + $0x90] sm:$0xff] (!%p19917_p0)  ;;  %17813 = vst [vmem:[%s24422_s7] sm:$0xff] (!%p19917_p0), %v19958_v35  ;;  %v17506_v27 = vld [vmem:[#allocation2 + $0x118] sm:$0xff] (!%p19917_p0) }
 0x7be   : > { %v17396_v55 = vadd.f32 %v14620_v51, %v385_v43  ;;  %v17398_v56 = vadd.f32 %v17332_v52, %v387_v44  ;;  %v14622_v57 = vpop.f32.mrb[30].mxu0  ;;  %v17334_v58 = vpop.f32.mrb[30].mxu1  ;;  %v19961_v43 = vpack.c.bf16 (!%p19917_p0), %v17564_v31, %v17563_v30  ;;  %v17567_v44 = vadd.f32 (!%p19917_p0), %v26418_v15, %v17481_v26  ;;  %17814 = vst [vmem:[%s24422_s7 + $0x8] sm:$0xff] (!%p19917_p0), %v19959_v36  ;;  %v17505_v26 = vld [vmem:[#allocation2 + $0x110] sm:$0xff] (!%p19917_p0)  ;;  %v17507_v28 = vld [vmem:[#allocation2 + $0x120] sm:$0xff] (!%p19917_p0) }
 0x7bf   : > { %17459 = vst [vmem:[#allocation2 + $0x1c0] sm:$0xff] %v17395_v49  ;;  %17461 = vst [vmem:[#allocation2 + $0x1d0] sm:$0xff] %v17397_v50  ;;  %v17399_v59 = vadd.f32 %v14622_v57, %v388_v47  ;;  %v17401_v60 = vadd.f32 %v17334_v58, %v390_v48  ;;  %v14624_v61 = vpop.f32.mrb[31].mxu0  ;;  %v17336_v62 = vpop.f32.mrb[31].mxu1  ;;  %v17490_v47 = vld [vmem:[#allocation2 + $0x98] sm:$0xff] (!%p19917_p0)  ;;  %v17491_v48 = vld [vmem:[#allocation2 + $0xa0] sm:$0xff] (!%p19917_p0)  ;;  %v19962_v49 = vpack.c.bf16 (!%p19917_p0), %v17566_v38, %v17565_v37 }
 0x7c0   : > { %17460 = vst [vmem:[#allocation2 + $0x1c8] sm:$0xff] %v17396_v55  ;;  %17462 = vst [vmem:[#allocation2 + $0x1d8] sm:$0xff] %v17398_v56  ;;  %v17400_v63 = vadd.f32 %v14624_v61, %v389_v53  ;;  %v17402_v0 = vadd.f32 %v17336_v62, %v391_v54  ;;  %v17569_v50 = vadd.f32 (!%p19917_p0), %v26414_v13, %v17483_v32  ;;  %v17492_v53 = vld [vmem:[#allocation2 + $0xa8] sm:$0xff] (!%p19917_p0)  ;;  %v17493_v54 = vld [vmem:[#allocation2 + $0xb0] sm:$0xff] (!%p19917_p0) }
 0x7c1   : > { %17463 = vst [vmem:[#allocation2 + $0x1e0] sm:$0xff] %v17399_v59  ;;  %17465 = vst [vmem:[#allocation2 + $0x1f0] sm:$0xff] %v17401_v60  ;;  %v17570_v51 = vadd.f32 (!%p19917_p0), %v26416_v14, %v17484_v33  ;;  %v17571_v52 = vadd.f32 (!%p19917_p0), %v26418_v15, %v17485_v34  ;;  %v19963_v55 = vpack.c.bf16 (!%p19917_p0), %v17568_v45, %v17567_v44  ;;  %v17494_v59 = vld [vmem:[#allocation2 + $0xb8] sm:$0xff] (!%p19917_p0)  ;;  %v17495_v60 = vld [vmem:[#allocation2 + $0xc0] sm:$0xff] (!%p19917_p0) }
 0x7c2   : > { %17464 = vst [vmem:[#allocation2 + $0x1e8] sm:$0xff] %v17400_v63  ;;  %17466 = vst [vmem:[#allocation2 + $0x1f8] sm:$0xff] %v17402_v0  ;;  %v17572_v56 = vadd.f32 (!%p19917_p0), %v26420_v16, %v17486_v39  ;;  %v17573_v57 = vadd.f32 (!%p19917_p0), %v26414_v13, %v17487_v40  ;;  %v17574_v58 = vadd.f32 (!%p19917_p0), %v26416_v14, %v17488_v41  ;;  %v17496_v61 = vld [vmem:[#allocation2 + $0xc8] sm:$0xff] (!%p19917_p0)  ;;  %v17509_v34 = vld [vmem:[#allocation2 + $0x130] sm:$0xff] (!%p19917_p0) }
 0x7c3   : > { %17815 = vst [vmem:[%s24422_s7 + $0x10] sm:$0xff] %v19960_v42  ;;  %17816 = vst [vmem:[%s24422_s7 + $0x18] sm:$0xff] %v19961_v43  ;;  %v19964_v62 = vpack.c.bf16 %v17570_v51, %v17569_v50  ;;  %v17575_v63 = vadd.f32 %v26418_v15, %v17489_v46  ;;  %v17576_v0 = vadd.f32 %v26420_v16, %v17490_v47  ;;  %v17508_v33 = vld [vmem:[#allocation2 + $0x128] sm:$0xff]  ;;  %v17510_v39 = vld [vmem:[#allocation2 + $0x138] sm:$0xff] }
 0x7c4   : > { %17817 = vst [vmem:[%s24422_s7 + $0x20] sm:$0xff] %v19962_v49  ;;  %v17577_v1 = vadd.f32 %v26414_v13, %v17491_v48  ;;  %17818 = vst [vmem:[%s24422_s7 + $0x28] sm:$0xff] %v19963_v55  ;;  %v19965_v5 = vpack.c.bf16 %v17572_v56, %v17571_v52  ;;  %v19966_v6 = vpack.c.bf16 %v17574_v58, %v17573_v57  ;;  %v17511_v40 = vld [vmem:[#allocation2 + $0x140] sm:$0xff]  ;;  %v17512_v41 = vld [vmem:[#allocation2 + $0x148] sm:$0xff] }
 0x7c5   : > { %v17578_v7 = vadd.f32 %v26416_v14, %v17492_v53  ;;  %v17579_v8 = vadd.f32 %v26418_v15, %v17493_v54  ;;  %17819 = vst [vmem:[%s24422_s7 + $0x30] sm:$0xff] %v19964_v62  ;;  %v19967_v11 = vpack.c.bf16 %v17576_v0, %v17575_v63  ;;  %v17580_v12 = vadd.f32 %v26420_v16, %v17494_v59  ;;  %v17513_v46 = vld [vmem:[#allocation2 + $0x150] sm:$0xff]  ;;  %v17514_v47 = vld [vmem:[#allocation2 + $0x158] sm:$0xff]  ;;  %v17515_v48 = vld [vmem:[#allocation2 + $0x160] sm:$0xff] }
 0x7c6   : > { %v17581_v17 = vadd.f32 %v26414_v13, %v17495_v60  ;;  %v17582_v18 = vadd.f32 %v26416_v14, %v17496_v61  ;;  %17820 = vst [vmem:[%s24422_s7 + $0x38] sm:$0xff] %v19965_v5  ;;  %17821 = vst [vmem:[%s24422_s7 + $0x40] sm:$0xff] %v19966_v6  ;;  %v17586_v31 = vadd.f32 %v26416_v14, %v17500_v9  ;;  %v17516_v53 = vld [vmem:[#allocation2 + $0x168] sm:$0xff]  ;;  %v17517_v54 = vld [vmem:[#allocation2 + $0x170] sm:$0xff] }
 0x7c7   : > { %v19968_v22 = vpack.c.bf16 %v17578_v7, %v17577_v1  ;;  %17822 = vst [vmem:[%s24422_s7 + $0x48] sm:$0xff] %v19967_v11  ;;  %v19969_v29 = vpack.c.bf16 %v17580_v12, %v17579_v8  ;;  %v17587_v32 = vadd.f32 %v26418_v15, %v17501_v10  ;;  %v19971_v35 = vpack.c.bf16 %v17584_v24, %v17583_v23  ;;  %v17518_v59 = vld [vmem:[#allocation2 + $0x178] sm:$0xff]  ;;  %v17519_v60 = vld [vmem:[#allocation2 + $0x180] sm:$0xff]  ;;  %v17520_v61 = vld [vmem:[#allocation2 + $0x188] sm:$0xff] }
 0x7c8   : > { %v19970_v30 = vpack.c.bf16 %v17582_v18, %v17581_v17  ;;  %v17588_v36 = vadd.f32 %v26420_v16, %v17502_v19  ;;  %v17589_v37 = vadd.f32 %v26414_v13, %v17503_v20  ;;  %v17590_v38 = vadd.f32 %v26416_v14, %v17504_v21  ;;  %v17521_v2 = vld [vmem:[#allocation2 + $0x190] sm:$0xff]  ;;  %v17522_v3 = vld [vmem:[#allocation2 + $0x198] sm:$0xff]  ;;  %v17523_v4 = vld [vmem:[#allocation2 + $0x1a0] sm:$0xff] }
 0x7c9   : > { %17823 = vst [vmem:[%s24422_s7 + $0x50] sm:$0xff] %v19968_v22  ;;  %17824 = vst [vmem:[%s24422_s7 + $0x58] sm:$0xff] %v19969_v29  ;;  %v19972_v42 = vpack.c.bf16 %v17586_v31, %v17585_v25  ;;  %v17591_v43 = vadd.f32 %v26418_v15, %v17505_v26  ;;  %v17592_v44 = vadd.f32 %v26420_v16, %v17506_v27  ;;  %v17524_v9 = vld [vmem:[#allocation2 + $0x1a8] sm:$0xff]  ;;  %v17525_v10 = vld [vmem:[#allocation2 + $0x1b0] sm:$0xff] }
 0x7ca   : > { %17825 = vst [vmem:[%s24422_s7 + $0x60] sm:$0xff] %v19970_v30  ;;  %v17593_v45 = vadd.f32 %v26414_v13, %v17507_v28  ;;  %17826 = vst [vmem:[%s24422_s7 + $0x68] sm:$0xff] %v19971_v35  ;;  %v19973_v49 = vpack.c.bf16 %v17588_v36, %v17587_v32  ;;  %v19974_v50 = vpack.c.bf16 %v17590_v38, %v17589_v37  ;;  %v17526_v19 = vld [vmem:[#allocation2 + $0x1b8] sm:$0xff]  ;;  %v17527_v20 = vld [vmem:[#allocation2 + $0x1c0] sm:$0xff] }
 0x7cb   : > { %v17594_v51 = vadd.f32 %v26416_v14, %v17508_v33  ;;  %v17595_v52 = vadd.f32 %v26418_v15, %v17509_v34  ;;  %17827 = vst [vmem:[%s24422_s7 + $0x70] sm:$0xff] %v19972_v42  ;;  %v19975_v55 = vpack.c.bf16 %v17592_v44, %v17591_v43  ;;  %v17596_v56 = vadd.f32 %v26420_v16, %v17510_v39  ;;  %v17528_v21 = vld [vmem:[#allocation2 + $0x1c8] sm:$0xff]  ;;  %v17529_v26 = vld [vmem:[#allocation2 + $0x1d0] sm:$0xff]  ;;  %v17530_v27 = vld [vmem:[#allocation2 + $0x1d8] sm:$0xff] }
 0x7cc   : > { %v17597_v57 = vadd.f32 %v26414_v13, %v17511_v40  ;;  %v17598_v58 = vadd.f32 %v26416_v14, %v17512_v41  ;;  %17828 = vst [vmem:[%s24422_s7 + $0x78] sm:$0xff] %v19973_v49  ;;  %17829 = vst [vmem:[%s24422_s7 + $0x80] sm:$0xff] %v19974_v50  ;;  %v17599_v63 = vadd.f32 %v26418_v15, %v17513_v46  ;;  %v17531_v28 = vld [vmem:[#allocation2 + $0x1e0] sm:$0xff]  ;;  %v17532_v33 = vld [vmem:[#allocation2 + $0x1e8] sm:$0xff] }
 0x7cd   : > { %v19976_v62 = vpack.c.bf16 %v17594_v51, %v17593_v45  ;;  %v17600_v0 = vadd.f32 %v26420_v16, %v17514_v47  ;;  %v17601_v1 = vadd.f32 %v26414_v13, %v17515_v48  ;;  %17830 = vst [vmem:[%s24422_s7 + $0x88] sm:$0xff] %v19975_v55  ;;  %v19977_v5 = vpack.c.bf16 %v17596_v56, %v17595_v52  ;;  %v17533_v34 = vld [vmem:[#allocation2 + $0x1f0] sm:$0xff]  ;;  %v17534_v39 = vld [vmem:[#allocation2 + $0x1f8] sm:$0xff] }
 0x7ce   : > { %v19978_v6 = vpack.c.bf16 %v17598_v58, %v17597_v57  ;;  %v17602_v7 = vadd.f32 %v26416_v14, %v17516_v53  ;;  %v17603_v8 = vadd.f32 %v26418_v15, %v17517_v54  ;;  %v17604_v12 = vadd.f32 %v26420_v16, %v17518_v59 }
 0x7cf   : > { %17831 = vst [vmem:[%s24422_s7 + $0x90] sm:$0xff] %v19976_v62  ;;  %v19979_v11 = vpack.c.bf16 %v17600_v0, %v17599_v63  ;;  %v17605_v17 = vadd.f32 %v26414_v13, %v17519_v60  ;;  %v17606_v18 = vadd.f32 %v26416_v14, %v17520_v61  ;;  %17832 = vst [vmem:[%s24422_s7 + $0x98] sm:$0xff] %v19977_v5 }
 0x7d0   : > { %17833 = vst [vmem:[%s24422_s7 + $0xa0] sm:$0xff] %v19978_v6  ;;  %v19980_v22 = vpack.c.bf16 %v17602_v7, %v17601_v1  ;;  %v17607_v23 = vadd.f32 %v26418_v15, %v17521_v2  ;;  %v17608_v24 = vadd.f32 %v26420_v16, %v17522_v3  ;;  %v17609_v25 = vadd.f32 %v26414_v13, %v17523_v4 }
 0x7d1   : > { %17834 = vst [vmem:[%s24422_s7 + $0xa8] sm:$0xff] %v19979_v11  ;;  %v19981_v29 = vpack.c.bf16 %v17604_v12, %v17603_v8  ;;  %v19982_v30 = vpack.c.bf16 %v17606_v18, %v17605_v17  ;;  %v17610_v31 = vadd.f32 %v26416_v14, %v17524_v9  ;;  %v17611_v32 = vadd.f32 %v26418_v15, %v17525_v10 }
 0x7d2   : > { %17835 = vst [vmem:[%s24422_s7 + $0xb0] sm:$0xff] %v19980_v22  ;;  %v19983_v35 = vpack.c.bf16 %v17608_v24, %v17607_v23  ;;  %v17612_v36 = vadd.f32 %v26420_v16, %v17526_v19  ;;  %v17613_v37 = vadd.f32 %v26414_v13, %v17527_v20  ;;  %v17614_v38 = vadd.f32 %v26416_v14, %v17528_v21 }
 0x7d3   : > { %17836 = vst [vmem:[%s24422_s7 + $0xb8] sm:$0xff] %v19981_v29  ;;  %17837 = vst [vmem:[%s24422_s7 + $0xc0] sm:$0xff] %v19982_v30  ;;  %v19984_v40 = vpack.c.bf16 %v17610_v31, %v17609_v25  ;;  %v17615_v41 = vadd.f32 %v26418_v15, %v17529_v26  ;;  %v17616_v42 = vadd.f32 %v26420_v16, %v17530_v27 }
 0x7d4   : > { %v17617_v43 = vadd.f32 %v26414_v13, %v17531_v28  ;;  %17838 = vst [vmem:[%s24422_s7 + $0xc8] sm:$0xff] %v19983_v35  ;;  %v19985_v44 = vpack.c.bf16 %v17612_v36, %v17611_v32  ;;  %v19986_v45 = vpack.c.bf16 %v17614_v38, %v17613_v37  ;;  %v17618_v46 = vadd.f32 %v26416_v14, %v17532_v33 }
 0x7d5   : > { %v17619_v47 = vadd.f32 %v26418_v15, %v17533_v34  ;;  %17839 = vst [vmem:[%s24422_s7 + $0xd0] sm:$0xff] %v19984_v40  ;;  %v19987_v48 = vpack.c.bf16 %v17616_v42, %v17615_v41  ;;  %v17620_v49 = vadd.f32 %v26420_v16, %v17534_v39 }
 0x7d6   : > { %17840 = vst [vmem:[%s24422_s7 + $0xd8] sm:$0xff] %v19985_v44  ;;  %17841 = vst [vmem:[%s24422_s7 + $0xe0] sm:$0xff] %v19986_v45  ;;  %v19988_v50 = vpack.c.bf16 %v17618_v46, %v17617_v43 }
 0x7d7   : > { %17842 = vst [vmem:[%s24422_s7 + $0xe8] sm:$0xff] %v19987_v48  ;;  %v19989_v51 = vpack.c.bf16 %v17620_v49, %v17619_v47 }
 0x7d8   : > { %17843 = vst [vmem:[%s24422_s7 + $0xf0] sm:$0xff] %v19988_v50 }
 0x7d9   : > { %17844 = vst [vmem:[%s24422_s7 + $0xf8] sm:$0xff] %v19989_v51 }
 0x7da PF: > { %s19990_s18 = sshll.u32 %s24102_s19, 8  ;;  %s26624_s11 = sld [smem:[#allocation17_spill]] }
 0x7db   : > { %s17859_s3 = sshll.u32 %s24422_s7, 4  ;;  %s17846_s26 = scalar_lea.sflag [#allocation5], %s24412_s25  ;;  %s26525_s3 = int_to_ptr.vmem [resolvable:$true] %s17859_s3 }
 0x7dc   : > { %s23984_s0 = scalar_lea.vmem %s26525_s3, 4096  ;;  %p26625_p13 = scmp.ne.s32.totalorder %s26614_s15, 0 }
 0x7dd   : > { %p23985_p4 = scmp.ne.s32.totalorder %s26525_s3, %s23984_s0  ;;  %s24125_s28 = smov [#allocation9]  }
 0x7de   : > { %s23988_s23 = sshll.u32 %s24125_s28, 4  ;;  %s23989_s23 = int_to_ptr.vmem [resolvable:$false] %s23988_s23 }
 0x7df   : > { %p23986_p1 = pnand %p23985_p4, %p26625_p13  ;;  %s23990_s19 = scalar_lea.vmem %s23989_s23, 8192 }
 0x7e0   : > { %s26522_s9 = scalar_lea.hbm %s26624_s11, %s19990_s18  ;;  %p23991_p9 = scmp.lt.s32.totalorder %s26525_s3, %s23989_s23 }
 0x7e1   : > { %p23987_p7 = pneg %p23986_p1  ;;  %p23992_p3 = scmp.lt.s32.totalorder %s23990_s19, %s23984_s0 }
 0x7e3   : > { %p23993_p6 = por %p23992_p3, %p23991_p9 }
 0x7e5   : > { %p23994_p10 = pnand %p23993_p6, %p23987_p7 }
 0x7e7   : > { %23997 = shalt.err (!%p23994_p10)
}
 0x7e8   : > { %s23998_s6 = scalar_lea.hbm %s26522_s9, 4096  ;;  %s24002_s5 = scalar_lea.hbm %s26624_s11, 16384 }
 0x7e9   : > { %p23999_p11 = scmp.ne.s32.totalorder %s26522_s9, %s23998_s6  ;;  %p24003_p12 = scmp.lt.u32.totalorder %s26522_s9, %s26624_s11 }
 0x7ea   : > { %p24004_p5 = scmp.lt.u32.totalorder %s24002_s5, %s23998_s6  ;;  %p24006_p4 = scmp.lt.u32.totalorder %s23998_s6, %s26522_s9 }
 0x7eb   : > { %p24000_p2 = pnand %p23999_p11, %p26625_p13 }
 0x7ec   : > { %p24005_p0 = por %p24004_p5, %p24003_p12 }
 0x7ed   : > { %p24001_p8 = pneg %p24000_p2 }
 0x7ee   : > { %p24007_p1 = por %p24006_p4, %p24005_p0 }
 0x7f0   : > { %p24008_p7 = pnand %p24007_p1, %p24001_p8 }
 0x7f2   : > { %24011 = shalt.err (!%p24008_p7)
}
 0x7f3   : > { %s24126_s4 = smov 256   ;;  %s24127_s27 = smov 1024  }
 0x7f4   : > { %s24128_s0 = smov 16  }
 0x7f5   : > { %21473 = dma.vmem_to_hbm [thread:$0]  (%p26625_p13), %s26525_s3, 4096, %s26522_s9, %s17846_s26, %s24126_s4, %s24127_s27, %s24128_s0  }
 0x7f6 PF: > { %p21493_p9 = scmp.ge.s32.totalorder %s24114_s22, 2  ;;  %s17874_s28 = sand.u32 1, %s24074_s12  }
 0x7f7   : > { %p26626_p3 = scmp.ne.s32.totalorder %s26617_s29, 0  ;;  %s17875_s23 = scalar_lea.sflag [#allocation5], %s17874_s28 }
 0x7f9   : > { %p21487_p6 = pnand %p21493_p9, %p26626_p3 }
 0x7fb   : > { %24069 = dma.done.wait (!%p21487_p6), %s17875_s23, 4096  }
 0x7fc   : > { %24071 = vsyncadd (!%p21487_p6), %s17875_s23, 4294963200  ;;  %s20_s22 = sadd.s32 1, %s24114_s22   ;;  %s26627_s25 = sld [smem:[#allocation14_spill]] }
 0x7fd   : > { %p17_p10 = scmp.ge.s32.totalorder %s20_s22, 14   ;;  %s26628_s9 = sld [smem:[#allocation15_spill]] }
 0x7fe   : > { %s26629_s12 = smov %s24078_s13  ;;  %s26630_s13 = smov %s24082_s14 }
 0x7ff   : > { %s26631_s14 = smov %s24328_s8  ;;  %s26632_s15 = smov %s24090_s16 }
 0x800   : > { %s26633_s16 = smov %s24094_s17  ;;  %s26634_s17 = smov %s24234_s10 }
 0x801   : > { %s26635_s18 = smov %s24106_s20  ;;  %s26636_s19 = smov %s24110_s21 }
 0x802   : > { %s26637_s20 = smov %s26627_s25  ;;  %19 = sbr.rel (!%p17_p10) target bundleno = 13 (0xd), region = 102 }
 0x803   : > { %s26638_s21 = smov %s26628_s9 }
 0x809   :  { %17880 = vsyncpa [#allocation4], 1 }
 0x80a   :  { %17882 = vsyncpa [#allocation4 + $0x1], 1 }
 0x80b   :  { %17883 = vsyncpa [#allocation7], 1 }
 0x80c   :  { %17885 = vsyncpa [#allocation7 + $0x1], 1 }
 0x80d   :  { %17886 = vsyncpa [#allocation5], 1 }
 0x80e   :  { %17888 = vsyncpa [#allocation5 + $0x1], 1 }

</bundles_post_ra>
